<compile_context>
chip_gen: v7x
topology: tpu7x:2x2x1
jax: 0.10.0
libtpu: 0.0.40
codegen_flags: <defaults>
</compile_context>

<pallas_src>
import math
import numpy as np
import jax
import jax.numpy as jnp
from jax.experimental import pallas as pl
from jax.experimental.pallas import tpu as pltpu

# ----------------------------- configuration --------------------------------
N_BATCH = 2
T_FRAMES = 8
NT = N_BATCH * T_FRAMES
K_W = 3                        # args.dynamic_kernel_size
PAD = K_W // 2
NEIGHBOR_DIST = 2              # args.neighbor_dist_thresh
LRELU_SLOPE = 0.01
BN_EPS = 1e-5

TOPOLOGY_L1 = [0, 0, 1, 2, 0, 4, 5, 6]                                  # 8 joints
TOPOLOGY_L2 = [0, 0, 1, 2, 3, 0, 5, 6, 7, 0, 9, 10, 0, 12, 13, 14]      # 16 joints
EXPAND_L1 = [2, 2, 2, 2]       # 4 joints  -> 8   (dec_layer1 un-pool)
EXPAND_L2 = [2] * 8            # 8 joints  -> 16  (dec_layer2 un-pool)

J0, J1, J2 = 4, 8, 16
C1IN, CH1, C1OUT = 128 + 32, 32, 64
C2IN, CH2, C2OUT = 64 + 3, 2, 4


# ----------------------------- helpers (glue) --------------------------------
def build_neighbor_mask(topology, dist_thresh):
    """mask[j, d] = 1 if graph distance(j, d) <= dist_thresh."""
    J = len(topology)
    dist = np.full((J, J), 1e9, dtype=np.float64)
    np.fill_diagonal(dist, 0.0)
    for child, parent in enumerate(topology):
        if child != parent:
            dist[child, parent] = 1.0
            dist[parent, child] = 1.0
    for k in range(J):  # Floyd-Warshall
        dist = np.minimum(dist, dist[:, k:k + 1] + dist[k:k + 1, :])
    return jnp.asarray((dist <= dist_thresh).astype(np.float32))


def xavier_normal(key, shape, fan_in, fan_out):
    std = math.sqrt(2.0 / (fan_in + fan_out))
    return std * jax.random.normal(key, shape, jnp.float32)


def pack_skel(W, mask):
    """W: (Co, Ci, J, kW) shared SkeletonConvolution weight, mask: (J, J).

    Returns (kW*J*Ci, J*Co) bf16 with rows ordered (w, d, c) [matching the
    stacked lane-dense LHS] and columns ordered (j, o) joint-major."""
    Co, Ci, J, kW = W.shape
    Wm = W[None] * mask[:, None, None, :, None]          # (Jout, Co, Ci, Jd, kW)
    Wbig = jnp.transpose(Wm, (4, 3, 2, 0, 1)).reshape(kW * J * Ci, J * Co)
    return Wbig.astype(jnp.bfloat16)


# ----------------------------- Pallas kernel ---------------------------------
def decoder_kernel(x1_ref, sx_ref, mprev_ref, mnext_ref,
                   w1x1t_ref, b1x1_ref,
                   wc11_ref, bc11_ref, g11_ref, be11_ref,
                   wc12_ref, bc12_ref, g12_ref, be12_ref,
                   wid2_ref, bid2_ref,
                   wc21_ref, bc21_ref, g21_ref, be21_ref,
                   wc22_ref, bc22_ref, g22_ref, be22_ref,
                   out_ref):
    f32, bf16 = jnp.float32, jnp.bfloat16
    mprev = mprev_ref[...]                               # (NT, 1) zeros at t == 0
    mnext = mnext_ref[...]                               # (NT, 1) zeros at t == T-1

    def mm(x_bf16, w_ref):                               # bf16 x bf16 -> f32 acc
        return jnp.dot(x_bf16, w_ref[...], preferred_element_type=f32)

    def stack_kw(x):
        # (NT, F) f32 -> (NT, 3F) bf16 lane concat of the three temporal taps.
        # Temporal shift via sublane roll (XLU) + boundary masks; no shift
        # matrices, no MXU round trips.
        xm = pltpu.roll(x, shift=1, axis=0) * mprev      # x[t-1], zeroed at t==0
        xp = pltpu.roll(x, shift=NT - 1, axis=0) * mnext  # x[t+1], zeroed at t==T-1
        return jnp.concatenate(
            [xm.astype(bf16), x.astype(bf16), xp.astype(bf16)], axis=1)

    def lrelu(x):
        return jnp.maximum(x, LRELU_SLOPE * x)

    def batchnorm(h, C, J, g_ref, b_ref):
        # h: (NT, J*C), joint-major columns (j, c).  Training-mode BatchNorm2d
        # (biased batch statistics), centered two-pass variance for stability.
        inv_cnt = 1.0 / float(J * NT)
        colsum = jnp.sum(h, axis=0, keepdims=True)       # (1, J*C)
        cs = colsum[:, 0:C]
        for j in range(1, J):                            # unrolled (1, C) lane slices
            cs = cs + colsum[:, j * C:(j + 1) * C]
        mean = cs * inv_cnt                              # (1, C)
        mean_c = jnp.concatenate([mean] * J, axis=1)     # (1, J*C) row broadcast
        d = h - mean_c
        sqsum = jnp.sum(d * d, axis=0, keepdims=True)
        vs = sqsum[:, 0:C]
        for j in range(1, J):
            vs = vs + sqsum[:, j * C:(j + 1) * C]
        var = vs * inv_cnt
        sc = g_ref[...] * jax.lax.rsqrt(var + BN_EPS)    # (1, C)
        sc_c = jnp.concatenate([sc] * J, axis=1)
        sh_c = jnp.concatenate([b_ref[...]] * J, axis=1)
        return d * sc_c + sh_c

    # ------------------------------ dec_layer1 -------------------------------
    x1 = x1_ref[...]                                     # (NT, J1*C1IN) = (16, 1280)
    x1b = x1.astype(bf16)

    # 1x1 identity conv: shared (C1IN, C1OUT) weight applied to each joint's
    # lane slice, results lane-concatenated into the conv2 column order.
    # (A single fused matmul would require a sublane->lane relayout or a
    #  1.25 MB block-diagonal weight, both worse at this size.)
    idp = [mm(x1b[:, j * C1IN:(j + 1) * C1IN], w1x1t_ref) for j in range(J1)]
    id1 = jnp.concatenate(idp, axis=1) + b1x1_ref[...]   # (NT, 512)

    h = mm(stack_kw(x1), wc11_ref) + bc11_ref[...]       # skeleton conv1 (NT, 256)
    h = lrelu(batchnorm(h, CH1, J1, g11_ref, be11_ref))
    h = mm(stack_kw(h), wc12_ref) + bc12_ref[...]        # skeleton conv2 (NT, 512)
    h = batchnorm(h, C1OUT, J1, g12_ref, be12_ref)
    o1 = lrelu(h + id1)                                  # residual + Decoder LeakyReLU

    # ------------------------------ dec_layer2 -------------------------------
    # SkeletonUnPool + channel concat are folded into the packed block-2 weights.
    x2 = jnp.concatenate([o1, sx_ref[...]], axis=1)      # (NT, 560)
    id2 = mm(x2.astype(bf16), wid2_ref) + bid2_ref[...]  # 1x1 identity (NT, 64)
    h = mm(stack_kw(x2), wc21_ref) + bc21_ref[...]       # skeleton conv1 (NT, 32)
    h = lrelu(batchnorm(h, CH2, J2, g21_ref, be21_ref))
    h = mm(stack_kw(h), wc22_ref) + bc22_ref[...]        # skeleton conv2 (NT, 64)
    h = batchnorm(h, C2OUT, J2, g22_ref, be22_ref)
    out_ref[...] = h + id2                               # residual, no final activation


# ----------------------------- parameter packing -----------------------------
def build_params(key):
    k = jax.random.split(key, 6)
    mask1 = build_neighbor_mask(TOPOLOGY_L1, NEIGHBOR_DIST)
    mask2 = build_neighbor_mask(TOPOLOGY_L2, NEIGHBOR_DIST)
    bconst = 0.01

    # raw parameters, matching Decoder._init_weights (xavier_normal_, bias 0.01)
    w1x1_b1 = xavier_normal(k[0], (C1OUT, C1IN), C1IN, C1OUT)
    wc1_b1 = xavier_normal(k[1], (CH1, C1IN, J1, K_W), C1IN * J1 * K_W, CH1 * J1 * K_W)
    wc2_b1 = xavier_normal(k[2], (C1OUT, CH1, J1, K_W), CH1 * J1 * K_W, C1OUT * J1 * K_W)
    w1x1_b2 = xavier_normal(k[3], (C2OUT, C2IN), C2IN, C2OUT)
    wc1_b2 = xavier_normal(k[4], (CH2, C2IN, J2, K_W), C2IN * J2 * K_W, CH2 * J2 * K_W)
    wc2_b2 = xavier_normal(k[5], (C2OUT, CH2, J2, K_W), CH2 * J2 * K_W, C2OUT * J2 * K_W)

    def tiled_bias(C, J):
        # (1, J*C) bias row matching joint-major output columns (j, o)
        return jnp.tile(jnp.full((C,), bconst, jnp.float32), J).reshape(1, J * C)

    # ---- block 1 (columns joint-major (j, c)) --------------------------------
    w1x1t = w1x1_b1.T.astype(jnp.bfloat16)               # (160, 64) shared weight
    b1x1 = tiled_bias(C1OUT, J1)                         # (1, 512)
    wc11 = pack_skel(wc1_b1, mask1)                      # (3840, 256)
    bc11 = tiled_bias(CH1, J1)
    wc12 = pack_skel(wc2_b1, mask1)                      # (768, 512)
    bc12 = tiled_bias(C1OUT, J1)
    g11, be11 = jnp.ones((1, CH1), jnp.float32), jnp.zeros((1, CH1), jnp.float32)
    g12, be12 = jnp.ones((1, C1OUT), jnp.float32), jnp.zeros((1, C1OUT), jnp.float32)

    # ---- block 2 : un-pool folded into the packed weights ---------------------
    parent = np.repeat(np.arange(J1), EXPAND_L2)         # (J2,) parent joint per child
    P = np.zeros((J1, J2), np.float32)
    P[parent, np.arange(J2)] = 1.0
    Pj = jnp.asarray(P)

    # skeleton conv1: LHS cols per tap = [o1 cols (p, c) | sx cols (d2, c')]
    Wo = wc1_b2[:, :C1OUT]                               # (CH2, 64, J2, kW)
    Wo_m = Wo[None] * mask2[:, None, None, :, None]      # (J2, CH2, 64, J2d, kW)
    Wo_f = jnp.einsum('pd,jocdw->jocpw', Pj, Wo_m)       # fold children -> parent joint
    Wo_big = jnp.transpose(Wo_f, (4, 3, 2, 0, 1)).reshape(K_W, J1 * C1OUT, J2 * CH2)
    Ws = wc1_b2[:, C1OUT:]                               # (CH2, 3, J2, kW)
    Ws_m = Ws[None] * mask2[:, None, None, :, None]      # (J2, CH2, 3, J2d, kW)
    Ws_big = jnp.transpose(Ws_m, (4, 3, 2, 0, 1)).reshape(K_W, J2 * 3, J2 * CH2)
    wc21 = jnp.concatenate([Wo_big, Ws_big], axis=1).reshape(
        K_W * (J1 * C1OUT + J2 * 3), J2 * CH2).astype(jnp.bfloat16)      # (1680, 32)
    bc21 = tiled_bias(CH2, J2)

    # skeleton conv2: rows (w, d2, cH), cols (j2, o)
    wc22 = pack_skel(wc2_b2, mask2)                      # (96, 64)
    bc22 = tiled_bias(C2OUT, J2)

    # 1x1 identity conv with the un-pool folded in: rows [o1 (p,c) | sx (d2,c')]
    Wid_o1 = jnp.einsum('pj,oc->pcjo', Pj,
                        w1x1_b2[:, :C1OUT]).reshape(J1 * C1OUT, J2 * C2OUT)
    Wid_sx = jnp.einsum('dj,oc->dcjo', jnp.eye(J2, dtype=jnp.float32),
                        w1x1_b2[:, C1OUT:]).reshape(J2 * 3, J2 * C2OUT)
    wid2 = jnp.concatenate([Wid_o1, Wid_sx], axis=0).astype(jnp.bfloat16)  # (560, 64)
    bid2 = tiled_bias(C2OUT, J2)

    g21, be21 = jnp.ones((1, CH2), jnp.float32), jnp.zeros((1, CH2), jnp.float32)
    g22, be22 = jnp.ones((1, C2OUT), jnp.float32), jnp.zeros((1, C2OUT), jnp.float32)

    return (w1x1t, b1x1,
            wc11, bc11, g11, be11,
            wc12, bc12, g12, be12,
            wid2, bid2,
            wc21, bc21, g21, be21,
            wc22, bc22, g22, be22)


# ----------------------------- Decoder forward --------------------------------
def decoder_forward(d_latent, s_latent, sx, params):
    # glue: SkeletonUnPool(d_latent) ++ s_latent -> lane-dense (NT, features)
    up1 = jnp.repeat(d_latent, np.asarray(EXPAND_L1), axis=2, total_repeat_length=J1)
    x1 = jnp.concatenate([up1, s_latent], axis=1)                    # (N, 160, J1, T)
    x1_b = jnp.transpose(x1, (0, 3, 2, 1)).reshape(NT, J1 * C1IN)    # rows (n,t), cols (j,c)
    sx_b = jnp.transpose(sx, (0, 3, 2, 1)).reshape(NT, J2 * 3)       # rows (n,t), cols (j2,c')

    # temporal boundary masks (zero-pad the rolled taps at batch edges)
    t_idx = np.arange(NT) % T_FRAMES
    mprev = jnp.asarray((t_idx != 0).astype(np.float32).reshape(NT, 1))
    mnext = jnp.asarray((t_idx != T_FRAMES - 1).astype(np.float32).reshape(NT, 1))

    inputs = (x1_b, sx_b, mprev, mnext) + params
    vmem = pltpu.MemorySpace.VMEM
    out_flat = pl.pallas_call(
        decoder_kernel,
        out_shape=jax.ShapeDtypeStruct((NT, J2 * C2OUT), jnp.float32),
        in_specs=[pl.BlockSpec(memory_space=vmem)] * len(inputs),
        out_specs=pl.BlockSpec(memory_space=vmem),
    )(*inputs)
    # rows (n, t), cols (j2, o) -> (N, C, J, T)
    return out_flat.reshape(N_BATCH, T_FRAMES, J2, C2OUT).transpose(0, 3, 2, 1)


# ----------------------------- main -------------------------------------------
if __name__ == "__main__":
    root = jax.random.PRNGKey(0)
    kd, ks, kx, kp = jax.random.split(root, 4)

    d_latent = jax.random.normal(kd, (N_BATCH, 128, J0, T_FRAMES), jnp.float32)
    s_latent = jax.random.normal(ks, (N_BATCH, 32, J1, T_FRAMES), jnp.float32)
    sx = jax.random.normal(kx, (N_BATCH, 3, J2, T_FRAMES), jnp.float32)

    params = build_params(kp)
    fwd = jax.jit(lambda d, s, x: decoder_forward(d, s, x, params))
    out = fwd(d_latent, s_latent, sx)
    jax.block_until_ready(out)

    assert out.shape == (N_BATCH, C2OUT, J2, T_FRAMES), out.shape
    assert bool(jnp.all(jnp.isfinite(out)))
    print("KERNEL_OK")
</pallas_src>

<mosaic_0001>
module attributes {stable_mosaic.version = 11 : i64} {
  func.func @decoder_kernel(%arg0: memref<16x1280xf32, #tpu.memory_space<vmem>>, %arg1: memref<16x48xf32, #tpu.memory_space<vmem>>, %arg2: memref<16x1xf32, #tpu.memory_space<vmem>>, %arg3: memref<16x1xf32, #tpu.memory_space<vmem>>, %arg4: memref<160x64xbf16, #tpu.memory_space<vmem>>, %arg5: memref<1x512xf32, #tpu.memory_space<vmem>>, %arg6: memref<3840x256xbf16, #tpu.memory_space<vmem>>, %arg7: memref<1x256xf32, #tpu.memory_space<vmem>>, %arg8: memref<1x32xf32, #tpu.memory_space<vmem>>, %arg9: memref<1x32xf32, #tpu.memory_space<vmem>>, %arg10: memref<768x512xbf16, #tpu.memory_space<vmem>>, %arg11: memref<1x512xf32, #tpu.memory_space<vmem>>, %arg12: memref<1x64xf32, #tpu.memory_space<vmem>>, %arg13: memref<1x64xf32, #tpu.memory_space<vmem>>, %arg14: memref<560x64xbf16, #tpu.memory_space<vmem>>, %arg15: memref<1x64xf32, #tpu.memory_space<vmem>>, %arg16: memref<1680x32xbf16, #tpu.memory_space<vmem>>, %arg17: memref<1x32xf32, #tpu.memory_space<vmem>>, %arg18: memref<1x2xf32, #tpu.memory_space<vmem>>, %arg19: memref<1x2xf32, #tpu.memory_space<vmem>>, %arg20: memref<96x64xbf16, #tpu.memory_space<vmem>>, %arg21: memref<1x64xf32, #tpu.memory_space<vmem>>, %arg22: memref<1x4xf32, #tpu.memory_space<vmem>>, %arg23: memref<1x4xf32, #tpu.memory_space<vmem>>, %arg24: memref<16x64xf32, #tpu.memory_space<vmem>>) attributes {dimension_semantics = [], scalar_prefetch = 0 : i64, scratch_operands = 0 : i64, tpu.core_type = #tpu.core_type<tc>} {
    %c0 = arith.constant 0 : index
    %c0_0 = arith.constant 0 : index
    %0 = vector.load %arg2[%c0, %c0_0] : memref<16x1xf32, #tpu.memory_space<vmem>>, vector<16x1xf32>
    %c0_1 = arith.constant 0 : index
    %c0_2 = arith.constant 0 : index
    %1 = vector.load %arg3[%c0_1, %c0_2] : memref<16x1xf32, #tpu.memory_space<vmem>>, vector<16x1xf32>
    %c0_3 = arith.constant 0 : index
    %c0_4 = arith.constant 0 : index
    %2 = vector.load %arg0[%c0_3, %c0_4] : memref<16x1280xf32, #tpu.memory_space<vmem>>, vector<16x1280xf32>
    %3 = arith.truncf %2 : vector<16x1280xf32> to vector<16x1280xbf16>
    %4 = vector.extract_strided_slice %3 {offsets = [0, 0], sizes = [16, 160], strides = [1, 1]} : vector<16x1280xbf16> to vector<16x160xbf16>
    %c0_5 = arith.constant 0 : index
    %c0_6 = arith.constant 0 : index
    %5 = vector.load %arg4[%c0_5, %c0_6] : memref<160x64xbf16, #tpu.memory_space<vmem>>, vector<160x64xbf16>
    %cst = arith.constant dense<0.000000e+00> : vector<16x64xf32>
    %6 = tpu.matmul %4, %5, %cst {dimension_numbers = #tpu.dot_dimension_numbers<[1], [0], [0], [1], [0, 0, 1, 1], [], []>} : vector<16x160xbf16>, vector<160x64xbf16>, vector<16x64xf32> -> vector<16x64xf32>
    %7 = vector.extract_strided_slice %3 {offsets = [0, 160], sizes = [16, 160], strides = [1, 1]} : vector<16x1280xbf16> to vector<16x160xbf16>
    %c0_7 = arith.constant 0 : index
    %c0_8 = arith.constant 0 : index
    %8 = vector.load %arg4[%c0_7, %c0_8] : memref<160x64xbf16, #tpu.memory_space<vmem>>, vector<160x64xbf16>
    %cst_9 = arith.constant dense<0.000000e+00> : vector<16x64xf32>
    %9 = tpu.matmul %7, %8, %cst_9 {dimension_numbers = #tpu.dot_dimension_numbers<[1], [0], [0], [1], [0, 0, 1, 1], [], []>} : vector<16x160xbf16>, vector<160x64xbf16>, vector<16x64xf32> -> vector<16x64xf32>
    %10 = vector.extract_strided_slice %3 {offsets = [0, 320], sizes = [16, 160], strides = [1, 1]} : vector<16x1280xbf16> to vector<16x160xbf16>
    %c0_10 = arith.constant 0 : index
    %c0_11 = arith.constant 0 : index
    %11 = vector.load %arg4[%c0_10, %c0_11] : memref<160x64xbf16, #tpu.memory_space<vmem>>, vector<160x64xbf16>
    %cst_12 = arith.constant dense<0.000000e+00> : vector<16x64xf32>
    %12 = tpu.matmul %10, %11, %cst_12 {dimension_numbers = #tpu.dot_dimension_numbers<[1], [0], [0], [1], [0, 0, 1, 1], [], []>} : vector<16x160xbf16>, vector<160x64xbf16>, vector<16x64xf32> -> vector<16x64xf32>
    %13 = vector.extract_strided_slice %3 {offsets = [0, 480], sizes = [16, 160], strides = [1, 1]} : vector<16x1280xbf16> to vector<16x160xbf16>
    %c0_13 = arith.constant 0 : index
    %c0_14 = arith.constant 0 : index
    %14 = vector.load %arg4[%c0_13, %c0_14] : memref<160x64xbf16, #tpu.memory_space<vmem>>, vector<160x64xbf16>
    %cst_15 = arith.constant dense<0.000000e+00> : vector<16x64xf32>
    %15 = tpu.matmul %13, %14, %cst_15 {dimension_numbers = #tpu.dot_dimension_numbers<[1], [0], [0], [1], [0, 0, 1, 1], [], []>} : vector<16x160xbf16>, vector<160x64xbf16>, vector<16x64xf32> -> vector<16x64xf32>
    %16 = vector.extract_strided_slice %3 {offsets = [0, 640], sizes = [16, 160], strides = [1, 1]} : vector<16x1280xbf16> to vector<16x160xbf16>
    %c0_16 = arith.constant 0 : index
    %c0_17 = arith.constant 0 : index
    %17 = vector.load %arg4[%c0_16, %c0_17] : memref<160x64xbf16, #tpu.memory_space<vmem>>, vector<160x64xbf16>
    %cst_18 = arith.constant dense<0.000000e+00> : vector<16x64xf32>
    %18 = tpu.matmul %16, %17, %cst_18 {dimension_numbers = #tpu.dot_dimension_numbers<[1], [0], [0], [1], [0, 0, 1, 1], [], []>} : vector<16x160xbf16>, vector<160x64xbf16>, vector<16x64xf32> -> vector<16x64xf32>
    %19 = vector.extract_strided_slice %3 {offsets = [0, 800], sizes = [16, 160], strides = [1, 1]} : vector<16x1280xbf16> to vector<16x160xbf16>
    %c0_19 = arith.constant 0 : index
    %c0_20 = arith.constant 0 : index
    %20 = vector.load %arg4[%c0_19, %c0_20] : memref<160x64xbf16, #tpu.memory_space<vmem>>, vector<160x64xbf16>
    %cst_21 = arith.constant dense<0.000000e+00> : vector<16x64xf32>
    %21 = tpu.matmul %19, %20, %cst_21 {dimension_numbers = #tpu.dot_dimension_numbers<[1], [0], [0], [1], [0, 0, 1, 1], [], []>} : vector<16x160xbf16>, vector<160x64xbf16>, vector<16x64xf32> -> vector<16x64xf32>
    %22 = vector.extract_strided_slice %3 {offsets = [0, 960], sizes = [16, 160], strides = [1, 1]} : vector<16x1280xbf16> to vector<16x160xbf16>
    %c0_22 = arith.constant 0 : index
    %c0_23 = arith.constant 0 : index
    %23 = vector.load %arg4[%c0_22, %c0_23] : memref<160x64xbf16, #tpu.memory_space<vmem>>, vector<160x64xbf16>
    %cst_24 = arith.constant dense<0.000000e+00> : vector<16x64xf32>
    %24 = tpu.matmul %22, %23, %cst_24 {dimension_numbers = #tpu.dot_dimension_numbers<[1], [0], [0], [1], [0, 0, 1, 1], [], []>} : vector<16x160xbf16>, vector<160x64xbf16>, vector<16x64xf32> -> vector<16x64xf32>
    %25 = vector.extract_strided_slice %3 {offsets = [0, 1120], sizes = [16, 160], strides = [1, 1]} : vector<16x1280xbf16> to vector<16x160xbf16>
    %c0_25 = arith.constant 0 : index
    %c0_26 = arith.constant 0 : index
    %26 = vector.load %arg4[%c0_25, %c0_26] : memref<160x64xbf16, #tpu.memory_space<vmem>>, vector<160x64xbf16>
    %cst_27 = arith.constant dense<0.000000e+00> : vector<16x64xf32>
    %27 = tpu.matmul %25, %26, %cst_27 {dimension_numbers = #tpu.dot_dimension_numbers<[1], [0], [0], [1], [0, 0, 1, 1], [], []>} : vector<16x160xbf16>, vector<160x64xbf16>, vector<16x64xf32> -> vector<16x64xf32>
    %28 = tpu.concatenate %6, %9, %12, %15, %18, %21, %24, %27 in 1 : vector<16x64xf32>, vector<16x64xf32>, vector<16x64xf32>, vector<16x64xf32>, vector<16x64xf32>, vector<16x64xf32>, vector<16x64xf32>, vector<16x64xf32> -> vector<16x512xf32>
    %c0_28 = arith.constant 0 : index
    %c0_29 = arith.constant 0 : index
    %29 = vector.load %arg5[%c0_28, %c0_29] : memref<1x512xf32, #tpu.memory_space<vmem>>, vector<1x512xf32>
    %30 = vector.broadcast %29 : vector<1x512xf32> to vector<16x512xf32>
    %31 = arith.addf %28, %30 : vector<16x512xf32>
    %c1_i32 = arith.constant 1 : i32
    %32 = tpu.dynamic_rotate %2 by %c1_i32 dim 0 : vector<16x1280xf32>, i32 -> vector<16x1280xf32>
    %33 = vector.broadcast %0 : vector<16x1xf32> to vector<16x1280xf32>
    %34 = arith.mulf %32, %33 : vector<16x1280xf32>
    %c15_i32 = arith.constant 15 : i32
    %35 = tpu.dynamic_rotate %2 by %c15_i32 dim 0 : vector<16x1280xf32>, i32 -> vector<16x1280xf32>
    %36 = vector.broadcast %1 : vector<16x1xf32> to vector<16x1280xf32>
    %37 = arith.mulf %35, %36 : vector<16x1280xf32>
    %38 = arith.truncf %34 : vector<16x1280xf32> to vector<16x1280xbf16>
    %39 = arith.truncf %2 : vector<16x1280xf32> to vector<16x1280xbf16>
    %40 = arith.truncf %37 : vector<16x1280xf32> to vector<16x1280xbf16>
    %41 = tpu.concatenate %38, %39, %40 in 1 : vector<16x1280xbf16>, vector<16x1280xbf16>, vector<16x1280xbf16> -> vector<16x3840xbf16>
    %c0_30 = arith.constant 0 : index
    %c0_31 = arith.constant 0 : index
    %42 = vector.load %arg6[%c0_30, %c0_31] : memref<3840x256xbf16, #tpu.memory_space<vmem>>, vector<3840x256xbf16>
    %cst_32 = arith.constant dense<0.000000e+00> : vector<16x256xf32>
    %43 = tpu.matmul %41, %42, %cst_32 {dimension_numbers = #tpu.dot_dimension_numbers<[1], [0], [0], [1], [0, 0, 1, 1], [], []>} : vector<16x3840xbf16>, vector<3840x256xbf16>, vector<16x256xf32> -> vector<16x256xf32>
    %c0_33 = arith.constant 0 : index
    %c0_34 = arith.constant 0 : index
    %44 = vector.load %arg7[%c0_33, %c0_34] : memref<1x256xf32, #tpu.memory_space<vmem>>, vector<1x256xf32>
    %45 = vector.broadcast %44 : vector<1x256xf32> to vector<16x256xf32>
    %46 = arith.addf %43, %45 : vector<16x256xf32>
    %cst_35 = arith.constant dense<0.000000e+00> : vector<256xf32>
    %47 = vector.multi_reduction <add>, %46, %cst_35 [0] : vector<16x256xf32> to vector<256xf32>
    %48 = vector.shape_cast %47 : vector<256xf32> to vector<1x256xf32>
    %49 = vector.extract_strided_slice %48 {offsets = [0, 0], sizes = [1, 32], strides = [1, 1]} : vector<1x256xf32> to vector<1x32xf32>
    %50 = vector.extract_strided_slice %48 {offsets = [0, 32], sizes = [1, 32], strides = [1, 1]} : vector<1x256xf32> to vector<1x32xf32>
    %51 = arith.addf %49, %50 : vector<1x32xf32>
    %52 = vector.extract_strided_slice %48 {offsets = [0, 64], sizes = [1, 32], strides = [1, 1]} : vector<1x256xf32> to vector<1x32xf32>
    %53 = arith.addf %51, %52 : vector<1x32xf32>
    %54 = vector.extract_strided_slice %48 {offsets = [0, 96], sizes = [1, 32], strides = [1, 1]} : vector<1x256xf32> to vector<1x32xf32>
    %55 = arith.addf %53, %54 : vector<1x32xf32>
    %56 = vector.extract_strided_slice %48 {offsets = [0, 128], sizes = [1, 32], strides = [1, 1]} : vector<1x256xf32> to vector<1x32xf32>
    %57 = arith.addf %55, %56 : vector<1x32xf32>
    %58 = vector.extract_strided_slice %48 {offsets = [0, 160], sizes = [1, 32], strides = [1, 1]} : vector<1x256xf32> to vector<1x32xf32>
    %59 = arith.addf %57, %58 : vector<1x32xf32>
    %60 = vector.extract_strided_slice %48 {offsets = [0, 192], sizes = [1, 32], strides = [1, 1]} : vector<1x256xf32> to vector<1x32xf32>
    %61 = arith.addf %59, %60 : vector<1x32xf32>
    %62 = vector.extract_strided_slice %48 {offsets = [0, 224], sizes = [1, 32], strides = [1, 1]} : vector<1x256xf32> to vector<1x32xf32>
    %63 = arith.addf %61, %62 : vector<1x32xf32>
    %cst_36 = arith.constant 7.812500e-03 : f32
    %64 = vector.broadcast %cst_36 : f32 to vector<1x32xf32>
    %65 = arith.mulf %63, %64 : vector<1x32xf32>
    %66 = tpu.concatenate %65, %65, %65, %65, %65, %65, %65, %65 in 1 : vector<1x32xf32>, vector<1x32xf32>, vector<1x32xf32>, vector<1x32xf32>, vector<1x32xf32>, vector<1x32xf32>, vector<1x32xf32>, vector<1x32xf32> -> vector<1x256xf32>
    %67 = vector.broadcast %66 : vector<1x256xf32> to vector<16x256xf32>
    %68 = arith.subf %46, %67 : vector<16x256xf32>
    %69 = arith.mulf %68, %68 : vector<16x256xf32>
    %cst_37 = arith.constant dense<0.000000e+00> : vector<256xf32>
    %70 = vector.multi_reduction <add>, %69, %cst_37 [0] : vector<16x256xf32> to vector<256xf32>
    %71 = vector.shape_cast %70 : vector<256xf32> to vector<1x256xf32>
    %72 = vector.extract_strided_slice %71 {offsets = [0, 0], sizes = [1, 32], strides = [1, 1]} : vector<1x256xf32> to vector<1x32xf32>
    %73 = vector.extract_strided_slice %71 {offsets = [0, 32], sizes = [1, 32], strides = [1, 1]} : vector<1x256xf32> to vector<1x32xf32>
    %74 = arith.addf %72, %73 : vector<1x32xf32>
    %75 = vector.extract_strided_slice %71 {offsets = [0, 64], sizes = [1, 32], strides = [1, 1]} : vector<1x256xf32> to vector<1x32xf32>
    %76 = arith.addf %74, %75 : vector<1x32xf32>
    %77 = vector.extract_strided_slice %71 {offsets = [0, 96], sizes = [1, 32], strides = [1, 1]} : vector<1x256xf32> to vector<1x32xf32>
    %78 = arith.addf %76, %77 : vector<1x32xf32>
    %79 = vector.extract_strided_slice %71 {offsets = [0, 128], sizes = [1, 32], strides = [1, 1]} : vector<1x256xf32> to vector<1x32xf32>
    %80 = arith.addf %78, %79 : vector<1x32xf32>
    %81 = vector.extract_strided_slice %71 {offsets = [0, 160], sizes = [1, 32], strides = [1, 1]} : vector<1x256xf32> to vector<1x32xf32>
    %82 = arith.addf %80, %81 : vector<1x32xf32>
    %83 = vector.extract_strided_slice %71 {offsets = [0, 192], sizes = [1, 32], strides = [1, 1]} : vector<1x256xf32> to vector<1x32xf32>
    %84 = arith.addf %82, %83 : vector<1x32xf32>
    %85 = vector.extract_strided_slice %71 {offsets = [0, 224], sizes = [1, 32], strides = [1, 1]} : vector<1x256xf32> to vector<1x32xf32>
    %86 = arith.addf %84, %85 : vector<1x32xf32>
    %cst_38 = arith.constant 7.812500e-03 : f32
    %87 = vector.broadcast %cst_38 : f32 to vector<1x32xf32>
    %88 = arith.mulf %86, %87 : vector<1x32xf32>
    %c0_39 = arith.constant 0 : index
    %c0_40 = arith.constant 0 : index
    %89 = vector.load %arg8[%c0_39, %c0_40] : memref<1x32xf32, #tpu.memory_space<vmem>>, vector<1x32xf32>
    %cst_41 = arith.constant 9.99999974E-6 : f32
    %90 = vector.broadcast %cst_41 : f32 to vector<1x32xf32>
    %91 = arith.addf %88, %90 : vector<1x32xf32>
    %92 = math.rsqrt %91 : vector<1x32xf32>
    %93 = arith.mulf %89, %92 : vector<1x32xf32>
    %94 = tpu.concatenate %93, %93, %93, %93, %93, %93, %93, %93 in 1 : vector<1x32xf32>, vector<1x32xf32>, vector<1x32xf32>, vector<1x32xf32>, vector<1x32xf32>, vector<1x32xf32>, vector<1x32xf32>, vector<1x32xf32> -> vector<1x256xf32>
    %c0_42 = arith.constant 0 : index
    %c0_43 = arith.constant 0 : index
    %95 = vector.load %arg9[%c0_42, %c0_43] : memref<1x32xf32, #tpu.memory_space<vmem>>, vector<1x32xf32>
    %96 = tpu.concatenate %95, %95, %95, %95, %95, %95, %95, %95 in 1 : vector<1x32xf32>, vector<1x32xf32>, vector<1x32xf32>, vector<1x32xf32>, vector<1x32xf32>, vector<1x32xf32>, vector<1x32xf32>, vector<1x32xf32> -> vector<1x256xf32>
    %97 = vector.broadcast %94 : vector<1x256xf32> to vector<16x256xf32>
    %98 = arith.mulf %68, %97 : vector<16x256xf32>
    %99 = vector.broadcast %96 : vector<1x256xf32> to vector<16x256xf32>
    %100 = arith.addf %98, %99 : vector<16x256xf32>
    %cst_44 = arith.constant 0.00999999977 : f32
    %101 = vector.broadcast %cst_44 : f32 to vector<16x256xf32>
    %102 = arith.mulf %101, %100 : vector<16x256xf32>
    %103 = arith.maximumf %100, %102 : vector<16x256xf32>
    %c1_i32_45 = arith.constant 1 : i32
    %104 = tpu.dynamic_rotate %103 by %c1_i32_45 dim 0 : vector<16x256xf32>, i32 -> vector<16x256xf32>
    %105 = vector.broadcast %0 : vector<16x1xf32> to vector<16x256xf32>
    %106 = arith.mulf %104, %105 : vector<16x256xf32>
    %c15_i32_46 = arith.constant 15 : i32
    %107 = tpu.dynamic_rotate %103 by %c15_i32_46 dim 0 : vector<16x256xf32>, i32 -> vector<16x256xf32>
    %108 = vector.broadcast %1 : vector<16x1xf32> to vector<16x256xf32>
    %109 = arith.mulf %107, %108 : vector<16x256xf32>
    %110 = arith.truncf %106 : vector<16x256xf32> to vector<16x256xbf16>
    %111 = arith.truncf %103 : vector<16x256xf32> to vector<16x256xbf16>
    %112 = arith.truncf %109 : vector<16x256xf32> to vector<16x256xbf16>
    %113 = tpu.concatenate %110, %111, %112 in 1 : vector<16x256xbf16>, vector<16x256xbf16>, vector<16x256xbf16> -> vector<16x768xbf16>
    %c0_47 = arith.constant 0 : index
    %c0_48 = arith.constant 0 : index
    %114 = vector.load %arg10[%c0_47, %c0_48] : memref<768x512xbf16, #tpu.memory_space<vmem>>, vector<768x512xbf16>
    %cst_49 = arith.constant dense<0.000000e+00> : vector<16x512xf32>
    %115 = tpu.matmul %113, %114, %cst_49 {dimension_numbers = #tpu.dot_dimension_numbers<[1], [0], [0], [1], [0, 0, 1, 1], [], []>} : vector<16x768xbf16>, vector<768x512xbf16>, vector<16x512xf32> -> vector<16x512xf32>
    %c0_50 = arith.constant 0 : index
    %c0_51 = arith.constant 0 : index
    %116 = vector.load %arg11[%c0_50, %c0_51] : memref<1x512xf32, #tpu.memory_space<vmem>>, vector<1x512xf32>
    %117 = vector.broadcast %116 : vector<1x512xf32> to vector<16x512xf32>
    %118 = arith.addf %115, %117 : vector<16x512xf32>
    %cst_52 = arith.constant dense<0.000000e+00> : vector<512xf32>
    %119 = vector.multi_reduction <add>, %118, %cst_52 [0] : vector<16x512xf32> to vector<512xf32>
    %120 = vector.shape_cast %119 : vector<512xf32> to vector<1x512xf32>
    %121 = vector.extract_strided_slice %120 {offsets = [0, 0], sizes = [1, 64], strides = [1, 1]} : vector<1x512xf32> to vector<1x64xf32>
    %122 = vector.extract_strided_slice %120 {offsets = [0, 64], sizes = [1, 64], strides = [1, 1]} : vector<1x512xf32> to vector<1x64xf32>
    %123 = arith.addf %121, %122 : vector<1x64xf32>
    %124 = vector.extract_strided_slice %120 {offsets = [0, 128], sizes = [1, 64], strides = [1, 1]} : vector<1x512xf32> to vector<1x64xf32>
    %125 = arith.addf %123, %124 : vector<1x64xf32>
    %126 = vector.extract_strided_slice %120 {offsets = [0, 192], sizes = [1, 64], strides = [1, 1]} : vector<1x512xf32> to vector<1x64xf32>
    %127 = arith.addf %125, %126 : vector<1x64xf32>
    %128 = vector.extract_strided_slice %120 {offsets = [0, 256], sizes = [1, 64], strides = [1, 1]} : vector<1x512xf32> to vector<1x64xf32>
    %129 = arith.addf %127, %128 : vector<1x64xf32>
    %130 = vector.extract_strided_slice %120 {offsets = [0, 320], sizes = [1, 64], strides = [1, 1]} : vector<1x512xf32> to vector<1x64xf32>
    %131 = arith.addf %129, %130 : vector<1x64xf32>
    %132 = vector.extract_strided_slice %120 {offsets = [0, 384], sizes = [1, 64], strides = [1, 1]} : vector<1x512xf32> to vector<1x64xf32>
    %133 = arith.addf %131, %132 : vector<1x64xf32>
    %134 = vector.extract_strided_slice %120 {offsets = [0, 448], sizes = [1, 64], strides = [1, 1]} : vector<1x512xf32> to vector<1x64xf32>
    %135 = arith.addf %133, %134 : vector<1x64xf32>
    %cst_53 = arith.constant 7.812500e-03 : f32
    %136 = vector.broadcast %cst_53 : f32 to vector<1x64xf32>
    %137 = arith.mulf %135, %136 : vector<1x64xf32>
    %138 = tpu.concatenate %137, %137, %137, %137, %137, %137, %137, %137 in 1 : vector<1x64xf32>, vector<1x64xf32>, vector<1x64xf32>, vector<1x64xf32>, vector<1x64xf32>, vector<1x64xf32>, vector<1x64xf32>, vector<1x64xf32> -> vector<1x512xf32>
    %139 = vector.broadcast %138 : vector<1x512xf32> to vector<16x512xf32>
    %140 = arith.subf %118, %139 : vector<16x512xf32>
    %141 = arith.mulf %140, %140 : vector<16x512xf32>
    %cst_54 = arith.constant dense<0.000000e+00> : vector<512xf32>
    %142 = vector.multi_reduction <add>, %141, %cst_54 [0] : vector<16x512xf32> to vector<512xf32>
    %143 = vector.shape_cast %142 : vector<512xf32> to vector<1x512xf32>
    %144 = vector.extract_strided_slice %143 {offsets = [0, 0], sizes = [1, 64], strides = [1, 1]} : vector<1x512xf32> to vector<1x64xf32>
    %145 = vector.extract_strided_slice %143 {offsets = [0, 64], sizes = [1, 64], strides = [1, 1]} : vector<1x512xf32> to vector<1x64xf32>
    %146 = arith.addf %144, %145 : vector<1x64xf32>
    %147 = vector.extract_strided_slice %143 {offsets = [0, 128], sizes = [1, 64], strides = [1, 1]} : vector<1x512xf32> to vector<1x64xf32>
    %148 = arith.addf %146, %147 : vector<1x64xf32>
    %149 = vector.extract_strided_slice %143 {offsets = [0, 192], sizes = [1, 64], strides = [1, 1]} : vector<1x512xf32> to vector<1x64xf32>
    %150 = arith.addf %148, %149 : vector<1x64xf32>
    %151 = vector.extract_strided_slice %143 {offsets = [0, 256], sizes = [1, 64], strides = [1, 1]} : vector<1x512xf32> to vector<1x64xf32>
    %152 = arith.addf %150, %151 : vector<1x64xf32>
    %153 = vector.extract_strided_slice %143 {offsets = [0, 320], sizes = [1, 64], strides = [1, 1]} : vector<1x512xf32> to vector<1x64xf32>
    %154 = arith.addf %152, %153 : vector<1x64xf32>
    %155 = vector.extract_strided_slice %143 {offsets = [0, 384], sizes = [1, 64], strides = [1, 1]} : vector<1x512xf32> to vector<1x64xf32>
    %156 = arith.addf %154, %155 : vector<1x64xf32>
    %157 = vector.extract_strided_slice %143 {offsets = [0, 448], sizes = [1, 64], strides = [1, 1]} : vector<1x512xf32> to vector<1x64xf32>
    %158 = arith.addf %156, %157 : vector<1x64xf32>
    %cst_55 = arith.constant 7.812500e-03 : f32
    %159 = vector.broadcast %cst_55 : f32 to vector<1x64xf32>
    %160 = arith.mulf %158, %159 : vector<1x64xf32>
    %c0_56 = arith.constant 0 : index
    %c0_57 = arith.constant 0 : index
    %161 = vector.load %arg12[%c0_56, %c0_57] : memref<1x64xf32, #tpu.memory_space<vmem>>, vector<1x64xf32>
    %cst_58 = arith.constant 9.99999974E-6 : f32
    %162 = vector.broadcast %cst_58 : f32 to vector<1x64xf32>
    %163 = arith.addf %160, %162 : vector<1x64xf32>
    %164 = math.rsqrt %163 : vector<1x64xf32>
    %165 = arith.mulf %161, %164 : vector<1x64xf32>
    %166 = tpu.concatenate %165, %165, %165, %165, %165, %165, %165, %165 in 1 : vector<1x64xf32>, vector<1x64xf32>, vector<1x64xf32>, vector<1x64xf32>, vector<1x64xf32>, vector<1x64xf32>, vector<1x64xf32>, vector<1x64xf32> -> vector<1x512xf32>
    %c0_59 = arith.constant 0 : index
    %c0_60 = arith.constant 0 : index
    %167 = vector.load %arg13[%c0_59, %c0_60] : memref<1x64xf32, #tpu.memory_space<vmem>>, vector<1x64xf32>
    %168 = tpu.concatenate %167, %167, %167, %167, %167, %167, %167, %167 in 1 : vector<1x64xf32>, vector<1x64xf32>, vector<1x64xf32>, vector<1x64xf32>, vector<1x64xf32>, vector<1x64xf32>, vector<1x64xf32>, vector<1x64xf32> -> vector<1x512xf32>
    %169 = vector.broadcast %166 : vector<1x512xf32> to vector<16x512xf32>
    %170 = arith.mulf %140, %169 : vector<16x512xf32>
    %171 = vector.broadcast %168 : vector<1x512xf32> to vector<16x512xf32>
    %172 = arith.addf %170, %171 : vector<16x512xf32>
    %173 = arith.addf %172, %31 : vector<16x512xf32>
    %cst_61 = arith.constant 0.00999999977 : f32
    %174 = vector.broadcast %cst_61 : f32 to vector<16x512xf32>
    %175 = arith.mulf %174, %173 : vector<16x512xf32>
    %176 = arith.maximumf %173, %175 : vector<16x512xf32>
    %c0_62 = arith.constant 0 : index
    %c0_63 = arith.constant 0 : index
    %177 = vector.load %arg1[%c0_62, %c0_63] : memref<16x48xf32, #tpu.memory_space<vmem>>, vector<16x48xf32>
    %178 = tpu.concatenate %176, %177 in 1 : vector<16x512xf32>, vector<16x48xf32> -> vector<16x560xf32>
    %179 = arith.truncf %178 : vector<16x560xf32> to vector<16x560xbf16>
    %c0_64 = arith.constant 0 : index
    %c0_65 = arith.constant 0 : index
    %180 = vector.load %arg14[%c0_64, %c0_65] : memref<560x64xbf16, #tpu.memory_space<vmem>>, vector<560x64xbf16>
    %cst_66 = arith.constant dense<0.000000e+00> : vector<16x64xf32>
    %181 = tpu.matmul %179, %180, %cst_66 {dimension_numbers = #tpu.dot_dimension_numbers<[1], [0], [0], [1], [0, 0, 1, 1], [], []>} : vector<16x560xbf16>, vector<560x64xbf16>, vector<16x64xf32> -> vector<16x64xf32>
    %c0_67 = arith.constant 0 : index
    %c0_68 = arith.constant 0 : index
    %182 = vector.load %arg15[%c0_67, %c0_68] : memref<1x64xf32, #tpu.memory_space<vmem>>, vector<1x64xf32>
    %183 = vector.broadcast %182 : vector<1x64xf32> to vector<16x64xf32>
    %184 = arith.addf %181, %183 : vector<16x64xf32>
    %c1_i32_69 = arith.constant 1 : i32
    %185 = tpu.dynamic_rotate %178 by %c1_i32_69 dim 0 : vector<16x560xf32>, i32 -> vector<16x560xf32>
    %186 = vector.broadcast %0 : vector<16x1xf32> to vector<16x560xf32>
    %187 = arith.mulf %185, %186 : vector<16x560xf32>
    %c15_i32_70 = arith.constant 15 : i32
    %188 = tpu.dynamic_rotate %178 by %c15_i32_70 dim 0 : vector<16x560xf32>, i32 -> vector<16x560xf32>
    %189 = vector.broadcast %1 : vector<16x1xf32> to vector<16x560xf32>
    %190 = arith.mulf %188, %189 : vector<16x560xf32>
    %191 = arith.truncf %187 : vector<16x560xf32> to vector<16x560xbf16>
    %192 = arith.truncf %178 : vector<16x560xf32> to vector<16x560xbf16>
    %193 = arith.truncf %190 : vector<16x560xf32> to vector<16x560xbf16>
    %194 = tpu.concatenate %191, %192, %193 in 1 : vector<16x560xbf16>, vector<16x560xbf16>, vector<16x560xbf16> -> vector<16x1680xbf16>
    %c0_71 = arith.constant 0 : index
    %c0_72 = arith.constant 0 : index
    %195 = vector.load %arg16[%c0_71, %c0_72] : memref<1680x32xbf16, #tpu.memory_space<vmem>>, vector<1680x32xbf16>
    %cst_73 = arith.constant dense<0.000000e+00> : vector<16x32xf32>
    %196 = tpu.matmul %194, %195, %cst_73 {dimension_numbers = #tpu.dot_dimension_numbers<[1], [0], [0], [1], [0, 0, 1, 1], [], []>} : vector<16x1680xbf16>, vector<1680x32xbf16>, vector<16x32xf32> -> vector<16x32xf32>
    %c0_74 = arith.constant 0 : index
    %c0_75 = arith.constant 0 : index
    %197 = vector.load %arg17[%c0_74, %c0_75] : memref<1x32xf32, #tpu.memory_space<vmem>>, vector<1x32xf32>
    %198 = vector.broadcast %197 : vector<1x32xf32> to vector<16x32xf32>
    %199 = arith.addf %196, %198 : vector<16x32xf32>
    %cst_76 = arith.constant dense<0.000000e+00> : vector<32xf32>
    %200 = vector.multi_reduction <add>, %199, %cst_76 [0] : vector<16x32xf32> to vector<32xf32>
    %201 = vector.shape_cast %200 : vector<32xf32> to vector<1x32xf32>
    %202 = vector.extract_strided_slice %201 {offsets = [0, 0], sizes = [1, 2], strides = [1, 1]} : vector<1x32xf32> to vector<1x2xf32>
    %203 = vector.extract_strided_slice %201 {offsets = [0, 2], sizes = [1, 2], strides = [1, 1]} : vector<1x32xf32> to vector<1x2xf32>
    %204 = arith.addf %202, %203 : vector<1x2xf32>
    %205 = vector.extract_strided_slice %201 {offsets = [0, 4], sizes = [1, 2], strides = [1, 1]} : vector<1x32xf32> to vector<1x2xf32>
    %206 = arith.addf %204, %205 : vector<1x2xf32>
    %207 = vector.extract_strided_slice %201 {offsets = [0, 6], sizes = [1, 2], strides = [1, 1]} : vector<1x32xf32> to vector<1x2xf32>
    %208 = arith.addf %206, %207 : vector<1x2xf32>
    %209 = vector.extract_strided_slice %201 {offsets = [0, 8], sizes = [1, 2], strides = [1, 1]} : vector<1x32xf32> to vector<1x2xf32>
    %210 = arith.addf %208, %209 : vector<1x2xf32>
    %211 = vector.extract_strided_slice %201 {offsets = [0, 10], sizes = [1, 2], strides = [1, 1]} : vector<1x32xf32> to vector<1x2xf32>
    %212 = arith.addf %210, %211 : vector<1x2xf32>
    %213 = vector.extract_strided_slice %201 {offsets = [0, 12], sizes = [1, 2], strides = [1, 1]} : vector<1x32xf32> to vector<1x2xf32>
    %214 = arith.addf %212, %213 : vector<1x2xf32>
    %215 = vector.extract_strided_slice %201 {offsets = [0, 14], sizes = [1, 2], strides = [1, 1]} : vector<1x32xf32> to vector<1x2xf32>
    %216 = arith.addf %214, %215 : vector<1x2xf32>
    %217 = vector.extract_strided_slice %201 {offsets = [0, 16], sizes = [1, 2], strides = [1, 1]} : vector<1x32xf32> to vector<1x2xf32>
    %218 = arith.addf %216, %217 : vector<1x2xf32>
    %219 = vector.extract_strided_slice %201 {offsets = [0, 18], sizes = [1, 2], strides = [1, 1]} : vector<1x32xf32> to vector<1x2xf32>
    %220 = arith.addf %218, %219 : vector<1x2xf32>
    %221 = vector.extract_strided_slice %201 {offsets = [0, 20], sizes = [1, 2], strides = [1, 1]} : vector<1x32xf32> to vector<1x2xf32>
    %222 = arith.addf %220, %221 : vector<1x2xf32>
    %223 = vector.extract_strided_slice %201 {offsets = [0, 22], sizes = [1, 2], strides = [1, 1]} : vector<1x32xf32> to vector<1x2xf32>
    %224 = arith.addf %222, %223 : vector<1x2xf32>
    %225 = vector.extract_strided_slice %201 {offsets = [0, 24], sizes = [1, 2], strides = [1, 1]} : vector<1x32xf32> to vector<1x2xf32>
    %226 = arith.addf %224, %225 : vector<1x2xf32>
    %227 = vector.extract_strided_slice %201 {offsets = [0, 26], sizes = [1, 2], strides = [1, 1]} : vector<1x32xf32> to vector<1x2xf32>
    %228 = arith.addf %226, %227 : vector<1x2xf32>
    %229 = vector.extract_strided_slice %201 {offsets = [0, 28], sizes = [1, 2], strides = [1, 1]} : vector<1x32xf32> to vector<1x2xf32>
    %230 = arith.addf %228, %229 : vector<1x2xf32>
    %231 = vector.extract_strided_slice %201 {offsets = [0, 30], sizes = [1, 2], strides = [1, 1]} : vector<1x32xf32> to vector<1x2xf32>
    %232 = arith.addf %230, %231 : vector<1x2xf32>
    %cst_77 = arith.constant 3.906250e-03 : f32
    %233 = vector.broadcast %cst_77 : f32 to vector<1x2xf32>
    %234 = arith.mulf %232, %233 : vector<1x2xf32>
    %235 = tpu.concatenate %234, %234, %234, %234, %234, %234, %234, %234, %234, %234, %234, %234, %234, %234, %234, %234 in 1 : vector<1x2xf32>, vector<1x2xf32>, vector<1x2xf32>, vector<1x2xf32>, vector<1x2xf32>, vector<1x2xf32>, vector<1x2xf32>, vector<1x2xf32>, vector<1x2xf32>, vector<1x2xf32>, vector<1x2xf32>, vector<1x2xf32>, vector<1x2xf32>, vector<1x2xf32>, vector<1x2xf32>, vector<1x2xf32> -> vector<1x32xf32>
    %236 = vector.broadcast %235 : vector<1x32xf32> to vector<16x32xf32>
    %237 = arith.subf %199, %236 : vector<16x32xf32>
    %238 = arith.mulf %237, %237 : vector<16x32xf32>
    %cst_78 = arith.constant dense<0.000000e+00> : vector<32xf32>
    %239 = vector.multi_reduction <add>, %238, %cst_78 [0] : vector<16x32xf32> to vector<32xf32>
    %240 = vector.shape_cast %239 : vector<32xf32> to vector<1x32xf32>
    %241 = vector.extract_strided_slice %240 {offsets = [0, 0], sizes = [1, 2], strides = [1, 1]} : vector<1x32xf32> to vector<1x2xf32>
    %242 = vector.extract_strided_slice %240 {offsets = [0, 2], sizes = [1, 2], strides = [1, 1]} : vector<1x32xf32> to vector<1x2xf32>
    %243 = arith.addf %241, %242 : vector<1x2xf32>
    %244 = vector.extract_strided_slice %240 {offsets = [0, 4], sizes = [1, 2], strides = [1, 1]} : vector<1x32xf32> to vector<1x2xf32>
    %245 = arith.addf %243, %244 : vector<1x2xf32>
    %246 = vector.extract_strided_slice %240 {offsets = [0, 6], sizes = [1, 2], strides = [1, 1]} : vector<1x32xf32> to vector<1x2xf32>
    %247 = arith.addf %245, %246 : vector<1x2xf32>
    %248 = vector.extract_strided_slice %240 {offsets = [0, 8], sizes = [1, 2], strides = [1, 1]} : vector<1x32xf32> to vector<1x2xf32>
    %249 = arith.addf %247, %248 : vector<1x2xf32>
    %250 = vector.extract_strided_slice %240 {offsets = [0, 10], sizes = [1, 2], strides = [1, 1]} : vector<1x32xf32> to vector<1x2xf32>
    %251 = arith.addf %249, %250 : vector<1x2xf32>
    %252 = vector.extract_strided_slice %240 {offsets = [0, 12], sizes = [1, 2], strides = [1, 1]} : vector<1x32xf32> to vector<1x2xf32>
    %253 = arith.addf %251, %252 : vector<1x2xf32>
    %254 = vector.extract_strided_slice %240 {offsets = [0, 14], sizes = [1, 2], strides = [1, 1]} : vector<1x32xf32> to vector<1x2xf32>
    %255 = arith.addf %253, %254 : vector<1x2xf32>
    %256 = vector.extract_strided_slice %240 {offsets = [0, 16], sizes = [1, 2], strides = [1, 1]} : vector<1x32xf32> to vector<1x2xf32>
    %257 = arith.addf %255, %256 : vector<1x2xf32>
    %258 = vector.extract_strided_slice %240 {offsets = [0, 18], sizes = [1, 2], strides = [1, 1]} : vector<1x32xf32> to vector<1x2xf32>
    %259 = arith.addf %257, %258 : vector<1x2xf32>
    %260 = vector.extract_strided_slice %240 {offsets = [0, 20], sizes = [1, 2], strides = [1, 1]} : vector<1x32xf32> to vector<1x2xf32>
    %261 = arith.addf %259, %260 : vector<1x2xf32>
    %262 = vector.extract_strided_slice %240 {offsets = [0, 22], sizes = [1, 2], strides = [1, 1]} : vector<1x32xf32> to vector<1x2xf32>
    %263 = arith.addf %261, %262 : vector<1x2xf32>
    %264 = vector.extract_strided_slice %240 {offsets = [0, 24], sizes = [1, 2], strides = [1, 1]} : vector<1x32xf32> to vector<1x2xf32>
    %265 = arith.addf %263, %264 : vector<1x2xf32>
    %266 = vector.extract_strided_slice %240 {offsets = [0, 26], sizes = [1, 2], strides = [1, 1]} : vector<1x32xf32> to vector<1x2xf32>
    %267 = arith.addf %265, %266 : vector<1x2xf32>
    %268 = vector.extract_strided_slice %240 {offsets = [0, 28], sizes = [1, 2], strides = [1, 1]} : vector<1x32xf32> to vector<1x2xf32>
    %269 = arith.addf %267, %268 : vector<1x2xf32>
    %270 = vector.extract_strided_slice %240 {offsets = [0, 30], sizes = [1, 2], strides = [1, 1]} : vector<1x32xf32> to vector<1x2xf32>
    %271 = arith.addf %269, %270 : vector<1x2xf32>
    %cst_79 = arith.constant 3.906250e-03 : f32
    %272 = vector.broadcast %cst_79 : f32 to vector<1x2xf32>
    %273 = arith.mulf %271, %272 : vector<1x2xf32>
    %c0_80 = arith.constant 0 : index
    %c0_81 = arith.constant 0 : index
    %274 = vector.load %arg18[%c0_80, %c0_81] : memref<1x2xf32, #tpu.memory_space<vmem>>, vector<1x2xf32>
    %cst_82 = arith.constant 9.99999974E-6 : f32
    %275 = vector.broadcast %cst_82 : f32 to vector<1x2xf32>
    %276 = arith.addf %273, %275 : vector<1x2xf32>
    %277 = math.rsqrt %276 : vector<1x2xf32>
    %278 = arith.mulf %274, %277 : vector<1x2xf32>
    %279 = tpu.concatenate %278, %278, %278, %278, %278, %278, %278, %278, %278, %278, %278, %278, %278, %278, %278, %278 in 1 : vector<1x2xf32>, vector<1x2xf32>, vector<1x2xf32>, vector<1x2xf32>, vector<1x2xf32>, vector<1x2xf32>, vector<1x2xf32>, vector<1x2xf32>, vector<1x2xf32>, vector<1x2xf32>, vector<1x2xf32>, vector<1x2xf32>, vector<1x2xf32>, vector<1x2xf32>, vector<1x2xf32>, vector<1x2xf32> -> vector<1x32xf32>
    %c0_83 = arith.constant 0 : index
    %c0_84 = arith.constant 0 : index
    %280 = vector.load %arg19[%c0_83, %c0_84] : memref<1x2xf32, #tpu.memory_space<vmem>>, vector<1x2xf32>
    %281 = tpu.concatenate %280, %280, %280, %280, %280, %280, %280, %280, %280, %280, %280, %280, %280, %280, %280, %280 in 1 : vector<1x2xf32>, vector<1x2xf32>, vector<1x2xf32>, vector<1x2xf32>, vector<1x2xf32>, vector<1x2xf32>, vector<1x2xf32>, vector<1x2xf32>, vector<1x2xf32>, vector<1x2xf32>, vector<1x2xf32>, vector<1x2xf32>, vector<1x2xf32>, vector<1x2xf32>, vector<1x2xf32>, vector<1x2xf32> -> vector<1x32xf32>
    %282 = vector.broadcast %279 : vector<1x32xf32> to vector<16x32xf32>
    %283 = arith.mulf %237, %282 : vector<16x32xf32>
    %284 = vector.broadcast %281 : vector<1x32xf32> to vector<16x32xf32>
    %285 = arith.addf %283, %284 : vector<16x32xf32>
    %cst_85 = arith.constant 0.00999999977 : f32
    %286 = vector.broadcast %cst_85 : f32 to vector<16x32xf32>
    %287 = arith.mulf %286, %285 : vector<16x32xf32>
    %288 = arith.maximumf %285, %287 : vector<16x32xf32>
    %c1_i32_86 = arith.constant 1 : i32
    %289 = tpu.dynamic_rotate %288 by %c1_i32_86 dim 0 : vector<16x32xf32>, i32 -> vector<16x32xf32>
    %290 = vector.broadcast %0 : vector<16x1xf32> to vector<16x32xf32>
    %291 = arith.mulf %289, %290 : vector<16x32xf32>
    %c15_i32_87 = arith.constant 15 : i32
    %292 = tpu.dynamic_rotate %288 by %c15_i32_87 dim 0 : vector<16x32xf32>, i32 -> vector<16x32xf32>
    %293 = vector.broadcast %1 : vector<16x1xf32> to vector<16x32xf32>
    %294 = arith.mulf %292, %293 : vector<16x32xf32>
    %295 = arith.truncf %291 : vector<16x32xf32> to vector<16x32xbf16>
    %296 = arith.truncf %288 : vector<16x32xf32> to vector<16x32xbf16>
    %297 = arith.truncf %294 : vector<16x32xf32> to vector<16x32xbf16>
    %298 = tpu.concatenate %295, %296, %297 in 1 : vector<16x32xbf16>, vector<16x32xbf16>, vector<16x32xbf16> -> vector<16x96xbf16>
    %c0_88 = arith.constant 0 : index
    %c0_89 = arith.constant 0 : index
    %299 = vector.load %arg20[%c0_88, %c0_89] : memref<96x64xbf16, #tpu.memory_space<vmem>>, vector<96x64xbf16>
    %cst_90 = arith.constant dense<0.000000e+00> : vector<16x64xf32>
    %300 = tpu.matmul %298, %299, %cst_90 {dimension_numbers = #tpu.dot_dimension_numbers<[1], [0], [0], [1], [0, 0, 1, 1], [], []>} : vector<16x96xbf16>, vector<96x64xbf16>, vector<16x64xf32> -> vector<16x64xf32>
    %c0_91 = arith.constant 0 : index
    %c0_92 = arith.constant 0 : index
    %301 = vector.load %arg21[%c0_91, %c0_92] : memref<1x64xf32, #tpu.memory_space<vmem>>, vector<1x64xf32>
    %302 = vector.broadcast %301 : vector<1x64xf32> to vector<16x64xf32>
    %303 = arith.addf %300, %302 : vector<16x64xf32>
    %cst_93 = arith.constant dense<0.000000e+00> : vector<64xf32>
    %304 = vector.multi_reduction <add>, %303, %cst_93 [0] : vector<16x64xf32> to vector<64xf32>
    %305 = vector.shape_cast %304 : vector<64xf32> to vector<1x64xf32>
    %306 = vector.extract_strided_slice %305 {offsets = [0, 0], sizes = [1, 4], strides = [1, 1]} : vector<1x64xf32> to vector<1x4xf32>
    %307 = vector.extract_strided_slice %305 {offsets = [0, 4], sizes = [1, 4], strides = [1, 1]} : vector<1x64xf32> to vector<1x4xf32>
    %308 = arith.addf %306, %307 : vector<1x4xf32>
    %309 = vector.extract_strided_slice %305 {offsets = [0, 8], sizes = [1, 4], strides = [1, 1]} : vector<1x64xf32> to vector<1x4xf32>
    %310 = arith.addf %308, %309 : vector<1x4xf32>
    %311 = vector.extract_strided_slice %305 {offsets = [0, 12], sizes = [1, 4], strides = [1, 1]} : vector<1x64xf32> to vector<1x4xf32>
    %312 = arith.addf %310, %311 : vector<1x4xf32>
    %313 = vector.extract_strided_slice %305 {offsets = [0, 16], sizes = [1, 4], strides = [1, 1]} : vector<1x64xf32> to vector<1x4xf32>
    %314 = arith.addf %312, %313 : vector<1x4xf32>
    %315 = vector.extract_strided_slice %305 {offsets = [0, 20], sizes = [1, 4], strides = [1, 1]} : vector<1x64xf32> to vector<1x4xf32>
    %316 = arith.addf %314, %315 : vector<1x4xf32>
    %317 = vector.extract_strided_slice %305 {offsets = [0, 24], sizes = [1, 4], strides = [1, 1]} : vector<1x64xf32> to vector<1x4xf32>
    %318 = arith.addf %316, %317 : vector<1x4xf32>
    %319 = vector.extract_strided_slice %305 {offsets = [0, 28], sizes = [1, 4], strides = [1, 1]} : vector<1x64xf32> to vector<1x4xf32>
    %320 = arith.addf %318, %319 : vector<1x4xf32>
    %321 = vector.extract_strided_slice %305 {offsets = [0, 32], sizes = [1, 4], strides = [1, 1]} : vector<1x64xf32> to vector<1x4xf32>
    %322 = arith.addf %320, %321 : vector<1x4xf32>
    %323 = vector.extract_strided_slice %305 {offsets = [0, 36], sizes = [1, 4], strides = [1, 1]} : vector<1x64xf32> to vector<1x4xf32>
    %324 = arith.addf %322, %323 : vector<1x4xf32>
    %325 = vector.extract_strided_slice %305 {offsets = [0, 40], sizes = [1, 4], strides = [1, 1]} : vector<1x64xf32> to vector<1x4xf32>
    %326 = arith.addf %324, %325 : vector<1x4xf32>
    %327 = vector.extract_strided_slice %305 {offsets = [0, 44], sizes = [1, 4], strides = [1, 1]} : vector<1x64xf32> to vector<1x4xf32>
    %328 = arith.addf %326, %327 : vector<1x4xf32>
    %329 = vector.extract_strided_slice %305 {offsets = [0, 48], sizes = [1, 4], strides = [1, 1]} : vector<1x64xf32> to vector<1x4xf32>
    %330 = arith.addf %328, %329 : vector<1x4xf32>
    %331 = vector.extract_strided_slice %305 {offsets = [0, 52], sizes = [1, 4], strides = [1, 1]} : vector<1x64xf32> to vector<1x4xf32>
    %332 = arith.addf %330, %331 : vector<1x4xf32>
    %333 = vector.extract_strided_slice %305 {offsets = [0, 56], sizes = [1, 4], strides = [1, 1]} : vector<1x64xf32> to vector<1x4xf32>
    %334 = arith.addf %332, %333 : vector<1x4xf32>
    %335 = vector.extract_strided_slice %305 {offsets = [0, 60], sizes = [1, 4], strides = [1, 1]} : vector<1x64xf32> to vector<1x4xf32>
    %336 = arith.addf %334, %335 : vector<1x4xf32>
    %cst_94 = arith.constant 3.906250e-03 : f32
    %337 = vector.broadcast %cst_94 : f32 to vector<1x4xf32>
    %338 = arith.mulf %336, %337 : vector<1x4xf32>
    %339 = tpu.concatenate %338, %338, %338, %338, %338, %338, %338, %338, %338, %338, %338, %338, %338, %338, %338, %338 in 1 : vector<1x4xf32>, vector<1x4xf32>, vector<1x4xf32>, vector<1x4xf32>, vector<1x4xf32>, vector<1x4xf32>, vector<1x4xf32>, vector<1x4xf32>, vector<1x4xf32>, vector<1x4xf32>, vector<1x4xf32>, vector<1x4xf32>, vector<1x4xf32>, vector<1x4xf32>, vector<1x4xf32>, vector<1x4xf32> -> vector<1x64xf32>
    %340 = vector.broadcast %339 : vector<1x64xf32> to vector<16x64xf32>
    %341 = arith.subf %303, %340 : vector<16x64xf32>
    %342 = arith.mulf %341, %341 : vector<16x64xf32>
    %cst_95 = arith.constant dense<0.000000e+00> : vector<64xf32>
    %343 = vector.multi_reduction <add>, %342, %cst_95 [0] : vector<16x64xf32> to vector<64xf32>
    %344 = vector.shape_cast %343 : vector<64xf32> to vector<1x64xf32>
    %345 = vector.extract_strided_slice %344 {offsets = [0, 0], sizes = [1, 4], strides = [1, 1]} : vector<1x64xf32> to vector<1x4xf32>
    %346 = vector.extract_strided_slice %344 {offsets = [0, 4], sizes = [1, 4], strides = [1, 1]} : vector<1x64xf32> to vector<1x4xf32>
    %347 = arith.addf %345, %346 : vector<1x4xf32>
    %348 = vector.extract_strided_slice %344 {offsets = [0, 8], sizes = [1, 4], strides = [1, 1]} : vector<1x64xf32> to vector<1x4xf32>
    %349 = arith.addf %347, %348 : vector<1x4xf32>
    %350 = vector.extract_strided_slice %344 {offsets = [0, 12], sizes = [1, 4], strides = [1, 1]} : vector<1x64xf32> to vector<1x4xf32>
    %351 = arith.addf %349, %350 : vector<1x4xf32>
    %352 = vector.extract_strided_slice %344 {offsets = [0, 16], sizes = [1, 4], strides = [1, 1]} : vector<1x64xf32> to vector<1x4xf32>
    %353 = arith.addf %351, %352 : vector<1x4xf32>
    %354 = vector.extract_strided_slice %344 {offsets = [0, 20], sizes = [1, 4], strides = [1, 1]} : vector<1x64xf32> to vector<1x4xf32>
    %355 = arith.addf %353, %354 : vector<1x4xf32>
    %356 = vector.extract_strided_slice %344 {offsets = [0, 24], sizes = [1, 4], strides = [1, 1]} : vector<1x64xf32> to vector<1x4xf32>
    %357 = arith.addf %355, %356 : vector<1x4xf32>
    %358 = vector.extract_strided_slice %344 {offsets = [0, 28], sizes = [1, 4], strides = [1, 1]} : vector<1x64xf32> to vector<1x4xf32>
    %359 = arith.addf %357, %358 : vector<1x4xf32>
    %360 = vector.extract_strided_slice %344 {offsets = [0, 32], sizes = [1, 4], strides = [1, 1]} : vector<1x64xf32> to vector<1x4xf32>
    %361 = arith.addf %359, %360 : vector<1x4xf32>
    %362 = vector.extract_strided_slice %344 {offsets = [0, 36], sizes = [1, 4], strides = [1, 1]} : vector<1x64xf32> to vector<1x4xf32>
    %363 = arith.addf %361, %362 : vector<1x4xf32>
    %364 = vector.extract_strided_slice %344 {offsets = [0, 40], sizes = [1, 4], strides = [1, 1]} : vector<1x64xf32> to vector<1x4xf32>
    %365 = arith.addf %363, %364 : vector<1x4xf32>
    %366 = vector.extract_strided_slice %344 {offsets = [0, 44], sizes = [1, 4], strides = [1, 1]} : vector<1x64xf32> to vector<1x4xf32>
    %367 = arith.addf %365, %366 : vector<1x4xf32>
    %368 = vector.extract_strided_slice %344 {offsets = [0, 48], sizes = [1, 4], strides = [1, 1]} : vector<1x64xf32> to vector<1x4xf32>
    %369 = arith.addf %367, %368 : vector<1x4xf32>
    %370 = vector.extract_strided_slice %344 {offsets = [0, 52], sizes = [1, 4], strides = [1, 1]} : vector<1x64xf32> to vector<1x4xf32>
    %371 = arith.addf %369, %370 : vector<1x4xf32>
    %372 = vector.extract_strided_slice %344 {offsets = [0, 56], sizes = [1, 4], strides = [1, 1]} : vector<1x64xf32> to vector<1x4xf32>
    %373 = arith.addf %371, %372 : vector<1x4xf32>
    %374 = vector.extract_strided_slice %344 {offsets = [0, 60], sizes = [1, 4], strides = [1, 1]} : vector<1x64xf32> to vector<1x4xf32>
    %375 = arith.addf %373, %374 : vector<1x4xf32>
    %cst_96 = arith.constant 3.906250e-03 : f32
    %376 = vector.broadcast %cst_96 : f32 to vector<1x4xf32>
    %377 = arith.mulf %375, %376 : vector<1x4xf32>
    %c0_97 = arith.constant 0 : index
    %c0_98 = arith.constant 0 : index
    %378 = vector.load %arg22[%c0_97, %c0_98] : memref<1x4xf32, #tpu.memory_space<vmem>>, vector<1x4xf32>
    %cst_99 = arith.constant 9.99999974E-6 : f32
    %379 = vector.broadcast %cst_99 : f32 to vector<1x4xf32>
    %380 = arith.addf %377, %379 : vector<1x4xf32>
    %381 = math.rsqrt %380 : vector<1x4xf32>
    %382 = arith.mulf %378, %381 : vector<1x4xf32>
    %383 = tpu.concatenate %382, %382, %382, %382, %382, %382, %382, %382, %382, %382, %382, %382, %382, %382, %382, %382 in 1 : vector<1x4xf32>, vector<1x4xf32>, vector<1x4xf32>, vector<1x4xf32>, vector<1x4xf32>, vector<1x4xf32>, vector<1x4xf32>, vector<1x4xf32>, vector<1x4xf32>, vector<1x4xf32>, vector<1x4xf32>, vector<1x4xf32>, vector<1x4xf32>, vector<1x4xf32>, vector<1x4xf32>, vector<1x4xf32> -> vector<1x64xf32>
    %c0_100 = arith.constant 0 : index
    %c0_101 = arith.constant 0 : index
    %384 = vector.load %arg23[%c0_100, %c0_101] : memref<1x4xf32, #tpu.memory_space<vmem>>, vector<1x4xf32>
    %385 = tpu.concatenate %384, %384, %384, %384, %384, %384, %384, %384, %384, %384, %384, %384, %384, %384, %384, %384 in 1 : vector<1x4xf32>, vector<1x4xf32>, vector<1x4xf32>, vector<1x4xf32>, vector<1x4xf32>, vector<1x4xf32>, vector<1x4xf32>, vector<1x4xf32>, vector<1x4xf32>, vector<1x4xf32>, vector<1x4xf32>, vector<1x4xf32>, vector<1x4xf32>, vector<1x4xf32>, vector<1x4xf32>, vector<1x4xf32> -> vector<1x64xf32>
    %386 = vector.broadcast %383 : vector<1x64xf32> to vector<16x64xf32>
    %387 = arith.mulf %341, %386 : vector<16x64xf32>
    %388 = vector.broadcast %385 : vector<1x64xf32> to vector<16x64xf32>
    %389 = arith.addf %387, %388 : vector<16x64xf32>
    %390 = arith.addf %389, %184 : vector<16x64xf32>
    %c0_102 = arith.constant 0 : index
    %c0_103 = arith.constant 0 : index
    %391 = vector.load %arg24[%c0_102, %c0_103] : memref<16x64xf32, #tpu.memory_space<vmem>>, vector<16x64xf32>
    tpu.vector_store %arg24[%c0_102, %c0_103], %390 {strides = array<i32>} : memref<16x64xf32, #tpu.memory_space<vmem>>, vector<16x64xf32>,
    return
  }
}

</mosaic_0001>

<bundles_post_ra>
// kernel: _lambda_.1
= control target key start
LH: loop header
LB: loop body
LE: loop exit
PB: predicated region body
PF: predicated region fallthrough
CT: control target
= control target key end

     0   :  { %v15563_v3 = vmov 0   ;;  %s15579_s28 = smov 64   ;;  %vm192_vm0 = vcmask 261120   ;;  %s15580_s26 = smov 32   ;;  %vm15596_vm1 = vcmask 523264   ;;  %v635_v57 = vlaneseq  ;;  %s15532_s0 = inlined_call_operand.vmem [shape: f32[16,1280], index: 0, kind: input, shape index: {}]   ;;  %s15533_s4 = inlined_call_operand.vmem [shape: bf16[160,64], index: 4, kind: input, shape index: {}]   ;;  %s15534_s2 = inlined_call_operand.vmem [shape: f32[16,1], index: 2, kind: input, shape index: {}]   ;;  %s15535_s3 = inlined_call_operand.vmem [shape: f32[16,1], index: 3, kind: input, shape index: {}]   ;;  %s15536_s6 = inlined_call_operand.vmem [shape: bf16[3840,256], index: 6, kind: input, shape index: {}]   ;;  %s15537_s7 = inlined_call_operand.vmem [shape: f32[1,256], index: 7, kind: input, shape index: {}]   ;;  %s15538_s9 = inlined_call_operand.vmem [shape: f32[1,32], index: 9, kind: input, shape index: {}]   ;;  %s15539_s10 = inlined_call_operand.vmem [shape: bf16[768,512], index: 10, kind: input, shape index: {}]   ;;  %s15540_s8 = inlined_call_operand.vmem [shape: f32[1,32], index: 8, kind: input, shape index: {}]   ;;  %s15541_s11 = inlined_call_operand.vmem [shape: f32[1,512], index: 11, kind: input, shape index: {}, may-alias: {5,11}]   ;;  %s15542_s13 = inlined_call_operand.vmem [shape: f32[1,64], index: 13, kind: input, shape index: {}]   ;;  %s15543_s14 = inlined_call_operand.vmem [shape: bf16[560,64], index: 14, kind: input, shape index: {}]   ;;  %s15544_s12 = inlined_call_operand.vmem [shape: f32[1,64], index: 12, kind: input, shape index: {}]   ;;  %s15545_s16 = inlined_call_operand.vmem [shape: bf16[1680,32], index: 16, kind: input, shape index: {}]   ;;  %s15546_s1 = inlined_call_operand.vmem [shape: f32[16,48], index: 1, kind: input, shape index: {}]   ;;  %s15547_s5 = inlined_call_operand.vmem [shape: f32[1,512], index: 5, kind: input, shape index: {}, may-alias: {5,11}]   ;;  %s15548_s15 = inlined_call_operand.vmem [shape: f32[1,64], index: 15, kind: input, shape index: {}, may-alias: {15,21}]   ;;  %s15549_s17 = inlined_call_operand.vmem [shape: f32[1,32], index: 17, kind: input, shape index: {}]   ;;  %s15550_s19 = inlined_call_operand.vmem [shape: f32[1,2], index: 19, kind: input, shape index: {}]   ;;  %s15551_s18 = inlined_call_operand.vmem [shape: f32[1,2], index: 18, kind: input, shape index: {}]   ;;  %s15552_s20 = inlined_call_operand.vmem [shape: bf16[96,64], index: 20, kind: input, shape index: {}]   ;;  %s15553_s21 = inlined_call_operand.vmem [shape: f32[1,64], index: 21, kind: input, shape index: {}, may-alias: {15,21}]   ;;  %s15554_s23 = inlined_call_operand.vmem [shape: f32[1,4], index: 23, kind: input, shape index: {}]   ;;  %s15555_s22 = inlined_call_operand.vmem [shape: f32[1,4], index: 22, kind: input, shape index: {}]   ;;  %s15556_s24 = inlined_call_operand.vmem [shape: f32[16,64], index: 24, kind: output, shape index: {}]  }
   0x1   :  { %15603 = sst [smem:[#allocation12_spill]] %s15532_s0  ;;  %9944 = vset.pattern.permute.xlu1 %v15563_v3  ;;  %9943 = vset.pattern.permute.xlu0 %v15563_v3  ;;  %vm15595_vm3 = vcmask 785408   ;;  %vm11135_vm5 = vmmov 0   ;;  %vm15594_vm6 = vcmask 392192   ;;  %vm7591_vm7 = vcmask 130048   ;;  %s11138_s29 = smov 120  }
   0x2   :  { %15604 = sst [smem:[#allocation13_spill]] %s15533_s4  ;;  %s15612_s27 = sld [smem:[#allocation12_spill]]  ;;  %196 = vmatprep.subr.bf16.mxu0 %v15563_v3  ;;  %249 = vmatprep.subr.bf16.mxu1 %v15563_v3  ;;  %vm7999_vm8 = vcmask 15360   ;;  %vm8001_vm9 = vcmask 31744   ;;  %vm8003_vm10 = vcmask 48128   ;;  %vm8005_vm11 = vcmask 64512  }
   0x3   :  { %15605 = sst [smem:[#allocation14_spill]] %s15534_s2  ;;  %s11140_s25 = smov 116   ;;  %vm8007_vm12 = vcmask 80896   ;;  %vm8009_vm13 = vcmask 97280   ;;  %vm8011_vm14 = vcmask 113664   ;;  %vm8014_vm15 = vcmask 146432  }
   0x4   :  { %15606 = sst [smem:[#allocation15_spill]] %s15535_s3  ;;  %s15617_s3 = sld [smem:[#allocation13_spill]] }
   0x5   :  { %15607 = sst [smem:[#allocation16_spill]] %s15536_s6  ;;  %s15620_s30 = sld [smem:[#allocation15_spill]] }
   0x6   :  { %15608 = sst [smem:[#allocation17_spill]] %s15537_s7  ;;  %s15619_s7 = sld [smem:[#allocation14_spill]] }
   0x7   :  { %15609 = sst [smem:[#allocation18_spill]] %s15538_s9  ;;  %s15647_s9 = sld [smem:[#allocation16_spill]] }
   0x8   :  { %15610 = sst [smem:[#allocation19_spill]] %s15539_s10  ;;  %v11307_v0 = vld [vmem:[%s15612_s27 + $0x38] sm:$0xff]  ;;  %v11312_v1 = vld [vmem:[%s15612_s27 + $0x88] sm:$0xff]  ;;  %v11317_v2 = vld [vmem:[%s15612_s27 + $0x10] sm:$0xff]  ;;  %s15577_s10 = smov 96  }
   0x9   :  { %15611 = sst [smem:[#allocation20_spill]] %s15540_s8  ;;  %v11323_v4 = vpack.c.bf16 %v11312_v1, %v11307_v0  ;;  %v11328_v5 = vld [vmem:[%s15612_s27 + $0x60] sm:$0xff]  ;;  %v11338_v7 = vld [vmem:[%s15612_s27 + $0x90] sm:$0xff]  ;;  %v11349_v9 = vld [vmem:[%s15612_s27 + $0x18] sm:$0xff]  ;;  %v670_v45 = vrot.slane %v11307_v0, 7  ;;  %v680_v46 = vrot.slane %v11312_v1, 7 }
   0xa   :  { %v11333_v6 = vld [vmem:[%s15612_s27 + $0x40] sm:$0xff]  ;;  %v11344_v8 = vpack.c.bf16 %v11328_v5, %v11317_v2  ;;  %v11354_v10 = vld [vmem:[%s15612_s27 + $0x68] sm:$0xff]  ;;  %v11376_v14 = vld [vmem:[%s15612_s27 + $0x58] sm:$0xff]  ;;  %v681_v54 = vrot.slane %v11338_v7, 7  ;;  %v666_v55 = vrot.slane %v11349_v9, 7  ;;  %s15677_s2 = sld [smem:[#allocation18_spill]] }
   0xb   :  { %15613 = vst [vmem:[#allocation2_spill] sm:$0xff] %v11323_v4  ;;  %491 = vrot.lane.b32.xlu1 %v11323_v4, %s15579_s28  ;;  %v11360_v11 = vpack.c.bf16 %v11338_v7, %v11333_v6  ;;  %v11366_v12 = vpack.c.bf16 %v11354_v10, %v11349_v9  ;;  %v11371_v13 = vld [vmem:[%s15612_s27 + $0x8] sm:$0xff]  ;;  %v11381_v15 = vld [vmem:[%s15617_s3] sm:$0xff]   ;;  %v11412_v20 = vld [vmem:[%s15617_s3 + $0x10] sm:$0xff]   ;;  %v671_v53 = vrot.slane %v11333_v6, 7  ;;  %v676_v56 = vrot.slane %v11354_v10, 7 }
   0xc   :  { %15614 = vst [vmem:[#allocation3_spill] sm:$0xff] %v11344_v8  ;;  %291 = vrot.lane.b32.xlu0 %v11344_v8, %s15579_s28  ;;  %v11385_v16 = vpack.c.bf16 %v11376_v14, %v11371_v13  ;;  %197 = vmatpush1.bf16.msra.mxu0 %v11381_v15  ;;  %v11391_v17 = vld [vmem:[%s15617_s3 + $0x8] sm:$0xff]   ;;  %v78_v19 = vld [vmem:[%s15619_s7] sm:$0xff]  ;;  %v11427_v23 = vld [vmem:[%s15617_s3 + $0x18] sm:$0xff]   ;;  %v664_v59 = vrot.slane %v11371_v13, 7  ;;  %v674_v60 = vrot.slane %v11376_v14, 7 }
   0xd   :  { %15615 = vst [vmem:[#allocation4_spill] sm:$0xff] %v11360_v11  ;;  %15616 = vst [vmem:[#allocation5_spill] sm:$0xff] %v11366_v12  ;;  %250 = vmatpush1.bf16.msra.mxu1 %v11381_v15  ;;  %v79_v18 = vld [vmem:[%s15619_s7 + $0x8] sm:$0xff]  ;;  %198 = vmatprep.subr.bf16.mxu0 %v15563_v3  ;;  %v80_v21 = vld [vmem:[%s15620_s30] sm:$0xff]  ;;  %s15678_s0 = sld [smem:[#allocation19_spill]]  ;;  %s15679_s4 = sld [smem:[#allocation20_spill]] }
   0xe   :  { %15618 = vst [vmem:[#allocation6_spill] sm:$0xff] %v11385_v16  ;;  %8764 = vmatprep.mubr.msk.bf16.mxu0 %vm192_vm0, %v11385_v16  ;;  %251 = vmatprep.subr.bf16.mxu1 %v15563_v3  ;;  %v81_v22 = vld [vmem:[%s15620_s30 + $0x8] sm:$0xff]  ;;  %v11435_v24 = vld [vmem:[%s15612_s27 + $0x20] sm:$0xff]  ;;  %v11440_v25 = vld [vmem:[%s15612_s27 + $0x70] sm:$0xff]  ;;  %s11139_s30 = smov 122   ;;  %s11147_s8 = smov 106  }
   0xf   :  { %493 = vrot.lane.b32.xlu1 %v11360_v11, %s15579_s28  ;;  %v11446_v26 = vld [vmem:[%s15617_s3 + $0x20] sm:$0xff]   ;;  %v11456_v27 = vpack.c.bf16 %v11440_v25, %v11435_v24  ;;  %v11461_v28 = vld [vmem:[%s15612_s27 + $0x30] sm:$0xff]  ;;  %v11473_v30 = vld [vmem:[%s15617_s3 + $0x28] sm:$0xff]   ;;  %v667_v61 = vrot.slane %v11435_v24, 7  ;;  %v677_v62 = vrot.slane %v11440_v25, 7  ;;  %s11148_s6 = smov 100  }
  0x10   :  { %293 = vrot.lane.b32.xlu0 %v11366_v12, %s15579_s28  ;;  %199 = vmatpush1.bf16.msra.mxu0 %v11391_v17  ;;  %v11466_v29 = vld [vmem:[%s15612_s27 + $0x80] sm:$0xff]  ;;  %v11489_v32 = vld [vmem:[%s15612_s27 + $0x48] sm:$0xff]  ;;  %v11494_v33 = vld [vmem:[%s15612_s27 + $0x98] sm:$0xff]  ;;  %s11152_s7 = smov 2  }
  0x11   :  { %252 = vmatpush1.bf16.msra.mxu1 %v11391_v17  ;;  %200 = vmatprep.subr.bf16.mxu0 %v15563_v3  ;;  %15621 = vst [vmem:[#allocation7_spill] sm:$0xff] %v11456_v27  ;;  %v11481_v31 = vpack.c.bf16 %v11466_v29, %v11461_v28  ;;  %v11500_v34 = vld [vmem:[%s15617_s3 + $0x30] sm:$0xff]   ;;  %v11511_v35 = vpack.c.bf16 %v11494_v33, %v11489_v32  ;;  %v11517_v36 = vld [vmem:[%s15617_s3 + $0x38] sm:$0xff]   ;;  %v11530_v37 = vld [vmem:[%s15617_s3 + $0x40] sm:$0xff]  }
  0x12   :  { %253 = vmatprep.subr.bf16.mxu1 %v15563_v3  ;;  %v11539_v38 = vld [vmem:[%s15617_s3 + $0x48] sm:$0xff]   ;;  %v11544_v39 = vld [vmem:[%s15612_s27] sm:$0xff]  ;;  %v11549_v40 = vld [vmem:[%s15612_s27 + $0x50] sm:$0xff] }
  0x13   :  { %713 = vperm.xlu1 %9944, %v79_v18   ;;  %15622 = vst [vmem:[#allocation8_spill] sm:$0xff] %v11481_v31  ;;  %15623 = vst [vmem:[#allocation9_spill] sm:$0xff] %v11511_v35  ;;  %v11556_v41 = vpack.c.bf16 %v11549_v40, %v11544_v39  ;;  %v663_v63 = vrot.slane %v11544_v39, 7  ;;  %v11610_v18 = vshrl.u32 %v635_v57, 7 }
  0x14   :  { %708 = vperm.xlu0 %9943, %v78_v19   ;;  %201 = vmatpush1.bf16.msra.mxu0 %v11412_v20  ;;  %v673_v19 = vrot.slane %v11549_v40, 7 }
  0x15   :  { %254 = vmatpush1.bf16.msra.mxu1 %v11412_v20  ;;  %202 = vmatprep.subr.bf16.mxu0 %v15563_v3  ;;  %15624 = vst [vmem:[#allocation10_spill] sm:$0xff] %v11556_v41  ;;  %vm15597_vm2 = vcmp.lt.s32.totalorder %v11610_v18, 1  ;;  %vm15598_vm4 = vcmp.lt.s32.totalorder %v11610_v18, 7 }
  0x16   :  { %255 = vmatprep.subr.bf16.mxu1 %v15563_v3  ;;  %v690_v58 = vsel %vm15597_vm2, %v667_v61, %v677_v62  ;;  %v700_v49 = vsel %vm15597_vm2, %v677_v62, %v667_v61  ;;  %v693_v50 = vsel %vm15597_vm2, %v670_v45, %v680_v46  ;;  %v703_v48 = vsel %vm15597_vm2, %v680_v46, %v670_v45 }
  0x17   :  { %779 = vperm.xlu1 %9944, %v80_v21   ;;  %v669_v21 = vrot.slane %v11461_v28, 7  ;;  %v687_v57 = vsel %vm15597_vm2, %v664_v59, %v674_v60  ;;  %v697_v52 = vsel %vm15597_vm2, %v674_v60, %v664_v59  ;;  %v686_v61 = vsel %vm15597_vm2, %v663_v63, %v673_v19 }
  0x18   :  { %784 = vperm.xlu0 %9943, %v81_v22   ;;  %203 = vmatpush1.bf16.msra.mxu0 %v11427_v23  ;;  %v679_v22 = vrot.slane %v11466_v29, 7  ;;  %v696_v45 = vsel %vm15597_vm2, %v673_v19, %v663_v63  ;;  %v15625_v62 = vmov 0   ;;  %v704_v63 = vsel %vm15597_vm2, %v681_v54, %v671_v53 }
  0x19   :  { %256 = vmatpush1.bf16.msra.mxu1 %v11427_v23  ;;  %204 = vmatprep.subr.bf16.mxu0 %v15563_v3  ;;  %v736_v19 = vrot.slane %v11544_v39, 1 }
  0x1a   :  { %257 = vmatprep.subr.bf16.mxu1 %v15563_v3  ;;  %v692_v51 = vsel %vm15597_vm2, %v669_v21, %v679_v22 }
  0x1b   :  { %239 = vrot.lane.b32.xlu1 %v11385_v16, %s15577_s10 }
  0x1c   :  { %241 = vrot.lane.b32.xlu0 %v11344_v8, %s15577_s10  ;;  %205 = vmatpush1.bf16.msra.mxu0 %v11446_v26 }
  0x1d   :  { %258 = vmatpush1.bf16.msra.mxu1 %v11446_v26  ;;  %206 = vmatprep.subr.bf16.mxu0 %v15563_v3 }
  0x1e   :  { %259 = vmatprep.subr.bf16.mxu1 %v15563_v3 }
  0x1f   :  { %343 = vrot.lane.b32.xlu1 %v11366_v12, %s15580_s26 }
  0x20   :  { %345 = vrot.lane.b32.xlu0 %v11456_v27, %s15580_s26  ;;  %207 = vmatpush1.bf16.msra.mxu0 %v11473_v30 }
  0x21   :  { %260 = vmatpush1.bf16.msra.mxu1 %v11473_v30  ;;  %208 = vmatprep.subr.bf16.mxu0 %v15563_v3 }
  0x22   :  { %261 = vmatprep.subr.bf16.mxu1 %v15563_v3 }
  0x23   :  { %440 = vrot.lane.b32.xlu1 %v11481_v31, %s15577_s10 }
  0x24   :  { %442 = vrot.lane.b32.xlu0 %v11323_v4, %s15577_s10  ;;  %209 = vmatpush1.bf16.msra.mxu0 %v11500_v34 }
  0x25   :  { %262 = vmatpush1.bf16.msra.mxu1 %v11500_v34  ;;  %210 = vmatprep.subr.bf16.mxu0 %v15563_v3 }
  0x26   :  { %263 = vmatprep.subr.bf16.mxu1 %v15563_v3 }
  0x27   :  { %542 = vrot.lane.b32.xlu1 %v11360_v11, %s15580_s26  ;;  %v694_v11 = vsel %vm15597_vm2, %v671_v53, %v681_v54 }
  0x28   :  { %544 = vrot.lane.b32.xlu0 %v11511_v35, %s15580_s26  ;;  %211 = vmatpush1.bf16.msra.mxu0 %v11517_v36 }
  0x29   :  { %264 = vmatpush1.bf16.msra.mxu1 %v11517_v36  ;;  %212 = vmatprep.subr.bf16.mxu0 %v15563_v3 }
  0x2a   :  { %265 = vmatprep.subr.bf16.mxu1 %v15563_v3 }
  0x2c   :  { %213 = vmatpush1.bf16.msra.mxu0 %v11530_v37 }
  0x2d   :  { %266 = vmatpush1.bf16.msra.mxu1 %v11530_v37  ;;  %214 = vmatprep.subr.bf16.mxu0 %v15563_v3 }
  0x2e   :  { %267 = vmatprep.subr.bf16.mxu1 %v15563_v3 }
  0x30   :  { %215 = vmatpush1.bf16.msra.mxu0 %v11539_v38 }
  0x31   :  { %268 = vmatpush1.bf16.msra.mxu1 %v11539_v38  ;;  %301 = vmatprep.subr.bf16.mxu0 %v15563_v3 }
  0x32   :  { %353 = vmatprep.subr.bf16.mxu1 %v15563_v3 }
  0x33   :  { %229 = vmatmul.mubr.bf16.vlgmr.msra.gmra.mrb[0].mxu0 %v11556_v41 }
  0x34   :  { %302 = vmatpush1.bf16.msra.mxu0 %v11381_v15 }
  0x35   :  { %303 = vmatprep.subr.bf16.mxu0 %v15563_v3 }
  0x38   :  { %304 = vmatpush1.bf16.msra.mxu0 %v11391_v17 }
  0x39   :  { %305 = vmatprep.subr.bf16.mxu0 %v15563_v3 }
  0x3c   :  { %306 = vmatpush1.bf16.msra.mxu0 %v11412_v20 }
  0x3d   :  { %307 = vmatprep.subr.bf16.mxu0 %v15563_v3 }
  0x40   :  { %308 = vmatpush1.bf16.msra.mxu0 %v11427_v23 }
  0x41   :  { %309 = vmatprep.subr.bf16.mxu0 %v15563_v3 }
  0x44   :  { %310 = vmatpush1.bf16.msra.mxu0 %v11446_v26 }
  0x45   :  { %311 = vmatprep.subr.bf16.mxu0 %v15563_v3 }
  0x48   :  { %312 = vmatpush1.bf16.msra.mxu0 %v11473_v30 }
  0x49   :  { %313 = vmatprep.subr.bf16.mxu0 %v15563_v3 }
  0x4c   :  { %314 = vmatpush1.bf16.msra.mxu0 %v11500_v34 }
  0x4d   :  { %315 = vmatprep.subr.bf16.mxu0 %v15563_v3 }
  0x50   :  { %316 = vmatpush1.bf16.msra.mxu0 %v11517_v36 }
  0x51   :  { %317 = vmatprep.subr.bf16.mxu0 %v15563_v3 }
  0x54   :  { %318 = vmatpush1.bf16.msra.mxu0 %v11530_v37 }
  0x55   :  { %319 = vmatprep.subr.bf16.mxu0 %v15563_v3 }
  0x58   :  { %320 = vmatpush1.bf16.msra.mxu0 %v11539_v38 }
  0x59   :  { %397 = vmatprep.subr.bf16.mxu0 %v15563_v3 }
  0x7d   :  { %v11591_v47 = vpop.permute.xlu1 %491 }
  0x7e   :  { %v292_v42 = vpop.permute.xlu0 %291 }
  0x82   :  { %v294_v43 = vpop.permute.xlu0 %293 }
  0x83   :  { %8766 = vmatprep.mubr.msk.bf16.mxu0 %vm192_vm0, %v294_v43  ;;  %v296_v44 = vsel %vm15596_vm1, %v292_v42, %v294_v43  ;;  %v11615_v42 = vpop.permute.xlu1 %493  ;;  %v672_v43 = vrot.slane %v11489_v32, 7 }
  0x84   :  { %334 = vmatmul.mubr.bf16.vlgmr.msra.gmra.mrb[4].mxu0 %v296_v44  ;;  %v682_v44 = vrot.slane %v11494_v33, 7 }
  0x85   :  { %398 = vmatpush1.bf16.msra.mxu0 %v11381_v15  ;;  %8768 = vmatprep.mubr.msk.bf16.mxu0 %vm192_vm0, %v11481_v31 }
  0x86   :  { %399 = vmatprep.subr.bf16.mxu0 %v15563_v3  ;;  %v695_v46 = vsel %vm15597_vm2, %v672_v43, %v682_v44  ;;  %v705_v59 = vsel %vm15597_vm2, %v682_v44, %v672_v43 }
  0x89   :  { %400 = vmatpush1.bf16.msra.mxu0 %v11391_v17 }
  0x8a   :  { %401 = vmatprep.subr.bf16.mxu0 %v15563_v3 }
  0x8d   :  { %402 = vmatpush1.bf16.msra.mxu0 %v11412_v20 }
  0x8e   :  { %403 = vmatprep.subr.bf16.mxu0 %v15563_v3  ;;  %v702_v3 = vsel %vm15597_vm2, %v679_v22, %v669_v21  ;;  %v689_v21 = vsel %vm15597_vm2, %v666_v55, %v676_v56  ;;  %v699_v22 = vsel %vm15597_vm2, %v676_v56, %v666_v55  ;;  %v746_v55 = vrot.slane %v11549_v40, 1 }
  0x91   :  { %404 = vmatpush1.bf16.msra.mxu0 %v11427_v23 }
  0x92   :  { %v11651_v60 = vpop.permute.xlu1 %713  ;;  %405 = vmatprep.subr.bf16.mxu0 %v15625_v62 }
  0x93   :  { %v11663_v35 = vpop.permute.xlu0 %708  ;;  %v11666_v43 = vmul.f32 %v11651_v60, %v690_v58  ;;  %v11669_v44 = vmul.f32 %v11651_v60, %v693_v50  ;;  %v11672_v31 = vmul.f32 %v11651_v60, %v687_v57  ;;  %v11689_v50 = vmul.f32 %v11651_v60, %v692_v51 }
  0x94   :  { %v11676_v56 = vmul.f32 %v11663_v35, %v700_v49  ;;  %v11679_v53 = vmul.f32 %v11663_v35, %v703_v48  ;;  %v11682_v39 = vmul.f32 %v11663_v35, %v697_v52  ;;  %v11686_v54 = vmul.f32 %v11663_v35, %v702_v3 }
  0x95   :  { %406 = vmatpush1.bf16.msra.mxu0 %v11446_v26  ;;  %v11692_v58 = vmul.f32 %v11663_v35, %v696_v45  ;;  %v11695_v40 = vmul.f32 %v11651_v60, %v686_v61  ;;  %v11713_v45 = vmul.f32 %v11663_v35, %v705_v59  ;;  %v11716_v4 = vmul.f32 %v11651_v60, %v695_v46 }
  0x96   :  { %v11697_v49 = vpop.permute.xlu1 %779  ;;  %407 = vmatprep.subr.bf16.mxu0 %v15625_v62  ;;  %v11719_v48 = vmul.f32 %v11663_v35, %v699_v22  ;;  %v11722_v3 = vmul.f32 %v11651_v60, %v689_v21  ;;  %v11725_v51 = vmul.f32 %v11663_v35, %v704_v63  ;;  %v11728_v57 = vmul.f32 %v11651_v60, %v694_v11 }
  0x97   :  { %v11706_v52 = vpop.permute.xlu0 %784  ;;  %v15627_v46 = vrot.slane %v11328_v5, 7  ;;  %v15628_v61 = vrot.slane %v11317_v2, 7 }
  0x98   :  { %15626 = vst [vmem:[#allocation11_spill] sm:$0xff] %v11725_v51 }
  0x99   :  { %408 = vmatpush1.bf16.msra.mxu0 %v11473_v30  ;;  %v688_v22 = vsel %vm15597_vm2, %v15628_v61, %v15627_v46  ;;  %v15629_v21 = vmov %v15628_v61  ;;  %v15630_v63 = vmov %v15627_v46 }
  0x9a   :  { %v698_v11 = vsel %vm15597_vm2, %v15630_v63, %v15629_v21  ;;  %v240_v27 = vpop.permute.xlu1 %239  ;;  %409 = vmatprep.subr.bf16.mxu0 %v15625_v62  ;;  %v11755_v46 = vmul.f32 %v11651_v60, %v688_v22  ;;  %v15631_v21 = vrot.slane %v11376_v14, 1  ;;  %v15632_v63 = vrot.slane %v11371_v13, 1 }
  0x9b   :  { %v11752_v61 = vmul.f32 %v11663_v35, %v698_v11  ;;  %v242_v12 = vpop.permute.xlu0 %241  ;;  %v757_v11 = vsel %vm15598_vm4, %v736_v19, %v746_v55  ;;  %v767_v22 = vsel %vm15598_vm4, %v746_v55, %v736_v19 }
  0x9c   :  { %v758_v41 = vsel %vm15598_vm4, %v15632_v63, %v15631_v21  ;;  %v15633_v16 = vmov %v15632_v63  ;;  %v15634_v59 = vmov %v15631_v21  ;;  %8765 = vmatprep.mubr.msk.bf16.mxu1 %vm192_vm0, %v242_v12  ;;  %v244_v51 = vsel %vm15595_vm3, %v240_v27, %v242_v12  ;;  %v9963_v21 = vld [vmem:[%s15647_s9 + $0x224] ss:$8 sps:$4 sm:$0xff]  }
  0x9d   :  { %v768_v8 = vsel %vm15598_vm4, %v15634_v59, %v15633_v16  ;;  %v11778_v13 = vmul.f32 %v11697_v49, %v758_v41  ;;  %v750_v16 = vrot.slane %v11440_v25, 1  ;;  %410 = vmatpush1.bf16.msra.mxu0 %v11500_v34  ;;  %282 = vmatmul.mubr.bf16.vlgmr.msra.gmra.mrb[0].mxu1 %v244_v51  ;;  %v11786_v19 = vmul.f32 %v11697_v49, %v757_v11 }
  0x9e   :  { %v11781_v14 = vmul.f32 %v11706_v52, %v768_v8  ;;  %v11789_v55 = vmul.f32 %v11706_v52, %v767_v22  ;;  %v15635_v12 = vrot.slane %v11354_v10, 1  ;;  %v15636_v27 = vrot.slane %v11349_v9, 1  ;;  %354 = vmatpush1.bf16.msra.mxu1 %v11381_v15  ;;  %411 = vmatprep.subr.bf16.mxu0 %v15625_v62 }
  0x9f   :  { %v753_v8 = vrot.slane %v11312_v1, 1  ;;  %355 = vmatprep.subr.bf16.mxu1 %v15625_v62  ;;  %v11812_v1 = vpop.permute.xlu0 %345  ;;  %v15639_v9 = vrot.slane %v11328_v5, 1  ;;  %v15640_v10 = vrot.slane %v11317_v2, 1  ;;  %v752_v15 = vrot.slane %v11466_v29, 1 }
  0xa0   :  { %v760_v41 = vsel %vm15598_vm4, %v15636_v27, %v15635_v12  ;;  %v15637_v51 = vmov %v15636_v27  ;;  %v15638_v59 = vmov %v15635_v12  ;;  %8767 = vmatprep.mubr.msk.bf16.mxu1 %vm192_vm0, %v11812_v1  ;;  %v745_v2 = vrot.slane %v11489_v32, 1 }
  0xa1   :  { %v770_v63 = vsel %vm15598_vm4, %v15638_v59, %v15637_v51  ;;  %v11809_v11 = vmul.f32 %v11697_v49, %v760_v41  ;;  %v759_v12 = vsel %vm15598_vm4, %v15640_v10, %v15639_v9  ;;  %v15641_v27 = vmov %v15640_v10  ;;  %412 = vmatpush1.bf16.msra.mxu0 %v11517_v36 }
  0xa2   :  { %v11817_v22 = vmul.f32 %v11706_v52, %v770_v63  ;;  %v15642_v41 = vmov %v15639_v9  ;;  %v742_v59 = vrot.slane %v11461_v28, 1  ;;  %v11836_v63 = vmul.f32 %v11697_v49, %v759_v12  ;;  %356 = vmatpush1.bf16.msra.mxu1 %v11391_v17  ;;  %413 = vmatprep.subr.bf16.mxu0 %v15625_v62  ;;  %v9958_v28 = vld [vmem:[%s15647_s9 + $0x210] ss:$8 sps:$4 sm:$0xff]  }
  0xa3   :  { %v769_v51 = vsel %vm15598_vm4, %v15642_v41, %v15641_v27  ;;  %v755_v5 = vrot.slane %v11494_v33, 1  ;;  %v15643_v29 = vrot.slane %v11435_v24, 1  ;;  %v744_v10 = vrot.slane %v11333_v6, 1  ;;  %357 = vmatprep.subr.bf16.mxu1 %v15625_v62  ;;  %v11864_v6 = vld [vmem:[%s15612_s27 + $0x28] sm:$0xff] }
  0xa4   :  { %v11839_v25 = vmul.f32 %v11706_v52, %v769_v51  ;;  %v754_v12 = vrot.slane %v11338_v7, 1  ;;  %v11869_v7 = vld [vmem:[%s15612_s27 + $0x78] sm:$0xff] }
  0xa5   :  { %v761_v9 = vsel %vm15598_vm4, %v15643_v29, %v750_v16  ;;  %v15644_v33 = vmov %v15643_v29  ;;  %414 = vmatpush1.bf16.msra.mxu0 %v11530_v37 }
  0xa6   :  { %v771_v27 = vsel %vm15598_vm4, %v750_v16, %v15644_v33  ;;  %v11872_v17 = vmul.f32 %v11697_v49, %v761_v9  ;;  %v15645_v16 = vrot.slane %v11307_v0, 1  ;;  %v773_v0 = vsel %vm15598_vm4, %v752_v15, %v742_v59  ;;  %358 = vmatpush1.bf16.msra.mxu1 %v11412_v20  ;;  %415 = vmatprep.subr.bf16.mxu0 %v15625_v62 }
  0xa7   :  { %v11875_v24 = vmul.f32 %v11706_v52, %v771_v27  ;;  %v763_v27 = vsel %vm15598_vm4, %v742_v59, %v752_v15  ;;  %359 = vmatprep.subr.bf16.mxu1 %v15625_v62  ;;  %v776_v15 = vsel %vm15598_vm4, %v755_v5, %v745_v2  ;;  %v765_v20 = vsel %vm15598_vm4, %v744_v10, %v754_v12 }
  0xa8   :  { %v764_v41 = vsel %vm15598_vm4, %v15645_v16, %v753_v8  ;;  %v15646_v51 = vmov %v15645_v16  ;;  %v11927_v16 = vmul.f32 %v11706_v52, %v776_v15  ;;  %v344_v15 = vpop.permute.xlu1 %343  ;;  %v495_v9 = vsel %vm15596_vm1, %v11591_v47, %v11615_v42  ;;  %v9961_v47 = vld [vmem:[%s15647_s9 + $0x220] ss:$8 sps:$4 sm:$0xff]  }
  0xa9   :  { %v774_v29 = vsel %vm15598_vm4, %v753_v8, %v15646_v51  ;;  %v11886_v33 = vmul.f32 %v11697_v49, %v764_v41  ;;  %v766_v8 = vsel %vm15598_vm4, %v745_v2, %v755_v5  ;;  %v11905_v41 = vmul.f32 %v11697_v49, %v763_v27  ;;  %416 = vmatpush1.bf16.msra.mxu0 %v11539_v38 }
  0xaa   :  { %v11889_v32 = vmul.f32 %v11706_v52, %v774_v29  ;;  %v11908_v51 = vmul.f32 %v11706_v52, %v773_v0  ;;  %v11914_v59 = vmul.f32 %v11697_v49, %v766_v8  ;;  %v775_v29 = vsel %vm15598_vm4, %v754_v12, %v744_v10  ;;  %360 = vmatpush1.bf16.msra.mxu1 %v11427_v23  ;;  %v11947_v8 = vld [vmem:[%s15617_s3] sm:$0xff]   ;;  %v11958_v23 = vld [vmem:[%s15617_s3 + $0x8] sm:$0xff]  }
  0xab   :  { %v11922_v27 = vpack.c.bf16 %v11869_v7, %v11864_v6  ;;  %v11930_v2 = vmul.f32 %v11697_v49, %v765_v20  ;;  %v11934_v5 = vmul.f32 %v11706_v52, %v775_v29  ;;  %500 = vmatprep.subr.bf16.mxu0 %v15625_v62  ;;  %361 = vmatprep.subr.bf16.mxu1 %v15625_v62  ;;  %v12007_v29 = vld [vmem:[%s15617_s3 + $0x30] sm:$0xff]  }
  0xac   :  { %v348_v20 = vsel %vm192_vm0, %v344_v15, %v11812_v1  ;;  %v678_v1 = vrot.slane %v11869_v7, 7  ;;  %v12020_v15 = vld [vmem:[%s15617_s3 + $0x38] sm:$0xff]  }
  0xad   :  { %430 = vmatmul.mubr.bf16.vlgmr.msra.gmra.mrb[8].mxu0 %v11922_v27 }
  0xae   :  { %501 = vmatpush1.bf16.msra.mxu0 %v11947_v8  ;;  %8770 = vmatprep.mubr.msk.bf16.mxu0 %vm192_vm0, %v11615_v42  ;;  %v9966_v42 = vld [vmem:[%s15647_s9 + $0x234] ss:$8 sps:$4 sm:$0xff]  }
  0xaf   :  { %362 = vmatpush1.bf16.msra.mxu1 %v11446_v26  ;;  %502 = vmatprep.subr.bf16.mxu0 %v15625_v62  ;;  %v11967_v26 = vld [vmem:[%s15617_s3 + $0x10] sm:$0xff]  }
  0xb0   :  { %363 = vmatprep.subr.bf16.mxu1 %v15625_v62 }
  0xb2   :  { %503 = vmatpush1.bf16.msra.mxu0 %v11958_v23 }
  0xb3   :  { %364 = vmatpush1.bf16.msra.mxu1 %v11473_v30  ;;  %504 = vmatprep.subr.bf16.mxu0 %v15625_v62  ;;  %v11976_v30 = vld [vmem:[%s15617_s3 + $0x18] sm:$0xff]  }
  0xb4   :  { %365 = vmatprep.subr.bf16.mxu1 %v15625_v62 }
  0xb6   :  { %505 = vmatpush1.bf16.msra.mxu0 %v11967_v26 }
  0xb7   :  { %366 = vmatpush1.bf16.msra.mxu1 %v11500_v34  ;;  %506 = vmatprep.subr.bf16.mxu0 %v15625_v62  ;;  %v11985_v34 = vld [vmem:[%s15617_s3 + $0x20] sm:$0xff]  }
  0xb8   :  { %367 = vmatprep.subr.bf16.mxu1 %v15625_v62 }
  0xba   :  { %507 = vmatpush1.bf16.msra.mxu0 %v11976_v30 }
  0xbb   :  { %368 = vmatpush1.bf16.msra.mxu1 %v11517_v36  ;;  %508 = vmatprep.subr.bf16.mxu0 %v15625_v62  ;;  %v11994_v36 = vld [vmem:[%s15617_s3 + $0x28] sm:$0xff]  }
  0xbc   :  { %369 = vmatprep.subr.bf16.mxu1 %v15625_v62 }
  0xbe   :  { %509 = vmatpush1.bf16.msra.mxu0 %v11985_v34 }
  0xbf   :  { %370 = vmatpush1.bf16.msra.mxu1 %v11530_v37  ;;  %510 = vmatprep.subr.bf16.mxu0 %v15625_v62  ;;  %v12002_v37 = vpop.permute.xlu0 %442 }
  0xc0   :  { %371 = vmatprep.subr.bf16.mxu1 %v15625_v62 }
  0xc2   :  { %511 = vmatpush1.bf16.msra.mxu0 %v11994_v36 }
  0xc3   :  { %372 = vmatpush1.bf16.msra.mxu1 %v11539_v38  ;;  %512 = vmatprep.subr.bf16.mxu0 %v15625_v62  ;;  %v668_v38 = vrot.slane %v11864_v6, 7 }
  0xc4   :  { %449 = vmatprep.subr.bf16.mxu1 %v15625_v62 }
  0xc5   :  { %v691_v6 = vsel %vm15597_vm2, %v668_v38, %v678_v1  ;;  %v701_v7 = vsel %vm15597_vm2, %v678_v1, %v668_v38  ;;  %v9957_v38 = vld [vmem:[%s15647_s9 + $0x204] ss:$8 sps:$4 sm:$0xff]   ;;  %v9955_v1 = vld [vmem:[%s15647_s9 + $0x200] ss:$8 sps:$4 sm:$0xff]  }
  0xc6   :  { %513 = vmatpush1.bf16.msra.mxu0 %v12007_v29  ;;  %386 = vmatmul.mubr.bf16.vlgmr.msra.gmra.mrb[4].mxu1 %v348_v20  ;;  %v12033_v20 = vld [vmem:[%s15617_s3 + $0x40] sm:$0xff]   ;;  %v721_v12 = vmul.f32 %v11663_v35, %v701_v7  ;;  %v731_v10 = vmul.f32 %v11651_v60, %v691_v6  ;;  %v9960_v7 = vld [vmem:[%s15647_s9 + $0x214] ss:$8 sps:$4 sm:$0xff]   ;;  %v12053_v6 = vld [vmem:[%s15617_s3 + $0x48] sm:$0xff]   ;;  %s15676_s3 = sld [smem:[#allocation17_spill]] }
  0xc7   :  { %450 = vmatpush1.bf16.msra.mxu1 %v11947_v8  ;;  %514 = vmatprep.subr.bf16.mxu0 %v15625_v62 }
  0xc8   :  { %451 = vmatprep.subr.bf16.mxu1 %v15625_v62  ;;  %8769 = vmatprep.mubr.msk.bf16.mxu1 %vm192_vm0, %v12002_v37  ;;  %v812_v0 = vpack.c.bf16 %v731_v10, %v721_v12  ;;  %v9970_v10 = vld [vmem:[%s15647_s9 + $0x250] ss:$8 sps:$4 sm:$0xff]   ;;  %v9975_v12 = vld [vmem:[%s15647_s9 + $0x264] ss:$8 sps:$4 sm:$0xff]  }
  0xca   :  { %515 = vmatpush1.bf16.msra.mxu0 %v12020_v15 }
  0xcb   :  { %452 = vmatpush1.bf16.msra.mxu1 %v11958_v23  ;;  %516 = vmatprep.subr.bf16.mxu0 %v15625_v62 }
  0xcc   :  { %453 = vmatprep.subr.bf16.mxu1 %v15625_v62 }
  0xce   :  { %517 = vmatpush1.bf16.msra.mxu0 %v12033_v20 }
  0xcf   :  { %454 = vmatpush1.bf16.msra.mxu1 %v11967_v26  ;;  %518 = vmatprep.subr.bf16.mxu0 %v15625_v62 }
  0xd0   :  { %455 = vmatprep.subr.bf16.mxu1 %v15625_v62 }
  0xd2   :  { %519 = vmatpush1.bf16.msra.mxu0 %v12053_v6 }
  0xd3   :  { %456 = vmatpush1.bf16.msra.mxu1 %v11976_v30  ;;  %3805 = vmatprep.subr.bf16.mxu0 %v9957_v38  ;;  %v441_v38 = vpop.permute.xlu1 %440 }
  0xd4   :  { %457 = vmatprep.subr.bf16.mxu1 %v15625_v62 }
  0xd5   :  { %533 = vmatmul.mubr.bf16.vlgmr.msra.gmra.mrb[12].mxu0 %v495_v9  ;;  %v9964_v9 = vld [vmem:[%s15647_s9 + $0x230] ss:$8 sps:$4 sm:$0xff]  }
  0xd6   :  { %3806 = vmatpush1.bf16.msra.mxu0 %v9955_v1  ;;  %3837 = vmatprep.mubr.bf16.mxu0 %v812_v0  ;;  %v9972_v0 = vld [vmem:[%s15647_s9 + $0x254] ss:$8 sps:$4 sm:$0xff]   ;;  %v9973_v1 = vld [vmem:[%s15647_s9 + $0x260] ss:$8 sps:$4 sm:$0xff]  }
  0xd7   :  { %458 = vmatpush1.bf16.msra.mxu1 %v11985_v34  ;;  %3807 = vmatprep.subr.bf16.mxu0 %v9960_v7  ;;  %v444_v7 = vsel %vm15595_vm3, %v441_v38, %v12002_v37  ;;  %v9981_v37 = vld [vmem:[%s15647_s9 + $0x284] ss:$8 sps:$4 sm:$0xff]   ;;  %v9996_v38 = vld [vmem:[%s15647_s9 + $0x2d4] ss:$8 sps:$4 sm:$0xff]  }
  0xd8   :  { %459 = vmatprep.subr.bf16.mxu1 %v15625_v62 }
  0xda   :  { %3808 = vmatpush1.bf16.msra.mxu0 %v9958_v28  ;;  %v9969_v28 = vld [vmem:[%s15647_s9 + $0x244] ss:$8 sps:$4 sm:$0xff]  }
  0xdb   :  { %460 = vmatpush1.bf16.msra.mxu1 %v11994_v36  ;;  %3809 = vmatprep.subr.bf16.mxu0 %v9963_v21  ;;  %v9967_v21 = vld [vmem:[%s15647_s9 + $0x240] ss:$8 sps:$4 sm:$0xff]  }
  0xdc   :  { %461 = vmatprep.subr.bf16.mxu1 %v15625_v62 }
  0xde   :  { %3810 = vmatpush1.bf16.msra.mxu0 %v9961_v47  ;;  %v9978_v47 = vld [vmem:[%s15647_s9 + $0x274] ss:$8 sps:$4 sm:$0xff]  }
  0xdf   :  { %462 = vmatpush1.bf16.msra.mxu1 %v12007_v29  ;;  %3811 = vmatprep.subr.bf16.mxu0 %v9966_v42  ;;  %v9976_v42 = vld [vmem:[%s15647_s9 + $0x270] ss:$8 sps:$4 sm:$0xff]  }
  0xe0   :  { %463 = vmatprep.subr.bf16.mxu1 %v15625_v62 }
  0xe2   :  { %3812 = vmatpush1.bf16.msra.mxu0 %v9964_v9  ;;  %v12114_v9 = vpop.permute.xlu0 %544 }
  0xe3   :  { %464 = vmatpush1.bf16.msra.mxu1 %v12020_v15  ;;  %3813 = vmatprep.subr.bf16.mxu0 %v9969_v28  ;;  %v9979_v28 = vld [vmem:[%s15647_s9 + $0x280] ss:$8 sps:$4 sm:$0xff]  }
  0xe4   :  { %465 = vmatprep.subr.bf16.mxu1 %v15625_v62 }
  0xe6   :  { %3814 = vmatpush1.bf16.msra.mxu0 %v9967_v21  ;;  %v9982_v21 = vld [vmem:[%s15647_s9 + $0x290] ss:$8 sps:$4 sm:$0xff]  }
  0xe7   :  { %466 = vmatpush1.bf16.msra.mxu1 %v12033_v20  ;;  %3815 = vmatprep.subr.bf16.mxu0 %v9972_v0  ;;  %v9987_v0 = vld [vmem:[%s15647_s9 + $0x2a4] ss:$8 sps:$4 sm:$0xff]  }
  0xe8   :  { %467 = vmatprep.subr.bf16.mxu1 %v15625_v62 }
  0xea   :  { %3816 = vmatpush1.bf16.msra.mxu0 %v9970_v10  ;;  %v9990_v10 = vld [vmem:[%s15647_s9 + $0x2b4] ss:$8 sps:$4 sm:$0xff]  }
  0xeb   :  { %468 = vmatpush1.bf16.msra.mxu1 %v12053_v6  ;;  %3817 = vmatprep.subr.bf16.mxu0 %v9975_v12  ;;  %v9993_v12 = vld [vmem:[%s15647_s9 + $0x2c4] ss:$8 sps:$4 sm:$0xff]  }
  0xec   :  { %551 = vmatprep.subr.bf16.mxu1 %v15625_v62 }
  0xee   :  { %3818 = vmatpush1.bf16.msra.mxu0 %v9973_v1  ;;  %482 = vmatmul.mubr.bf16.vlgmr.msra.gmra.mrb[8].mxu1 %v444_v7  ;;  %v9999_v1 = vld [vmem:[%s15647_s9 + $0x2e4] ss:$8 sps:$4 sm:$0xff]  }
  0xef   :  { %552 = vmatpush1.bf16.msra.mxu1 %v11947_v8  ;;  %3819 = vmatprep.subr.bf16.mxu0 %v9978_v47  ;;  %v9984_v8 = vld [vmem:[%s15647_s9 + $0x294] ss:$8 sps:$4 sm:$0xff]  }
  0xf0   :  { %553 = vmatprep.subr.bf16.mxu1 %v15625_v62  ;;  %8771 = vmatprep.mubr.msk.bf16.mxu1 %vm192_vm0, %v12114_v9 }
  0xf2   :  { %3820 = vmatpush1.bf16.msra.mxu0 %v9976_v42 }
  0xf3   :  { %554 = vmatpush1.bf16.msra.mxu1 %v11958_v23  ;;  %3821 = vmatprep.subr.bf16.mxu0 %v9981_v37  ;;  %v9985_v23 = vld [vmem:[%s15647_s9 + $0x2a0] ss:$8 sps:$4 sm:$0xff]   ;;  %v10000_v37 = vld [vmem:[%s15647_s9 + $0x2f0] ss:$8 sps:$4 sm:$0xff]  }
  0xf4   :  { %555 = vmatprep.subr.bf16.mxu1 %v15625_v62 }
  0xf6   :  { %3822 = vmatpush1.bf16.msra.mxu0 %v9979_v28 }
  0xf7   :  { %556 = vmatpush1.bf16.msra.mxu1 %v11967_v26  ;;  %3823 = vmatprep.subr.bf16.mxu0 %v9984_v8  ;;  %v9988_v26 = vld [vmem:[%s15647_s9 + $0x2b0] ss:$8 sps:$4 sm:$0xff]   ;;  %v543_v8 = vpop.permute.xlu1 %542 }
  0xf8   :  { %557 = vmatprep.subr.bf16.mxu1 %v15625_v62 }
  0xfa   :  { %3824 = vmatpush1.bf16.msra.mxu0 %v9982_v21  ;;  %v10003_v21 = vld [vmem:[%s15647_s9 + $0x300] ss:$8 sps:$4 sm:$0xff]  }
  0xfb   :  { %558 = vmatpush1.bf16.msra.mxu1 %v11976_v30  ;;  %3825 = vmatprep.subr.bf16.mxu0 %v9987_v0  ;;  %v9991_v30 = vld [vmem:[%s15647_s9 + $0x2c0] ss:$8 sps:$4 sm:$0xff]   ;;  %v10008_v0 = vld [vmem:[%s15647_s9 + $0x4] ss:$8 sps:$4 sm:$0xff]  }
  0xfc   :  { %559 = vmatprep.subr.bf16.mxu1 %v15625_v62 }
  0xfe   :  { %3826 = vmatpush1.bf16.msra.mxu0 %v9985_v23  ;;  %v546_v23 = vsel %vm192_vm0, %v543_v8, %v12114_v9  ;;  %v10014_v9 = vld [vmem:[%s15647_s9 + $0x14] ss:$8 sps:$4 sm:$0xff]   ;;  %v10033_v8 = vld [vmem:[%s15647_s9 + $0x350] ss:$8 sps:$4 sm:$0xff]  }
  0xff   :  { %560 = vmatpush1.bf16.msra.mxu1 %v11985_v34  ;;  %3827 = vmatprep.subr.bf16.mxu0 %v9990_v10  ;;  %v9994_v34 = vld [vmem:[%s15647_s9 + $0x2d0] ss:$8 sps:$4 sm:$0xff]  }
 0x100   :  { %561 = vmatprep.subr.bf16.mxu1 %v15625_v62  ;;  %v10009_v10 = vld [vmem:[%s15647_s9 + $0x310] ss:$8 sps:$4 sm:$0xff]  }
 0x102   :  { %3828 = vmatpush1.bf16.msra.mxu0 %v9988_v26  ;;  %v10011_v26 = vld [vmem:[%s15647_s9 + $0x314] ss:$8 sps:$4 sm:$0xff]  }
 0x103   :  { %562 = vmatpush1.bf16.msra.mxu1 %v11994_v36  ;;  %3829 = vmatprep.subr.bf16.mxu0 %v9993_v12  ;;  %v9997_v36 = vld [vmem:[%s15647_s9 + $0x2e0] ss:$8 sps:$4 sm:$0xff]   ;;  %v15648_v12 = vpack.c.bf16 %v11666_v43, %v11676_v56  ;;  %v15649_v43 = vpack.c.bf16 %v11669_v44, %v11679_v53  ;;  %v15650_v56 = vpack.c.bf16 %v11672_v31, %v11682_v39  ;;  %v10023_v44 = vld [vmem:[%s15647_s9 + $0x334] ss:$8 sps:$4 sm:$0xff]   ;;  %v10021_v53 = vld [vmem:[%s15647_s9 + $0x330] ss:$8 sps:$4 sm:$0xff]  }
 0x104   :  { %563 = vmatprep.subr.bf16.mxu1 %v15625_v62  ;;  %v10026_v31 = vld [vmem:[%s15647_s9 + $0x34] ss:$8 sps:$4 sm:$0xff]   ;;  %v10024_v39 = vld [vmem:[%s15647_s9 + $0x30] ss:$8 sps:$4 sm:$0xff]  }
 0x106   :  { %3830 = vmatpush1.bf16.msra.mxu0 %v9991_v30  ;;  %v12174_v7 = vpop.f32.mrb[0].mxu0  ;;  %v10017_v30 = vld [vmem:[%s15647_s9 + $0x324] ss:$8 sps:$4 sm:$0xff]  }
 0x107   :  { %564 = vmatpush1.bf16.msra.mxu1 %v12007_v29  ;;  %3831 = vmatprep.subr.bf16.mxu0 %v9996_v38  ;;  %v232_v47 = vpop.f32.mrb[1].mxu0  ;;  %v10002_v29 = vld [vmem:[%s15647_s9 + $0x2f4] ss:$8 sps:$4 sm:$0xff]   ;;  %v10020_v38 = vld [vmem:[%s15647_s9 + $0x24] ss:$8 sps:$4 sm:$0xff]  }
 0x108   :  { %565 = vmatprep.subr.bf16.mxu1 %v15625_v62  ;;  %v12180_v42 = vpop.f32.mrb[2].mxu0  ;;  %v10032_v47 = vld [vmem:[%s15647_s9 + $0x44] ss:$8 sps:$4 sm:$0xff]  }
 0x109   :  { %v235_v28 = vpop.f32.mrb[3].mxu0 }
 0x10a   :  { %3832 = vmatpush1.bf16.msra.mxu0 %v9994_v34  ;;  %v10015_v34 = vld [vmem:[%s15647_s9 + $0x320] ss:$8 sps:$4 sm:$0xff]   ;;  %v10035_v28 = vld [vmem:[%s15647_s9 + $0x354] ss:$8 sps:$4 sm:$0xff]  }
 0x10b   :  { %566 = vmatpush1.bf16.msra.mxu1 %v12020_v15  ;;  %3833 = vmatprep.subr.bf16.mxu0 %v9999_v1  ;;  %v10005_v15 = vld [vmem:[%s15647_s9 + $0x304] ss:$8 sps:$4 sm:$0xff]   ;;  %v10018_v1 = vld [vmem:[%s15647_s9 + $0x20] ss:$8 sps:$4 sm:$0xff]  }
 0x10c   :  { %567 = vmatprep.subr.bf16.mxu1 %v15625_v62 }
 0x10e   :  { %3834 = vmatpush1.bf16.msra.mxu0 %v9997_v36  ;;  %v10029_v36 = vld [vmem:[%s15647_s9 + $0x344] ss:$8 sps:$4 sm:$0xff]  }
 0x10f   :  { %568 = vmatpush1.bf16.msra.mxu1 %v12033_v20  ;;  %3835 = vmatprep.subr.bf16.mxu0 %v10002_v29  ;;  %v10006_v20 = vld [vmem:[%s15647_s9] ss:$8 sps:$4 sm:$0xff]  }
 0x110   :  { %569 = vmatprep.subr.bf16.mxu1 %v15625_v62  ;;  %v10027_v29 = vld [vmem:[%s15647_s9 + $0x340] ss:$8 sps:$4 sm:$0xff]  }
 0x112   :  { %3836 = vmatpush1.bf16.msra.mxu0 %v10000_v37  ;;  %v10030_v37 = vld [vmem:[%s15647_s9 + $0x40] ss:$8 sps:$4 sm:$0xff]  }
 0x113   :  { %570 = vmatpush1.bf16.msra.mxu1 %v12053_v6  ;;  %3848 = vmatprep.subr.bf16.mxu0 %v10005_v15  ;;  %v10012_v6 = vld [vmem:[%s15647_s9 + $0x10] ss:$8 sps:$4 sm:$0xff]   ;;  %v10038_v15 = vld [vmem:[%s15647_s9 + $0x54] ss:$8 sps:$4 sm:$0xff]  }
 0x114   :  { %3719 = vmatprep.subr.bf16.mxu1 %v10008_v0  ;;  %v10041_v0 = vld [vmem:[%s15647_s9 + $0x364] ss:$8 sps:$4 sm:$0xff]  }
 0x115   :  { %3838 = vmatmul.mubr.bf16.vlgmr.msra.gmra.mrb[16].mxu0 %v15648_v12  ;;  %v10050_v12 = vld [vmem:[%s15647_s9 + $0x74] ss:$8 sps:$4 sm:$0xff]  }
 0x116   :  { %584 = vmatmul.mubr.bf16.vlgmr.msra.gmra.mrb[12].mxu1 %v546_v23  ;;  %3849 = vmatpush1.bf16.msra.mxu0 %v10003_v21  ;;  %v10036_v21 = vld [vmem:[%s15647_s9 + $0x50] ss:$8 sps:$4 sm:$0xff]   ;;  %v10044_v23 = vld [vmem:[%s15647_s9 + $0x64] ss:$8 sps:$4 sm:$0xff]  }
 0x117   :  { %3880 = vmatprep.mubr.bf16.mxu0 %v15649_v43  ;;  %3720 = vmatpush1.bf16.msra.mxu1 %v10006_v20  ;;  %v10039_v20 = vld [vmem:[%s15647_s9 + $0x360] ss:$8 sps:$4 sm:$0xff]  }
 0x118   :  { %3751 = vmatprep.mubr.bf16.mxu1 %v15650_v56  ;;  %3850 = vmatprep.subr.bf16.mxu0 %v10011_v26  ;;  %v10047_v26 = vld [vmem:[%s15647_s9 + $0x374] ss:$8 sps:$4 sm:$0xff]   ;;  %v10051_v43 = vld [vmem:[%s15647_s9 + $0x380] ss:$8 sps:$4 sm:$0xff]  }
 0x119   :  { %3721 = vmatprep.subr.bf16.mxu1 %v10014_v9  ;;  %v10048_v9 = vld [vmem:[%s15647_s9 + $0x70] ss:$8 sps:$4 sm:$0xff]   ;;  %v10054_v56 = vld [vmem:[%s15647_s9 + $0x80] ss:$8 sps:$4 sm:$0xff]  }
 0x11a   :  { %3851 = vmatpush1.bf16.msra.mxu0 %v10009_v10  ;;  %v10042_v10 = vld [vmem:[%s15647_s9 + $0x60] ss:$8 sps:$4 sm:$0xff]  }
 0x11b   :  { %3722 = vmatpush1.bf16.msra.mxu1 %v10012_v6  ;;  %3852 = vmatprep.subr.bf16.mxu0 %v10017_v30  ;;  %v10045_v6 = vld [vmem:[%s15647_s9 + $0x370] ss:$8 sps:$4 sm:$0xff]   ;;  %v10053_v30 = vld [vmem:[%s15647_s9 + $0x384] ss:$8 sps:$4 sm:$0xff]  }
 0x11c   :  { %3723 = vmatprep.subr.bf16.mxu1 %v10020_v38  ;;  %v10056_v38 = vld [vmem:[%s15647_s9 + $0x84] ss:$8 sps:$4 sm:$0xff]  }
 0x11e   :  { %3853 = vmatpush1.bf16.msra.mxu0 %v10015_v34  ;;  %v10059_v34 = vld [vmem:[%s15647_s9 + $0x394] ss:$8 sps:$4 sm:$0xff]  }
 0x11f   :  { %3724 = vmatpush1.bf16.msra.mxu1 %v10018_v1  ;;  %3854 = vmatprep.subr.bf16.mxu0 %v10023_v44  ;;  %v10062_v1 = vld [vmem:[%s15647_s9 + $0x94] ss:$8 sps:$4 sm:$0xff]   ;;  %v10057_v44 = vld [vmem:[%s15647_s9 + $0x390] ss:$8 sps:$4 sm:$0xff]  }
 0x120   :  { %3725 = vmatprep.subr.bf16.mxu1 %v10026_v31  ;;  %v10060_v31 = vld [vmem:[%s15647_s9 + $0x90] ss:$8 sps:$4 sm:$0xff]  }
 0x122   :  { %3855 = vmatpush1.bf16.msra.mxu0 %v10021_v53  ;;  %v10065_v53 = vld [vmem:[%s15647_s9 + $0x3a4] ss:$8 sps:$4 sm:$0xff]  }
 0x123   :  { %3726 = vmatpush1.bf16.msra.mxu1 %v10024_v39  ;;  %3856 = vmatprep.subr.bf16.mxu0 %v10029_v36  ;;  %v10068_v39 = vld [vmem:[%s15647_s9 + $0xa4] ss:$8 sps:$4 sm:$0xff]   ;;  %v10063_v36 = vld [vmem:[%s15647_s9 + $0x3a0] ss:$8 sps:$4 sm:$0xff]  }
 0x124   :  { %3727 = vmatprep.subr.bf16.mxu1 %v10032_v47  ;;  %v10066_v47 = vld [vmem:[%s15647_s9 + $0xa0] ss:$8 sps:$4 sm:$0xff]  }
 0x126   :  { %3857 = vmatpush1.bf16.msra.mxu0 %v10027_v29  ;;  %v10071_v29 = vld [vmem:[%s15647_s9 + $0x3b4] ss:$8 sps:$4 sm:$0xff]  }
 0x127   :  { %3728 = vmatpush1.bf16.msra.mxu1 %v10030_v37  ;;  %3858 = vmatprep.subr.bf16.mxu0 %v10035_v28  ;;  %v10074_v37 = vld [vmem:[%s15647_s9 + $0xb4] ss:$8 sps:$4 sm:$0xff]   ;;  %v10069_v28 = vld [vmem:[%s15647_s9 + $0x3b0] ss:$8 sps:$4 sm:$0xff]  }
 0x128   :  { %3729 = vmatprep.subr.bf16.mxu1 %v10038_v15  ;;  %v10072_v15 = vld [vmem:[%s15647_s9 + $0xb0] ss:$8 sps:$4 sm:$0xff]  }
 0x12a   :  { %3859 = vmatpush1.bf16.msra.mxu0 %v10033_v8  ;;  %v10077_v8 = vld [vmem:[%s15647_s9 + $0x3c4] ss:$8 sps:$4 sm:$0xff]  }
 0x12b   :  { %3730 = vmatpush1.bf16.msra.mxu1 %v10036_v21  ;;  %3860 = vmatprep.subr.bf16.mxu0 %v10041_v0  ;;  %v10080_v21 = vld [vmem:[%s15647_s9 + $0xc4] ss:$8 sps:$4 sm:$0xff]   ;;  %v10075_v0 = vld [vmem:[%s15647_s9 + $0x3c0] ss:$8 sps:$4 sm:$0xff]  }
 0x12c   :  { %3731 = vmatprep.subr.bf16.mxu1 %v10044_v23  ;;  %v10083_v23 = vld [vmem:[%s15647_s9 + $0x3d4] ss:$8 sps:$4 sm:$0xff]  }
 0x12e   :  { %3861 = vmatpush1.bf16.msra.mxu0 %v10039_v20  ;;  %v10078_v20 = vld [vmem:[%s15647_s9 + $0xc0] ss:$8 sps:$4 sm:$0xff]  }
 0x12f   :  { %3732 = vmatpush1.bf16.msra.mxu1 %v10042_v10  ;;  %3862 = vmatprep.subr.bf16.mxu0 %v10047_v26  ;;  %v10086_v10 = vld [vmem:[%s15647_s9 + $0xd4] ss:$8 sps:$4 sm:$0xff]   ;;  %v10081_v26 = vld [vmem:[%s15647_s9 + $0x3d0] ss:$8 sps:$4 sm:$0xff]  }
 0x130   :  { %3733 = vmatprep.subr.bf16.mxu1 %v10050_v12  ;;  %v10084_v12 = vld [vmem:[%s15647_s9 + $0xd0] ss:$8 sps:$4 sm:$0xff]  }
 0x132   :  { %3863 = vmatpush1.bf16.msra.mxu0 %v10045_v6  ;;  %v10089_v6 = vld [vmem:[%s15647_s9 + $0x3e4] ss:$8 sps:$4 sm:$0xff]  }
 0x133   :  { %3734 = vmatpush1.bf16.msra.mxu1 %v10048_v9  ;;  %3864 = vmatprep.subr.bf16.mxu0 %v10053_v30  ;;  %v10092_v9 = vld [vmem:[%s15647_s9 + $0xe4] ss:$8 sps:$4 sm:$0xff]   ;;  %v10087_v30 = vld [vmem:[%s15647_s9 + $0x3e0] ss:$8 sps:$4 sm:$0xff]  }
 0x134   :  { %3735 = vmatprep.subr.bf16.mxu1 %v10056_v38  ;;  %v10090_v38 = vld [vmem:[%s15647_s9 + $0xe0] ss:$8 sps:$4 sm:$0xff]  }
 0x136   :  { %3865 = vmatpush1.bf16.msra.mxu0 %v10051_v43  ;;  %v10095_v43 = vld [vmem:[%s15647_s9 + $0x3f4] ss:$8 sps:$4 sm:$0xff]  }
 0x137   :  { %3736 = vmatpush1.bf16.msra.mxu1 %v10054_v56  ;;  %3866 = vmatprep.subr.bf16.mxu0 %v10059_v34  ;;  %v10098_v56 = vld [vmem:[%s15647_s9 + $0xf4] ss:$8 sps:$4 sm:$0xff]   ;;  %v10093_v34 = vld [vmem:[%s15647_s9 + $0x3f0] ss:$8 sps:$4 sm:$0xff]  }
 0x138   :  { %3737 = vmatprep.subr.bf16.mxu1 %v10062_v1  ;;  %v10096_v1 = vld [vmem:[%s15647_s9 + $0xf0] ss:$8 sps:$4 sm:$0xff]  }
 0x13a   :  { %3867 = vmatpush1.bf16.msra.mxu0 %v10057_v44  ;;  %v10101_v44 = vld [vmem:[%s15647_s9 + $0x404] ss:$8 sps:$4 sm:$0xff]  }
 0x13b   :  { %3738 = vmatpush1.bf16.msra.mxu1 %v10060_v31  ;;  %3868 = vmatprep.subr.bf16.mxu0 %v10065_v53  ;;  %v10104_v31 = vld [vmem:[%s15647_s9 + $0x104] ss:$8 sps:$4 sm:$0xff]   ;;  %v10099_v53 = vld [vmem:[%s15647_s9 + $0x400] ss:$8 sps:$4 sm:$0xff]  }
 0x13c   :  { %3739 = vmatprep.subr.bf16.mxu1 %v10068_v39  ;;  %v10102_v39 = vld [vmem:[%s15647_s9 + $0x100] ss:$8 sps:$4 sm:$0xff]  }
 0x13e   :  { %3869 = vmatpush1.bf16.msra.mxu0 %v10063_v36  ;;  %v10107_v36 = vld [vmem:[%s15647_s9 + $0x414] ss:$8 sps:$4 sm:$0xff]  }
 0x13f   :  { %3740 = vmatpush1.bf16.msra.mxu1 %v10066_v47  ;;  %3870 = vmatprep.subr.bf16.mxu0 %v10071_v29  ;;  %v15651_v47 = vpack.c.bf16 %v11689_v50, %v11686_v54  ;;  %v10110_v29 = vld [vmem:[%s15647_s9 + $0x114] ss:$8 sps:$4 sm:$0xff]   ;;  %v10108_v54 = vld [vmem:[%s15647_s9 + $0x110] ss:$8 sps:$4 sm:$0xff]   ;;  %v10113_v50 = vld [vmem:[%s15647_s9 + $0x424] ss:$8 sps:$4 sm:$0xff]  }
 0x140   :  { %3741 = vmatprep.subr.bf16.mxu1 %v10074_v37  ;;  %v15652_v37 = vpack.c.bf16 %v11695_v40, %v11692_v58  ;;  %v15654_v58 = vpack.c.bf16 %v11722_v3, %v11719_v48  ;;  %v10114_v48 = vld [vmem:[%s15647_s9 + $0x120] ss:$8 sps:$4 sm:$0xff]   ;;  %v10119_v3 = vld [vmem:[%s15647_s9 + $0x434] ss:$8 sps:$4 sm:$0xff]  }
 0x142   :  { %3871 = vmatpush1.bf16.msra.mxu0 %v10069_v28  ;;  %v10105_v28 = vld [vmem:[%s15647_s9 + $0x410] ss:$8 sps:$4 sm:$0xff]  }
 0x143   :  { %3742 = vmatpush1.bf16.msra.mxu1 %v10072_v15  ;;  %3872 = vmatprep.subr.bf16.mxu0 %v10077_v8  ;;  %v15653_v15 = vpack.c.bf16 %v11716_v4, %v11713_v45  ;;  %v10116_v4 = vld [vmem:[%s15647_s9 + $0x124] ss:$8 sps:$4 sm:$0xff]  }
 0x144   :  { %3743 = vmatprep.subr.bf16.mxu1 %v10080_v21  ;;  %v10111_v21 = vld [vmem:[%s15647_s9 + $0x420] ss:$8 sps:$4 sm:$0xff]  }
 0x146   :  { %3873 = vmatpush1.bf16.msra.mxu0 %v10075_v0 }
 0x147   :  { %3744 = vmatpush1.bf16.msra.mxu1 %v10078_v20  ;;  %3874 = vmatprep.subr.bf16.mxu0 %v10083_v23  ;;  %v10122_v20 = vld [vmem:[%s15647_s9 + $0x134] ss:$8 sps:$4 sm:$0xff]   ;;  %v10117_v23 = vld [vmem:[%s15647_s9 + $0x430] ss:$8 sps:$4 sm:$0xff]  }
 0x148   :  { %3745 = vmatprep.subr.bf16.mxu1 %v10086_v10  ;;  %v10120_v10 = vld [vmem:[%s15647_s9 + $0x130] ss:$8 sps:$4 sm:$0xff]  }
 0x14a   :  { %3875 = vmatpush1.bf16.msra.mxu0 %v10081_v26  ;;  %v10125_v26 = vld [vmem:[%s15647_s9 + $0x444] ss:$8 sps:$4 sm:$0xff]  }
 0x14b   :  { %3746 = vmatpush1.bf16.msra.mxu1 %v10084_v12  ;;  %3876 = vmatprep.subr.bf16.mxu0 %v10089_v6  ;;  %v10128_v12 = vld [vmem:[%s15647_s9 + $0x144] ss:$8 sps:$4 sm:$0xff]   ;;  %v10123_v6 = vld [vmem:[%s15647_s9 + $0x440] ss:$8 sps:$4 sm:$0xff]  }
 0x14c   :  { %3747 = vmatprep.subr.bf16.mxu1 %v10092_v9  ;;  %v10126_v9 = vld [vmem:[%s15647_s9 + $0x140] ss:$8 sps:$4 sm:$0xff]  }
 0x14e   :  { %3877 = vmatpush1.bf16.msra.mxu0 %v10087_v30  ;;  %v10131_v30 = vld [vmem:[%s15647_s9 + $0x454] ss:$8 sps:$4 sm:$0xff]  }
 0x14f   :  { %3748 = vmatpush1.bf16.msra.mxu1 %v10090_v38  ;;  %3878 = vmatprep.subr.bf16.mxu0 %v10095_v43  ;;  %v10134_v38 = vld [vmem:[%s15647_s9 + $0x154] ss:$8 sps:$4 sm:$0xff]   ;;  %v10129_v43 = vld [vmem:[%s15647_s9 + $0x450] ss:$8 sps:$4 sm:$0xff]  }
 0x150   :  { %3749 = vmatprep.subr.bf16.mxu1 %v10098_v56  ;;  %v10132_v56 = vld [vmem:[%s15647_s9 + $0x150] ss:$8 sps:$4 sm:$0xff]  }
 0x152   :  { %3879 = vmatpush1.bf16.msra.mxu0 %v10093_v34  ;;  %v10137_v34 = vld [vmem:[%s15647_s9 + $0x464] ss:$8 sps:$4 sm:$0xff]  }
 0x153   :  { %3750 = vmatpush1.bf16.msra.mxu1 %v10096_v1  ;;  %3891 = vmatprep.subr.bf16.mxu0 %v10101_v44  ;;  %v10140_v1 = vld [vmem:[%s15647_s9 + $0x164] ss:$8 sps:$4 sm:$0xff]   ;;  %v10135_v44 = vld [vmem:[%s15647_s9 + $0x460] ss:$8 sps:$4 sm:$0xff]  }
 0x154   :  { %3762 = vmatprep.subr.bf16.mxu1 %v10104_v31  ;;  %v10138_v31 = vld [vmem:[%s15647_s9 + $0x160] ss:$8 sps:$4 sm:$0xff]  }
 0x155   :  { %3881 = vmatmul.mubr.bf16.vlgmr.msra.gmra.mrb[16].mxu0 %v15651_v47  ;;  %v10144_v47 = vld [vmem:[%s15647_s9 + $0x170] ss:$8 sps:$4 sm:$0xff]  }
 0x156   :  { %3752 = vmatmul.mubr.bf16.vlgmr.msra.gmra.mrb[16].mxu1 %v15652_v37  ;;  %3892 = vmatpush1.bf16.msra.mxu0 %v10099_v53  ;;  %v10143_v53 = vld [vmem:[%s15647_s9 + $0x474] ss:$8 sps:$4 sm:$0xff]   ;;  %v10152_v37 = vld [vmem:[%s15647_s9 + $0x184] ss:$8 sps:$4 sm:$0xff]  }
 0x157   :  { %3923 = vmatprep.mubr.bf16.mxu0 %v15653_v15  ;;  %3763 = vmatpush1.bf16.msra.mxu1 %v10102_v39  ;;  %v12431_v40 = vpop.f32.mrb[4].mxu0  ;;  %v10146_v39 = vld [vmem:[%s15647_s9 + $0x174] ss:$8 sps:$4 sm:$0xff]   ;;  %v10150_v15 = vld [vmem:[%s15647_s9 + $0x180] ss:$8 sps:$4 sm:$0xff]  }
 0x158   :  { %3794 = vmatprep.mubr.bf16.mxu1 %v15654_v58  ;;  %3893 = vmatprep.subr.bf16.mxu0 %v10107_v36  ;;  %v337_v45 = vpop.f32.mrb[5].mxu0  ;;  %v10141_v36 = vld [vmem:[%s15647_s9 + $0x470] ss:$8 sps:$4 sm:$0xff]  }
 0x159   :  { %3764 = vmatprep.subr.bf16.mxu1 %v10110_v29  ;;  %v12436_v8 = vpop.f32.mrb[6].mxu0  ;;  %v10149_v29 = vld [vmem:[%s15647_s9 + $0x484] ss:$8 sps:$4 sm:$0xff]   ;;  %v10153_v58 = vld [vmem:[%s15647_s9 + $0x490] ss:$8 sps:$4 sm:$0xff]  }
 0x15a   :  { %3894 = vmatpush1.bf16.msra.mxu0 %v10105_v28  ;;  %v340_v0 = vpop.f32.mrb[7].mxu0  ;;  %v10147_v28 = vld [vmem:[%s15647_s9 + $0x480] ss:$8 sps:$4 sm:$0xff]   ;;  %v10161_v45 = vld [vmem:[%s15647_s9 + $0x4a4] ss:$8 sps:$4 sm:$0xff]  }
 0x15b   :  { %3765 = vmatpush1.bf16.msra.mxu1 %v10108_v54  ;;  %3895 = vmatprep.subr.bf16.mxu0 %v10113_v50  ;;  %v10155_v54 = vld [vmem:[%s15647_s9 + $0x494] ss:$8 sps:$4 sm:$0xff]   ;;  %v10159_v0 = vld [vmem:[%s15647_s9 + $0x4a0] ss:$8 sps:$4 sm:$0xff]  }
 0x15c   :  { %3766 = vmatprep.subr.bf16.mxu1 %v10116_v4  ;;  %v10158_v50 = vld [vmem:[%s15647_s9 + $0x194] ss:$8 sps:$4 sm:$0xff]   ;;  %v10156_v4 = vld [vmem:[%s15647_s9 + $0x190] ss:$8 sps:$4 sm:$0xff]  }
 0x15e   :  { %3896 = vmatpush1.bf16.msra.mxu0 %v10111_v21  ;;  %v10164_v21 = vld [vmem:[%s15647_s9 + $0x1a4] ss:$8 sps:$4 sm:$0xff]  }
 0x15f   :  { %3767 = vmatpush1.bf16.msra.mxu1 %v10114_v48  ;;  %3897 = vmatprep.subr.bf16.mxu0 %v10119_v3  ;;  %v10162_v48 = vld [vmem:[%s15647_s9 + $0x1a0] ss:$8 sps:$4 sm:$0xff]   ;;  %v10167_v3 = vld [vmem:[%s15647_s9 + $0x4b4] ss:$8 sps:$4 sm:$0xff]  }
 0x160   :  { %3768 = vmatprep.subr.bf16.mxu1 %v10122_v20  ;;  %v10170_v20 = vld [vmem:[%s15647_s9 + $0x1b4] ss:$8 sps:$4 sm:$0xff]  }
 0x162   :  { %3898 = vmatpush1.bf16.msra.mxu0 %v10117_v23  ;;  %v10165_v23 = vld [vmem:[%s15647_s9 + $0x4b0] ss:$8 sps:$4 sm:$0xff]  }
 0x163   :  { %3769 = vmatpush1.bf16.msra.mxu1 %v10120_v10  ;;  %3899 = vmatprep.subr.bf16.mxu0 %v10125_v26  ;;  %v10168_v10 = vld [vmem:[%s15647_s9 + $0x1b0] ss:$8 sps:$4 sm:$0xff]   ;;  %v10173_v26 = vld [vmem:[%s15647_s9 + $0x4c4] ss:$8 sps:$4 sm:$0xff]  }
 0x164   :  { %3770 = vmatprep.subr.bf16.mxu1 %v10128_v12 }
 0x166   :  { %3900 = vmatpush1.bf16.msra.mxu0 %v10123_v6  ;;  %v10176_v6 = vld [vmem:[%s15647_s9 + $0x1c4] ss:$8 sps:$4 sm:$0xff]  }
 0x167   :  { %3771 = vmatpush1.bf16.msra.mxu1 %v10126_v9  ;;  %3901 = vmatprep.subr.bf16.mxu0 %v10131_v30 }
 0x168   :  { %3772 = vmatprep.subr.bf16.mxu1 %v10134_v38  ;;  %v10171_v38 = vld [vmem:[%s15647_s9 + $0x4c0] ss:$8 sps:$4 sm:$0xff]  }
 0x16a   :  { %3902 = vmatpush1.bf16.msra.mxu0 %v10129_v43 }
 0x16b   :  { %3773 = vmatpush1.bf16.msra.mxu1 %v10132_v56  ;;  %3903 = vmatprep.subr.bf16.mxu0 %v10137_v34  ;;  %v10174_v56 = vld [vmem:[%s15647_s9 + $0x1c0] ss:$8 sps:$4 sm:$0xff]   ;;  %v10179_v34 = vld [vmem:[%s15647_s9 + $0x4d4] ss:$8 sps:$4 sm:$0xff]  }
 0x16c   :  { %3774 = vmatprep.subr.bf16.mxu1 %v10140_v1  ;;  %v10182_v1 = vld [vmem:[%s15647_s9 + $0x1d4] ss:$8 sps:$4 sm:$0xff]  }
 0x16e   :  { %3904 = vmatpush1.bf16.msra.mxu0 %v10135_v44  ;;  %v10177_v44 = vld [vmem:[%s15647_s9 + $0x4d0] ss:$8 sps:$4 sm:$0xff]  }
 0x16f   :  { %3775 = vmatpush1.bf16.msra.mxu1 %v10138_v31  ;;  %3905 = vmatprep.subr.bf16.mxu0 %v10143_v53  ;;  %v10180_v31 = vld [vmem:[%s15647_s9 + $0x1d0] ss:$8 sps:$4 sm:$0xff]   ;;  %v10185_v53 = vld [vmem:[%s15647_s9 + $0x4e4] ss:$8 sps:$4 sm:$0xff]  }
 0x170   :  { %3776 = vmatprep.subr.bf16.mxu1 %v10146_v39  ;;  %v10188_v39 = vld [vmem:[%s15647_s9 + $0x1e4] ss:$8 sps:$4 sm:$0xff]  }
 0x172   :  { %3906 = vmatpush1.bf16.msra.mxu0 %v10141_v36  ;;  %v10183_v36 = vld [vmem:[%s15647_s9 + $0x4e0] ss:$8 sps:$4 sm:$0xff]  }
 0x173   :  { %3777 = vmatpush1.bf16.msra.mxu1 %v10144_v47  ;;  %3907 = vmatprep.subr.bf16.mxu0 %v10149_v29  ;;  %v10186_v47 = vld [vmem:[%s15647_s9 + $0x1e0] ss:$8 sps:$4 sm:$0xff]   ;;  %v10191_v29 = vld [vmem:[%s15647_s9 + $0x4f4] ss:$8 sps:$4 sm:$0xff]  }
 0x174   :  { %3778 = vmatprep.subr.bf16.mxu1 %v10152_v37  ;;  %v10194_v37 = vld [vmem:[%s15647_s9 + $0x1f4] ss:$8 sps:$4 sm:$0xff]  }
 0x176   :  { %3908 = vmatpush1.bf16.msra.mxu0 %v10147_v28  ;;  %v10189_v28 = vld [vmem:[%s15647_s9 + $0x4f0] ss:$8 sps:$4 sm:$0xff]  }
 0x177   :  { %3779 = vmatpush1.bf16.msra.mxu1 %v10150_v15  ;;  %3909 = vmatprep.subr.bf16.mxu0 %v10155_v54  ;;  %v10192_v15 = vld [vmem:[%s15647_s9 + $0x1f0] ss:$8 sps:$4 sm:$0xff]   ;;  %v10197_v54 = vld [vmem:[%s15647_s9 + $0x504] ss:$8 sps:$4 sm:$0xff]  }
 0x178   :  { %3780 = vmatprep.subr.bf16.mxu1 %v10158_v50  ;;  %v10195_v50 = vld [vmem:[%s15647_s9 + $0x500] ss:$8 sps:$4 sm:$0xff]  }
 0x17a   :  { %3910 = vmatpush1.bf16.msra.mxu0 %v10153_v58  ;;  %v10200_v58 = vld [vmem:[%s15647_s9 + $0x514] ss:$8 sps:$4 sm:$0xff]  }
 0x17b   :  { %3781 = vmatpush1.bf16.msra.mxu1 %v10156_v4  ;;  %3911 = vmatprep.subr.bf16.mxu0 %v10161_v45  ;;  %v15655_v4 = vld [vmem:[#allocation11_spill] sm:$0xff] }
 0x17c   :  { %3782 = vmatprep.subr.bf16.mxu1 %v10164_v21  ;;  %v15656_v45 = vpack.c.bf16 %v11728_v57, %v15655_v4  ;;  %v15657_v21 = vpack.c.bf16 %v11755_v46, %v11752_v61  ;;  %v10201_v57 = vld [vmem:[%s15647_s9 + $0x520] ss:$8 sps:$4 sm:$0xff]   ;;  %v10206_v61 = vld [vmem:[%s15647_s9 + $0x534] ss:$8 sps:$4 sm:$0xff]   ;;  %v10204_v46 = vld [vmem:[%s15647_s9 + $0x530] ss:$8 sps:$4 sm:$0xff]  }
 0x17d   :  { %v10239_v4 = vld [vmem:[%s15647_s9 + $0x5e4] ss:$8 sps:$4 sm:$0xff]  }
 0x17e   :  { %3912 = vmatpush1.bf16.msra.mxu0 %v10159_v0  ;;  %v10198_v0 = vld [vmem:[%s15647_s9 + $0x510] ss:$8 sps:$4 sm:$0xff]  }
 0x17f   :  { %3783 = vmatpush1.bf16.msra.mxu1 %v10162_v48  ;;  %3913 = vmatprep.subr.bf16.mxu0 %v10167_v3  ;;  %v10203_v48 = vld [vmem:[%s15647_s9 + $0x524] ss:$8 sps:$4 sm:$0xff]  }
 0x180   :  { %v12555_v12 = vpop.f32.mrb[8].mxu0  ;;  %3784 = vmatprep.subr.bf16.mxu1 %v10170_v20  ;;  %v15658_v3 = vld [vmem:[#allocation6_spill] sm:$0xff] }
 0x181   :  { %v433_v9 = vpop.f32.mrb[9].mxu0  ;;  %v10209_v20 = vld [vmem:[%s15647_s9 + $0x544] ss:$8 sps:$4 sm:$0xff]  }
 0x182   :  { %v12560_v30 = vpop.f32.mrb[10].mxu0  ;;  %3914 = vmatpush1.bf16.msra.mxu0 %v10165_v23  ;;  %v10207_v23 = vld [vmem:[%s15647_s9 + $0x540] ss:$8 sps:$4 sm:$0xff]  }
 0x183   :  { %v436_v43 = vpop.f32.mrb[11].mxu0  ;;  %3785 = vmatpush1.bf16.msra.mxu1 %v10168_v10  ;;  %3915 = vmatprep.subr.bf16.mxu0 %v10173_v26  ;;  %v10212_v10 = vld [vmem:[%s15647_s9 + $0x554] ss:$8 sps:$4 sm:$0xff]   ;;  %v10210_v26 = vld [vmem:[%s15647_s9 + $0x550] ss:$8 sps:$4 sm:$0xff]  }
 0x184   :  { %3786 = vmatprep.subr.bf16.mxu1 %v10176_v6  ;;  %v10215_v6 = vld [vmem:[%s15647_s9 + $0x564] ss:$8 sps:$4 sm:$0xff]  }
 0x186   :  { %3916 = vmatpush1.bf16.msra.mxu0 %v10171_v38 }
 0x187   :  { %3787 = vmatpush1.bf16.msra.mxu1 %v10174_v56  ;;  %3917 = vmatprep.subr.bf16.mxu0 %v10179_v34  ;;  %v10213_v56 = vld [vmem:[%s15647_s9 + $0x560] ss:$8 sps:$4 sm:$0xff]  }
 0x188   :  { %3788 = vmatprep.subr.bf16.mxu1 %v10182_v1  ;;  %v10218_v1 = vld [vmem:[%s15647_s9 + $0x574] ss:$8 sps:$4 sm:$0xff]  }
 0x18a   :  { %3918 = vmatpush1.bf16.msra.mxu0 %v10177_v44  ;;  %v10216_v44 = vld [vmem:[%s15647_s9 + $0x570] ss:$8 sps:$4 sm:$0xff]  }
 0x18b   :  { %3789 = vmatpush1.bf16.msra.mxu1 %v10180_v31  ;;  %3919 = vmatprep.subr.bf16.mxu0 %v10185_v53  ;;  %v10221_v31 = vld [vmem:[%s15647_s9 + $0x584] ss:$8 sps:$4 sm:$0xff]   ;;  %v10219_v53 = vld [vmem:[%s15647_s9 + $0x580] ss:$8 sps:$4 sm:$0xff]  }
 0x18c   :  { %3790 = vmatprep.subr.bf16.mxu1 %v10188_v39  ;;  %v10224_v39 = vld [vmem:[%s15647_s9 + $0x594] ss:$8 sps:$4 sm:$0xff]  }
 0x18e   :  { %3920 = vmatpush1.bf16.msra.mxu0 %v10183_v36  ;;  %v10222_v36 = vld [vmem:[%s15647_s9 + $0x590] ss:$8 sps:$4 sm:$0xff]  }
 0x18f   :  { %3791 = vmatpush1.bf16.msra.mxu1 %v10186_v47  ;;  %3921 = vmatprep.subr.bf16.mxu0 %v10191_v29  ;;  %v10227_v47 = vld [vmem:[%s15647_s9 + $0x5a4] ss:$8 sps:$4 sm:$0xff]   ;;  %v10225_v29 = vld [vmem:[%s15647_s9 + $0x5a0] ss:$8 sps:$4 sm:$0xff]  }
 0x190   :  { %3792 = vmatprep.subr.bf16.mxu1 %v10194_v37  ;;  %v10230_v37 = vld [vmem:[%s15647_s9 + $0x5b4] ss:$8 sps:$4 sm:$0xff]  }
 0x192   :  { %3922 = vmatpush1.bf16.msra.mxu0 %v10189_v28  ;;  %v10228_v28 = vld [vmem:[%s15647_s9 + $0x5b0] ss:$8 sps:$4 sm:$0xff]  }
 0x193   :  { %3793 = vmatpush1.bf16.msra.mxu1 %v10192_v15  ;;  %3934 = vmatprep.subr.bf16.mxu0 %v10197_v54  ;;  %v10233_v15 = vld [vmem:[%s15647_s9 + $0x5c4] ss:$8 sps:$4 sm:$0xff]   ;;  %v10231_v54 = vld [vmem:[%s15647_s9 + $0x5c0] ss:$8 sps:$4 sm:$0xff]  }
 0x195   :  { %3924 = vmatmul.mubr.bf16.vlgmr.msra.gmra.mrb[16].mxu0 %v15656_v45  ;;  %v10237_v45 = vld [vmem:[%s15647_s9 + $0x5e0] ss:$8 sps:$4 sm:$0xff]  }
 0x196   :  { %3795 = vmatmul.mubr.bf16.vlgmr.msra.gmra.mrb[16].mxu1 %v15657_v21  ;;  %3935 = vmatpush1.bf16.msra.mxu0 %v10195_v50  ;;  %v10236_v50 = vld [vmem:[%s15647_s9 + $0x5d4] ss:$8 sps:$4 sm:$0xff]  }
 0x197   :  { %3936 = vmatprep.subr.bf16.mxu0 %v10200_v58  ;;  %3966 = vmatprep.mubr.bf16.mxu0 %v15658_v3  ;;  %v10234_v58 = vld [vmem:[%s15647_s9 + $0x5d0] ss:$8 sps:$4 sm:$0xff]   ;;  %v10242_v21 = vld [vmem:[%s15647_s9 + $0x5f4] ss:$8 sps:$4 sm:$0xff]   ;;  %v10243_v3 = vld [vmem:[%s15647_s9 + $0x600] ss:$8 sps:$4 sm:$0xff]  }
 0x19a   :  { %3937 = vmatpush1.bf16.msra.mxu0 %v10198_v0  ;;  %v10240_v0 = vld [vmem:[%s15647_s9 + $0x5f0] ss:$8 sps:$4 sm:$0xff]  }
 0x19b   :  { %3938 = vmatprep.subr.bf16.mxu0 %v10203_v48  ;;  %v10245_v48 = vld [vmem:[%s15647_s9 + $0x604] ss:$8 sps:$4 sm:$0xff]  }
 0x19e   :  { %3939 = vmatpush1.bf16.msra.mxu0 %v10201_v57  ;;  %v10248_v57 = vld [vmem:[%s15647_s9 + $0x614] ss:$8 sps:$4 sm:$0xff]  }
 0x19f   :  { %3940 = vmatprep.subr.bf16.mxu0 %v10206_v61  ;;  %v15659_v61 = vld [vmem:[#allocation10_spill] sm:$0xff] }
 0x1a2   :  { %3941 = vmatpush1.bf16.msra.mxu0 %v10204_v46  ;;  %v10246_v46 = vld [vmem:[%s15647_s9 + $0x610] ss:$8 sps:$4 sm:$0xff]  }
 0x1a3   :  { %3942 = vmatprep.subr.bf16.mxu0 %v10209_v20  ;;  %v15660_v20 = vld [vmem:[#allocation5_spill] sm:$0xff] }
 0x1a6   :  { %3943 = vmatpush1.bf16.msra.mxu0 %v10207_v23  ;;  %v12725_v23 = vpop.f32.mrb[0].mxu1 }
 0x1a7   :  { %3944 = vmatprep.subr.bf16.mxu0 %v10212_v10  ;;  %v10251_v10 = vld [vmem:[%s15647_s9 + $0x624] ss:$8 sps:$4 sm:$0xff]  }
 0x1a8   :  { %v12650_v9 = vpop.f32.mrb[12].mxu0 }
 0x1a9   :  { %v536_v38 = vpop.f32.mrb[13].mxu0 }
 0x1aa   :  { %v12652_v43 = vpop.f32.mrb[14].mxu0  ;;  %3945 = vmatpush1.bf16.msra.mxu0 %v10210_v26  ;;  %v285_v26 = vpop.f32.mrb[1].mxu1 }
 0x1ab   :  { %v539_v34 = vpop.f32.mrb[15].mxu0  ;;  %3946 = vmatprep.subr.bf16.mxu0 %v10215_v6  ;;  %v10249_v6 = vld [vmem:[%s15647_s9 + $0x620] ss:$8 sps:$4 sm:$0xff]   ;;  %v12733_v38 = vpop.f32.mrb[2].mxu1  ;;  %v10275_v26 = vld [vmem:[%s15647_s9 + $0x6a4] ss:$8 sps:$4 sm:$0xff]  }
 0x1ac   :  { %v288_v34 = vpop.f32.mrb[3].mxu1 }
 0x1ad   :  { %v10276_v34 = vld [vmem:[%s15647_s9 + $0x6b0] ss:$8 sps:$4 sm:$0xff]  }
 0x1ae   :  { %3947 = vmatpush1.bf16.msra.mxu0 %v10213_v56  ;;  %v10254_v56 = vld [vmem:[%s15647_s9 + $0x634] ss:$8 sps:$4 sm:$0xff]  }
 0x1af   :  { %3948 = vmatprep.subr.bf16.mxu0 %v10218_v1  ;;  %v12738_v1 = vpop.f32.mrb[4].mxu1 }
 0x1b2   :  { %3949 = vmatpush1.bf16.msra.mxu0 %v10216_v44  ;;  %v389_v44 = vpop.f32.mrb[5].mxu1 }
 0x1b3   :  { %3950 = vmatprep.subr.bf16.mxu0 %v10221_v31  ;;  %v10252_v31 = vld [vmem:[%s15647_s9 + $0x630] ss:$8 sps:$4 sm:$0xff]   ;;  %v10281_v44 = vld [vmem:[%s15647_s9 + $0x6c4] ss:$8 sps:$4 sm:$0xff]  }
 0x1b6   :  { %3951 = vmatpush1.bf16.msra.mxu0 %v10219_v53  ;;  %v12743_v53 = vpop.f32.mrb[6].mxu1 }
 0x1b7   :  { %3952 = vmatprep.subr.bf16.mxu0 %v10224_v39  ;;  %v10257_v39 = vld [vmem:[%s15647_s9 + $0x644] ss:$8 sps:$4 sm:$0xff]  }
 0x1ba   :  { %3953 = vmatpush1.bf16.msra.mxu0 %v10222_v36  ;;  %v392_v36 = vpop.f32.mrb[7].mxu1 }
 0x1bb   :  { %3954 = vmatprep.subr.bf16.mxu0 %v10227_v47  ;;  %v10282_v36 = vld [vmem:[%s15647_s9 + $0x6d0] ss:$8 sps:$4 sm:$0xff]  }
 0x1be   :  { %3955 = vmatpush1.bf16.msra.mxu0 %v10225_v29 }
 0x1bf   :  { %3956 = vmatprep.subr.bf16.mxu0 %v10230_v37  ;;  %v10255_v37 = vld [vmem:[%s15647_s9 + $0x640] ss:$8 sps:$4 sm:$0xff]  }
 0x1c1   :  { %v12748_v47 = vpop.f32.mrb[8].mxu1 }
 0x1c2   :  { %3957 = vmatpush1.bf16.msra.mxu0 %v10228_v28  ;;  %v485_v29 = vpop.f32.mrb[9].mxu1 }
 0x1c3   :  { %3958 = vmatprep.subr.bf16.mxu0 %v10233_v15  ;;  %v12753_v28 = vpop.f32.mrb[10].mxu1  ;;  %v10260_v15 = vld [vmem:[%s15647_s9 + $0x654] ss:$8 sps:$4 sm:$0xff]   ;;  %v10287_v29 = vld [vmem:[%s15647_s9 + $0x6e4] ss:$8 sps:$4 sm:$0xff]  }
 0x1c6   :  { %3959 = vmatpush1.bf16.msra.mxu0 %v10231_v54  ;;  %v488_v54 = vpop.f32.mrb[11].mxu1 }
 0x1c7   :  { %3960 = vmatprep.subr.bf16.mxu0 %v10236_v50  ;;  %v10258_v50 = vld [vmem:[%s15647_s9 + $0x650] ss:$8 sps:$4 sm:$0xff]  }
 0x1c8   :  { %v10288_v54 = vld [vmem:[%s15647_s9 + $0x6f0] ss:$8 sps:$4 sm:$0xff]  }
 0x1ca   :  { %3961 = vmatpush1.bf16.msra.mxu0 %v10234_v58  ;;  %v10263_v58 = vld [vmem:[%s15647_s9 + $0x664] ss:$8 sps:$4 sm:$0xff]  }
 0x1cb   :  { %3962 = vmatprep.subr.bf16.mxu0 %v10239_v4 }
 0x1ce   :  { %3963 = vmatpush1.bf16.msra.mxu0 %v10237_v45  ;;  %v10261_v45 = vld [vmem:[%s15647_s9 + $0x660] ss:$8 sps:$4 sm:$0xff]  }
 0x1cf   :  { %3964 = vmatprep.subr.bf16.mxu0 %v10242_v21 }
 0x1d2   :  { %3965 = vmatpush1.bf16.msra.mxu0 %v10240_v0  ;;  %v10266_v0 = vld [vmem:[%s15647_s9 + $0x674] ss:$8 sps:$4 sm:$0xff]  }
 0x1d3   :  { %3977 = vmatprep.subr.bf16.mxu0 %v10245_v48 }
 0x1d5   :  { %3967 = vmatmul.mubr.bf16.vlgmr.msra.gmra.mrb[16].mxu0 %v15659_v61  ;;  %v10269_v61 = vld [vmem:[%s15647_s9 + $0x684] ss:$8 sps:$4 sm:$0xff]  }
 0x1d6   :  { %3978 = vmatpush1.bf16.msra.mxu0 %v10243_v3  ;;  %4009 = vmatprep.mubr.bf16.mxu0 %v15660_v20  ;;  %v10272_v20 = vld [vmem:[%s15647_s9 + $0x694] ss:$8 sps:$4 sm:$0xff]  }
 0x1d7   :  { %3979 = vmatprep.subr.bf16.mxu0 %v10248_v57  ;;  %v10264_v57 = vld [vmem:[%s15647_s9 + $0x670] ss:$8 sps:$4 sm:$0xff]  }
 0x1da   :  { %3980 = vmatpush1.bf16.msra.mxu0 %v10246_v46  ;;  %v10267_v46 = vld [vmem:[%s15647_s9 + $0x680] ss:$8 sps:$4 sm:$0xff]  }
 0x1db   :  { %3981 = vmatprep.subr.bf16.mxu0 %v10251_v10  ;;  %v10270_v10 = vld [vmem:[%s15647_s9 + $0x690] ss:$8 sps:$4 sm:$0xff]  }
 0x1de   :  { %3982 = vmatpush1.bf16.msra.mxu0 %v10249_v6  ;;  %v10273_v6 = vld [vmem:[%s15647_s9 + $0x6a0] ss:$8 sps:$4 sm:$0xff]  }
 0x1df   :  { %3983 = vmatprep.subr.bf16.mxu0 %v10254_v56  ;;  %v10278_v56 = vld [vmem:[%s15647_s9 + $0x6b4] ss:$8 sps:$4 sm:$0xff]  }
 0x1e2   :  { %3984 = vmatpush1.bf16.msra.mxu0 %v10252_v31  ;;  %v10279_v31 = vld [vmem:[%s15647_s9 + $0x6c0] ss:$8 sps:$4 sm:$0xff]  }
 0x1e3   :  { %3985 = vmatprep.subr.bf16.mxu0 %v10257_v39  ;;  %v10284_v39 = vld [vmem:[%s15647_s9 + $0x6d4] ss:$8 sps:$4 sm:$0xff]  }
 0x1e6   :  { %3986 = vmatpush1.bf16.msra.mxu0 %v10255_v37  ;;  %v10285_v37 = vld [vmem:[%s15647_s9 + $0x6e0] ss:$8 sps:$4 sm:$0xff]  }
 0x1e7   :  { %3987 = vmatprep.subr.bf16.mxu0 %v10260_v15  ;;  %v10290_v15 = vld [vmem:[%s15647_s9 + $0x6f4] ss:$8 sps:$4 sm:$0xff]  }
 0x1e9   :  { %v12764_v4 = vpop.f32.mrb[12].mxu1 }
 0x1ea   :  { %3988 = vmatpush1.bf16.msra.mxu0 %v10258_v50  ;;  %v587_v21 = vpop.f32.mrb[13].mxu1  ;;  %v10293_v50 = vld [vmem:[%s15647_s9 + $0x704] ss:$8 sps:$4 sm:$0xff]  }
 0x1eb   :  { %3989 = vmatprep.subr.bf16.mxu0 %v10263_v58  ;;  %v12772_v48 = vpop.f32.mrb[14].mxu1  ;;  %v10291_v58 = vld [vmem:[%s15647_s9 + $0x700] ss:$8 sps:$4 sm:$0xff]  }
 0x1ec   :  { %v590_v3 = vpop.f32.mrb[15].mxu1  ;;  %v15661_v21 = vld [vmem:[#allocation3_spill] sm:$0xff] }
 0x1ed   :  { %v10299_v3 = vld [vmem:[%s15647_s9 + $0x724] ss:$8 sps:$4 sm:$0xff]  }
 0x1ee   :  { %3990 = vmatpush1.bf16.msra.mxu0 %v10261_v45  ;;  %v10296_v45 = vld [vmem:[%s15647_s9 + $0x714] ss:$8 sps:$4 sm:$0xff]  }
 0x1ef   :  { %3991 = vmatprep.subr.bf16.mxu0 %v10266_v0  ;;  %v10294_v0 = vld [vmem:[%s15647_s9 + $0x710] ss:$8 sps:$4 sm:$0xff]  }
 0x1f2   :  { %3992 = vmatpush1.bf16.msra.mxu0 %v10264_v57  ;;  %v10297_v57 = vld [vmem:[%s15647_s9 + $0x720] ss:$8 sps:$4 sm:$0xff]  }
 0x1f3   :  { %3993 = vmatprep.subr.bf16.mxu0 %v10269_v61  ;;  %v10302_v61 = vld [vmem:[%s15647_s9 + $0x734] ss:$8 sps:$4 sm:$0xff]  }
 0x1f6   :  { %3994 = vmatpush1.bf16.msra.mxu0 %v10267_v46  ;;  %v10305_v46 = vld [vmem:[%s15647_s9 + $0x744] ss:$8 sps:$4 sm:$0xff]  }
 0x1f7   :  { %3995 = vmatprep.subr.bf16.mxu0 %v10272_v20  ;;  %v10303_v20 = vld [vmem:[%s15647_s9 + $0x740] ss:$8 sps:$4 sm:$0xff]  }
 0x1fa   :  { %3996 = vmatpush1.bf16.msra.mxu0 %v10270_v10  ;;  %v10308_v10 = vld [vmem:[%s15647_s9 + $0x754] ss:$8 sps:$4 sm:$0xff]  }
 0x1fb   :  { %3997 = vmatprep.subr.bf16.mxu0 %v10275_v26  ;;  %v10306_v26 = vld [vmem:[%s15647_s9 + $0x750] ss:$8 sps:$4 sm:$0xff]  }
 0x1fe   :  { %3998 = vmatpush1.bf16.msra.mxu0 %v10273_v6  ;;  %v10311_v6 = vld [vmem:[%s15647_s9 + $0x764] ss:$8 sps:$4 sm:$0xff]  }
 0x1ff   :  { %3999 = vmatprep.subr.bf16.mxu0 %v10278_v56  ;;  %v10309_v56 = vld [vmem:[%s15647_s9 + $0x760] ss:$8 sps:$4 sm:$0xff]  }
 0x202   :  { %4000 = vmatpush1.bf16.msra.mxu0 %v10276_v34  ;;  %v10314_v34 = vld [vmem:[%s15647_s9 + $0x774] ss:$8 sps:$4 sm:$0xff]  }
 0x203   :  { %4001 = vmatprep.subr.bf16.mxu0 %v10281_v44  ;;  %v10312_v44 = vld [vmem:[%s15647_s9 + $0x770] ss:$8 sps:$4 sm:$0xff]  }
 0x206   :  { %4002 = vmatpush1.bf16.msra.mxu0 %v10279_v31  ;;  %v10317_v31 = vld [vmem:[%s15647_s9 + $0x784] ss:$8 sps:$4 sm:$0xff]  }
 0x207   :  { %4003 = vmatprep.subr.bf16.mxu0 %v10284_v39  ;;  %v10315_v39 = vld [vmem:[%s15647_s9 + $0x780] ss:$8 sps:$4 sm:$0xff]  }
 0x20a   :  { %4004 = vmatpush1.bf16.msra.mxu0 %v10282_v36  ;;  %v10320_v36 = vld [vmem:[%s15647_s9 + $0x794] ss:$8 sps:$4 sm:$0xff]  }
 0x20b   :  { %4005 = vmatprep.subr.bf16.mxu0 %v10287_v29  ;;  %v10318_v29 = vld [vmem:[%s15647_s9 + $0x790] ss:$8 sps:$4 sm:$0xff]  }
 0x20e   :  { %4006 = vmatpush1.bf16.msra.mxu0 %v10285_v37  ;;  %v10323_v37 = vld [vmem:[%s15647_s9 + $0x7a4] ss:$8 sps:$4 sm:$0xff]  }
 0x20f   :  { %4007 = vmatprep.subr.bf16.mxu0 %v10290_v15  ;;  %v10321_v15 = vld [vmem:[%s15647_s9 + $0x7a0] ss:$8 sps:$4 sm:$0xff]  }
 0x212   :  { %4008 = vmatpush1.bf16.msra.mxu0 %v10288_v54  ;;  %v10326_v54 = vld [vmem:[%s15647_s9 + $0x7b4] ss:$8 sps:$4 sm:$0xff]  }
 0x213   :  { %4020 = vmatprep.subr.bf16.mxu0 %v10293_v50  ;;  %v10324_v50 = vld [vmem:[%s15647_s9 + $0x7b0] ss:$8 sps:$4 sm:$0xff]  }
 0x215   :  { %4010 = vmatmul.mubr.bf16.vlgmr.msra.gmra.mrb[16].mxu0 %v15661_v21  ;;  %v10332_v21 = vld [vmem:[%s15647_s9 + $0x7d4] ss:$8 sps:$4 sm:$0xff]  }
 0x216   :  { %4021 = vmatpush1.bf16.msra.mxu0 %v10291_v58  ;;  %4052 = vmatprep.mubr.bf16.mxu0 %v11922_v27  ;;  %v10300_v27 = vld [vmem:[%s15647_s9 + $0x730] ss:$8 sps:$4 sm:$0xff]   ;;  %v10329_v58 = vld [vmem:[%s15647_s9 + $0x7c4] ss:$8 sps:$4 sm:$0xff]  }
 0x217   :  { %4022 = vmatprep.subr.bf16.mxu0 %v10296_v45  ;;  %v10327_v45 = vld [vmem:[%s15647_s9 + $0x7c0] ss:$8 sps:$4 sm:$0xff]  }
 0x21a   :  { %4023 = vmatpush1.bf16.msra.mxu0 %v10294_v0  ;;  %v10330_v0 = vld [vmem:[%s15647_s9 + $0x7d0] ss:$8 sps:$4 sm:$0xff]  }
 0x21b   :  { %4024 = vmatprep.subr.bf16.mxu0 %v10299_v3  ;;  %v10335_v3 = vld [vmem:[%s15647_s9 + $0x7e4] ss:$8 sps:$4 sm:$0xff]  }
 0x21e   :  { %4025 = vmatpush1.bf16.msra.mxu0 %v10297_v57  ;;  %v10333_v57 = vld [vmem:[%s15647_s9 + $0x7e0] ss:$8 sps:$4 sm:$0xff]  }
 0x21f   :  { %4026 = vmatprep.subr.bf16.mxu0 %v10302_v61  ;;  %v10338_v61 = vld [vmem:[%s15647_s9 + $0x7f4] ss:$8 sps:$4 sm:$0xff]  }
 0x222   :  { %4027 = vmatpush1.bf16.msra.mxu0 %v10300_v27  ;;  %v10336_v27 = vld [vmem:[%s15647_s9 + $0x7f0] ss:$8 sps:$4 sm:$0xff]  }
 0x223   :  { %4028 = vmatprep.subr.bf16.mxu0 %v10305_v46  ;;  %v10341_v46 = vld [vmem:[%s15647_s9 + $0x804] ss:$8 sps:$4 sm:$0xff]  }
 0x226   :  { %4029 = vmatpush1.bf16.msra.mxu0 %v10303_v20  ;;  %v10339_v20 = vld [vmem:[%s15647_s9 + $0x800] ss:$8 sps:$4 sm:$0xff]  }
 0x227   :  { %4030 = vmatprep.subr.bf16.mxu0 %v10308_v10  ;;  %v10344_v10 = vld [vmem:[%s15647_s9 + $0x814] ss:$8 sps:$4 sm:$0xff]  }
 0x22a   :  { %4031 = vmatpush1.bf16.msra.mxu0 %v10306_v26  ;;  %v15662_v26 = vld [vmem:[#allocation7_spill] sm:$0xff] }
 0x22b   :  { %4032 = vmatprep.subr.bf16.mxu0 %v10311_v6  ;;  %v10342_v6 = vld [vmem:[%s15647_s9 + $0x810] ss:$8 sps:$4 sm:$0xff]  }
 0x22e   :  { %4033 = vmatpush1.bf16.msra.mxu0 %v10309_v56  ;;  %v15663_v56 = vld [vmem:[#allocation2_spill] sm:$0xff] }
 0x22f   :  { %4034 = vmatprep.subr.bf16.mxu0 %v10314_v34  ;;  %v10347_v34 = vld [vmem:[%s15647_s9 + $0x824] ss:$8 sps:$4 sm:$0xff]  }
 0x232   :  { %4035 = vmatpush1.bf16.msra.mxu0 %v10312_v44  ;;  %v10345_v44 = vld [vmem:[%s15647_s9 + $0x820] ss:$8 sps:$4 sm:$0xff]  }
 0x233   :  { %4036 = vmatprep.subr.bf16.mxu0 %v10317_v31  ;;  %v10350_v31 = vld [vmem:[%s15647_s9 + $0x834] ss:$8 sps:$4 sm:$0xff]  }
 0x236   :  { %4037 = vmatpush1.bf16.msra.mxu0 %v10315_v39  ;;  %v10348_v39 = vld [vmem:[%s15647_s9 + $0x830] ss:$8 sps:$4 sm:$0xff]  }
 0x237   :  { %4038 = vmatprep.subr.bf16.mxu0 %v10320_v36  ;;  %v10353_v36 = vld [vmem:[%s15647_s9 + $0x844] ss:$8 sps:$4 sm:$0xff]  }
 0x23a   :  { %4039 = vmatpush1.bf16.msra.mxu0 %v10318_v29  ;;  %v10351_v29 = vld [vmem:[%s15647_s9 + $0x840] ss:$8 sps:$4 sm:$0xff]  }
 0x23b   :  { %4040 = vmatprep.subr.bf16.mxu0 %v10323_v37  ;;  %v10356_v37 = vld [vmem:[%s15647_s9 + $0x854] ss:$8 sps:$4 sm:$0xff]  }
 0x23e   :  { %4041 = vmatpush1.bf16.msra.mxu0 %v10321_v15  ;;  %v10354_v15 = vld [vmem:[%s15647_s9 + $0x850] ss:$8 sps:$4 sm:$0xff]  }
 0x23f   :  { %4042 = vmatprep.subr.bf16.mxu0 %v10326_v54  ;;  %v10359_v54 = vld [vmem:[%s15647_s9 + $0x864] ss:$8 sps:$4 sm:$0xff]  }
 0x242   :  { %4043 = vmatpush1.bf16.msra.mxu0 %v10324_v50 }
 0x243   :  { %4044 = vmatprep.subr.bf16.mxu0 %v10329_v58 }
 0x246   :  { %4045 = vmatpush1.bf16.msra.mxu0 %v10327_v45  ;;  %v10357_v45 = vld [vmem:[%s15647_s9 + $0x860] ss:$8 sps:$4 sm:$0xff]  }
 0x247   :  { %4046 = vmatprep.subr.bf16.mxu0 %v10332_v21 }
 0x24a   :  { %4047 = vmatpush1.bf16.msra.mxu0 %v10330_v0  ;;  %v10362_v0 = vld [vmem:[%s15647_s9 + $0x874] ss:$8 sps:$4 sm:$0xff]  }
 0x24b   :  { %4048 = vmatprep.subr.bf16.mxu0 %v10335_v3 }
 0x24e   :  { %4049 = vmatpush1.bf16.msra.mxu0 %v10333_v57  ;;  %v10360_v57 = vld [vmem:[%s15647_s9 + $0x870] ss:$8 sps:$4 sm:$0xff]  }
 0x24f   :  { %4050 = vmatprep.subr.bf16.mxu0 %v10338_v61  ;;  %v10365_v61 = vld [vmem:[%s15647_s9 + $0x884] ss:$8 sps:$4 sm:$0xff]  }
 0x252   :  { %4051 = vmatpush1.bf16.msra.mxu0 %v10336_v27  ;;  %v10363_v27 = vld [vmem:[%s15647_s9 + $0x880] ss:$8 sps:$4 sm:$0xff]  }
 0x253   :  { %4063 = vmatprep.subr.bf16.mxu0 %v10341_v46  ;;  %v10368_v46 = vld [vmem:[%s15647_s9 + $0x894] ss:$8 sps:$4 sm:$0xff]  }
 0x255   :  { %4053 = vmatmul.mubr.bf16.vlgmr.msra.gmra.mrb[16].mxu0 %v15662_v26  ;;  %v10369_v26 = vld [vmem:[%s15647_s9 + $0x8a0] ss:$8 sps:$4 sm:$0xff]  }
 0x256   :  { %4064 = vmatpush1.bf16.msra.mxu0 %v10339_v20  ;;  %4095 = vmatprep.mubr.bf16.mxu0 %v15663_v56  ;;  %v10366_v20 = vld [vmem:[%s15647_s9 + $0x890] ss:$8 sps:$4 sm:$0xff]  }
 0x257   :  { %4065 = vmatprep.subr.bf16.mxu0 %v10344_v10  ;;  %v10371_v10 = vld [vmem:[%s15647_s9 + $0x8a4] ss:$8 sps:$4 sm:$0xff]   ;;  %v10372_v56 = vld [vmem:[%s15647_s9 + $0x8b0] ss:$8 sps:$4 sm:$0xff]  }
 0x25a   :  { %4066 = vmatpush1.bf16.msra.mxu0 %v10342_v6  ;;  %v10374_v6 = vld [vmem:[%s15647_s9 + $0x8b4] ss:$8 sps:$4 sm:$0xff]  }
 0x25b   :  { %4067 = vmatprep.subr.bf16.mxu0 %v10347_v34  ;;  %v10377_v34 = vld [vmem:[%s15647_s9 + $0x8c4] ss:$8 sps:$4 sm:$0xff]  }
 0x25e   :  { %4068 = vmatpush1.bf16.msra.mxu0 %v10345_v44  ;;  %v10375_v44 = vld [vmem:[%s15647_s9 + $0x8c0] ss:$8 sps:$4 sm:$0xff]  }
 0x25f   :  { %4069 = vmatprep.subr.bf16.mxu0 %v10350_v31  ;;  %v10380_v31 = vld [vmem:[%s15647_s9 + $0x8d4] ss:$8 sps:$4 sm:$0xff]  }
 0x262   :  { %4070 = vmatpush1.bf16.msra.mxu0 %v10348_v39  ;;  %v10378_v39 = vld [vmem:[%s15647_s9 + $0x8d0] ss:$8 sps:$4 sm:$0xff]  }
 0x263   :  { %4071 = vmatprep.subr.bf16.mxu0 %v10353_v36  ;;  %v10383_v36 = vld [vmem:[%s15647_s9 + $0x8e4] ss:$8 sps:$4 sm:$0xff]  }
 0x266   :  { %4072 = vmatpush1.bf16.msra.mxu0 %v10351_v29  ;;  %v10381_v29 = vld [vmem:[%s15647_s9 + $0x8e0] ss:$8 sps:$4 sm:$0xff]  }
 0x267   :  { %4073 = vmatprep.subr.bf16.mxu0 %v10356_v37  ;;  %v10386_v37 = vld [vmem:[%s15647_s9 + $0x8f4] ss:$8 sps:$4 sm:$0xff]  }
 0x269   :  { %v12964_v50 = vpop.f32.mrb[16].mxu1 }
 0x26a   :  { %v12966_v58 = vpop.f32.mrb[17].mxu1  ;;  %4074 = vmatpush1.bf16.msra.mxu0 %v10354_v15  ;;  %v10384_v15 = vld [vmem:[%s15647_s9 + $0x8f0] ss:$8 sps:$4 sm:$0xff]  }
 0x26b   :  { %v12971_v21 = vpop.f32.mrb[18].mxu1  ;;  %4075 = vmatprep.subr.bf16.mxu0 %v10359_v54  ;;  %v10389_v54 = vld [vmem:[%s15647_s9 + $0x904] ss:$8 sps:$4 sm:$0xff]  }
 0x26c   :  { %v12976_v3 = vpop.f32.mrb[19].mxu1 }
 0x26e   :  { %4076 = vmatpush1.bf16.msra.mxu0 %v10357_v45  ;;  %v10387_v45 = vld [vmem:[%s15647_s9 + $0x900] ss:$8 sps:$4 sm:$0xff]  }
 0x26f   :  { %4077 = vmatprep.subr.bf16.mxu0 %v10362_v0  ;;  %v10392_v0 = vld [vmem:[%s15647_s9 + $0x914] ss:$8 sps:$4 sm:$0xff]  }
 0x272   :  { %4078 = vmatpush1.bf16.msra.mxu0 %v10360_v57  ;;  %v15664_v57 = vld [vmem:[#allocation8_spill] sm:$0xff] }
 0x273   :  { %4079 = vmatprep.subr.bf16.mxu0 %v10365_v61  ;;  %v10390_v61 = vld [vmem:[%s15647_s9 + $0x910] ss:$8 sps:$4 sm:$0xff]  }
 0x276   :  { %4080 = vmatpush1.bf16.msra.mxu0 %v10363_v27  ;;  %v15665_v27 = vld [vmem:[#allocation9_spill] sm:$0xff] }
 0x277   :  { %4081 = vmatprep.subr.bf16.mxu0 %v10368_v46  ;;  %v10395_v46 = vld [vmem:[%s15647_s9 + $0x924] ss:$8 sps:$4 sm:$0xff]  }
 0x27a   :  { %4082 = vmatpush1.bf16.msra.mxu0 %v10366_v20  ;;  %v10393_v20 = vld [vmem:[%s15647_s9 + $0x920] ss:$8 sps:$4 sm:$0xff]  }
 0x27b   :  { %4083 = vmatprep.subr.bf16.mxu0 %v10371_v10  ;;  %v10398_v10 = vld [vmem:[%s15647_s9 + $0x934] ss:$8 sps:$4 sm:$0xff]  }
 0x27e   :  { %4084 = vmatpush1.bf16.msra.mxu0 %v10369_v26  ;;  %v10396_v26 = vld [vmem:[%s15647_s9 + $0x930] ss:$8 sps:$4 sm:$0xff]  }
 0x27f   :  { %4085 = vmatprep.subr.bf16.mxu0 %v10374_v6  ;;  %v10401_v6 = vld [vmem:[%s15647_s9 + $0x944] ss:$8 sps:$4 sm:$0xff]  }
 0x282   :  { %4086 = vmatpush1.bf16.msra.mxu0 %v10372_v56  ;;  %v10399_v56 = vld [vmem:[%s15647_s9 + $0x940] ss:$8 sps:$4 sm:$0xff]  }
 0x283   :  { %4087 = vmatprep.subr.bf16.mxu0 %v10377_v34  ;;  %v10404_v34 = vld [vmem:[%s15647_s9 + $0x954] ss:$8 sps:$4 sm:$0xff]  }
 0x286   :  { %4088 = vmatpush1.bf16.msra.mxu0 %v10375_v44  ;;  %v10402_v44 = vld [vmem:[%s15647_s9 + $0x950] ss:$8 sps:$4 sm:$0xff]  }
 0x287   :  { %4089 = vmatprep.subr.bf16.mxu0 %v10380_v31  ;;  %v10407_v31 = vld [vmem:[%s15647_s9 + $0x964] ss:$8 sps:$4 sm:$0xff]  }
 0x28a   :  { %4090 = vmatpush1.bf16.msra.mxu0 %v10378_v39  ;;  %v10405_v39 = vld [vmem:[%s15647_s9 + $0x960] ss:$8 sps:$4 sm:$0xff]  }
 0x28b   :  { %4091 = vmatprep.subr.bf16.mxu0 %v10383_v36  ;;  %v10410_v36 = vld [vmem:[%s15647_s9 + $0x974] ss:$8 sps:$4 sm:$0xff]  }
 0x28e   :  { %4092 = vmatpush1.bf16.msra.mxu0 %v10381_v29  ;;  %v10408_v29 = vld [vmem:[%s15647_s9 + $0x970] ss:$8 sps:$4 sm:$0xff]  }
 0x28f   :  { %4093 = vmatprep.subr.bf16.mxu0 %v10386_v37  ;;  %v10413_v37 = vld [vmem:[%s15647_s9 + $0x984] ss:$8 sps:$4 sm:$0xff]  }
 0x292   :  { %4094 = vmatpush1.bf16.msra.mxu0 %v10384_v15  ;;  %v10411_v15 = vld [vmem:[%s15647_s9 + $0x980] ss:$8 sps:$4 sm:$0xff]  }
 0x293   :  { %4106 = vmatprep.subr.bf16.mxu0 %v10389_v54  ;;  %v10416_v54 = vld [vmem:[%s15647_s9 + $0x994] ss:$8 sps:$4 sm:$0xff]  }
 0x295   :  { %4096 = vmatmul.mubr.bf16.vlgmr.msra.gmra.mrb[16].mxu0 %v15664_v57  ;;  %v10417_v57 = vld [vmem:[%s15647_s9 + $0x9a0] ss:$8 sps:$4 sm:$0xff]  }
 0x296   :  { %4107 = vmatpush1.bf16.msra.mxu0 %v10387_v45  ;;  %4138 = vmatprep.mubr.bf16.mxu0 %v15665_v27  ;;  %v10414_v45 = vld [vmem:[%s15647_s9 + $0x990] ss:$8 sps:$4 sm:$0xff]  }
 0x297   :  { %4108 = vmatprep.subr.bf16.mxu0 %v10392_v0  ;;  %v10419_v0 = vld [vmem:[%s15647_s9 + $0x9a4] ss:$8 sps:$4 sm:$0xff]   ;;  %v10420_v27 = vld [vmem:[%s15647_s9 + $0x9b0] ss:$8 sps:$4 sm:$0xff]  }
 0x29a   :  { %4109 = vmatpush1.bf16.msra.mxu0 %v10390_v61  ;;  %v10422_v61 = vld [vmem:[%s15647_s9 + $0x9b4] ss:$8 sps:$4 sm:$0xff]  }
 0x29b   :  { %4110 = vmatprep.subr.bf16.mxu0 %v10395_v46  ;;  %v10425_v46 = vld [vmem:[%s15647_s9 + $0x9c4] ss:$8 sps:$4 sm:$0xff]  }
 0x29e   :  { %4111 = vmatpush1.bf16.msra.mxu0 %v10393_v20  ;;  %v10423_v20 = vld [vmem:[%s15647_s9 + $0x9c0] ss:$8 sps:$4 sm:$0xff]  }
 0x29f   :  { %4112 = vmatprep.subr.bf16.mxu0 %v10398_v10  ;;  %v10428_v10 = vld [vmem:[%s15647_s9 + $0x9d4] ss:$8 sps:$4 sm:$0xff]  }
 0x2a2   :  { %4113 = vmatpush1.bf16.msra.mxu0 %v10396_v26  ;;  %v10426_v26 = vld [vmem:[%s15647_s9 + $0x9d0] ss:$8 sps:$4 sm:$0xff]  }
 0x2a3   :  { %4114 = vmatprep.subr.bf16.mxu0 %v10401_v6  ;;  %v10431_v6 = vld [vmem:[%s15647_s9 + $0x9e4] ss:$8 sps:$4 sm:$0xff]  }
 0x2a6   :  { %4115 = vmatpush1.bf16.msra.mxu0 %v10399_v56  ;;  %v10429_v56 = vld [vmem:[%s15647_s9 + $0x9e0] ss:$8 sps:$4 sm:$0xff]  }
 0x2a7   :  { %4116 = vmatprep.subr.bf16.mxu0 %v10404_v34  ;;  %v10434_v34 = vld [vmem:[%s15647_s9 + $0x9f4] ss:$8 sps:$4 sm:$0xff]  }
 0x2aa   :  { %4117 = vmatpush1.bf16.msra.mxu0 %v10402_v44  ;;  %v10432_v44 = vld [vmem:[%s15647_s9 + $0x9f0] ss:$8 sps:$4 sm:$0xff]  }
 0x2ab   :  { %4118 = vmatprep.subr.bf16.mxu0 %v10407_v31  ;;  %v10437_v31 = vld [vmem:[%s15647_s9 + $0xa04] ss:$8 sps:$4 sm:$0xff]  }
 0x2ae   :  { %4119 = vmatpush1.bf16.msra.mxu0 %v10405_v39  ;;  %v10435_v39 = vld [vmem:[%s15647_s9 + $0xa00] ss:$8 sps:$4 sm:$0xff]  }
 0x2af   :  { %4120 = vmatprep.subr.bf16.mxu0 %v10410_v36  ;;  %v10440_v36 = vld [vmem:[%s15647_s9 + $0xa14] ss:$8 sps:$4 sm:$0xff]  }
 0x2b2   :  { %4121 = vmatpush1.bf16.msra.mxu0 %v10408_v29  ;;  %v15666_v29 = vld [vmem:[#allocation4_spill] sm:$0xff] }
 0x2b3   :  { %4122 = vmatprep.subr.bf16.mxu0 %v10413_v37  ;;  %v15667_v37 = vpack.c.bf16 %v11781_v14, %v11778_v13  ;;  %v10446_v13 = vld [vmem:[%s15647_s9 + $0xa34] ss:$8 sps:$4 sm:$0xff]   ;;  %v10444_v14 = vld [vmem:[%s15647_s9 + $0xa30] ss:$8 sps:$4 sm:$0xff]  }
 0x2b6   :  { %4123 = vmatpush1.bf16.msra.mxu0 %v10411_v15  ;;  %v10438_v15 = vld [vmem:[%s15647_s9 + $0xa10] ss:$8 sps:$4 sm:$0xff]  }
 0x2b7   :  { %4124 = vmatprep.subr.bf16.mxu0 %v10416_v54  ;;  %v10443_v54 = vld [vmem:[%s15647_s9 + $0xa24] ss:$8 sps:$4 sm:$0xff]  }
 0x2ba   :  { %4125 = vmatpush1.bf16.msra.mxu0 %v10414_v45  ;;  %v10441_v45 = vld [vmem:[%s15647_s9 + $0xa20] ss:$8 sps:$4 sm:$0xff]  }
 0x2bb   :  { %4126 = vmatprep.subr.bf16.mxu0 %v10419_v0  ;;  %v10449_v0 = vld [vmem:[%s15647_s9 + $0xa44] ss:$8 sps:$4 sm:$0xff]  }
 0x2be   :  { %4127 = vmatpush1.bf16.msra.mxu0 %v10417_v57  ;;  %v10447_v57 = vld [vmem:[%s15647_s9 + $0xa40] ss:$8 sps:$4 sm:$0xff]  }
 0x2bf   :  { %4128 = vmatprep.subr.bf16.mxu0 %v10422_v61  ;;  %v10452_v61 = vld [vmem:[%s15647_s9 + $0xa54] ss:$8 sps:$4 sm:$0xff]  }
 0x2c2   :  { %4129 = vmatpush1.bf16.msra.mxu0 %v10420_v27  ;;  %v10450_v27 = vld [vmem:[%s15647_s9 + $0xa50] ss:$8 sps:$4 sm:$0xff]  }
 0x2c3   :  { %4130 = vmatprep.subr.bf16.mxu0 %v10425_v46  ;;  %v10455_v46 = vld [vmem:[%s15647_s9 + $0xa64] ss:$8 sps:$4 sm:$0xff]  }
 0x2c6   :  { %4131 = vmatpush1.bf16.msra.mxu0 %v10423_v20  ;;  %v10453_v20 = vld [vmem:[%s15647_s9 + $0xa60] ss:$8 sps:$4 sm:$0xff]  }
 0x2c7   :  { %4132 = vmatprep.subr.bf16.mxu0 %v10428_v10  ;;  %v10458_v10 = vld [vmem:[%s15647_s9 + $0xa74] ss:$8 sps:$4 sm:$0xff]  }
 0x2ca   :  { %4133 = vmatpush1.bf16.msra.mxu0 %v10426_v26  ;;  %v10456_v26 = vld [vmem:[%s15647_s9 + $0xa70] ss:$8 sps:$4 sm:$0xff]  }
 0x2cb   :  { %4134 = vmatprep.subr.bf16.mxu0 %v10431_v6  ;;  %v10461_v6 = vld [vmem:[%s15647_s9 + $0xa84] ss:$8 sps:$4 sm:$0xff]  }
 0x2ce   :  { %4135 = vmatpush1.bf16.msra.mxu0 %v10429_v56  ;;  %v10459_v56 = vld [vmem:[%s15647_s9 + $0xa80] ss:$8 sps:$4 sm:$0xff]  }
 0x2cf   :  { %4136 = vmatprep.subr.bf16.mxu0 %v10434_v34  ;;  %v10464_v34 = vld [vmem:[%s15647_s9 + $0xa94] ss:$8 sps:$4 sm:$0xff]  }
 0x2d2   :  { %4137 = vmatpush1.bf16.msra.mxu0 %v10432_v44  ;;  %v10462_v44 = vld [vmem:[%s15647_s9 + $0xa90] ss:$8 sps:$4 sm:$0xff]  }
 0x2d3   :  { %4149 = vmatprep.subr.bf16.mxu0 %v10437_v31  ;;  %v10467_v31 = vld [vmem:[%s15647_s9 + $0xaa4] ss:$8 sps:$4 sm:$0xff]  }
 0x2d5   :  { %4139 = vmatmul.mubr.bf16.vlgmr.msra.gmra.mrb[16].mxu0 %v15666_v29  ;;  %v10468_v29 = vld [vmem:[%s15647_s9 + $0xab0] ss:$8 sps:$4 sm:$0xff]  }
 0x2d6   :  { %4150 = vmatpush1.bf16.msra.mxu0 %v10435_v39  ;;  %4181 = vmatprep.mubr.bf16.mxu0 %v15667_v37  ;;  %v10465_v39 = vld [vmem:[%s15647_s9 + $0xaa0] ss:$8 sps:$4 sm:$0xff]   ;;  %v10473_v37 = vld [vmem:[%s15647_s9 + $0xac4] ss:$8 sps:$4 sm:$0xff]  }
 0x2d7   :  { %4151 = vmatprep.subr.bf16.mxu0 %v10440_v36  ;;  %v10470_v36 = vld [vmem:[%s15647_s9 + $0xab4] ss:$8 sps:$4 sm:$0xff]  }
 0x2da   :  { %4152 = vmatpush1.bf16.msra.mxu0 %v10438_v15  ;;  %v10471_v15 = vld [vmem:[%s15647_s9 + $0xac0] ss:$8 sps:$4 sm:$0xff]  }
 0x2db   :  { %4153 = vmatprep.subr.bf16.mxu0 %v10443_v54  ;;  %v10476_v54 = vld [vmem:[%s15647_s9 + $0xad4] ss:$8 sps:$4 sm:$0xff]  }
 0x2de   :  { %4154 = vmatpush1.bf16.msra.mxu0 %v10441_v45  ;;  %v10474_v45 = vld [vmem:[%s15647_s9 + $0xad0] ss:$8 sps:$4 sm:$0xff]  }
 0x2df   :  { %4155 = vmatprep.subr.bf16.mxu0 %v10446_v13  ;;  %v10479_v13 = vld [vmem:[%s15647_s9 + $0xae4] ss:$8 sps:$4 sm:$0xff]  }
 0x2e2   :  { %4156 = vmatpush1.bf16.msra.mxu0 %v10444_v14  ;;  %v10477_v14 = vld [vmem:[%s15647_s9 + $0xae0] ss:$8 sps:$4 sm:$0xff]  }
 0x2e3   :  { %4157 = vmatprep.subr.bf16.mxu0 %v10449_v0  ;;  %v10482_v0 = vld [vmem:[%s15647_s9 + $0xaf4] ss:$8 sps:$4 sm:$0xff]  }
 0x2e6   :  { %4158 = vmatpush1.bf16.msra.mxu0 %v10447_v57  ;;  %v10480_v57 = vld [vmem:[%s15647_s9 + $0xaf0] ss:$8 sps:$4 sm:$0xff]  }
 0x2e7   :  { %4159 = vmatprep.subr.bf16.mxu0 %v10452_v61  ;;  %v10485_v61 = vld [vmem:[%s15647_s9 + $0xb04] ss:$8 sps:$4 sm:$0xff]  }
 0x2ea   :  { %4160 = vmatpush1.bf16.msra.mxu0 %v10450_v27  ;;  %v10483_v27 = vld [vmem:[%s15647_s9 + $0xb00] ss:$8 sps:$4 sm:$0xff]  }
 0x2eb   :  { %4161 = vmatprep.subr.bf16.mxu0 %v10455_v46  ;;  %v10488_v46 = vld [vmem:[%s15647_s9 + $0xb14] ss:$8 sps:$4 sm:$0xff]  }
 0x2ee   :  { %4162 = vmatpush1.bf16.msra.mxu0 %v10453_v20  ;;  %v15668_v20 = vpack.c.bf16 %v11789_v55, %v11786_v19  ;;  %v10489_v19 = vld [vmem:[%s15647_s9 + $0xb20] ss:$8 sps:$4 sm:$0xff]   ;;  %v10494_v55 = vld [vmem:[%s15647_s9 + $0xb34] ss:$8 sps:$4 sm:$0xff]  }
 0x2ef   :  { %4163 = vmatprep.subr.bf16.mxu0 %v10458_v10  ;;  %v15669_v10 = vpack.c.bf16 %v11817_v22, %v11809_v11  ;;  %v10492_v11 = vld [vmem:[%s15647_s9 + $0xb30] ss:$8 sps:$4 sm:$0xff]   ;;  %v10497_v22 = vld [vmem:[%s15647_s9 + $0xb44] ss:$8 sps:$4 sm:$0xff]  }
 0x2f2   :  { %4164 = vmatpush1.bf16.msra.mxu0 %v10456_v26  ;;  %v10486_v26 = vld [vmem:[%s15647_s9 + $0xb10] ss:$8 sps:$4 sm:$0xff]  }
 0x2f3   :  { %4165 = vmatprep.subr.bf16.mxu0 %v10461_v6  ;;  %v10491_v6 = vld [vmem:[%s15647_s9 + $0xb24] ss:$8 sps:$4 sm:$0xff]  }
 0x2f6   :  { %4166 = vmatpush1.bf16.msra.mxu0 %v10459_v56  ;;  %v10495_v56 = vld [vmem:[%s15647_s9 + $0xb40] ss:$8 sps:$4 sm:$0xff]  }
 0x2f7   :  { %4167 = vmatprep.subr.bf16.mxu0 %v10464_v34  ;;  %v10500_v34 = vld [vmem:[%s15647_s9 + $0xb54] ss:$8 sps:$4 sm:$0xff]  }
 0x2fa   :  { %4168 = vmatpush1.bf16.msra.mxu0 %v10462_v44  ;;  %v10498_v44 = vld [vmem:[%s15647_s9 + $0xb50] ss:$8 sps:$4 sm:$0xff]  }
 0x2fb   :  { %4169 = vmatprep.subr.bf16.mxu0 %v10467_v31  ;;  %v10503_v31 = vld [vmem:[%s15647_s9 + $0xb64] ss:$8 sps:$4 sm:$0xff]  }
 0x2fe   :  { %4170 = vmatpush1.bf16.msra.mxu0 %v10465_v39  ;;  %v10501_v39 = vld [vmem:[%s15647_s9 + $0xb60] ss:$8 sps:$4 sm:$0xff]  }
 0x2ff   :  { %4171 = vmatprep.subr.bf16.mxu0 %v10470_v36  ;;  %v10506_v36 = vld [vmem:[%s15647_s9 + $0xb74] ss:$8 sps:$4 sm:$0xff]  }
 0x302   :  { %4172 = vmatpush1.bf16.msra.mxu0 %v10468_v29  ;;  %v10504_v29 = vld [vmem:[%s15647_s9 + $0xb70] ss:$8 sps:$4 sm:$0xff]  }
 0x303   :  { %4173 = vmatprep.subr.bf16.mxu0 %v10473_v37  ;;  %v10509_v37 = vld [vmem:[%s15647_s9 + $0xb84] ss:$8 sps:$4 sm:$0xff]  }
 0x306   :  { %4174 = vmatpush1.bf16.msra.mxu0 %v10471_v15  ;;  %v10507_v15 = vld [vmem:[%s15647_s9 + $0xb80] ss:$8 sps:$4 sm:$0xff]  }
 0x307   :  { %4175 = vmatprep.subr.bf16.mxu0 %v10476_v54  ;;  %v10512_v54 = vld [vmem:[%s15647_s9 + $0xb94] ss:$8 sps:$4 sm:$0xff]  }
 0x30a   :  { %4176 = vmatpush1.bf16.msra.mxu0 %v10474_v45  ;;  %v10510_v45 = vld [vmem:[%s15647_s9 + $0xb90] ss:$8 sps:$4 sm:$0xff]  }
 0x30b   :  { %4177 = vmatprep.subr.bf16.mxu0 %v10479_v13  ;;  %v10515_v13 = vld [vmem:[%s15647_s9 + $0xba4] ss:$8 sps:$4 sm:$0xff]  }
 0x30e   :  { %4178 = vmatpush1.bf16.msra.mxu0 %v10477_v14  ;;  %v10513_v14 = vld [vmem:[%s15647_s9 + $0xba0] ss:$8 sps:$4 sm:$0xff]  }
 0x30f   :  { %4179 = vmatprep.subr.bf16.mxu0 %v10482_v0  ;;  %v10518_v0 = vld [vmem:[%s15647_s9 + $0xbb4] ss:$8 sps:$4 sm:$0xff]  }
 0x312   :  { %4180 = vmatpush1.bf16.msra.mxu0 %v10480_v57  ;;  %v10516_v57 = vld [vmem:[%s15647_s9 + $0xbb0] ss:$8 sps:$4 sm:$0xff]  }
 0x313   :  { %4192 = vmatprep.subr.bf16.mxu0 %v10485_v61  ;;  %v10521_v61 = vld [vmem:[%s15647_s9 + $0xbc4] ss:$8 sps:$4 sm:$0xff]  }
 0x315   :  { %4182 = vmatmul.mubr.bf16.vlgmr.msra.gmra.mrb[16].mxu0 %v15668_v20  ;;  %v10522_v20 = vld [vmem:[%s15647_s9 + $0xbd0] ss:$8 sps:$4 sm:$0xff]  }
 0x316   :  { %4193 = vmatpush1.bf16.msra.mxu0 %v10483_v27  ;;  %4224 = vmatprep.mubr.bf16.mxu0 %v15669_v10  ;;  %v10519_v27 = vld [vmem:[%s15647_s9 + $0xbc0] ss:$8 sps:$4 sm:$0xff]   ;;  %v10527_v10 = vld [vmem:[%s15647_s9 + $0xbe4] ss:$8 sps:$4 sm:$0xff]  }
 0x317   :  { %4194 = vmatprep.subr.bf16.mxu0 %v10488_v46  ;;  %v10524_v46 = vld [vmem:[%s15647_s9 + $0xbd4] ss:$8 sps:$4 sm:$0xff]  }
 0x31a   :  { %4195 = vmatpush1.bf16.msra.mxu0 %v10486_v26  ;;  %v11127_v26 = vld [vmem:[%s15612_s27 + $0x28] sm:$0xff] }
 0x31b   :  { %4196 = vmatprep.subr.bf16.mxu0 %v10491_v6  ;;  %v741_v6 = vrot.slane %v11127_v26, 1  ;;  %v10552_v26 = vld [vmem:[%s15647_s9 + $0xc70] ss:$8 sps:$4 sm:$0xff]  }
 0x31e   :  { %4197 = vmatpush1.bf16.msra.mxu0 %v10489_v19  ;;  %v11128_v19 = vld [vmem:[%s15612_s27 + $0x78] sm:$0xff]  ;;  %s11137_s27 = smov 126  }
 0x31f   :  { %4198 = vmatprep.subr.bf16.mxu0 %v10494_v55  ;;  %v751_v55 = vrot.slane %v11128_v19, 1  ;;  %v10555_v19 = vld [vmem:[%s15647_s9 + $0xc80] ss:$8 sps:$4 sm:$0xff]  }
 0x322   :  { %4199 = vmatpush1.bf16.msra.mxu0 %v10492_v11  ;;  %v10525_v11 = vld [vmem:[%s15647_s9 + $0xbe0] ss:$8 sps:$4 sm:$0xff]  }
 0x323   :  { %4200 = vmatprep.subr.bf16.mxu0 %v10497_v22  ;;  %v10530_v22 = vld [vmem:[%s15647_s9 + $0xbf4] ss:$8 sps:$4 sm:$0xff]  }
 0x326   :  { %4201 = vmatpush1.bf16.msra.mxu0 %v10495_v56  ;;  %v762_v56 = vsel %vm15598_vm4, %v741_v6, %v751_v55 }
 0x327   :  { %4202 = vmatprep.subr.bf16.mxu0 %v10500_v34  ;;  %v772_v34 = vsel %vm15598_vm4, %v751_v55, %v741_v6  ;;  %v10557_v6 = vld [vmem:[%s15647_s9 + $0xc84] ss:$8 sps:$4 sm:$0xff]   ;;  %v10560_v55 = vld [vmem:[%s15647_s9 + $0xc94] ss:$8 sps:$4 sm:$0xff]  }
 0x32a   :  { %4203 = vmatpush1.bf16.msra.mxu0 %v10498_v44  ;;  %v10528_v44 = vld [vmem:[%s15647_s9 + $0xbf0] ss:$8 sps:$4 sm:$0xff]  }
 0x32b   :  { %4204 = vmatprep.subr.bf16.mxu0 %v10503_v31  ;;  %v10533_v31 = vld [vmem:[%s15647_s9 + $0xc04] ss:$8 sps:$4 sm:$0xff]  }
 0x32e   :  { %4205 = vmatpush1.bf16.msra.mxu0 %v10501_v39  ;;  %v792_v39 = vmul.f32 %v11697_v49, %v762_v56  ;;  %v10561_v56 = vld [vmem:[%s15647_s9 + $0xca0] ss:$8 sps:$4 sm:$0xff]  }
 0x32f   :  { %4206 = vmatprep.subr.bf16.mxu0 %v10506_v36  ;;  %v802_v36 = vmul.f32 %v11706_v52, %v772_v34  ;;  %v10566_v34 = vld [vmem:[%s15647_s9 + $0xcb4] ss:$8 sps:$4 sm:$0xff]  }
 0x332   :  { %4207 = vmatpush1.bf16.msra.mxu0 %v10504_v29  ;;  %v10531_v29 = vld [vmem:[%s15647_s9 + $0xc00] ss:$8 sps:$4 sm:$0xff]  }
 0x333   :  { %4208 = vmatprep.subr.bf16.mxu0 %v10509_v37  ;;  %v10536_v37 = vld [vmem:[%s15647_s9 + $0xc14] ss:$8 sps:$4 sm:$0xff]  }
 0x336   :  { %4209 = vmatpush1.bf16.msra.mxu0 %v10507_v15  ;;  %v822_v15 = vpack.c.bf16 %v802_v36, %v792_v39  ;;  %v10567_v39 = vld [vmem:[%s15647_s9 + $0xcc0] ss:$8 sps:$4 sm:$0xff]   ;;  %v10572_v36 = vld [vmem:[%s15647_s9 + $0xcd4] ss:$8 sps:$4 sm:$0xff]  }
 0x337   :  { %4210 = vmatprep.subr.bf16.mxu0 %v10512_v54  ;;  %v15670_v54 = vpack.c.bf16 %v11839_v25, %v11836_v63  ;;  %v10542_v25 = vld [vmem:[%s15647_s9 + $0xc34] ss:$8 sps:$4 sm:$0xff]   ;;  %v10540_v63 = vld [vmem:[%s15647_s9 + $0xc30] ss:$8 sps:$4 sm:$0xff]  }
 0x33a   :  { %4211 = vmatpush1.bf16.msra.mxu0 %v10510_v45  ;;  %v10534_v45 = vld [vmem:[%s15647_s9 + $0xc10] ss:$8 sps:$4 sm:$0xff]  }
 0x33b   :  { %4212 = vmatprep.subr.bf16.mxu0 %v10515_v13  ;;  %v10539_v13 = vld [vmem:[%s15647_s9 + $0xc24] ss:$8 sps:$4 sm:$0xff]  }
 0x33e   :  { %4213 = vmatpush1.bf16.msra.mxu0 %v10513_v14  ;;  %v10537_v14 = vld [vmem:[%s15647_s9 + $0xc20] ss:$8 sps:$4 sm:$0xff]  }
 0x33f   :  { %4214 = vmatprep.subr.bf16.mxu0 %v10518_v0  ;;  %v10545_v0 = vld [vmem:[%s15647_s9 + $0xc44] ss:$8 sps:$4 sm:$0xff]  }
 0x342   :  { %4215 = vmatpush1.bf16.msra.mxu0 %v10516_v57  ;;  %v10543_v57 = vld [vmem:[%s15647_s9 + $0xc40] ss:$8 sps:$4 sm:$0xff]  }
 0x343   :  { %4216 = vmatprep.subr.bf16.mxu0 %v10521_v61  ;;  %v10548_v61 = vld [vmem:[%s15647_s9 + $0xc54] ss:$8 sps:$4 sm:$0xff]  }
 0x346   :  { %4217 = vmatpush1.bf16.msra.mxu0 %v10519_v27  ;;  %v10546_v27 = vld [vmem:[%s15647_s9 + $0xc50] ss:$8 sps:$4 sm:$0xff]  }
 0x347   :  { %4218 = vmatprep.subr.bf16.mxu0 %v10524_v46  ;;  %v10551_v46 = vld [vmem:[%s15647_s9 + $0xc64] ss:$8 sps:$4 sm:$0xff]  }
 0x34a   :  { %4219 = vmatpush1.bf16.msra.mxu0 %v10522_v20  ;;  %v10549_v20 = vld [vmem:[%s15647_s9 + $0xc60] ss:$8 sps:$4 sm:$0xff]  }
 0x34b   :  { %4220 = vmatprep.subr.bf16.mxu0 %v10527_v10  ;;  %v10554_v10 = vld [vmem:[%s15647_s9 + $0xc74] ss:$8 sps:$4 sm:$0xff]  }
 0x34e   :  { %4221 = vmatpush1.bf16.msra.mxu0 %v10525_v11  ;;  %v10558_v11 = vld [vmem:[%s15647_s9 + $0xc90] ss:$8 sps:$4 sm:$0xff]  }
 0x34f   :  { %4222 = vmatprep.subr.bf16.mxu0 %v10530_v22  ;;  %v10563_v22 = vld [vmem:[%s15647_s9 + $0xca4] ss:$8 sps:$4 sm:$0xff]  }
 0x352   :  { %4223 = vmatpush1.bf16.msra.mxu0 %v10528_v44  ;;  %v10564_v44 = vld [vmem:[%s15647_s9 + $0xcb0] ss:$8 sps:$4 sm:$0xff]  }
 0x353   :  { %4235 = vmatprep.subr.bf16.mxu0 %v10533_v31  ;;  %v10569_v31 = vld [vmem:[%s15647_s9 + $0xcc4] ss:$8 sps:$4 sm:$0xff]  }
 0x355   :  { %4225 = vmatmul.mubr.bf16.vlgmr.msra.gmra.mrb[16].mxu0 %v15670_v54  ;;  %v10578_v54 = vld [vmem:[%s15647_s9 + $0xcf4] ss:$8 sps:$4 sm:$0xff]  }
 0x356   :  { %4236 = vmatpush1.bf16.msra.mxu0 %v10531_v29  ;;  %4267 = vmatprep.mubr.bf16.mxu0 %v822_v15  ;;  %v10570_v29 = vld [vmem:[%s15647_s9 + $0xcd0] ss:$8 sps:$4 sm:$0xff]   ;;  %v10573_v15 = vld [vmem:[%s15647_s9 + $0xce0] ss:$8 sps:$4 sm:$0xff]  }
 0x357   :  { %4237 = vmatprep.subr.bf16.mxu0 %v10536_v37  ;;  %v10575_v37 = vld [vmem:[%s15647_s9 + $0xce4] ss:$8 sps:$4 sm:$0xff]  }
 0x35a   :  { %4238 = vmatpush1.bf16.msra.mxu0 %v10534_v45  ;;  %v10576_v45 = vld [vmem:[%s15647_s9 + $0xcf0] ss:$8 sps:$4 sm:$0xff]  }
 0x35b   :  { %4239 = vmatprep.subr.bf16.mxu0 %v10539_v13  ;;  %v10581_v13 = vld [vmem:[%s15647_s9 + $0xd04] ss:$8 sps:$4 sm:$0xff]  }
 0x35e   :  { %4240 = vmatpush1.bf16.msra.mxu0 %v10537_v14  ;;  %v10579_v14 = vld [vmem:[%s15647_s9 + $0xd00] ss:$8 sps:$4 sm:$0xff]  }
 0x35f   :  { %4241 = vmatprep.subr.bf16.mxu0 %v10542_v25  ;;  %v10584_v25 = vld [vmem:[%s15647_s9 + $0xd14] ss:$8 sps:$4 sm:$0xff]  }
 0x362   :  { %4242 = vmatpush1.bf16.msra.mxu0 %v10540_v63  ;;  %v15671_v63 = vpack.c.bf16 %v11875_v24, %v11872_v17  ;;  %v10585_v17 = vld [vmem:[%s15647_s9 + $0xd20] ss:$8 sps:$4 sm:$0xff]   ;;  %v10588_v24 = vld [vmem:[%s15647_s9 + $0xd30] ss:$8 sps:$4 sm:$0xff]  }
 0x363   :  { %4243 = vmatprep.subr.bf16.mxu0 %v10545_v0  ;;  %v15672_v0 = vpack.c.bf16 %v11889_v32, %v11886_v33  ;;  %v10590_v32 = vld [vmem:[%s15647_s9 + $0xd34] ss:$8 sps:$4 sm:$0xff]   ;;  %v10593_v33 = vld [vmem:[%s15647_s9 + $0xd44] ss:$8 sps:$4 sm:$0xff]  }
 0x366   :  { %4244 = vmatpush1.bf16.msra.mxu0 %v10543_v57  ;;  %v10582_v57 = vld [vmem:[%s15647_s9 + $0xd10] ss:$8 sps:$4 sm:$0xff]  }
 0x367   :  { %4245 = vmatprep.subr.bf16.mxu0 %v10548_v61  ;;  %v10587_v61 = vld [vmem:[%s15647_s9 + $0xd24] ss:$8 sps:$4 sm:$0xff]  }
 0x36a   :  { %4246 = vmatpush1.bf16.msra.mxu0 %v10546_v27  ;;  %v10591_v27 = vld [vmem:[%s15647_s9 + $0xd40] ss:$8 sps:$4 sm:$0xff]  }
 0x36b   :  { %4247 = vmatprep.subr.bf16.mxu0 %v10551_v46  ;;  %v10596_v46 = vld [vmem:[%s15647_s9 + $0xd54] ss:$8 sps:$4 sm:$0xff]  }
 0x36e   :  { %4248 = vmatpush1.bf16.msra.mxu0 %v10549_v20  ;;  %v10594_v20 = vld [vmem:[%s15647_s9 + $0xd50] ss:$8 sps:$4 sm:$0xff]  }
 0x36f   :  { %4249 = vmatprep.subr.bf16.mxu0 %v10554_v10  ;;  %v10599_v10 = vld [vmem:[%s15647_s9 + $0xd64] ss:$8 sps:$4 sm:$0xff]  }
 0x372   :  { %4250 = vmatpush1.bf16.msra.mxu0 %v10552_v26  ;;  %v10597_v26 = vld [vmem:[%s15647_s9 + $0xd60] ss:$8 sps:$4 sm:$0xff]  }
 0x373   :  { %4251 = vmatprep.subr.bf16.mxu0 %v10557_v6  ;;  %v10602_v6 = vld [vmem:[%s15647_s9 + $0xd74] ss:$8 sps:$4 sm:$0xff]  }
 0x376   :  { %4252 = vmatpush1.bf16.msra.mxu0 %v10555_v19  ;;  %v10600_v19 = vld [vmem:[%s15647_s9 + $0xd70] ss:$8 sps:$4 sm:$0xff]  }
 0x377   :  { %4253 = vmatprep.subr.bf16.mxu0 %v10560_v55  ;;  %v10605_v55 = vld [vmem:[%s15647_s9 + $0xd84] ss:$8 sps:$4 sm:$0xff]  }
 0x37a   :  { %4254 = vmatpush1.bf16.msra.mxu0 %v10558_v11  ;;  %v10603_v11 = vld [vmem:[%s15647_s9 + $0xd80] ss:$8 sps:$4 sm:$0xff]  }
 0x37b   :  { %4255 = vmatprep.subr.bf16.mxu0 %v10563_v22  ;;  %v10608_v22 = vld [vmem:[%s15647_s9 + $0xd94] ss:$8 sps:$4 sm:$0xff]  }
 0x37e   :  { %4256 = vmatpush1.bf16.msra.mxu0 %v10561_v56  ;;  %v10606_v56 = vld [vmem:[%s15647_s9 + $0xd90] ss:$8 sps:$4 sm:$0xff]  }
 0x37f   :  { %4257 = vmatprep.subr.bf16.mxu0 %v10566_v34  ;;  %v10611_v34 = vld [vmem:[%s15647_s9 + $0xda4] ss:$8 sps:$4 sm:$0xff]  }
 0x382   :  { %4258 = vmatpush1.bf16.msra.mxu0 %v10564_v44  ;;  %v10609_v44 = vld [vmem:[%s15647_s9 + $0xda0] ss:$8 sps:$4 sm:$0xff]  }
 0x383   :  { %4259 = vmatprep.subr.bf16.mxu0 %v10569_v31  ;;  %v10614_v31 = vld [vmem:[%s15647_s9 + $0xdb4] ss:$8 sps:$4 sm:$0xff]  }
 0x386   :  { %4260 = vmatpush1.bf16.msra.mxu0 %v10567_v39  ;;  %v10612_v39 = vld [vmem:[%s15647_s9 + $0xdb0] ss:$8 sps:$4 sm:$0xff]  }
 0x387   :  { %4261 = vmatprep.subr.bf16.mxu0 %v10572_v36  ;;  %v10617_v36 = vld [vmem:[%s15647_s9 + $0xdc4] ss:$8 sps:$4 sm:$0xff]  }
 0x38a   :  { %4262 = vmatpush1.bf16.msra.mxu0 %v10570_v29  ;;  %v10615_v29 = vld [vmem:[%s15647_s9 + $0xdc0] ss:$8 sps:$4 sm:$0xff]  }
 0x38b   :  { %4263 = vmatprep.subr.bf16.mxu0 %v10575_v37  ;;  %v10620_v37 = vld [vmem:[%s15647_s9 + $0xdd4] ss:$8 sps:$4 sm:$0xff]  }
 0x38e   :  { %4264 = vmatpush1.bf16.msra.mxu0 %v10573_v15  ;;  %v10618_v15 = vld [vmem:[%s15647_s9 + $0xdd0] ss:$8 sps:$4 sm:$0xff]  }
 0x38f   :  { %4265 = vmatprep.subr.bf16.mxu0 %v10578_v54  ;;  %v10623_v54 = vld [vmem:[%s15647_s9 + $0xde4] ss:$8 sps:$4 sm:$0xff]  }
 0x392   :  { %4266 = vmatpush1.bf16.msra.mxu0 %v10576_v45  ;;  %v10621_v45 = vld [vmem:[%s15647_s9 + $0xde0] ss:$8 sps:$4 sm:$0xff]  }
 0x393   :  { %4278 = vmatprep.subr.bf16.mxu0 %v10581_v13  ;;  %v10626_v13 = vld [vmem:[%s15647_s9 + $0xdf4] ss:$8 sps:$4 sm:$0xff]  }
 0x395   :  { %4268 = vmatmul.mubr.bf16.vlgmr.msra.gmra.mrb[16].mxu0 %v15671_v63  ;;  %v10627_v63 = vld [vmem:[%s15647_s9 + $0xe00] ss:$8 sps:$4 sm:$0xff]  }
 0x396   :  { %4279 = vmatpush1.bf16.msra.mxu0 %v10579_v14  ;;  %4310 = vmatprep.mubr.bf16.mxu0 %v15672_v0  ;;  %v10624_v14 = vld [vmem:[%s15647_s9 + $0xdf0] ss:$8 sps:$4 sm:$0xff]   ;;  %v10632_v0 = vld [vmem:[%s15647_s9 + $0xe14] ss:$8 sps:$4 sm:$0xff]  }
 0x397   :  { %4280 = vmatprep.subr.bf16.mxu0 %v10584_v25  ;;  %v10629_v25 = vld [vmem:[%s15647_s9 + $0xe04] ss:$8 sps:$4 sm:$0xff]  }
 0x39a   :  { %4281 = vmatpush1.bf16.msra.mxu0 %v10582_v57  ;;  %v15673_v57 = vpack.c.bf16 %v11908_v51, %v11905_v41  ;;  %v10633_v41 = vld [vmem:[%s15647_s9 + $0xe20] ss:$8 sps:$4 sm:$0xff]   ;;  %v10636_v51 = vld [vmem:[%s15647_s9 + $0xe30] ss:$8 sps:$4 sm:$0xff]  }
 0x39b   :  { %4282 = vmatprep.subr.bf16.mxu0 %v10587_v61  ;;  %v15674_v61 = vpack.c.bf16 %v11927_v16, %v11914_v59  ;;  %v10638_v16 = vld [vmem:[%s15647_s9 + $0xe34] ss:$8 sps:$4 sm:$0xff]   ;;  %v10641_v59 = vld [vmem:[%s15647_s9 + $0xe44] ss:$8 sps:$4 sm:$0xff]  }
 0x39e   :  { %4283 = vmatpush1.bf16.msra.mxu0 %v10585_v17  ;;  %v10630_v17 = vld [vmem:[%s15647_s9 + $0xe10] ss:$8 sps:$4 sm:$0xff]  }
 0x39f   :  { %4284 = vmatprep.subr.bf16.mxu0 %v10590_v32  ;;  %v10635_v32 = vld [vmem:[%s15647_s9 + $0xe24] ss:$8 sps:$4 sm:$0xff]  }
 0x3a2   :  { %4285 = vmatpush1.bf16.msra.mxu0 %v10588_v24  ;;  %v10639_v24 = vld [vmem:[%s15647_s9 + $0xe40] ss:$8 sps:$4 sm:$0xff]  }
 0x3a3   :  { %4286 = vmatprep.subr.bf16.mxu0 %v10593_v33  ;;  %v10644_v33 = vld [vmem:[%s15647_s9 + $0xe54] ss:$8 sps:$4 sm:$0xff]  }
 0x3a6   :  { %4287 = vmatpush1.bf16.msra.mxu0 %v10591_v27  ;;  %v10642_v27 = vld [vmem:[%s15647_s9 + $0xe50] ss:$8 sps:$4 sm:$0xff]  }
 0x3a7   :  { %4288 = vmatprep.subr.bf16.mxu0 %v10596_v46  ;;  %v10647_v46 = vld [vmem:[%s15647_s9 + $0xe64] ss:$8 sps:$4 sm:$0xff]  }
 0x3aa   :  { %4289 = vmatpush1.bf16.msra.mxu0 %v10594_v20  ;;  %v10645_v20 = vld [vmem:[%s15647_s9 + $0xe60] ss:$8 sps:$4 sm:$0xff]  }
 0x3ab   :  { %4290 = vmatprep.subr.bf16.mxu0 %v10599_v10  ;;  %v10650_v10 = vld [vmem:[%s15647_s9 + $0xe74] ss:$8 sps:$4 sm:$0xff]  }
 0x3ae   :  { %4291 = vmatpush1.bf16.msra.mxu0 %v10597_v26  ;;  %v10648_v26 = vld [vmem:[%s15647_s9 + $0xe70] ss:$8 sps:$4 sm:$0xff]  }
 0x3af   :  { %4292 = vmatprep.subr.bf16.mxu0 %v10602_v6  ;;  %v10653_v6 = vld [vmem:[%s15647_s9 + $0xe84] ss:$8 sps:$4 sm:$0xff]  }
 0x3b2   :  { %4293 = vmatpush1.bf16.msra.mxu0 %v10600_v19  ;;  %v10651_v19 = vld [vmem:[%s15647_s9 + $0xe80] ss:$8 sps:$4 sm:$0xff]  }
 0x3b3   :  { %4294 = vmatprep.subr.bf16.mxu0 %v10605_v55  ;;  %v10656_v55 = vld [vmem:[%s15647_s9 + $0xe94] ss:$8 sps:$4 sm:$0xff]  }
 0x3b6   :  { %4295 = vmatpush1.bf16.msra.mxu0 %v10603_v11  ;;  %v10654_v11 = vld [vmem:[%s15647_s9 + $0xe90] ss:$8 sps:$4 sm:$0xff]  }
 0x3b7   :  { %4296 = vmatprep.subr.bf16.mxu0 %v10608_v22  ;;  %v10659_v22 = vld [vmem:[%s15647_s9 + $0xea4] ss:$8 sps:$4 sm:$0xff]  }
 0x3ba   :  { %4297 = vmatpush1.bf16.msra.mxu0 %v10606_v56  ;;  %v10657_v56 = vld [vmem:[%s15647_s9 + $0xea0] ss:$8 sps:$4 sm:$0xff]  }
 0x3bb   :  { %4298 = vmatprep.subr.bf16.mxu0 %v10611_v34  ;;  %v10662_v34 = vld [vmem:[%s15647_s9 + $0xeb4] ss:$8 sps:$4 sm:$0xff]  }
 0x3be   :  { %4299 = vmatpush1.bf16.msra.mxu0 %v10609_v44  ;;  %v10660_v44 = vld [vmem:[%s15647_s9 + $0xeb0] ss:$8 sps:$4 sm:$0xff]  }
 0x3bf   :  { %4300 = vmatprep.subr.bf16.mxu0 %v10614_v31  ;;  %v10665_v31 = vld [vmem:[%s15647_s9 + $0xec4] ss:$8 sps:$4 sm:$0xff]  }
 0x3c2   :  { %4301 = vmatpush1.bf16.msra.mxu0 %v10612_v39  ;;  %v10663_v39 = vld [vmem:[%s15647_s9 + $0xec0] ss:$8 sps:$4 sm:$0xff]  }
 0x3c3   :  { %4302 = vmatprep.subr.bf16.mxu0 %v10617_v36  ;;  %v10668_v36 = vld [vmem:[%s15647_s9 + $0xed4] ss:$8 sps:$4 sm:$0xff]  }
 0x3c6   :  { %4303 = vmatpush1.bf16.msra.mxu0 %v10615_v29  ;;  %v10666_v29 = vld [vmem:[%s15647_s9 + $0xed0] ss:$8 sps:$4 sm:$0xff]  }
 0x3c7   :  { %4304 = vmatprep.subr.bf16.mxu0 %v10620_v37  ;;  %v10671_v37 = vld [vmem:[%s15647_s9 + $0xee4] ss:$8 sps:$4 sm:$0xff]  }
 0x3ca   :  { %4305 = vmatpush1.bf16.msra.mxu0 %v10618_v15  ;;  %v10669_v15 = vld [vmem:[%s15647_s9 + $0xee0] ss:$8 sps:$4 sm:$0xff]  }
 0x3cb   :  { %4306 = vmatprep.subr.bf16.mxu0 %v10623_v54  ;;  %v10674_v54 = vld [vmem:[%s15647_s9 + $0xef4] ss:$8 sps:$4 sm:$0xff]  }
 0x3ce   :  { %4307 = vmatpush1.bf16.msra.mxu0 %v10621_v45  ;;  %v10672_v45 = vld [vmem:[%s15647_s9 + $0xef0] ss:$8 sps:$4 sm:$0xff]   ;;  %s15582_s9 = smov 4  }
 0x3cf   :  { %4308 = vmatprep.subr.bf16.mxu0 %v10626_v13  ;;  %v15675_v13 = vpack.c.bf16 %v11934_v5, %v11930_v2 }
 0x3d2   :  { %4309 = vmatpush1.bf16.msra.mxu0 %v10624_v14  ;;  %v13648_v14 = vsub.s32 0, %v11610_v18 }
 0x3d3   :  { %4321 = vmatprep.subr.bf16.mxu0 %v10629_v25  ;;  %v1307_v25 = vld [vmem:[%s15676_s3] sm:$0x3]  ;;  %s11150_s3 = smov 98  }
 0x3d5   :  { %4311 = vmatmul.mubr.bf16.vlgmr.msra.gmra.mrb[16].mxu0 %v15673_v57 }
 0x3d6   :  { %4322 = vmatpush1.bf16.msra.mxu0 %v10627_v63  ;;  %4353 = vmatprep.mubr.bf16.mxu0 %v15674_v61  ;;  %v13654_v63 = vsub.s32 1, %v11610_v18 }
 0x3d7   :  { %4323 = vmatprep.subr.bf16.mxu0 %v10632_v0  ;;  %v1312_v0 = vrot.slane %v1307_v25, %v13648_v14 }
 0x3d8   :  { %v1316_v57 = vrot.slane %v1307_v25, %v13654_v63 }
 0x3d9   :  { %v9809_v61 = vadd.f32 %v12964_v50, %v1312_v0  ;;  %v9813_v5 = vadd.f32 %v12971_v21, %v1312_v0 }
 0x3da   :  { %4324 = vmatpush1.bf16.msra.mxu0 %v10630_v17  ;;  %v9811_v17 = vadd.f32 %v12966_v58, %v1316_v57 }
 0x3db   :  { %4325 = vmatprep.subr.bf16.mxu0 %v10635_v32 }
 0x3de   :  { %4326 = vmatpush1.bf16.msra.mxu0 %v10633_v41 }
 0x3df   :  { %4327 = vmatprep.subr.bf16.mxu0 %v10638_v16  ;;  %v9815_v16 = vadd.f32 %v12976_v3, %v1316_v57 }
 0x3e2   :  { %4328 = vmatpush1.bf16.msra.mxu0 %v10636_v51 }
 0x3e3   :  { %4329 = vmatprep.subr.bf16.mxu0 %v10641_v59 }
 0x3e6   :  { %4330 = vmatpush1.bf16.msra.mxu0 %v10639_v24 }
 0x3e7   :  { %4331 = vmatprep.subr.bf16.mxu0 %v10644_v33 }
 0x3ea   :  { %4332 = vmatpush1.bf16.msra.mxu0 %v10642_v27 }
 0x3eb   :  { %4333 = vmatprep.subr.bf16.mxu0 %v10647_v46 }
 0x3ee   :  { %4334 = vmatpush1.bf16.msra.mxu0 %v10645_v20 }
 0x3ef   :  { %4335 = vmatprep.subr.bf16.mxu0 %v10650_v10 }
 0x3f2   :  { %4336 = vmatpush1.bf16.msra.mxu0 %v10648_v26 }
 0x3f3   :  { %4337 = vmatprep.subr.bf16.mxu0 %v10653_v6 }
 0x3f6   :  { %4338 = vmatpush1.bf16.msra.mxu0 %v10651_v19 }
 0x3f7   :  { %4339 = vmatprep.subr.bf16.mxu0 %v10656_v55 }
 0x3fa   :  { %4340 = vmatpush1.bf16.msra.mxu0 %v10654_v11 }
 0x3fb   :  { %4341 = vmatprep.subr.bf16.mxu0 %v10659_v22 }
 0x3fe   :  { %4342 = vmatpush1.bf16.msra.mxu0 %v10657_v56 }
 0x3ff   :  { %4343 = vmatprep.subr.bf16.mxu0 %v10662_v34 }
 0x402   :  { %4344 = vmatpush1.bf16.msra.mxu0 %v10660_v44 }
 0x403   :  { %4345 = vmatprep.subr.bf16.mxu0 %v10665_v31 }
 0x406   :  { %4346 = vmatpush1.bf16.msra.mxu0 %v10663_v39 }
 0x407   :  { %4347 = vmatprep.subr.bf16.mxu0 %v10668_v36 }
 0x40a   :  { %4348 = vmatpush1.bf16.msra.mxu0 %v10666_v29 }
 0x40b   :  { %4349 = vmatprep.subr.bf16.mxu0 %v10671_v37 }
 0x40e   :  { %4350 = vmatpush1.bf16.msra.mxu0 %v10669_v15 }
 0x40f   :  { %4351 = vmatprep.subr.bf16.mxu0 %v10674_v54 }
 0x412   :  { %4352 = vmatpush1.bf16.msra.mxu0 %v10672_v45 }
 0x415   :  { %4354 = vmatmul.mubr.bf16.vlgmr.msra.gmra.mrb[16].mxu0 %v15675_v13 }
 0x4e8   :  { %v4355_v2 = vpop.f32.mrb[16].mxu0 }
 0x4e9   :  { %v9810_v32 = vadd.f32 %v9809_v61, %v4355_v2  ;;  %v4357_v41 = vpop.f32.mrb[17].mxu0 }
 0x4ea   :  { %v9812_v51 = vadd.f32 %v9811_v17, %v4357_v41  ;;  %v4359_v59 = vpop.f32.mrb[18].mxu0 }
 0x4eb   :  { %v9814_v24 = vadd.f32 %v9813_v5, %v4359_v59  ;;  %v4361_v33 = vpop.f32.mrb[19].mxu0 }
 0x4ec   :  { %v9816_v27 = vadd.f32 %v9815_v16, %v4361_v33 }
 0x4ed   :  { %v4364_v46 = vadd.f32 %v9814_v24, %v9810_v32 }
 0x4ee   :  { %v4371_v20 = vadd.f32 %v9816_v27, %v9812_v51 }
 0x4ef   :  { %v4365_v10 = vrot.slane %v4364_v46, 4 }
 0x4f0   :  { %v4372_v26 = vrot.slane %v4371_v20, 4 }
 0x4f1   :  { %v4366_v6 = vadd.f32 %v4365_v10, %v4364_v46 }
 0x4f2   :  { %v4373_v50 = vadd.f32 %v4372_v26, %v4371_v20 }
 0x4f3   :  { %v4367_v19 = vrot.slane %v4366_v6, 2 }
 0x4f4   :  { %v4374_v58 = vrot.slane %v4373_v50, 2 }
 0x4f5   :  { %v4368_v55 = vadd.f32 %v4367_v19, %v4366_v6 }
 0x4f6   :  { %v4375_v11 = vadd.f32 %v4374_v58, %v4373_v50 }
 0x4f7   :  { %v4369_v21 = vrot.slane %v4368_v55, 1 }
 0x4f8   :  { %v4376_v22 = vrot.slane %v4375_v11, 1 }
 0x4f9   :  { %v4370_v56 = vadd.f32 %v4369_v21, %v4368_v55 }
 0x4fa   :  { %v4377_v3 = vadd.f32 %v4376_v22, %v4375_v11 }
 0x4fb   :  { %4383 = vrot.lane.b32.xlu0 %v4370_v56, %s15579_s28  ;;  %4379 = vrot.lane.b32.xlu1 %v4370_v56, %s15577_s10 }
 0x4ff   :  { %4393 = vrot.lane.b32.xlu0 %v4377_v3, %s15577_s10  ;;  %4387 = vrot.lane.b32.xlu1 %v4370_v56, %s15580_s26 }
 0x503   :  { %4401 = vrot.lane.b32.xlu0 %v4377_v3, %s15580_s26  ;;  %4397 = vrot.lane.b32.xlu1 %v4377_v3, %s15579_s28 }
 0x56d   :  { %v4384_v34 = vpop.permute.xlu0 %4383  ;;  %v4380_v44 = vpop.permute.xlu1 %4379 }
 0x56e   :  { %v4382_v31 = vadd.f32 %v4380_v44, %v4370_v56 }
 0x570   :  { %v4386_v39 = vadd.f32 %v4384_v34, %v4382_v31 }
 0x571   :  { %v4388_v36 = vpop.permute.xlu1 %4387  ;;  %v4394_v37 = vpop.permute.xlu0 %4393 }
 0x572   :  { %v4390_v29 = vadd.f32 %v4388_v36, %v4386_v39  ;;  %v13698_v39 = vld [vmem:[%s15677_s2] sm:$0x1]  ;;  %s15586_s2 = smov 6  }
 0x573   :  { %v13704_v36 = vrot.slane %v13698_v39, %v13648_v14 }
 0x574   :  { %v4391_v15 = vadd.f32 %v4390_v29, %v4377_v3  ;;  %v10675_v29 = vld [vmem:[%s15678_s0] ss:$16 sps:$4 sm:$0xff]  }
 0x575   :  { %v4398_v45 = vpop.permute.xlu1 %4397  ;;  %v4402_v25 = vpop.permute.xlu0 %4401 }
 0x576   :  { %v4396_v54 = vadd.f32 %v4394_v37, %v4391_v15  ;;  %v10677_v37 = vld [vmem:[%s15678_s0 + $0x4] ss:$16 sps:$4 sm:$0xff]  }
 0x577   :  { %v10680_v15 = vld [vmem:[%s15678_s0 + $0x24] ss:$16 sps:$4 sm:$0xff]   ;;  %5741 = vmatprep.subr.bf16.mxu1 %v10677_v37 }
 0x578   :  { %v4400_v13 = vadd.f32 %v4398_v45, %v4396_v54  ;;  %5742 = vmatpush1.bf16.msra.mxu1 %v10675_v29  ;;  %v10678_v54 = vld [vmem:[%s15678_s0 + $0x20] ss:$16 sps:$4 sm:$0xff]   ;;  %v10683_v45 = vld [vmem:[%s15678_s0 + $0x44] ss:$16 sps:$4 sm:$0xff]  }
 0x579   :  { %5743 = vmatprep.subr.bf16.mxu1 %v10680_v15 }
 0x57a   :  { %v4404_v0 = vadd.f32 %v4402_v25, %v4400_v13  ;;  %v10681_v13 = vld [vmem:[%s15678_s0 + $0x40] ss:$16 sps:$4 sm:$0xff]   ;;  %v10686_v25 = vld [vmem:[%s15678_s0 + $0x64] ss:$16 sps:$4 sm:$0xff]  }
 0x57c   :  { %v4405_v57 = vmul.f32 0.0078125, %v4404_v0  ;;  %5744 = vmatpush1.bf16.msra.mxu1 %v10678_v54  ;;  %v10684_v0 = vld [vmem:[%s15678_s0 + $0x60] ss:$16 sps:$4 sm:$0xff]  }
 0x57d   :  { %5745 = vmatprep.subr.bf16.mxu1 %v10683_v45  ;;  %v10705_v54 = vld [vmem:[%s15678_s0 + $0x140] ss:$16 sps:$4 sm:$0xff]  }
 0x57e   :  { %4410 = vrot.lane.b32.xlu0 %v4405_v57, %s15579_s28  ;;  %4407 = vrot.lane.b32.xlu1 %v4405_v57, %s15580_s26  ;;  %v10708_v45 = vld [vmem:[%s15678_s0 + $0x160] ss:$16 sps:$4 sm:$0xff]  }
 0x580   :  { %5746 = vmatpush1.bf16.msra.mxu1 %v10681_v13  ;;  %v4474_v13 = vld [vmem:[%s15679_s4] sm:$0x1]  ;;  %s11149_s4 = smov 102  }
 0x581   :  { %5747 = vmatprep.subr.bf16.mxu1 %v10686_v25 }
 0x582   :  { %4413 = vrot.lane.b32.xlu1 %v4405_v57, %s15577_s10 }
 0x584   :  { %5748 = vmatpush1.bf16.msra.mxu1 %v10684_v0  ;;  %v10713_v0 = vld [vmem:[%s15678_s0 + $0x184] ss:$16 sps:$4 sm:$0xff]  }
 0x5f0   :  { %v4408_v61 = vpop.permute.xlu1 %4407  ;;  %v4411_v17 = vpop.permute.xlu0 %4410 }
 0x5f1   :  { %v4416_v2 = vsel %vm192_vm0, %v4405_v57, %v4408_v61  ;;  %v10689_v57 = vld [vmem:[%s15678_s0 + $0x84] ss:$16 sps:$4 sm:$0xff]   ;;  %v10687_v61 = vld [vmem:[%s15678_s0 + $0x80] ss:$16 sps:$4 sm:$0xff]  }
 0x5f2   :  { %v4417_v5 = vsel %vm15596_vm1, %v4416_v2, %v4411_v17  ;;  %v10692_v17 = vld [vmem:[%s15678_s0 + $0xa4] ss:$16 sps:$4 sm:$0xff]   ;;  %5749 = vmatprep.subr.bf16.mxu1 %v10689_v57  ;;  %v10690_v2 = vld [vmem:[%s15678_s0 + $0xa0] ss:$16 sps:$4 sm:$0xff]  }
 0x5f3   :  { %5750 = vmatpush1.bf16.msra.mxu1 %v10687_v61  ;;  %v10711_v61 = vld [vmem:[%s15678_s0 + $0x180] ss:$16 sps:$4 sm:$0xff]  }
 0x5f4   :  { %v4414_v41 = vpop.permute.xlu1 %4413  ;;  %5751 = vmatprep.subr.bf16.mxu1 %v10692_v17 }
 0x5f5   :  { %v4419_v16 = vsel %vm15595_vm3, %v4417_v5, %v4414_v41  ;;  %v10695_v5 = vld [vmem:[%s15678_s0 + $0xc4] ss:$16 sps:$4 sm:$0xff]   ;;  %v10693_v41 = vld [vmem:[%s15678_s0 + $0xc0] ss:$16 sps:$4 sm:$0xff]  }
 0x5f6   :  { %v4423_v59 = vrot.slane %v4419_v16, %v13648_v14  ;;  %v10698_v16 = vld [vmem:[%s15678_s0 + $0xe4] ss:$16 sps:$4 sm:$0xff]  }
 0x5f7   :  { %5752 = vmatpush1.bf16.msra.mxu1 %v10690_v2  ;;  %v10716_v2 = vld [vmem:[%s15678_s0 + $0x1a4] ss:$16 sps:$4 sm:$0xff]  }
 0x5f8   :  { %v13675_v33 = vsub.f32 %v9810_v32, %v4423_v59  ;;  %v13677_v46 = vsub.f32 %v9812_v51, %v4423_v59  ;;  %v13679_v20 = vsub.f32 %v9814_v24, %v4423_v59  ;;  %v13681_v10 = vsub.f32 %v9816_v27, %v4423_v59  ;;  %5753 = vmatprep.subr.bf16.mxu1 %v10695_v5  ;;  %v10696_v59 = vld [vmem:[%s15678_s0 + $0xe0] ss:$16 sps:$4 sm:$0xff]  }
 0x5f9   :  { %v10714_v5 = vld [vmem:[%s15678_s0 + $0x1a0] ss:$16 sps:$4 sm:$0xff]  }
 0x5fa   :  { %v4428_v26 = vmul.f32 %v13675_v33, %v13675_v33  ;;  %v4429_v6 = vmul.f32 %v13677_v46, %v13677_v46  ;;  %v4430_v50 = vmul.f32 %v13679_v20, %v13679_v20  ;;  %v4431_v19 = vmul.f32 %v13681_v10, %v13681_v10 }
 0x5fb   :  { %5754 = vmatpush1.bf16.msra.mxu1 %v10693_v41  ;;  %v10719_v41 = vld [vmem:[%s15678_s0 + $0x1c4] ss:$16 sps:$4 sm:$0xff]  }
 0x5fc   :  { %v4432_v32 = vadd.f32 %v4430_v50, %v4428_v26  ;;  %v4439_v58 = vadd.f32 %v4431_v19, %v4429_v6  ;;  %v10701_v26 = vld [vmem:[%s15678_s0 + $0x104] ss:$16 sps:$4 sm:$0xff]   ;;  %5755 = vmatprep.subr.bf16.mxu1 %v10698_v16  ;;  %v10699_v6 = vld [vmem:[%s15678_s0 + $0x100] ss:$16 sps:$4 sm:$0xff]  }
 0x5fd   :  { %v10704_v50 = vld [vmem:[%s15678_s0 + $0x124] ss:$16 sps:$4 sm:$0xff]   ;;  %v10702_v19 = vld [vmem:[%s15678_s0 + $0x120] ss:$16 sps:$4 sm:$0xff]  }
 0x5fe   :  { %v4433_v51 = vrot.slane %v4432_v32, 4  ;;  %v4440_v55 = vrot.slane %v4439_v58, 4  ;;  %v10717_v16 = vld [vmem:[%s15678_s0 + $0x1c0] ss:$16 sps:$4 sm:$0xff]  }
 0x5ff   :  { %5756 = vmatpush1.bf16.msra.mxu1 %v10696_v59  ;;  %v10722_v59 = vld [vmem:[%s15678_s0 + $0x1e4] ss:$16 sps:$4 sm:$0xff]  }
 0x600   :  { %v4434_v24 = vadd.f32 %v4433_v51, %v4432_v32  ;;  %v4441_v11 = vadd.f32 %v4440_v55, %v4439_v58  ;;  %5757 = vmatprep.subr.bf16.mxu1 %v10701_v26  ;;  %v10720_v26 = vld [vmem:[%s15678_s0 + $0x1e0] ss:$16 sps:$4 sm:$0xff]  }
 0x602   :  { %v4435_v27 = vrot.slane %v4434_v24, 2  ;;  %v4442_v21 = vrot.slane %v4441_v11, 2 }
 0x603   :  { %5758 = vmatpush1.bf16.msra.mxu1 %v10699_v6  ;;  %v10725_v6 = vld [vmem:[%s15678_s0 + $0x204] ss:$16 sps:$4 sm:$0xff]  }
 0x604   :  { %v4436_v22 = vadd.f32 %v4435_v27, %v4434_v24  ;;  %v4443_v56 = vadd.f32 %v4442_v21, %v4441_v11  ;;  %5759 = vmatprep.subr.bf16.mxu1 %v10704_v50 }
 0x606   :  { %v4437_v3 = vrot.slane %v4436_v22, 1  ;;  %v4444_v44 = vrot.slane %v4443_v56, 1 }
 0x607   :  { %5760 = vmatpush1.bf16.msra.mxu1 %v10702_v19 }
 0x608   :  { %v4438_v34 = vadd.f32 %v4437_v3, %v4436_v22  ;;  %v4445_v31 = vadd.f32 %v4444_v44, %v4443_v56 }
 0x60a   :  { %4451 = vrot.lane.b32.xlu1 %v4438_v34, %s15579_s28  ;;  %4447 = vrot.lane.b32.xlu0 %v4438_v34, %s15577_s10 }
 0x60e   :  { %4461 = vrot.lane.b32.xlu1 %v4445_v31, %s15577_s10  ;;  %4455 = vrot.lane.b32.xlu0 %v4438_v34, %s15580_s26 }
 0x612   :  { %4469 = vrot.lane.b32.xlu1 %v4445_v31, %s15580_s26  ;;  %4465 = vrot.lane.b32.xlu0 %v4445_v31, %s15579_s28 }
 0x616   :  { %4501 = vrot.lane.b32.xlu1 %v13704_v36, %s15580_s26 }
 0x67c   :  { %v4452_v32 = vpop.permute.xlu1 %4451  ;;  %v4448_v58 = vpop.permute.xlu0 %4447 }
 0x67d   :  { %v4450_v51 = vadd.f32 %v4448_v58, %v4438_v34  ;;  %v10707_v34 = vld [vmem:[%s15678_s0 + $0x144] ss:$16 sps:$4 sm:$0xff]  }
 0x67e   :  { %5761 = vmatprep.subr.bf16.mxu1 %v10707_v34 }
 0x67f   :  { %v4454_v55 = vadd.f32 %v4452_v32, %v4450_v51  ;;  %5762 = vmatpush1.bf16.msra.mxu1 %v10705_v54 }
 0x680   :  { %v4456_v24 = vpop.permute.xlu0 %4455  ;;  %v4462_v27 = vpop.permute.xlu1 %4461 }
 0x681   :  { %v4458_v11 = vadd.f32 %v4456_v24, %v4454_v55 }
 0x683   :  { %v4459_v21 = vadd.f32 %v4458_v11, %v4445_v31  ;;  %v10710_v31 = vld [vmem:[%s15678_s0 + $0x164] ss:$16 sps:$4 sm:$0xff]  }
 0x684   :  { %v4466_v56 = vpop.permute.xlu0 %4465  ;;  %v4470_v44 = vpop.permute.xlu1 %4469  ;;  %5763 = vmatprep.subr.bf16.mxu1 %v10710_v31 }
 0x685   :  { %v4464_v22 = vadd.f32 %v4462_v27, %v4459_v21  ;;  %5764 = vmatpush1.bf16.msra.mxu1 %v10708_v45 }
 0x686   :  { %5765 = vmatprep.subr.bf16.mxu1 %v10713_v0 }
 0x687   :  { %v4468_v3 = vadd.f32 %v4466_v56, %v4464_v22 }
 0x688   :  { %v4502_v50 = vpop.permute.xlu1 %4501 }
 0x689   :  { %v4472_v29 = vadd.f32 %v4470_v44, %v4468_v3  ;;  %5766 = vmatpush1.bf16.msra.mxu1 %v10711_v61 }
 0x68a   :  { %5767 = vmatprep.subr.bf16.mxu1 %v10716_v2 }
 0x68b   :  { %v4473_v37 = vmul.f32 0.0078125, %v4472_v29 }
 0x68d   :  { %v4475_v15 = vadd.f32 1e-05, %v4473_v37  ;;  %5768 = vmatpush1.bf16.msra.mxu1 %v10714_v5 }
 0x68e   :  { %5769 = vmatprep.subr.bf16.mxu1 %v10719_v41 }
 0x68f   :  { %11109 = vrsqrt.f32 %v4475_v15 }
 0x691   :  { %5770 = vmatpush1.bf16.msra.mxu1 %v10717_v16 }
 0x692   :  { %5771 = vmatprep.subr.bf16.mxu1 %v10722_v59 }
 0x695   :  { %5772 = vmatpush1.bf16.msra.mxu1 %v10720_v26 }
 0x696   :  { %5784 = vmatprep.subr.bf16.mxu1 %v10725_v6 }
 0x699   :  { %v11110_v25 = vpop.eup %11109 }
 0x69a   :  { %v4477_v57 = vmul.f32 %v11110_v25, %v4474_v13 }
 0x69c   :  { %v4482_v17 = vrot.slane %v4477_v57, %v13648_v14 }
 0x69e   :  { %4486 = vrot.lane.b32.xlu1 %v4482_v17, %s15579_s28  ;;  %4483 = vrot.lane.b32.xlu0 %v4482_v17, %s15580_s26  ;;  %s15601_s26 = smov 20  }
 0x6a2   :  { %4489 = vrot.lane.b32.xlu0 %v4482_v17, %s15577_s10  ;;  %4507 = vrot.lane.b32.xlu1 %v13704_v36, %s15577_s10 }
 0x6a6   :  { %4504 = vrot.lane.b32.xlu0 %v13704_v36, %s15579_s28  ;;  %v4510_v36 = vsel %vm192_vm0, %v13698_v39, %v4502_v50 }
 0x710   :  { %v4484_v19 = vpop.permute.xlu0 %4483  ;;  %v4487_v32 = vpop.permute.xlu1 %4486 }
 0x711   :  { %v4492_v58 = vsel %vm192_vm0, %v4477_v57, %v4484_v19 }
 0x712   :  { %v4493_v51 = vsel %vm15596_vm1, %v4492_v58, %v4487_v32 }
 0x714   :  { %v4490_v55 = vpop.permute.xlu0 %4489  ;;  %v4508_v27 = vpop.permute.xlu1 %4507 }
 0x715   :  { %v4494_v24 = vsel %vm15595_vm3, %v4493_v51, %v4490_v55 }
 0x716   :  { %v4516_v11 = vrot.slane %v4494_v24, %v13648_v14 }
 0x718   :  { %v4505_v21 = vpop.permute.xlu0 %4504  ;;  %v4517_v56 = vmul.f32 %v4516_v11, %v13675_v33  ;;  %v4518_v44 = vmul.f32 %v4516_v11, %v13677_v46  ;;  %v4519_v29 = vmul.f32 %v4516_v11, %v13679_v20  ;;  %v4520_v37 = vmul.f32 %v4516_v11, %v13681_v10 }
 0x719   :  { %v4511_v22 = vsel %vm15596_vm1, %v4510_v36, %v4505_v21 }
 0x71a   :  { %v4512_v3 = vsel %vm15595_vm3, %v4511_v22, %v4508_v27 }
 0x71b   :  { %v4524_v15 = vrot.slane %v4512_v3, %v13648_v14 }
 0x71d   :  { %v4525_v54 = vadd.f32 %v4524_v15, %v4517_v56  ;;  %v4526_v34 = vadd.f32 %v4524_v15, %v4518_v44  ;;  %v4527_v31 = vadd.f32 %v4524_v15, %v4519_v29  ;;  %v4528_v45 = vadd.f32 %v4524_v15, %v4520_v37  ;;  %v10723_v44 = vld [vmem:[%s15678_s0 + $0x200] ss:$16 sps:$4 sm:$0xff]   ;;  %v10728_v15 = vld [vmem:[%s15678_s0 + $0x224] ss:$16 sps:$4 sm:$0xff]  }
 0x71f   :  { %v4529_v39 = vmul.f32 0.01, %v4525_v54  ;;  %v4530_v13 = vmul.f32 0.01, %v4526_v34  ;;  %v4531_v25 = vmul.f32 0.01, %v4527_v31 }
 0x720   :  { %v4532_v0 = vmul.f32 0.01, %v4528_v45 }
 0x721   :  { %v4533_v57 = vmax.f32 %v4525_v54, %v4529_v39  ;;  %v4534_v33 = vmax.f32 %v4526_v34, %v4530_v13  ;;  %v4535_v61 = vmax.f32 %v4527_v31, %v4531_v25  ;;  %v10726_v39 = vld [vmem:[%s15678_s0 + $0x220] ss:$16 sps:$4 sm:$0xff]   ;;  %v10731_v13 = vld [vmem:[%s15678_s0 + $0x244] ss:$16 sps:$4 sm:$0xff]  }
 0x722   :  { %v4536_v17 = vmax.f32 %v4528_v45, %v4532_v0  ;;  %v10729_v25 = vld [vmem:[%s15678_s0 + $0x240] ss:$16 sps:$4 sm:$0xff]   ;;  %v10734_v0 = vld [vmem:[%s15678_s0 + $0x264] ss:$16 sps:$4 sm:$0xff]  }
 0x723   :  { %v4538_v2 = vrot.slane %v4534_v33, 7  ;;  %v4537_v46 = vrot.slane %v4533_v57, 7  ;;  %v4539_v5 = vrot.slane %v4535_v61, 7  ;;  %v13831_v20 = vpack.c.bf16 %v4535_v61, %v4533_v57 }
 0x724   :  { %v4540_v10 = vrot.slane %v4536_v17, 7  ;;  %v4550_v41 = vrot.slane %v4534_v33, 1  ;;  %v4552_v16 = vrot.slane %v4536_v17, 1  ;;  %v4549_v6 = vrot.slane %v4533_v57, 1  ;;  %v10732_v57 = vld [vmem:[%s15678_s0 + $0x260] ss:$16 sps:$4 sm:$0xff]  }
 0x725   :  { %v4541_v59 = vsel %vm15597_vm2, %v4537_v46, %v4539_v5  ;;  %v4543_v26 = vsel %vm15597_vm2, %v4539_v5, %v4537_v46  ;;  %v4551_v50 = vrot.slane %v4535_v61, 1  ;;  %v13870_v31 = vpack.c.bf16 %v4536_v17, %v4534_v33  ;;  %v10737_v33 = vld [vmem:[%s15678_s0 + $0x284] ss:$16 sps:$4 sm:$0xff]   ;;  %v10735_v61 = vld [vmem:[%s15678_s0 + $0x280] ss:$16 sps:$4 sm:$0xff]  }
 0x726   :  { %v4542_v19 = vsel %vm15597_vm2, %v4538_v2, %v4540_v10  ;;  %v4544_v32 = vsel %vm15597_vm2, %v4540_v10, %v4538_v2  ;;  %v4545_v58 = vmul.f32 %v4543_v26, %v11663_v35  ;;  %v4547_v51 = vmul.f32 %v4541_v59, %v11651_v60  ;;  %v10740_v17 = vld [vmem:[%s15678_s0 + $0x2a4] ss:$16 sps:$4 sm:$0xff]   ;;  %v10738_v2 = vld [vmem:[%s15678_s0 + $0x2a0] ss:$16 sps:$4 sm:$0xff]  }
 0x727   :  { %v4546_v55 = vmul.f32 %v4544_v32, %v11663_v35  ;;  %v4548_v24 = vmul.f32 %v4542_v19, %v11651_v60  ;;  %v4554_v11 = vsel %vm15598_vm4, %v4550_v41, %v4552_v16  ;;  %v4556_v27 = vsel %vm15598_vm4, %v4552_v16, %v4550_v41  ;;  %v10743_v46 = vld [vmem:[%s15678_s0 + $0x2c4] ss:$16 sps:$4 sm:$0xff]   ;;  %v10741_v5 = vld [vmem:[%s15678_s0 + $0x2c0] ss:$16 sps:$4 sm:$0xff]  }
 0x728   :  { %v13849_v36 = vpack.c.bf16 %v4547_v51, %v4545_v58  ;;  %v4558_v21 = vmul.f32 %v4554_v11, %v11697_v49  ;;  %v4560_v22 = vmul.f32 %v4556_v27, %v11706_v52  ;;  %v4553_v56 = vsel %vm15598_vm4, %v4549_v6, %v4551_v50  ;;  %v10746_v10 = vld [vmem:[%s15678_s0 + $0x2e4] ss:$16 sps:$4 sm:$0xff]   ;;  %v10744_v41 = vld [vmem:[%s15678_s0 + $0x2e0] ss:$16 sps:$4 sm:$0xff]  }
 0x729   :  { %v13855_v3 = vpack.c.bf16 %v4548_v24, %v4546_v55  ;;  %v4555_v29 = vsel %vm15598_vm4, %v4551_v50, %v4549_v6  ;;  %v4557_v37 = vmul.f32 %v4553_v56, %v11697_v49  ;;  %v10749_v16 = vld [vmem:[%s15678_s0 + $0x304] ss:$16 sps:$4 sm:$0xff]   ;;  %v10747_v59 = vld [vmem:[%s15678_s0 + $0x300] ss:$16 sps:$4 sm:$0xff]  }
 0x72a   :  { %v13866_v54 = vpack.c.bf16 %v4560_v22, %v4558_v21  ;;  %v4559_v34 = vmul.f32 %v4555_v29, %v11706_v52  ;;  %v10752_v26 = vld [vmem:[%s15678_s0 + $0x324] ss:$16 sps:$4 sm:$0xff]   ;;  %v10750_v6 = vld [vmem:[%s15678_s0 + $0x320] ss:$16 sps:$4 sm:$0xff]  }
 0x72b   :  { %5773 = vmatprep.mubr.bf16.mxu1 %v13855_v3  ;;  %v10755_v50 = vld [vmem:[%s15678_s0 + $0x344] ss:$16 sps:$4 sm:$0xff]   ;;  %v10753_v19 = vld [vmem:[%s15678_s0 + $0x340] ss:$16 sps:$4 sm:$0xff]  }
 0x72c   :  { %5774 = vmatmul.mubr.bf16.vlgmr.msra.gmra.mrb[20].mxu1 %v13849_v36  ;;  %v13873_v45 = vpack.c.bf16 %v4559_v34, %v4557_v37  ;;  %v10758_v32 = vld [vmem:[%s15678_s0 + $0x364] ss:$16 sps:$4 sm:$0xff]   ;;  %v10756_v58 = vld [vmem:[%s15678_s0 + $0x360] ss:$16 sps:$4 sm:$0xff]  }
 0x72d   :  { %5785 = vmatpush1.bf16.msra.mxu1 %v10723_v44  ;;  %5816 = vmatprep.mubr.bf16.mxu1 %v13870_v31  ;;  %v10761_v51 = vld [vmem:[%s15678_s0 + $0x384] ss:$16 sps:$4 sm:$0xff]   ;;  %v10759_v55 = vld [vmem:[%s15678_s0 + $0x380] ss:$16 sps:$4 sm:$0xff]  }
 0x72e   :  { %5786 = vmatprep.subr.bf16.mxu1 %v10728_v15  ;;  %v10764_v24 = vld [vmem:[%s15678_s0 + $0x3a4] ss:$16 sps:$4 sm:$0xff]   ;;  %v10762_v11 = vld [vmem:[%s15678_s0 + $0x3a0] ss:$16 sps:$4 sm:$0xff]  }
 0x72f   :  { %v10767_v27 = vld [vmem:[%s15678_s0 + $0x3c4] ss:$16 sps:$4 sm:$0xff]   ;;  %v10765_v21 = vld [vmem:[%s15678_s0 + $0x3c0] ss:$16 sps:$4 sm:$0xff]  }
 0x730   :  { %v10770_v22 = vld [vmem:[%s15678_s0 + $0x3e4] ss:$16 sps:$4 sm:$0xff]   ;;  %v10768_v56 = vld [vmem:[%s15678_s0 + $0x3e0] ss:$16 sps:$4 sm:$0xff]  }
 0x731   :  { %5787 = vmatpush1.bf16.msra.mxu1 %v10726_v39  ;;  %v10773_v44 = vld [vmem:[%s15678_s0 + $0x404] ss:$16 sps:$4 sm:$0xff]   ;;  %v10771_v29 = vld [vmem:[%s15678_s0 + $0x400] ss:$16 sps:$4 sm:$0xff]  }
 0x732   :  { %5788 = vmatprep.subr.bf16.mxu1 %v10731_v13  ;;  %v10776_v37 = vld [vmem:[%s15678_s0 + $0x424] ss:$16 sps:$4 sm:$0xff]   ;;  %v10774_v15 = vld [vmem:[%s15678_s0 + $0x420] ss:$16 sps:$4 sm:$0xff]  }
 0x733   :  { %v10779_v34 = vld [vmem:[%s15678_s0 + $0x444] ss:$16 sps:$4 sm:$0xff]   ;;  %v10777_v39 = vld [vmem:[%s15678_s0 + $0x440] ss:$16 sps:$4 sm:$0xff]  }
 0x734   :  { %v10782_v13 = vld [vmem:[%s15678_s0 + $0x464] ss:$16 sps:$4 sm:$0xff]  }
 0x735   :  { %5789 = vmatpush1.bf16.msra.mxu1 %v10729_v25  ;;  %v10780_v25 = vld [vmem:[%s15678_s0 + $0x460] ss:$16 sps:$4 sm:$0xff]  }
 0x736   :  { %5790 = vmatprep.subr.bf16.mxu1 %v10734_v0  ;;  %v10785_v0 = vld [vmem:[%s15678_s0 + $0x484] ss:$16 sps:$4 sm:$0xff]  }
 0x739   :  { %5791 = vmatpush1.bf16.msra.mxu1 %v10732_v57  ;;  %v10783_v57 = vld [vmem:[%s15678_s0 + $0x480] ss:$16 sps:$4 sm:$0xff]  }
 0x73a   :  { %5792 = vmatprep.subr.bf16.mxu1 %v10737_v33  ;;  %v10788_v33 = vld [vmem:[%s15678_s0 + $0x4a4] ss:$16 sps:$4 sm:$0xff]  }
 0x73d   :  { %5793 = vmatpush1.bf16.msra.mxu1 %v10735_v61  ;;  %v10786_v61 = vld [vmem:[%s15678_s0 + $0x4a0] ss:$16 sps:$4 sm:$0xff]  }
 0x73e   :  { %5794 = vmatprep.subr.bf16.mxu1 %v10740_v17  ;;  %v10791_v17 = vld [vmem:[%s15678_s0 + $0x4c4] ss:$16 sps:$4 sm:$0xff]  }
 0x741   :  { %5795 = vmatpush1.bf16.msra.mxu1 %v10738_v2  ;;  %v10789_v2 = vld [vmem:[%s15678_s0 + $0x4c0] ss:$16 sps:$4 sm:$0xff]  }
 0x742   :  { %5796 = vmatprep.subr.bf16.mxu1 %v10743_v46  ;;  %v10794_v46 = vld [vmem:[%s15678_s0 + $0x4e4] ss:$16 sps:$4 sm:$0xff]  }
 0x745   :  { %5797 = vmatpush1.bf16.msra.mxu1 %v10741_v5  ;;  %v10792_v5 = vld [vmem:[%s15678_s0 + $0x4e0] ss:$16 sps:$4 sm:$0xff]  }
 0x746   :  { %5798 = vmatprep.subr.bf16.mxu1 %v10746_v10  ;;  %v10797_v10 = vld [vmem:[%s15678_s0 + $0x504] ss:$16 sps:$4 sm:$0xff]  }
 0x749   :  { %5799 = vmatpush1.bf16.msra.mxu1 %v10744_v41  ;;  %v10795_v41 = vld [vmem:[%s15678_s0 + $0x500] ss:$16 sps:$4 sm:$0xff]  }
 0x74a   :  { %5800 = vmatprep.subr.bf16.mxu1 %v10749_v16  ;;  %v10800_v16 = vld [vmem:[%s15678_s0 + $0x524] ss:$16 sps:$4 sm:$0xff]  }
 0x74d   :  { %5801 = vmatpush1.bf16.msra.mxu1 %v10747_v59  ;;  %v10798_v59 = vld [vmem:[%s15678_s0 + $0x520] ss:$16 sps:$4 sm:$0xff]  }
 0x74e   :  { %5802 = vmatprep.subr.bf16.mxu1 %v10752_v26  ;;  %v10803_v26 = vld [vmem:[%s15678_s0 + $0x544] ss:$16 sps:$4 sm:$0xff]  }
 0x751   :  { %5803 = vmatpush1.bf16.msra.mxu1 %v10750_v6  ;;  %v10801_v6 = vld [vmem:[%s15678_s0 + $0x540] ss:$16 sps:$4 sm:$0xff]  }
 0x752   :  { %5804 = vmatprep.subr.bf16.mxu1 %v10755_v50  ;;  %v10806_v50 = vld [vmem:[%s15678_s0 + $0x564] ss:$16 sps:$4 sm:$0xff]  }
 0x755   :  { %5805 = vmatpush1.bf16.msra.mxu1 %v10753_v19  ;;  %v10804_v19 = vld [vmem:[%s15678_s0 + $0x560] ss:$16 sps:$4 sm:$0xff]  }
 0x756   :  { %5806 = vmatprep.subr.bf16.mxu1 %v10758_v32  ;;  %v10809_v32 = vld [vmem:[%s15678_s0 + $0x584] ss:$16 sps:$4 sm:$0xff]  }
 0x759   :  { %5807 = vmatpush1.bf16.msra.mxu1 %v10756_v58  ;;  %v10807_v58 = vld [vmem:[%s15678_s0 + $0x580] ss:$16 sps:$4 sm:$0xff]  }
 0x75a   :  { %5808 = vmatprep.subr.bf16.mxu1 %v10761_v51  ;;  %v10812_v51 = vld [vmem:[%s15678_s0 + $0x5a4] ss:$16 sps:$4 sm:$0xff]  }
 0x75d   :  { %5809 = vmatpush1.bf16.msra.mxu1 %v10759_v55  ;;  %v10810_v55 = vld [vmem:[%s15678_s0 + $0x5a0] ss:$16 sps:$4 sm:$0xff]  }
 0x75e   :  { %5810 = vmatprep.subr.bf16.mxu1 %v10764_v24  ;;  %v10815_v24 = vld [vmem:[%s15678_s0 + $0x5c4] ss:$16 sps:$4 sm:$0xff]  }
 0x761   :  { %5811 = vmatpush1.bf16.msra.mxu1 %v10762_v11  ;;  %v10813_v11 = vld [vmem:[%s15678_s0 + $0x5c0] ss:$16 sps:$4 sm:$0xff]  }
 0x762   :  { %5812 = vmatprep.subr.bf16.mxu1 %v10767_v27  ;;  %v10818_v27 = vld [vmem:[%s15678_s0 + $0x5e4] ss:$16 sps:$4 sm:$0xff]  }
 0x765   :  { %5813 = vmatpush1.bf16.msra.mxu1 %v10765_v21  ;;  %v10816_v21 = vld [vmem:[%s15678_s0 + $0x5e0] ss:$16 sps:$4 sm:$0xff]  }
 0x766   :  { %5814 = vmatprep.subr.bf16.mxu1 %v10770_v22  ;;  %v10821_v22 = vld [vmem:[%s15678_s0 + $0xc] ss:$16 sps:$4 sm:$0xff]  }
 0x769   :  { %5815 = vmatpush1.bf16.msra.mxu1 %v10768_v56  ;;  %v10819_v56 = vld [vmem:[%s15678_s0 + $0x8] ss:$16 sps:$4 sm:$0xff]  }
 0x76a   :  { %5827 = vmatprep.subr.bf16.mxu1 %v10773_v44  ;;  %v10824_v44 = vld [vmem:[%s15678_s0 + $0x2c] ss:$16 sps:$4 sm:$0xff]  }
 0x76c   :  { %5817 = vmatmul.mubr.bf16.vlgmr.msra.gmra.mrb[20].mxu1 %v13831_v20 }
 0x76d   :  { %5828 = vmatpush1.bf16.msra.mxu1 %v10771_v29  ;;  %5859 = vmatprep.mubr.bf16.mxu1 %v13866_v54  ;;  %v10822_v29 = vld [vmem:[%s15678_s0 + $0x28] ss:$16 sps:$4 sm:$0xff]  }
 0x76e   :  { %5829 = vmatprep.subr.bf16.mxu1 %v10776_v37  ;;  %v10827_v37 = vld [vmem:[%s15678_s0 + $0x4c] ss:$16 sps:$4 sm:$0xff]  }
 0x771   :  { %5830 = vmatpush1.bf16.msra.mxu1 %v10774_v15  ;;  %v10825_v15 = vld [vmem:[%s15678_s0 + $0x48] ss:$16 sps:$4 sm:$0xff]  }
 0x772   :  { %5831 = vmatprep.subr.bf16.mxu1 %v10779_v34  ;;  %v10830_v34 = vld [vmem:[%s15678_s0 + $0x6c] ss:$16 sps:$4 sm:$0xff]  }
 0x775   :  { %5832 = vmatpush1.bf16.msra.mxu1 %v10777_v39  ;;  %v10833_v39 = vld [vmem:[%s15678_s0 + $0x8c] ss:$16 sps:$4 sm:$0xff]  }
 0x776   :  { %5833 = vmatprep.subr.bf16.mxu1 %v10782_v13  ;;  %v10831_v13 = vld [vmem:[%s15678_s0 + $0x88] ss:$16 sps:$4 sm:$0xff]  }
 0x779   :  { %5834 = vmatpush1.bf16.msra.mxu1 %v10780_v25  ;;  %v10836_v25 = vld [vmem:[%s15678_s0 + $0xac] ss:$16 sps:$4 sm:$0xff]  }
 0x77a   :  { %5835 = vmatprep.subr.bf16.mxu1 %v10785_v0  ;;  %v10834_v0 = vld [vmem:[%s15678_s0 + $0xa8] ss:$16 sps:$4 sm:$0xff]  }
 0x77d   :  { %5836 = vmatpush1.bf16.msra.mxu1 %v10783_v57  ;;  %v10839_v57 = vld [vmem:[%s15678_s0 + $0xcc] ss:$16 sps:$4 sm:$0xff]  }
 0x77e   :  { %5837 = vmatprep.subr.bf16.mxu1 %v10788_v33  ;;  %v10837_v33 = vld [vmem:[%s15678_s0 + $0xc8] ss:$16 sps:$4 sm:$0xff]  }
 0x781   :  { %5838 = vmatpush1.bf16.msra.mxu1 %v10786_v61  ;;  %v10842_v61 = vld [vmem:[%s15678_s0 + $0xec] ss:$16 sps:$4 sm:$0xff]  }
 0x782   :  { %5839 = vmatprep.subr.bf16.mxu1 %v10791_v17  ;;  %v10840_v17 = vld [vmem:[%s15678_s0 + $0xe8] ss:$16 sps:$4 sm:$0xff]  }
 0x785   :  { %5840 = vmatpush1.bf16.msra.mxu1 %v10789_v2  ;;  %v10845_v2 = vld [vmem:[%s15678_s0 + $0x10c] ss:$16 sps:$4 sm:$0xff]  }
 0x786   :  { %5841 = vmatprep.subr.bf16.mxu1 %v10794_v46  ;;  %v10843_v46 = vld [vmem:[%s15678_s0 + $0x108] ss:$16 sps:$4 sm:$0xff]  }
 0x789   :  { %5842 = vmatpush1.bf16.msra.mxu1 %v10792_v5  ;;  %v10848_v5 = vld [vmem:[%s15678_s0 + $0x12c] ss:$16 sps:$4 sm:$0xff]  }
 0x78a   :  { %5843 = vmatprep.subr.bf16.mxu1 %v10797_v10  ;;  %v10846_v10 = vld [vmem:[%s15678_s0 + $0x128] ss:$16 sps:$4 sm:$0xff]  }
 0x78d   :  { %5844 = vmatpush1.bf16.msra.mxu1 %v10795_v41  ;;  %v10851_v41 = vld [vmem:[%s15678_s0 + $0x14c] ss:$16 sps:$4 sm:$0xff]  }
 0x78e   :  { %5845 = vmatprep.subr.bf16.mxu1 %v10800_v16  ;;  %v10849_v16 = vld [vmem:[%s15678_s0 + $0x148] ss:$16 sps:$4 sm:$0xff]  }
 0x791   :  { %5846 = vmatpush1.bf16.msra.mxu1 %v10798_v59  ;;  %v10854_v59 = vld [vmem:[%s15678_s0 + $0x16c] ss:$16 sps:$4 sm:$0xff]  }
 0x792   :  { %5847 = vmatprep.subr.bf16.mxu1 %v10803_v26  ;;  %v10852_v26 = vld [vmem:[%s15678_s0 + $0x168] ss:$16 sps:$4 sm:$0xff]  }
 0x795   :  { %5848 = vmatpush1.bf16.msra.mxu1 %v10801_v6  ;;  %v10857_v6 = vld [vmem:[%s15678_s0 + $0x18c] ss:$16 sps:$4 sm:$0xff]  }
 0x796   :  { %5849 = vmatprep.subr.bf16.mxu1 %v10806_v50  ;;  %v10855_v50 = vld [vmem:[%s15678_s0 + $0x188] ss:$16 sps:$4 sm:$0xff]  }
 0x799   :  { %5850 = vmatpush1.bf16.msra.mxu1 %v10804_v19  ;;  %v10860_v19 = vld [vmem:[%s15678_s0 + $0x1ac] ss:$16 sps:$4 sm:$0xff]  }
 0x79a   :  { %5851 = vmatprep.subr.bf16.mxu1 %v10809_v32  ;;  %v10858_v32 = vld [vmem:[%s15678_s0 + $0x1a8] ss:$16 sps:$4 sm:$0xff]  }
 0x79d   :  { %5852 = vmatpush1.bf16.msra.mxu1 %v10807_v58  ;;  %v10863_v58 = vld [vmem:[%s15678_s0 + $0x1cc] ss:$16 sps:$4 sm:$0xff]  }
 0x79e   :  { %5853 = vmatprep.subr.bf16.mxu1 %v10812_v51  ;;  %v10861_v51 = vld [vmem:[%s15678_s0 + $0x1c8] ss:$16 sps:$4 sm:$0xff]  }
 0x7a1   :  { %5854 = vmatpush1.bf16.msra.mxu1 %v10810_v55  ;;  %v10866_v55 = vld [vmem:[%s15678_s0 + $0x1ec] ss:$16 sps:$4 sm:$0xff]  }
 0x7a2   :  { %5855 = vmatprep.subr.bf16.mxu1 %v10815_v24  ;;  %v10864_v24 = vld [vmem:[%s15678_s0 + $0x1e8] ss:$16 sps:$4 sm:$0xff]  }
 0x7a5   :  { %5856 = vmatpush1.bf16.msra.mxu1 %v10813_v11  ;;  %v10869_v11 = vld [vmem:[%s15678_s0 + $0x20c] ss:$16 sps:$4 sm:$0xff]  }
 0x7a6   :  { %5857 = vmatprep.subr.bf16.mxu1 %v10818_v27  ;;  %v10867_v27 = vld [vmem:[%s15678_s0 + $0x208] ss:$16 sps:$4 sm:$0xff]  }
 0x7a9   :  { %5858 = vmatpush1.bf16.msra.mxu1 %v10816_v21  ;;  %v10872_v21 = vld [vmem:[%s15678_s0 + $0x22c] ss:$16 sps:$4 sm:$0xff]  }
 0x7aa   :  { %5870 = vmatprep.subr.bf16.mxu1 %v10821_v22  ;;  %v10870_v22 = vld [vmem:[%s15678_s0 + $0x228] ss:$16 sps:$4 sm:$0xff]  }
 0x7ac   :  { %5860 = vmatmul.mubr.bf16.vlgmr.msra.gmra.mrb[20].mxu1 %v13873_v45 }
 0x7ad   :  { %5871 = vmatpush1.bf16.msra.mxu1 %v10819_v56  ;;  %5902 = vmatprep.mubr.bf16.mxu1 %v13855_v3  ;;  %v10828_v3 = vld [vmem:[%s15678_s0 + $0x68] ss:$16 sps:$4 sm:$0xff]   ;;  %v10875_v56 = vld [vmem:[%s15678_s0 + $0x24c] ss:$16 sps:$4 sm:$0xff]  }
 0x7ae   :  { %5872 = vmatprep.subr.bf16.mxu1 %v10824_v44  ;;  %v10873_v44 = vld [vmem:[%s15678_s0 + $0x248] ss:$16 sps:$4 sm:$0xff]  }
 0x7b1   :  { %5873 = vmatpush1.bf16.msra.mxu1 %v10822_v29  ;;  %v10881_v29 = vld [vmem:[%s15678_s0 + $0x28c] ss:$16 sps:$4 sm:$0xff]  }
 0x7b2   :  { %5874 = vmatprep.subr.bf16.mxu1 %v10827_v37  ;;  %v10879_v37 = vld [vmem:[%s15678_s0 + $0x288] ss:$16 sps:$4 sm:$0xff]  }
 0x7b5   :  { %5875 = vmatpush1.bf16.msra.mxu1 %v10825_v15  ;;  %v10884_v15 = vld [vmem:[%s15678_s0 + $0x2ac] ss:$16 sps:$4 sm:$0xff]  }
 0x7b6   :  { %5876 = vmatprep.subr.bf16.mxu1 %v10830_v34  ;;  %v10882_v34 = vld [vmem:[%s15678_s0 + $0x2a8] ss:$16 sps:$4 sm:$0xff]  }
 0x7b9   :  { %5877 = vmatpush1.bf16.msra.mxu1 %v10828_v3  ;;  %v10887_v3 = vld [vmem:[%s15678_s0 + $0x2cc] ss:$16 sps:$4 sm:$0xff]  }
 0x7ba   :  { %5878 = vmatprep.subr.bf16.mxu1 %v10833_v39  ;;  %v10885_v39 = vld [vmem:[%s15678_s0 + $0x2c8] ss:$16 sps:$4 sm:$0xff]  }
 0x7bd   :  { %5879 = vmatpush1.bf16.msra.mxu1 %v10831_v13  ;;  %v10890_v13 = vld [vmem:[%s15678_s0 + $0x2ec] ss:$16 sps:$4 sm:$0xff]  }
 0x7be   :  { %5880 = vmatprep.subr.bf16.mxu1 %v10836_v25  ;;  %v10888_v25 = vld [vmem:[%s15678_s0 + $0x2e8] ss:$16 sps:$4 sm:$0xff]  }
 0x7c1   :  { %5881 = vmatpush1.bf16.msra.mxu1 %v10834_v0  ;;  %v10893_v0 = vld [vmem:[%s15678_s0 + $0x30c] ss:$16 sps:$4 sm:$0xff]  }
 0x7c2   :  { %5882 = vmatprep.subr.bf16.mxu1 %v10839_v57  ;;  %v10891_v57 = vld [vmem:[%s15678_s0 + $0x308] ss:$16 sps:$4 sm:$0xff]  }
 0x7c5   :  { %5883 = vmatpush1.bf16.msra.mxu1 %v10837_v33  ;;  %v10896_v33 = vld [vmem:[%s15678_s0 + $0x32c] ss:$16 sps:$4 sm:$0xff]  }
 0x7c6   :  { %5884 = vmatprep.subr.bf16.mxu1 %v10842_v61  ;;  %v10894_v61 = vld [vmem:[%s15678_s0 + $0x328] ss:$16 sps:$4 sm:$0xff]  }
 0x7c9   :  { %5885 = vmatpush1.bf16.msra.mxu1 %v10840_v17  ;;  %v10899_v17 = vld [vmem:[%s15678_s0 + $0x34c] ss:$16 sps:$4 sm:$0xff]  }
 0x7ca   :  { %5886 = vmatprep.subr.bf16.mxu1 %v10845_v2  ;;  %v10897_v2 = vld [vmem:[%s15678_s0 + $0x348] ss:$16 sps:$4 sm:$0xff]  }
 0x7cd   :  { %5887 = vmatpush1.bf16.msra.mxu1 %v10843_v46  ;;  %v10902_v46 = vld [vmem:[%s15678_s0 + $0x36c] ss:$16 sps:$4 sm:$0xff]  }
 0x7ce   :  { %5888 = vmatprep.subr.bf16.mxu1 %v10848_v5  ;;  %v10900_v5 = vld [vmem:[%s15678_s0 + $0x368] ss:$16 sps:$4 sm:$0xff]  }
 0x7d1   :  { %5889 = vmatpush1.bf16.msra.mxu1 %v10846_v10  ;;  %v10905_v10 = vld [vmem:[%s15678_s0 + $0x38c] ss:$16 sps:$4 sm:$0xff]  }
 0x7d2   :  { %5890 = vmatprep.subr.bf16.mxu1 %v10851_v41  ;;  %v10903_v41 = vld [vmem:[%s15678_s0 + $0x388] ss:$16 sps:$4 sm:$0xff]  }
 0x7d5   :  { %5891 = vmatpush1.bf16.msra.mxu1 %v10849_v16  ;;  %v10908_v16 = vld [vmem:[%s15678_s0 + $0x3ac] ss:$16 sps:$4 sm:$0xff]  }
 0x7d6   :  { %5892 = vmatprep.subr.bf16.mxu1 %v10854_v59  ;;  %v10906_v59 = vld [vmem:[%s15678_s0 + $0x3a8] ss:$16 sps:$4 sm:$0xff]  }
 0x7d9   :  { %5893 = vmatpush1.bf16.msra.mxu1 %v10852_v26  ;;  %v10911_v26 = vld [vmem:[%s15678_s0 + $0x3cc] ss:$16 sps:$4 sm:$0xff]  }
 0x7da   :  { %5894 = vmatprep.subr.bf16.mxu1 %v10857_v6  ;;  %v10909_v6 = vld [vmem:[%s15678_s0 + $0x3c8] ss:$16 sps:$4 sm:$0xff]  }
 0x7dd   :  { %5895 = vmatpush1.bf16.msra.mxu1 %v10855_v50  ;;  %v10914_v50 = vld [vmem:[%s15678_s0 + $0x3ec] ss:$16 sps:$4 sm:$0xff]  }
 0x7de   :  { %5896 = vmatprep.subr.bf16.mxu1 %v10860_v19  ;;  %v10912_v19 = vld [vmem:[%s15678_s0 + $0x3e8] ss:$16 sps:$4 sm:$0xff]  }
 0x7e1   :  { %5897 = vmatpush1.bf16.msra.mxu1 %v10858_v32  ;;  %v10917_v32 = vld [vmem:[%s15678_s0 + $0x40c] ss:$16 sps:$4 sm:$0xff]  }
 0x7e2   :  { %5898 = vmatprep.subr.bf16.mxu1 %v10863_v58  ;;  %v10915_v58 = vld [vmem:[%s15678_s0 + $0x408] ss:$16 sps:$4 sm:$0xff]  }
 0x7e5   :  { %5899 = vmatpush1.bf16.msra.mxu1 %v10861_v51  ;;  %v10920_v51 = vld [vmem:[%s15678_s0 + $0x42c] ss:$16 sps:$4 sm:$0xff]  }
 0x7e6   :  { %5900 = vmatprep.subr.bf16.mxu1 %v10866_v55  ;;  %v10918_v55 = vld [vmem:[%s15678_s0 + $0x428] ss:$16 sps:$4 sm:$0xff]  }
 0x7e9   :  { %5901 = vmatpush1.bf16.msra.mxu1 %v10864_v24  ;;  %v10923_v24 = vld [vmem:[%s15678_s0 + $0x44c] ss:$16 sps:$4 sm:$0xff]  }
 0x7ea   :  { %5913 = vmatprep.subr.bf16.mxu1 %v10869_v11  ;;  %v10921_v11 = vld [vmem:[%s15678_s0 + $0x448] ss:$16 sps:$4 sm:$0xff]  }
 0x7ec   :  { %5903 = vmatmul.mubr.bf16.vlgmr.msra.gmra.mrb[24].mxu1 %v13849_v36  ;;  %v10878_v36 = vld [vmem:[%s15678_s0 + $0x26c] ss:$16 sps:$4 sm:$0xff]  }
 0x7ed   :  { %5914 = vmatpush1.bf16.msra.mxu1 %v10867_v27  ;;  %5945 = vmatprep.mubr.bf16.mxu1 %v13870_v31  ;;  %v10876_v31 = vld [vmem:[%s15678_s0 + $0x268] ss:$16 sps:$4 sm:$0xff]   ;;  %v10929_v27 = vld [vmem:[%s15678_s0 + $0x48c] ss:$16 sps:$4 sm:$0xff]  }
 0x7ee   :  { %5915 = vmatprep.subr.bf16.mxu1 %v10872_v21  ;;  %v10927_v21 = vld [vmem:[%s15678_s0 + $0x488] ss:$16 sps:$4 sm:$0xff]  }
 0x7f1   :  { %5916 = vmatpush1.bf16.msra.mxu1 %v10870_v22  ;;  %v10932_v22 = vld [vmem:[%s15678_s0 + $0x4ac] ss:$16 sps:$4 sm:$0xff]  }
 0x7f2   :  { %5917 = vmatprep.subr.bf16.mxu1 %v10875_v56  ;;  %v10930_v56 = vld [vmem:[%s15678_s0 + $0x4a8] ss:$16 sps:$4 sm:$0xff]  }
 0x7f5   :  { %5918 = vmatpush1.bf16.msra.mxu1 %v10873_v44  ;;  %v10935_v44 = vld [vmem:[%s15678_s0 + $0x4cc] ss:$16 sps:$4 sm:$0xff]  }
 0x7f6   :  { %5919 = vmatprep.subr.bf16.mxu1 %v10878_v36  ;;  %v10933_v36 = vld [vmem:[%s15678_s0 + $0x4c8] ss:$16 sps:$4 sm:$0xff]  }
 0x7f9   :  { %5920 = vmatpush1.bf16.msra.mxu1 %v10876_v31  ;;  %v10938_v31 = vld [vmem:[%s15678_s0 + $0x4ec] ss:$16 sps:$4 sm:$0xff]  }
 0x7fa   :  { %5921 = vmatprep.subr.bf16.mxu1 %v10881_v29  ;;  %v10936_v29 = vld [vmem:[%s15678_s0 + $0x4e8] ss:$16 sps:$4 sm:$0xff]  }
 0x7fd   :  { %5922 = vmatpush1.bf16.msra.mxu1 %v10879_v37  ;;  %v10941_v37 = vld [vmem:[%s15678_s0 + $0x50c] ss:$16 sps:$4 sm:$0xff]  }
 0x7fe   :  { %5923 = vmatprep.subr.bf16.mxu1 %v10884_v15  ;;  %v10939_v15 = vld [vmem:[%s15678_s0 + $0x508] ss:$16 sps:$4 sm:$0xff]  }
 0x801   :  { %5924 = vmatpush1.bf16.msra.mxu1 %v10882_v34  ;;  %v10944_v34 = vld [vmem:[%s15678_s0 + $0x52c] ss:$16 sps:$4 sm:$0xff]  }
 0x802   :  { %5925 = vmatprep.subr.bf16.mxu1 %v10887_v3  ;;  %v10942_v3 = vld [vmem:[%s15678_s0 + $0x528] ss:$16 sps:$4 sm:$0xff]  }
 0x805   :  { %5926 = vmatpush1.bf16.msra.mxu1 %v10885_v39  ;;  %v10947_v39 = vld [vmem:[%s15678_s0 + $0x54c] ss:$16 sps:$4 sm:$0xff]  }
 0x806   :  { %5927 = vmatprep.subr.bf16.mxu1 %v10890_v13  ;;  %v10945_v13 = vld [vmem:[%s15678_s0 + $0x548] ss:$16 sps:$4 sm:$0xff]  }
 0x809   :  { %5928 = vmatpush1.bf16.msra.mxu1 %v10888_v25  ;;  %v10950_v25 = vld [vmem:[%s15678_s0 + $0x56c] ss:$16 sps:$4 sm:$0xff]  }
 0x80a   :  { %5929 = vmatprep.subr.bf16.mxu1 %v10893_v0  ;;  %v10948_v0 = vld [vmem:[%s15678_s0 + $0x568] ss:$16 sps:$4 sm:$0xff]  }
 0x80d   :  { %5930 = vmatpush1.bf16.msra.mxu1 %v10891_v57  ;;  %v10953_v57 = vld [vmem:[%s15678_s0 + $0x58c] ss:$16 sps:$4 sm:$0xff]  }
 0x80e   :  { %5931 = vmatprep.subr.bf16.mxu1 %v10896_v33  ;;  %v10951_v33 = vld [vmem:[%s15678_s0 + $0x588] ss:$16 sps:$4 sm:$0xff]  }
 0x811   :  { %5932 = vmatpush1.bf16.msra.mxu1 %v10894_v61  ;;  %v10956_v61 = vld [vmem:[%s15678_s0 + $0x5ac] ss:$16 sps:$4 sm:$0xff]  }
 0x812   :  { %5933 = vmatprep.subr.bf16.mxu1 %v10899_v17  ;;  %v10954_v17 = vld [vmem:[%s15678_s0 + $0x5a8] ss:$16 sps:$4 sm:$0xff]  }
 0x815   :  { %5934 = vmatpush1.bf16.msra.mxu1 %v10897_v2  ;;  %v10959_v2 = vld [vmem:[%s15678_s0 + $0x5cc] ss:$16 sps:$4 sm:$0xff]  }
 0x816   :  { %5935 = vmatprep.subr.bf16.mxu1 %v10902_v46  ;;  %v10957_v46 = vld [vmem:[%s15678_s0 + $0x5c8] ss:$16 sps:$4 sm:$0xff]  }
 0x819   :  { %5936 = vmatpush1.bf16.msra.mxu1 %v10900_v5  ;;  %v10962_v5 = vld [vmem:[%s15678_s0 + $0x5ec] ss:$16 sps:$4 sm:$0xff]  }
 0x81a   :  { %5937 = vmatprep.subr.bf16.mxu1 %v10905_v10  ;;  %v10960_v10 = vld [vmem:[%s15678_s0 + $0x5e8] ss:$16 sps:$4 sm:$0xff]  }
 0x81d   :  { %5938 = vmatpush1.bf16.msra.mxu1 %v10903_v41  ;;  %v4759_v41 = vld [vmem:[%s15541_s11] sm:$0xf]  ;;  %s11141_s11 = smov 118  }
 0x81e   :  { %5939 = vmatprep.subr.bf16.mxu1 %v10908_v16  ;;  %v4764_v16 = vrot.slane %v4759_v41, %v13648_v14 }
 0x821   :  { %5940 = vmatpush1.bf16.msra.mxu1 %v10906_v59 }
 0x822   :  { %5941 = vmatprep.subr.bf16.mxu1 %v10911_v26  ;;  %v4768_v26 = vrot.slane %v4759_v41, %v13654_v63 }
 0x825   :  { %5942 = vmatpush1.bf16.msra.mxu1 %v10909_v6 }
 0x826   :  { %5943 = vmatprep.subr.bf16.mxu1 %v10914_v50 }
 0x829   :  { %5944 = vmatpush1.bf16.msra.mxu1 %v10912_v19 }
 0x82a   :  { %5956 = vmatprep.subr.bf16.mxu1 %v10917_v32 }
 0x82c   :  { %5946 = vmatmul.mubr.bf16.vlgmr.msra.gmra.mrb[24].mxu1 %v13831_v20  ;;  %v10926_v20 = vld [vmem:[%s15678_s0 + $0x46c] ss:$16 sps:$4 sm:$0xff]  }
 0x82d   :  { %5957 = vmatpush1.bf16.msra.mxu1 %v10915_v58  ;;  %5988 = vmatprep.mubr.bf16.mxu1 %v13866_v54  ;;  %v10924_v54 = vld [vmem:[%s15678_s0 + $0x468] ss:$16 sps:$4 sm:$0xff]   ;;  %s15575_s0 = smov 48  }
 0x82e   :  { %5958 = vmatprep.subr.bf16.mxu1 %v10920_v51 }
 0x831   :  { %5959 = vmatpush1.bf16.msra.mxu1 %v10918_v55 }
 0x832   :  { %5960 = vmatprep.subr.bf16.mxu1 %v10923_v24 }
 0x835   :  { %5961 = vmatpush1.bf16.msra.mxu1 %v10921_v11 }
 0x836   :  { %5962 = vmatprep.subr.bf16.mxu1 %v10926_v20 }
 0x839   :  { %5963 = vmatpush1.bf16.msra.mxu1 %v10924_v54 }
 0x83a   :  { %5964 = vmatprep.subr.bf16.mxu1 %v10929_v27 }
 0x83d   :  { %5965 = vmatpush1.bf16.msra.mxu1 %v10927_v21 }
 0x83e   :  { %5966 = vmatprep.subr.bf16.mxu1 %v10932_v22 }
 0x841   :  { %5967 = vmatpush1.bf16.msra.mxu1 %v10930_v56 }
 0x842   :  { %5968 = vmatprep.subr.bf16.mxu1 %v10935_v44 }
 0x845   :  { %5969 = vmatpush1.bf16.msra.mxu1 %v10933_v36 }
 0x846   :  { %5970 = vmatprep.subr.bf16.mxu1 %v10938_v31 }
 0x849   :  { %5971 = vmatpush1.bf16.msra.mxu1 %v10936_v29 }
 0x84a   :  { %5972 = vmatprep.subr.bf16.mxu1 %v10941_v37 }
 0x84d   :  { %5973 = vmatpush1.bf16.msra.mxu1 %v10939_v15  ;;  %v645_v15 = vsub.s32 2, %v11610_v18 }
 0x84e   :  { %5974 = vmatprep.subr.bf16.mxu1 %v10944_v34  ;;  %v649_v34 = vsub.s32 3, %v11610_v18 }
 0x851   :  { %5975 = vmatpush1.bf16.msra.mxu1 %v10942_v3  ;;  %v4772_v3 = vrot.slane %v4759_v41, %v645_v15 }
 0x852   :  { %5976 = vmatprep.subr.bf16.mxu1 %v10947_v39 }
 0x855   :  { %5977 = vmatpush1.bf16.msra.mxu1 %v10945_v13  ;;  %v4776_v13 = vrot.slane %v4759_v41, %v649_v34 }
 0x856   :  { %5978 = vmatprep.subr.bf16.mxu1 %v10950_v25 }
 0x859   :  { %5979 = vmatpush1.bf16.msra.mxu1 %v10948_v0 }
 0x85a   :  { %5980 = vmatprep.subr.bf16.mxu1 %v10953_v57 }
 0x85d   :  { %5981 = vmatpush1.bf16.msra.mxu1 %v10951_v33 }
 0x85e   :  { %5982 = vmatprep.subr.bf16.mxu1 %v10956_v61 }
 0x861   :  { %5983 = vmatpush1.bf16.msra.mxu1 %v10954_v17 }
 0x862   :  { %5984 = vmatprep.subr.bf16.mxu1 %v10959_v2 }
 0x865   :  { %5985 = vmatpush1.bf16.msra.mxu1 %v10957_v46 }
 0x866   :  { %5986 = vmatprep.subr.bf16.mxu1 %v10962_v5 }
 0x869   :  { %5987 = vmatpush1.bf16.msra.mxu1 %v10960_v10 }
 0x86c   :  { %5989 = vmatmul.mubr.bf16.vlgmr.msra.gmra.mrb[24].mxu1 %v13873_v45 }
 0x87f   :  { %v5861_v59 = vpop.f32.mrb[20].mxu1 }
 0x880   :  { %v5863_v6 = vpop.f32.mrb[21].mxu1  ;;  %v14361_v19 = vadd.f32 %v5861_v59, %v4764_v16 }
 0x881   :  { %v5865_v50 = vpop.f32.mrb[22].mxu1  ;;  %v9818_v51 = vadd.f32 %v5863_v6, %v4768_v26 }
 0x882   :  { %v14363_v32 = vadd.f32 %v5865_v50, %v4764_v16  ;;  %v5867_v58 = vpop.f32.mrb[23].mxu1 }
 0x883   :  { %v9820_v55 = vadd.f32 %v5867_v58, %v4768_v26 }
 0x884   :  { %v5999_v45 = vadd.f32 %v14363_v32, %v14361_v19 }
 0x885   :  { %v6006_v24 = vadd.f32 %v9820_v55, %v9818_v51 }
 0x886   :  { %v6000_v11 = vrot.slane %v5999_v45, 4 }
 0x887   :  { %v6007_v20 = vrot.slane %v6006_v24, 4 }
 0x888   :  { %v6001_v54 = vadd.f32 %v6000_v11, %v5999_v45 }
 0x889   :  { %v6008_v27 = vadd.f32 %v6007_v20, %v6006_v24 }
 0x88a   :  { %v6002_v21 = vrot.slane %v6001_v54, 2 }
 0x88b   :  { %v6009_v22 = vrot.slane %v6008_v27, 2 }
 0x88c   :  { %v6003_v56 = vadd.f32 %v6002_v21, %v6001_v54 }
 0x88d   :  { %v6010_v44 = vadd.f32 %v6009_v22, %v6008_v27 }
 0x88e   :  { %v6004_v36 = vrot.slane %v6003_v56, 1 }
 0x88f   :  { %v6011_v31 = vrot.slane %v6010_v44, 1 }
 0x890   :  { %v6005_v29 = vadd.f32 %v6004_v36, %v6003_v56 }
 0x891   :  { %v6012_v37 = vadd.f32 %v6011_v31, %v6010_v44 }
 0x892   :  { %6028 = vrot.lane.b32.xlu0 %v6005_v29, %s15579_s28 }
 0x893   :  { %6034 = vrot.lane.b32.xlu1 %v6012_v37, %s15579_s28 }
 0x904   :  { %v6029_v54 = vpop.permute.xlu0 %6028 }
 0x905   :  { %v6031_v27 = vadd.f32 %v6029_v54, %v6005_v29  ;;  %v6035_v22 = vpop.permute.xlu1 %6034 }
 0x907   :  { %v6032_v21 = vadd.f32 %v6031_v27, %v6012_v37 }
 0x909   :  { %v6037_v56 = vadd.f32 %v6035_v22, %v6032_v21 }
 0x93f   :  { %v5990_v39 = vpop.f32.mrb[24].mxu1 }
 0x940   :  { %v5992_v25 = vpop.f32.mrb[25].mxu1  ;;  %v9821_v57 = vadd.f32 %v5990_v39, %v4772_v3 }
 0x941   :  { %v5994_v0 = vpop.f32.mrb[26].mxu1  ;;  %v9822_v17 = vadd.f32 %v5992_v25, %v4776_v13 }
 0x942   :  { %v9823_v33 = vadd.f32 %v5994_v0, %v4772_v3  ;;  %v5996_v61 = vpop.f32.mrb[27].mxu1 }
 0x943   :  { %v9824_v2 = vadd.f32 %v5996_v61, %v4776_v13 }
 0x944   :  { %v6013_v46 = vadd.f32 %v9823_v33, %v9821_v57 }
 0x945   :  { %v6020_v5 = vadd.f32 %v9824_v2, %v9822_v17 }
 0x946   :  { %v6014_v10 = vrot.slane %v6013_v46, 4 }
 0x947   :  { %v6021_v16 = vrot.slane %v6020_v5, 4 }
 0x948   :  { %v6015_v59 = vadd.f32 %v6014_v10, %v6013_v46 }
 0x949   :  { %v6022_v26 = vadd.f32 %v6021_v16, %v6020_v5 }
 0x94a   :  { %v6016_v6 = vrot.slane %v6015_v59, 2 }
 0x94b   :  { %v6023_v50 = vrot.slane %v6022_v26, 2 }
 0x94c   :  { %v6017_v58 = vadd.f32 %v6016_v6, %v6015_v59 }
 0x94d   :  { %v6024_v45 = vadd.f32 %v6023_v50, %v6022_v26 }
 0x94e   :  { %v6018_v24 = vrot.slane %v6017_v58, 1 }
 0x94f   :  { %v6025_v11 = vrot.slane %v6024_v45, 1 }
 0x950   :  { %v6019_v41 = vadd.f32 %v6018_v24, %v6017_v58 }
 0x951   :  { %v6026_v20 = vadd.f32 %v6025_v11, %v6024_v45 }
 0x952   :  { %6040 = vrot.lane.b32.xlu0 %v6019_v41, %s15579_s28  ;;  %v6038_v44 = vadd.f32 %v6037_v56, %v6019_v41 }
 0x953   :  { %6046 = vrot.lane.b32.xlu1 %v6026_v20, %s15579_s28 }
 0x9c4   :  { %v6041_v36 = vpop.permute.xlu0 %6040 }
 0x9c5   :  { %v6043_v31 = vadd.f32 %v6041_v36, %v6038_v44  ;;  %v6047_v39 = vpop.permute.xlu1 %6046 }
 0x9c7   :  { %v6044_v3 = vadd.f32 %v6043_v31, %v6026_v20 }
 0x9c9   :  { %v6049_v13 = vadd.f32 %v6047_v39, %v6044_v3 }
 0x9cb   :  { %v6050_v25 = vmul.f32 0.0078125, %v6049_v13 }
 0x9cd   :  { %6052 = vrot.lane.b32.xlu0 %v6050_v25, %s15579_s28 }
 0xa3f   :  { %v6053_v0 = vpop.permute.xlu0 %6052 }
 0xa40   :  { %v6055_v61 = vsel %vm15596_vm1, %v6050_v25, %v6053_v0 }
 0xa41   :  { %v6059_v46 = vrot.slane %v6055_v61, %v13648_v14 }
 0xa43   :  { %v14380_v5 = vsub.f32 %v9818_v51, %v6059_v46  ;;  %v14382_v29 = vsub.f32 %v9820_v55, %v6059_v46  ;;  %v14385_v37 = vsub.f32 %v14361_v19, %v6059_v46  ;;  %v14388_v10 = vsub.f32 %v14363_v32, %v6059_v46 }
 0xa44   :  { %v14390_v16 = vsub.f32 %v9822_v17, %v6059_v46  ;;  %v14392_v59 = vsub.f32 %v9824_v2, %v6059_v46  ;;  %v14394_v26 = vsub.f32 %v9821_v57, %v6059_v46  ;;  %v14396_v6 = vsub.f32 %v9823_v33, %v6059_v46 }
 0xa45   :  { %v6069_v51 = vmul.f32 %v14380_v5, %v14380_v5  ;;  %v6073_v55 = vmul.f32 %v14382_v29, %v14382_v29  ;;  %v6068_v19 = vmul.f32 %v14385_v37, %v14385_v37  ;;  %v6072_v32 = vmul.f32 %v14388_v10, %v14388_v10 }
 0xa46   :  { %v6071_v17 = vmul.f32 %v14390_v16, %v14390_v16  ;;  %v6075_v57 = vmul.f32 %v14392_v59, %v14392_v59  ;;  %v6070_v33 = vmul.f32 %v14394_v26, %v14394_v26  ;;  %v6074_v2 = vmul.f32 %v14396_v6, %v14396_v6 }
 0xa47   :  { %v6083_v50 = vadd.f32 %v6073_v55, %v6069_v51  ;;  %v6076_v58 = vadd.f32 %v6072_v32, %v6068_v19 }
 0xa48   :  { %v6097_v45 = vadd.f32 %v6075_v57, %v6071_v17  ;;  %v6090_v24 = vadd.f32 %v6074_v2, %v6070_v33  ;;  %v14419_v17 = vld [vmem:[%s15542_s13] sm:$0x1]  ;;  %s11145_s13 = smov 110  }
 0xa49   :  { %v6084_v11 = vrot.slane %v6083_v50, 4  ;;  %v6077_v41 = vrot.slane %v6076_v58, 4  ;;  %v6146_v2 = vrot.slane %v14419_v17, %v13648_v14 }
 0xa4a   :  { %v6098_v20 = vrot.slane %v6097_v45, 4  ;;  %v6091_v54 = vrot.slane %v6090_v24, 4 }
 0xa4b   :  { %v6085_v27 = vadd.f32 %v6084_v11, %v6083_v50  ;;  %v6078_v21 = vadd.f32 %v6077_v41, %v6076_v58  ;;  %v10963_v50 = vld [vmem:[%s15543_s14 + $0x40] sm:$0xff]  }
 0xa4c   :  { %v6099_v22 = vadd.f32 %v6098_v20, %v6097_v45  ;;  %v6092_v56 = vadd.f32 %v6091_v54, %v6090_v24  ;;  %v10964_v58 = vld [vmem:[%s15543_s14] sm:$0xff]   ;;  %9596 = vmatprep.subr.bf16.mxu1 %v10963_v50  ;;  %v10969_v45 = vld [vmem:[%s15543_s14 + $0x58] sm:$0xff]  }
 0xa4d   :  { %v6086_v44 = vrot.slane %v6085_v27, 2  ;;  %v6079_v36 = vrot.slane %v6078_v21, 2  ;;  %9597 = vmatpush3.bf16.msra.mxu1 %v10964_v58  ;;  %v10970_v24 = vld [vmem:[%s15543_s14 + $0x18] sm:$0xff]   ;;  %v10979_v50 = vld [vmem:[%s15543_s14 + $0xc0] sm:$0xff]  }
 0xa4e   :  { %v6100_v31 = vrot.slane %v6099_v22, 2  ;;  %v6093_v3 = vrot.slane %v6092_v56, 2 }
 0xa4f   :  { %v6087_v39 = vadd.f32 %v6086_v44, %v6085_v27  ;;  %v6080_v13 = vadd.f32 %v6079_v36, %v6078_v21 }
 0xa50   :  { %v6101_v25 = vadd.f32 %v6100_v31, %v6099_v22  ;;  %v6094_v0 = vadd.f32 %v6093_v3, %v6092_v56 }
 0xa51   :  { %v6088_v61 = vrot.slane %v6087_v39, 1  ;;  %v6081_v46 = vrot.slane %v6080_v13, 1 }
 0xa52   :  { %v6102_v19 = vrot.slane %v6101_v25, 1  ;;  %v6095_v32 = vrot.slane %v6094_v0, 1 }
 0xa53   :  { %v6089_v51 = vadd.f32 %v6088_v61, %v6087_v39  ;;  %v6082_v55 = vadd.f32 %v6081_v46, %v6080_v13  ;;  %v10971_v13 = vld [vmem:[%s15543_s14 + $0x60] sm:$0xff]   ;;  %v10973_v61 = vld [vmem:[%s15543_s14 + $0x68] sm:$0xff]  }
 0xa54   :  { %v6103_v57 = vadd.f32 %v6102_v19, %v6101_v25  ;;  %v6096_v33 = vadd.f32 %v6095_v32, %v6094_v0  ;;  %v10972_v25 = vld [vmem:[%s15543_s14 + $0x20] sm:$0xff]   ;;  %v10974_v46 = vld [vmem:[%s15543_s14 + $0x28] sm:$0xff]   ;;  %v10975_v19 = vld [vmem:[%s15543_s14 + $0x70] sm:$0xff]  }
 0xa55   :  { %6111 = vrot.lane.b32.xlu0 %v6089_v51, %s15579_s28  ;;  %6105 = vrot.lane.b32.xlu1 %v6082_v55, %s15579_s28  ;;  %v6128_v0 = vld [vmem:[%s15544_s12] sm:$0x1]  ;;  %s11146_s12 = smov 104  }
 0xa59   :  { %6123 = vrot.lane.b32.xlu0 %v6103_v57, %s15579_s28  ;;  %6117 = vrot.lane.b32.xlu1 %v6096_v33, %s15579_s28 }
 0xa5d   :  { %6147 = vrot.lane.b32.xlu0 %v6146_v2, %s15579_s28  ;;  %v10978_v2 = vld [vmem:[%s15543_s14 + $0x38] sm:$0xff]  }
 0xa61   :  { %604 = vrot.lane.b32.xlu0 %v12743_v53, %s15579_s28  ;;  %v10965_v53 = vld [vmem:[%s15543_s14 + $0x48] sm:$0xff]  }
 0xa62   :  { %9598 = vmatprep.subr.bf16.mxu1 %v10965_v53 }
 0xa65   :  { %596 = vrot.lane.b32.xlu0 %v12733_v38, %s15579_s28  ;;  %v10966_v38 = vld [vmem:[%s15543_s14 + $0x8] sm:$0xff]  }
 0xa66   :  { %9599 = vmatpush3.bf16.msra.mxu1 %v10966_v38 }
 0xa69   :  { %620 = vrot.lane.b32.xlu0 %v12772_v48, %s15579_s28  ;;  %v10968_v48 = vld [vmem:[%s15543_s14 + $0x10] sm:$0xff]  }
 0xa6d   :  { %612 = vrot.lane.b32.xlu0 %v12753_v28, %s15579_s28  ;;  %v10967_v28 = vld [vmem:[%s15543_s14 + $0x50] sm:$0xff]  }
 0xa6e   :  { %9600 = vmatprep.subr.bf16.mxu1 %v10967_v28  ;;  %v14506_v28 = vld [vmem:[%s15546_s1 + $0x8] sm:$0xff] }
 0xa6f   :  { %9601 = vmatpush3.bf16.msra.mxu1 %v10968_v48 }
 0xa70   :  { %9602 = vmatprep.subr.bf16.mxu1 %v10969_v45 }
 0xa73   :  { %9603 = vmatpush3.bf16.msra.mxu1 %v10970_v24 }
 0xa74   :  { %9604 = vmatprep.subr.bf16.mxu1 %v10971_v13 }
 0xa77   :  { %9605 = vmatpush3.bf16.msra.mxu1 %v10972_v25 }
 0xa78   :  { %9606 = vmatprep.subr.bf16.mxu1 %v10973_v61 }
 0xa7b   :  { %9607 = vmatpush3.bf16.msra.mxu1 %v10974_v46 }
 0xa7c   :  { %9608 = vmatprep.subr.bf16.mxu1 %v10975_v19 }
 0xac7   :  { %v6106_v11 = vpop.permute.xlu1 %6105  ;;  %v6112_v54 = vpop.permute.xlu0 %6111 }
 0xac8   :  { %v6108_v41 = vadd.f32 %v6106_v11, %v6082_v55 }
 0xaca   :  { %v6109_v20 = vadd.f32 %v6108_v41, %v6089_v51 }
 0xacb   :  { %v6118_v22 = vpop.permute.xlu1 %6117  ;;  %v6124_v36 = vpop.permute.xlu0 %6123 }
 0xacc   :  { %v6114_v27 = vadd.f32 %v6112_v54, %v6109_v20 }
 0xace   :  { %v6115_v21 = vadd.f32 %v6114_v27, %v6096_v33  ;;  %v10977_v33 = vld [vmem:[%s15543_s14 + $0x78] sm:$0xff]  }
 0xacf   :  { %v6148_v58 = vpop.permute.xlu0 %6147 }
 0xad0   :  { %v6120_v56 = vadd.f32 %v6118_v22, %v6115_v21  ;;  %v6150_v24 = vsel %vm15596_vm1, %v14419_v17, %v6148_v58 }
 0xad2   :  { %v6121_v44 = vadd.f32 %v6120_v56, %v6103_v57  ;;  %v10976_v57 = vld [vmem:[%s15543_s14 + $0x30] sm:$0xff]  }
 0xad3   :  { %9609 = vmatpush3.bf16.msra.mxu1 %v10976_v57  ;;  %v605_v53 = vpop.permute.xlu0 %604 }
 0xad4   :  { %v6126_v31 = vadd.f32 %v6124_v36, %v6121_v44  ;;  %9610 = vmatprep.subr.bf16.mxu1 %v10977_v33  ;;  %v628_v54 = vsel %vm15596_vm1, %v12436_v8, %v605_v53  ;;  %v6166_v36 = vrot.slane %v6150_v24, %v13648_v14 }
 0xad6   :  { %v6127_v3 = vmul.f32 0.0078125, %v6126_v31 }
 0xad7   :  { %9611 = vmatpush3.bf16.msra.mxu1 %v10978_v2  ;;  %v597_v38 = vpop.permute.xlu0 %596 }
 0xad8   :  { %v6129_v39 = vadd.f32 1e-05, %v6127_v3  ;;  %9618 = vmatprep.subr.bf16.mxu1 %v10979_v50  ;;  %v626_v56 = vsel %vm15596_vm1, %v12180_v42, %v597_v38 }
 0xada   :  { %11111 = vrsqrt.f32 %v6129_v39 }
 0xadb   :  { %v621_v48 = vpop.permute.xlu0 %620 }
 0xadc   :  { %v632_v8 = vsel %vm15596_vm1, %v12652_v43, %v621_v48 }
 0xadf   :  { %v613_v21 = vpop.permute.xlu0 %612 }
 0xae4   :  { %v11112_v51 = vpop.eup %11111 }
 0xae5   :  { %v6131_v55 = vmul.f32 %v11112_v51, %v6128_v0 }
 0xae7   :  { %v6136_v32 = vrot.slane %v6131_v55, %v13648_v14 }
 0xae9   :  { %6137 = vrot.lane.b32.xlu1 %v6136_v32, %s15579_s28 }
 0xaed   :  { %602 = vrot.lane.b32.xlu1 %v12738_v1, %s15579_s28  ;;  %v14501_v1 = vld [vmem:[%s15546_s1] sm:$0xff]  ;;  %s11142_s1 = smov 112  }
 0xaf1   :  { %594 = vrot.lane.b32.xlu1 %v12725_v23, %s15579_s28  ;;  %v6654_v23 = vrot.slane %v14501_v1, 1 }
 0xaf5   :  { %618 = vrot.lane.b32.xlu1 %v12764_v4, %s15579_s28  ;;  %v6659_v4 = vrot.slane %v14506_v28, 1 }
 0xaf7   :  { %v6664_v45 = vsel %vm15598_vm4, %v6654_v23, %v6659_v4  ;;  %v6669_v20 = vsel %vm15598_vm4, %v6659_v4, %v6654_v23 }
 0xaf8   :  { %v14530_v44 = vmul.f32 %v6664_v45, %v11697_v49  ;;  %v14540_v3 = vmul.f32 %v6669_v20, %v11706_v52 }
 0xaf9   :  { %610 = vrot.lane.b32.xlu1 %v12748_v47, %s15579_s28  ;;  %v633_v47 = vld [vmem:[%s15547_s5] sm:$0xf]  ;;  %s11143_s5 = smov 114   ;;  %s11158_s28 = smov 14  }
 0xafa   :  { %v642_v11 = vrot.slane %v633_v47, %v13654_v63  ;;  %v638_v27 = vrot.slane %v633_v47, %v13648_v14  ;;  %v650_v17 = vrot.slane %v633_v47, %v649_v34  ;;  %v14537_v31 = vrot.slane %v633_v47, %v645_v15 }
 0xafb   :  { %v630_v34 = vsel %vm15596_vm1, %v12560_v30, %v613_v21 }
 0xafc   :  { %v660_v42 = vadd.f32 %v642_v11, %v628_v54  ;;  %v659_v0 = vadd.f32 %v638_v27, %v626_v56  ;;  %v662_v46 = vadd.f32 %v650_v17, %v632_v8  ;;  %v661_v30 = vadd.f32 %v14537_v31, %v630_v34 }
 0xb5b   :  { %v6138_v41 = vpop.permute.xlu1 %6137 }
 0xb5c   :  { %v6140_v22 = vsel %vm15596_vm1, %v6131_v55, %v6138_v41 }
 0xb5d   :  { %v6154_v63 = vrot.slane %v6140_v22, %v13648_v14 }
 0xb5f   :  { %v6156_v39 = vmul.f32 %v6154_v63, %v14380_v5  ;;  %v603_v13 = vpop.permute.xlu1 %602  ;;  %v6160_v25 = vmul.f32 %v6154_v63, %v14382_v29  ;;  %v6159_v61 = vmul.f32 %v6154_v63, %v14388_v10  ;;  %v6162_v15 = vmul.f32 %v6154_v63, %v14392_v59 }
 0xb60   :  { %v627_v43 = vsel %vm15596_vm1, %v12431_v40, %v603_v13  ;;  %v6155_v19 = vmul.f32 %v6154_v63, %v14385_v37  ;;  %v6158_v2 = vmul.f32 %v6154_v63, %v14390_v16  ;;  %v6157_v40 = vmul.f32 %v6154_v63, %v14394_v26 }
 0xb61   :  { %v6168_v51 = vadd.f32 %v6166_v36, %v6156_v39  ;;  %v656_v55 = vadd.f32 %v642_v11, %v627_v43  ;;  %v6172_v32 = vadd.f32 %v6166_v36, %v6160_v25  ;;  %v6171_v5 = vadd.f32 %v6166_v36, %v6159_v61 }
 0xb62   :  { %v6174_v57 = vadd.f32 %v6166_v36, %v6162_v15  ;;  %v6161_v10 = vmul.f32 %v6154_v63, %v14396_v6  ;;  %v6167_v38 = vadd.f32 %v6166_v36, %v6155_v19  ;;  %v14559_v16 = vpack.c.bf16 %v14506_v28, %v14501_v1 }
 0xb63   :  { %v6176_v33 = vadd.f32 %v6168_v51, %v656_v55  ;;  %v595_v29 = vpop.permute.xlu1 %594  ;;  %v6180_v50 = vadd.f32 %v6172_v32, %v660_v42  ;;  %v6179_v58 = vadd.f32 %v6171_v5, %v659_v0  ;;  %v6170_v24 = vadd.f32 %v6166_v36, %v6158_v2  ;;  %v10980_v0 = vld [vmem:[%s15543_s14 + $0x80] sm:$0xff]  }
 0xb64   :  { %v625_v59 = vsel %vm15596_vm1, %v12174_v7, %v595_v29  ;;  %v6182_v53 = vadd.f32 %v6174_v57, %v662_v46  ;;  %v6173_v4 = vadd.f32 %v6166_v36, %v6161_v10  ;;  %v6169_v63 = vadd.f32 %v6166_v36, %v6157_v40 }
 0xb65   :  { %v6184_v37 = vmul.f32 0.01, %v6176_v33  ;;  %v655_v23 = vadd.f32 %v638_v27, %v625_v59  ;;  %v6188_v47 = vmul.f32 0.01, %v6180_v50  ;;  %v6187_v48 = vmul.f32 0.01, %v6179_v58 }
 0xb66   :  { %v6190_v45 = vmul.f32 0.01, %v6182_v53  ;;  %v6181_v7 = vadd.f32 %v6173_v4, %v661_v30  ;;  %v10983_v4 = vld [vmem:[%s15543_s14 + $0xd0] sm:$0xff]  }
 0xb67   :  { %v14561_v26 = vmax.f32 %v6176_v33, %v6184_v37  ;;  %v6175_v6 = vadd.f32 %v6167_v38, %v655_v23  ;;  %v619_v11 = vpop.permute.xlu1 %618  ;;  %v14565_v20 = vmax.f32 %v6180_v50, %v6188_v47  ;;  %v14567_v54 = vmax.f32 %v6179_v58, %v6187_v48 }
 0xb68   :  { %v631_v41 = vsel %vm15596_vm1, %v12650_v9, %v619_v11  ;;  %v14569_v27 = vmax.f32 %v6182_v53, %v6190_v45  ;;  %v6189_v39 = vmul.f32 0.01, %v6181_v7 }
 0xb69   :  { %v6621_v21 = vrot.slane %v14561_v26, 7  ;;  %v6183_v22 = vmul.f32 0.01, %v6175_v6  ;;  %v658_v56 = vadd.f32 %v650_v17, %v631_v41  ;;  %v6651_v8 = vrot.slane %v14561_v26, 1 }
 0xb6a   :  { %v6202_v42 = vpack.c.bf16 %v14565_v20, %v14561_v26  ;;  %v6625_v34 = vrot.slane %v14567_v54, 7  ;;  %v6655_v43 = vrot.slane %v14567_v54, 1  ;;  %v6656_v17 = vrot.slane %v14565_v20, 1 }
 0xb6b   :  { %v14576_v9 = vmax.f32 %v6175_v6, %v6183_v22  ;;  %v6178_v13 = vadd.f32 %v6170_v24, %v658_v56  ;;  %v611_v25 = vpop.permute.xlu1 %610  ;;  %v14586_v61 = vmax.f32 %v6181_v7, %v6189_v39  ;;  %v6658_v15 = vrot.slane %v14569_v27, 1  ;;  %v10985_v39 = vld [vmem:[%s15543_s14 + $0xd8] sm:$0xff]  }
 0xb6c   :  { %6697 = vrot.lane.b32.xlu0 %v6202_v42, %s15575_s0  ;;  %6529 = vmatprep.mubr.bf16.mxu1 %v6202_v42  ;;  %v629_v36 = vsel %vm15596_vm1, %v12555_v12, %v611_v25  ;;  %v6626_v46 = vrot.slane %v14565_v20, 7  ;;  %v6628_v30 = vrot.slane %v14569_v27, 7  ;;  %v10981_v12 = vld [vmem:[%s15543_s14 + $0xc8] sm:$0xff]   ;;  %v6661_v33 = vsel %vm15598_vm4, %v6651_v8, %v6656_v17 }
 0xb6d   :  { %v6650_v51 = vrot.slane %v14576_v9, 1  ;;  %v6186_v55 = vmul.f32 0.01, %v6178_v13  ;;  %v657_v19 = vadd.f32 %v14537_v31, %v629_v36  ;;  %v6620_v32 = vrot.slane %v14576_v9, 7  ;;  %v10982_v31 = vld [vmem:[%s15543_s14 + $0x88] sm:$0xff]  }
 0xb6e   :  { %v6201_v5 = vpack.c.bf16 %v14567_v54, %v14576_v9  ;;  %v6657_v57 = vrot.slane %v14586_v61, 1  ;;  %v6666_v58 = vsel %vm15598_vm4, %v6656_v17, %v6651_v8  ;;  %v6671_v48 = vmul.f32 %v6661_v33, %v11697_v49 }
 0xb6f   :  { %v6194_v29 = vmax.f32 %v6178_v13, %v6186_v55  ;;  %v6177_v2 = vadd.f32 %v6169_v63, %v657_v19  ;;  %v6660_v40 = vsel %vm15598_vm4, %v6650_v51, %v6655_v43  ;;  %v6665_v10 = vsel %vm15598_vm4, %v6655_v43, %v6650_v51  ;;  %v10984_v63 = vld [vmem:[%s15543_s14 + $0x90] sm:$0xff]  }
 0xb70   :  { %6695 = vrot.lane.b32.xlu1 %v6201_v5, %s15575_s0  ;;  %6530 = vmatmul.mubr.bf16.vlgmr.msra.gmra.mrb[28].mxu1 %v6201_v5  ;;  %v6670_v59 = vmul.f32 %v6660_v40, %v11697_v49  ;;  %v6675_v50 = vmul.f32 %v6665_v10, %v11706_v52  ;;  %v6676_v45 = vmul.f32 %v6666_v58, %v11706_v52  ;;  %v10988_v40 = vld [vmem:[%s15543_s14 + $0xa0] sm:$0xff]   ;;  %v10990_v58 = vld [vmem:[%s15543_s14 + $0xa8] sm:$0xff]   ;;  %vm8022_vm1 = vcmask 211968  }
 0xb71   :  { %v6623_v53 = vrot.slane %v6194_v29, 7  ;;  %v6653_v37 = vrot.slane %v6194_v29, 1  ;;  %v6185_v38 = vmul.f32 0.01, %v6177_v2  ;;  %9619 = vmatpush3.bf16.msra.mxu1 %v10980_v0  ;;  %v6204_v23 = vpack.c.bf16 %v14569_v27, %v6194_v29 }
 0xb72   :  { %9620 = vmatprep.subr.bf16.mxu1 %v10981_v12  ;;  %v6685_v47 = vpack.c.bf16 %v6675_v50, %v6670_v59  ;;  %v6631_v26 = vsel %vm15597_vm2, %v6621_v21, %v6626_v46  ;;  %v6686_v7 = vpack.c.bf16 %v6676_v45, %v6671_v48  ;;  %v6636_v27 = vsel %vm15597_vm2, %v6626_v46, %v6621_v21  ;;  %v10986_v46 = vld [vmem:[%s15543_s14 + $0x98] sm:$0xff]   ;;  %v10987_v12 = vld [vmem:[%s15543_s14 + $0xe0] sm:$0xff]   ;;  %v10989_v50 = vld [vmem:[%s15543_s14 + $0xe8] sm:$0xff]  }
 0xb73   :  { %v6193_v6 = vmax.f32 %v6177_v2, %v6185_v38  ;;  %6701 = vrot.lane.b32.xlu0 %v6204_v23, %s15575_s0  ;;  %6570 = vmatprep.mubr.bf16.mxu1 %v6204_v23  ;;  %v6663_v24 = vsel %vm15598_vm4, %v6653_v37, %v6658_v15  ;;  %v6668_v11 = vsel %vm15598_vm4, %v6658_v15, %v6653_v37  ;;  %v6627_v0 = vrot.slane %v14586_v61, 7  ;;  %v10994_v37 = vld [vmem:[%s15543_s14 + $0xb8] sm:$0xff]   ;;  %v10995_v38 = vld [vmem:[%s15543_s14 + $0x100] sm:$0xff]  }
 0xb74   :  { %v6673_v41 = vmul.f32 %v6663_v24, %v11697_v49  ;;  %v6678_v20 = vmul.f32 %v6668_v11, %v11706_v52  ;;  %v14636_v42 = vmul.f32 %v6636_v27, %v11663_v35  ;;  %v14642_v21 = vmul.f32 %v6631_v26, %v11651_v60  ;;  %v10998_v48 = vld [vmem:[%s15545_s16 + $0x40] sm:$0xff]   ;;  %v11000_v26 = vld [vmem:[%s15545_s16 + $0x48] sm:$0xff]   ;;  %v11002_v24 = vld [vmem:[%s15545_s16 + $0x50] sm:$0xff]  }
 0xb75   :  { %v6622_v22 = vrot.slane %v6193_v6, 7  ;;  %v6652_v56 = vrot.slane %v6193_v6, 1  ;;  %9621 = vmatpush3.bf16.msra.mxu1 %v10982_v31  ;;  %v6203_v8 = vpack.c.bf16 %v14586_v61, %v6193_v6  ;;  %v6630_v13 = vsel %vm15597_vm2, %v6620_v32, %v6625_v34  ;;  %v10999_v45 = vld [vmem:[%s15545_s16] sm:$0xff]   ;;  %v11001_v6 = vld [vmem:[%s15545_s16 + $0x8] sm:$0xff]   ;;  %v11003_v11 = vld [vmem:[%s15545_s16 + $0x10] sm:$0xff]  }
 0xb76   :  { %9622 = vmatprep.subr.bf16.mxu1 %v10983_v4  ;;  %v6688_v9 = vpack.c.bf16 %v6678_v20, %v6673_v41  ;;  %v6635_v25 = vsel %vm15597_vm2, %v6625_v34, %v6620_v32  ;;  %v6681_v34 = vpack.c.bf16 %v14642_v21, %v14636_v42  ;;  %v14667_v61 = vmul.f32 %v6630_v13, %v11651_v60  ;;  %v10996_v4 = vld [vmem:[%s15543_s14 + $0x108] sm:$0xff]   ;;  %v11006_v41 = vld [vmem:[%s15545_s16 + $0x60] sm:$0xff]   ;;  %v11013_v42 = vld [vmem:[%s15545_s16 + $0x38] sm:$0xff]  }
 0xb77   :  { %6718 = vrot.lane.b32.xlu0 %v6685_v47, %s15577_s10  ;;  %6699 = vrot.lane.b32.xlu1 %v6203_v8, %s15575_s0  ;;  %v6662_v43 = vsel %vm15598_vm4, %v6652_v56, %v6657_v57  ;;  %v6667_v17 = vsel %vm15598_vm4, %v6657_v57, %v6652_v56  ;;  %v14660_v36 = vmul.f32 %v6635_v25, %v11663_v35  ;;  %v11134_v23 = vmov 0.0   ;;  %v10997_v47 = vld [vmem:[%s15543_s14 + $0x110] sm:$0xff]   ;;  %v11007_v20 = vld [vmem:[%s15545_s16 + $0x20] sm:$0xff]  }
 0xb78   :  { %v6672_v54 = vmul.f32 %v6662_v43, %v11697_v49  ;;  %v6677_v15 = vmul.f32 %v6667_v17, %v11706_v52  ;;  %v6633_v51 = vsel %vm15597_vm2, %v6623_v53, %v6628_v30  ;;  %v6638_v55 = vsel %vm15597_vm2, %v6628_v30, %v6623_v53  ;;  %v10991_v53 = vld [vmem:[%s15543_s14 + $0xf0] sm:$0xff]   ;;  %v11008_v27 = vld [vmem:[%s15545_s16 + $0x68] sm:$0xff]   ;;  %v11020_v43 = vld [vmem:[%s15545_s16 + $0xd8] sm:$0xff]  }
 0xb79   :  { %9623 = vmatpush3.bf16.msra.mxu1 %v10984_v63  ;;  %v6632_v19 = vsel %vm15597_vm2, %v6622_v22, %v6627_v0  ;;  %v6637_v32 = vsel %vm15597_vm2, %v6627_v0, %v6622_v22  ;;  %v6680_v57 = vpack.c.bf16 %v14667_v61, %v14660_v36  ;;  %v14686_v33 = vmul.f32 %v6638_v55, %v11663_v35  ;;  %v11009_v22 = vld [vmem:[%s15545_s16 + $0x28] sm:$0xff]   ;;  %v11010_v56 = vld [vmem:[%s15545_s16 + $0x70] sm:$0xff]   ;;  %v11021_v17 = vld [vmem:[%s15545_s16 + $0x98] sm:$0xff]  }
 0xb7a   :  { %9624 = vmatprep.subr.bf16.mxu1 %v10985_v39  ;;  %v6687_v5 = vpack.c.bf16 %v6677_v15, %v6672_v54  ;;  %v14689_v30 = vmul.f32 %v6633_v51, %v11651_v60  ;;  %v14694_v29 = vmul.f32 %v6637_v32, %v11663_v35  ;;  %v14697_v2 = vmul.f32 %v6632_v19, %v11651_v60  ;;  %v11011_v63 = vld [vmem:[%s15545_s16 + $0x30] sm:$0xff]   ;;  %v11014_v39 = vld [vmem:[%s15545_s16 + $0xc0] sm:$0xff]   ;;  %v11016_v21 = vld [vmem:[%s15545_s16 + $0xc8] sm:$0xff]  }
 0xb7b   :  { %6703 = vrot.lane.b32.xlu1 %v14559_v16, %s15575_s0  ;;  %v6689_v59 = vpack.c.bf16 %v14540_v3, %v14530_v44  ;;  %v10992_v44 = vld [vmem:[%s15543_s14 + $0xb0] sm:$0xff]   ;;  %v10993_v3 = vld [vmem:[%s15543_s14 + $0xf8] sm:$0xff]   ;;  %v11017_v13 = vld [vmem:[%s15545_s16 + $0x88] sm:$0xff]   ;;  %s15584_s14 = smov 8   ;;  %s15590_s0 = smov 10   ;;  %vm8026_vm4 = vcmask 244736  }
 0xb7c   :  { %6722 = vrot.lane.b32.xlu0 %v6687_v5, %s15577_s10  ;;  %v6683_v31 = vpack.c.bf16 %v14689_v30, %v14686_v33  ;;  %v6682_v10 = vpack.c.bf16 %v14697_v2, %v14694_v29  ;;  %v11018_v25 = vld [vmem:[%s15545_s16 + $0xd0] sm:$0xff]   ;;  %v11022_v36 = vld [vmem:[%s15545_s16 + $0xe0] sm:$0xff]   ;;  %v11024_v15 = vld [vmem:[%s15545_s16 + $0xe8] sm:$0xff]  }
 0xb7d   :  { %9625 = vmatpush3.bf16.msra.mxu1 %v10986_v46  ;;  %v11019_v0 = vld [vmem:[%s15545_s16 + $0x90] sm:$0xff]   ;;  %v11023_v54 = vld [vmem:[%s15545_s16 + $0xa0] sm:$0xff]   ;;  %v11028_v51 = vld [vmem:[%s15545_s16 + $0xf8] sm:$0xff]  }
 0xb7e   :  { %9626 = vmatprep.subr.bf16.mxu1 %v10987_v12  ;;  %v11026_v61 = vld [vmem:[%s15545_s16 + $0xf0] sm:$0xff]   ;;  %v11029_v55 = vld [vmem:[%s15545_s16 + $0xb8] sm:$0xff]   ;;  %v11030_v19 = vld [vmem:[%s15545_s16 + $0x140] sm:$0xff]  }
 0xb7f   :  { %6720 = vrot.lane.b32.xlu1 %v6686_v7, %s15577_s10  ;;  %v11005_v7 = vld [vmem:[%s15545_s16 + $0x18] sm:$0xff]   ;;  %v11027_v46 = vld [vmem:[%s15545_s16 + $0xb0] sm:$0xff]   ;;  %v11031_v32 = vld [vmem:[%s15545_s16 + $0x100] sm:$0xff]  }
 0xb80   :  { %6726 = vrot.lane.b32.xlu0 %v6689_v59, %s15577_s10  ;;  %v11032_v5 = vld [vmem:[%s15545_s16 + $0x148] sm:$0xff]   ;;  %v11035_v33 = vld [vmem:[%s15545_s16 + $0x110] sm:$0xff]   ;;  %v11036_v29 = vld [vmem:[%s15545_s16 + $0x158] sm:$0xff]  }
 0xb81   :  { %9627 = vmatpush3.bf16.msra.mxu1 %v10988_v40  ;;  %v11033_v12 = vld [vmem:[%s15545_s16 + $0x108] sm:$0xff]   ;;  %v11037_v40 = vld [vmem:[%s15545_s16 + $0x118] sm:$0xff]   ;;  %v11039_v59 = vld [vmem:[%s15545_s16 + $0x120] sm:$0xff]  }
 0xb82   :  { %9628 = vmatprep.subr.bf16.mxu1 %v10989_v50  ;;  %v11040_v50 = vld [vmem:[%s15545_s16 + $0x168] sm:$0xff]  }
 0xb83   :  { %6724 = vrot.lane.b32.xlu1 %v6688_v9, %s15577_s10  ;;  %v11015_v9 = vld [vmem:[%s15545_s16 + $0x80] sm:$0xff]   ;;  %s15592_s10 = smov 16  }
 0xb85   :  { %9629 = vmatpush3.bf16.msra.mxu1 %v10990_v58  ;;  %v11041_v58 = vld [vmem:[%s15545_s16 + $0x128] sm:$0xff]  }
 0xb86   :  { %9630 = vmatprep.subr.bf16.mxu1 %v10991_v53  ;;  %v6624_v53 = vrot.slane %v14501_v1, 7 }
 0xb89   :  { %9631 = vmatpush3.bf16.msra.mxu1 %v10992_v44  ;;  %v6629_v44 = vrot.slane %v14506_v28, 7 }
 0xb8a   :  { %9632 = vmatprep.subr.bf16.mxu1 %v10993_v3  ;;  %v11042_v3 = vld [vmem:[%s15545_s16 + $0x170] sm:$0xff]  }
 0xb8b   :  { %v6634_v1 = vsel %vm15597_vm2, %v6624_v53, %v6629_v44  ;;  %v6639_v28 = vsel %vm15597_vm2, %v6629_v44, %v6624_v53  ;;  %v11080_v53 = vld [vmem:[%s15545_s16 + $0x2c8] sm:$0xff]   ;;  %vm8024_vm2 = vcmask 228352  }
 0xb8d   :  { %9633 = vmatpush3.bf16.msra.mxu1 %v10994_v37  ;;  %v11043_v37 = vld [vmem:[%s15545_s16 + $0x130] sm:$0xff]  }
 0xb8e   :  { %9783 = vmatprep.subr.bf16.mxu1 %v11134_v23 }
 0xb90   :  { %6571 = vmatmul.mubr.bf16.vlgmr.msra.gmra.mrb[32].mxu1 %v6203_v8  ;;  %v11012_v8 = vld [vmem:[%s15545_s16 + $0x78] sm:$0xff]  }
 0xb91   :  { %9784 = vmatpush3.bf16.msra.mxu1 %v10995_v38  ;;  %9789 = vmatprep.mubr.msk.bf16.mxu1 %vm11135_vm5, %v11134_v23  ;;  %v11044_v38 = vld [vmem:[%s15545_s16 + $0x178] sm:$0xff]  }
 0xb92   :  { %9785 = vmatprep.subr.bf16.mxu1 %v11134_v23 }
 0xb95   :  { %9786 = vmatpush3.bf16.msra.mxu1 %v10996_v4  ;;  %v11045_v4 = vld [vmem:[%s15545_s16 + $0x138] sm:$0xff]  }
 0xb96   :  { %9787 = vmatprep.subr.bf16.mxu1 %v11134_v23 }
 0xb99   :  { %9788 = vmatpush3.bf16.msra.mxu1 %v10997_v47  ;;  %v6644_v47 = vmul.f32 %v6639_v28, %v11663_v35  ;;  %v11083_v28 = vld [vmem:[%s15545_s16 + $0x290] sm:$0xff]  }
 0xb9a   :  { %9644 = vmatprep.subr.bf16.mxu1 %v10998_v48  ;;  %v6649_v48 = vmul.f32 %v6634_v1, %v11651_v60  ;;  %v11082_v1 = vld [vmem:[%s15545_s16 + $0x2d0] sm:$0xff]  }
 0xb9c   :  { %9790 = vmatmul.mubr.msk.bf16.vlgmr.msra.gmra.mrb[36].mxu1 %vm15594_vm6, %v14559_v16  ;;  %v11004_v16 = vld [vmem:[%s15545_s16 + $0x58] sm:$0xff]  }
 0xb9d   :  { %9645 = vmatpush3.bf16.msra.mxu1 %v10999_v45  ;;  %7627 = vmatprep.mubr.bf16.mxu1 %v6681_v34  ;;  %v11025_v34 = vld [vmem:[%s15545_s16 + $0xa8] sm:$0xff]   ;;  %v11046_v45 = vld [vmem:[%s15545_s16 + $0x1c0] sm:$0xff]  }
 0xb9e   :  { %9646 = vmatprep.subr.bf16.mxu1 %v11000_v26 }
 0xba1   :  { %9647 = vmatpush3.bf16.msra.mxu1 %v11001_v6  ;;  %v6684_v6 = vpack.c.bf16 %v6649_v48, %v6644_v47 }
 0xba2   :  { %9648 = vmatprep.subr.bf16.mxu1 %v11002_v24  ;;  %v11047_v24 = vld [vmem:[%s15545_s16 + $0x180] sm:$0xff]  }
 0xba5   :  { %9649 = vmatpush3.bf16.msra.mxu1 %v11003_v11  ;;  %v11048_v11 = vld [vmem:[%s15545_s16 + $0x1c8] sm:$0xff]  }
 0xba6   :  { %9650 = vmatprep.subr.bf16.mxu1 %v11004_v16 }
 0xba9   :  { %9651 = vmatpush3.bf16.msra.mxu1 %v11005_v7 }
 0xbaa   :  { %9652 = vmatprep.subr.bf16.mxu1 %v11006_v41 }
 0xbad   :  { %9653 = vmatpush3.bf16.msra.mxu1 %v11007_v20  ;;  %v11049_v20 = vld [vmem:[%s15545_s16 + $0x188] sm:$0xff]  }
 0xbae   :  { %9654 = vmatprep.subr.bf16.mxu1 %v11008_v27  ;;  %v11050_v27 = vld [vmem:[%s15545_s16 + $0x1d0] sm:$0xff]  }
 0xbb1   :  { %9655 = vmatpush3.bf16.msra.mxu1 %v11009_v22  ;;  %v11051_v22 = vld [vmem:[%s15545_s16 + $0x190] sm:$0xff]  }
 0xbb2   :  { %9656 = vmatprep.subr.bf16.mxu1 %v11010_v56  ;;  %v11052_v56 = vld [vmem:[%s15545_s16 + $0x1d8] sm:$0xff]  }
 0xbb5   :  { %9657 = vmatpush3.bf16.msra.mxu1 %v11011_v63  ;;  %v11053_v63 = vld [vmem:[%s15545_s16 + $0x198] sm:$0xff]  }
 0xbb6   :  { %9658 = vmatprep.subr.bf16.mxu1 %v11012_v8  ;;  %v11054_v8 = vld [vmem:[%s15545_s16 + $0x1e0] sm:$0xff]  }
 0xbb9   :  { %9659 = vmatpush3.bf16.msra.mxu1 %v11013_v42  ;;  %v11055_v42 = vld [vmem:[%s15545_s16 + $0x1a0] sm:$0xff]  }
 0xbba   :  { %9666 = vmatprep.subr.bf16.mxu1 %v11014_v39  ;;  %v11056_v39 = vld [vmem:[%s15545_s16 + $0x1e8] sm:$0xff]  }
 0xbbc   :  { %7628 = vmatmul.mubr.bf16.vlgmr.msra.gmra.mrb[40].mxu1 %v6680_v57  ;;  %v11034_v57 = vld [vmem:[%s15545_s16 + $0x150] sm:$0xff]  }
 0xbbd   :  { %9667 = vmatpush3.bf16.msra.mxu1 %v11015_v9  ;;  %7668 = vmatprep.mubr.bf16.mxu1 %v6683_v31  ;;  %v11057_v9 = vld [vmem:[%s15545_s16 + $0x1a8] sm:$0xff]  }
 0xbbe   :  { %9668 = vmatprep.subr.bf16.mxu1 %v11016_v21  ;;  %v11058_v21 = vld [vmem:[%s15545_s16 + $0x1f0] sm:$0xff]  }
 0xbc1   :  { %9669 = vmatpush3.bf16.msra.mxu1 %v11017_v13  ;;  %v11059_v13 = vld [vmem:[%s15545_s16 + $0x1b0] sm:$0xff]  }
 0xbc2   :  { %9670 = vmatprep.subr.bf16.mxu1 %v11018_v25  ;;  %v11060_v25 = vld [vmem:[%s15545_s16 + $0x1f8] sm:$0xff]  }
 0xbc5   :  { %9671 = vmatpush3.bf16.msra.mxu1 %v11019_v0 }
 0xbc6   :  { %9672 = vmatprep.subr.bf16.mxu1 %v11020_v43  ;;  %v11061_v43 = vld [vmem:[%s15545_s16 + $0x1b8] sm:$0xff]  }
 0xbc9   :  { %9673 = vmatpush3.bf16.msra.mxu1 %v11021_v17  ;;  %v11062_v17 = vld [vmem:[%s15545_s16 + $0x240] sm:$0xff]  }
 0xbca   :  { %9674 = vmatprep.subr.bf16.mxu1 %v11022_v36 }
 0xbcd   :  { %9675 = vmatpush3.bf16.msra.mxu1 %v11023_v54  ;;  %v11063_v54 = vld [vmem:[%s15545_s16 + $0x200] sm:$0xff]  }
 0xbce   :  { %9676 = vmatprep.subr.bf16.mxu1 %v11024_v15  ;;  %v11064_v15 = vld [vmem:[%s15545_s16 + $0x248] sm:$0xff]  }
 0xbd1   :  { %9677 = vmatpush3.bf16.msra.mxu1 %v11025_v34 }
 0xbd2   :  { %9678 = vmatprep.subr.bf16.mxu1 %v11026_v61 }
 0xbd5   :  { %9679 = vmatpush3.bf16.msra.mxu1 %v11027_v46 }
 0xbd6   :  { %9680 = vmatprep.subr.bf16.mxu1 %v11028_v51  ;;  %v11065_v51 = vld [vmem:[%s15545_s16 + $0x208] sm:$0xff]  }
 0xbd9   :  { %9681 = vmatpush3.bf16.msra.mxu1 %v11029_v55  ;;  %v11066_v55 = vld [vmem:[%s15545_s16 + $0x250] sm:$0xff]  }
 0xbda   :  { %9688 = vmatprep.subr.bf16.mxu1 %v11030_v19  ;;  %v11067_v19 = vld [vmem:[%s15545_s16 + $0x210] sm:$0xff]  }
 0xbdc   :  { %7669 = vmatmul.mubr.bf16.vlgmr.msra.gmra.mrb[44].mxu1 %v6682_v10  ;;  %v11038_v10 = vld [vmem:[%s15545_s16 + $0x160] sm:$0xff]  }
 0xbdd   :  { %9689 = vmatpush3.bf16.msra.mxu1 %v11031_v32  ;;  %v11068_v32 = vld [vmem:[%s15545_s16 + $0x258] sm:$0xff]  }
 0xbde   :  { %9690 = vmatprep.subr.bf16.mxu1 %v11032_v5  ;;  %v14869_v30 = vpop.permute.xlu0 %6697  ;;  %v11069_v5 = vld [vmem:[%s15545_s16 + $0x218] sm:$0xff]  }
 0xbe1   :  { %9691 = vmatpush3.bf16.msra.mxu1 %v11033_v12  ;;  %v11070_v12 = vld [vmem:[%s15545_s16 + $0x260] sm:$0xff]  }
 0xbe2   :  { %v6696_v31 = vpop.permute.xlu1 %6695  ;;  %9692 = vmatprep.subr.bf16.mxu1 %v11034_v57  ;;  %v11071_v57 = vld [vmem:[%s15545_s16 + $0x220] sm:$0xff]  }
 0xbe3   :  { %v6706_v2 = vsel %vm15594_vm6, %v6696_v31, %v14869_v30  ;;  %v6738_v7 = vsel %vm15594_vm6, %v6684_v6, %v6696_v31  ;;  %v11074_v31 = vld [vmem:[%s15545_s16 + $0x270] sm:$0xff]   ;;  %v11085_v6 = vld [vmem:[%s15545_s16 + $0x298] sm:$0xff]  }
 0xbe4   :  { %7709 = vmatprep.mubr.bf16.mxu1 %v6706_v2  ;;  %v11076_v2 = vld [vmem:[%s15545_s16 + $0x278] sm:$0xff]  }
 0xbe5   :  { %9693 = vmatpush3.bf16.msra.mxu1 %v11035_v33  ;;  %v14920_v16 = vpop.permute.xlu0 %6701  ;;  %v11072_v33 = vld [vmem:[%s15545_s16 + $0x268] sm:$0xff]  }
 0xbe6   :  { %9694 = vmatprep.subr.bf16.mxu1 %v11036_v29  ;;  %v11075_v29 = vld [vmem:[%s15545_s16 + $0x230] sm:$0xff]  }
 0xbe9   :  { %9695 = vmatpush3.bf16.msra.mxu1 %v11037_v40  ;;  %v6700_v26 = vpop.permute.xlu1 %6699  ;;  %v6719_v34 = vpop.permute.xlu0 %6718  ;;  %v11077_v40 = vld [vmem:[%s15545_s16 + $0x238] sm:$0xff]  }
 0xbea   :  { %9696 = vmatprep.subr.bf16.mxu1 %v11038_v10  ;;  %v6708_v41 = vsel %vm15594_vm6, %v6700_v26, %v14920_v16  ;;  %v6707_v61 = vsel %vm15594_vm6, %v14869_v30, %v6700_v26  ;;  %v11073_v30 = vld [vmem:[%s15545_s16 + $0x228] sm:$0xff]   ;;  %v11078_v10 = vld [vmem:[%s15545_s16 + $0x2c0] sm:$0xff]  }
 0xbed   :  { %9697 = vmatpush3.bf16.msra.mxu1 %v11039_v59  ;;  %v6704_v0 = vpop.permute.xlu1 %6703 }
 0xbee   :  { %9698 = vmatprep.subr.bf16.mxu1 %v11040_v50  ;;  %v6709_v59 = vsel %vm15594_vm6, %v14920_v16, %v6704_v0  ;;  %v6723_v44 = vpop.permute.xlu0 %6722  ;;  %vm8018_vm6 = vcmask 179200  }
 0xbf1   :  { %9699 = vmatpush3.bf16.msra.mxu1 %v11041_v58  ;;  %v14967_v36 = vpop.permute.xlu1 %6720  ;;  %v11079_v58 = vld [vmem:[%s15545_s16 + $0x280] sm:$0xff]  }
 0xbf2   :  { %9700 = vmatprep.subr.bf16.mxu1 %v11042_v3  ;;  %v6728_v46 = vsel %vm15595_vm3, %v6719_v34, %v14967_v36  ;;  %v6742_v3 = vsel %vm15595_vm3, %v6709_v59, %v6719_v34 }
 0xbf5   :  { %9701 = vmatpush3.bf16.msra.mxu1 %v11043_v37  ;;  %v15023_v50 = vpop.permute.xlu1 %6724 }
 0xbf6   :  { %9702 = vmatprep.subr.bf16.mxu1 %v11044_v38  ;;  %v6730_v37 = vsel %vm15595_vm3, %v6723_v44, %v15023_v50  ;;  %v11081_v38 = vld [vmem:[%s15545_s16 + $0x288] sm:$0xff]  }
 0xbf9   :  { %9703 = vmatpush3.bf16.msra.mxu1 %v11045_v4  ;;  %v11084_v4 = vld [vmem:[%s15545_s16 + $0x2d8] sm:$0xff]  }
 0xbfa   :  { %9710 = vmatprep.subr.bf16.mxu1 %v11046_v45 }
 0xbfc   :  { %7710 = vmatmul.mubr.bf16.vlgmr.msra.gmra.mrb[48].mxu1 %v6738_v7  ;;  %v11087_v7 = vld [vmem:[%s15545_s16 + $0x2a0] sm:$0xff]  }
 0xbfd   :  { %9711 = vmatpush3.bf16.msra.mxu1 %v11047_v24  ;;  %7750 = vmatprep.mubr.bf16.mxu1 %v6708_v41  ;;  %v11088_v41 = vld [vmem:[%s15545_s16 + $0x2e8] sm:$0xff]  }
 0xbfe   :  { %9712 = vmatprep.subr.bf16.mxu1 %v11048_v11  ;;  %v11086_v11 = vld [vmem:[%s15545_s16 + $0x2e0] sm:$0xff]  }
 0xc01   :  { %9713 = vmatpush3.bf16.msra.mxu1 %v11049_v20  ;;  %v11089_v20 = vld [vmem:[%s15545_s16 + $0x2a8] sm:$0xff]  }
 0xc02   :  { %9714 = vmatprep.subr.bf16.mxu1 %v11050_v27  ;;  %v11090_v27 = vld [vmem:[%s15545_s16 + $0x2f0] sm:$0xff]  }
 0xc05   :  { %9715 = vmatpush3.bf16.msra.mxu1 %v11051_v22  ;;  %v11091_v22 = vld [vmem:[%s15545_s16 + $0x2b0] sm:$0xff]  }
 0xc06   :  { %9716 = vmatprep.subr.bf16.mxu1 %v11052_v56  ;;  %v11092_v56 = vld [vmem:[%s15545_s16 + $0x2f8] sm:$0xff]  }
 0xc09   :  { %9717 = vmatpush3.bf16.msra.mxu1 %v11053_v63  ;;  %v11093_v63 = vld [vmem:[%s15545_s16 + $0x2b8] sm:$0xff]  }
 0xc0a   :  { %9718 = vmatprep.subr.bf16.mxu1 %v11054_v8  ;;  %v11094_v8 = vld [vmem:[%s15545_s16 + $0x300] sm:$0xff]  }
 0xc0d   :  { %9719 = vmatpush3.bf16.msra.mxu1 %v11055_v42  ;;  %v6729_v42 = vsel %vm15595_vm3, %v14967_v36, %v6723_v44 }
 0xc0e   :  { %9720 = vmatprep.subr.bf16.mxu1 %v11056_v39  ;;  %v6727_v39 = vpop.permute.xlu0 %6726 }
 0xc11   :  { %9721 = vmatpush3.bf16.msra.mxu1 %v11057_v9  ;;  %v11095_v9 = vld [vmem:[%s15545_s16 + $0x308] sm:$0xff]  }
 0xc12   :  { %9722 = vmatprep.subr.bf16.mxu1 %v11058_v21  ;;  %v11096_v21 = vld [vmem:[%s15545_s16 + $0x310] sm:$0xff]  }
 0xc15   :  { %9723 = vmatpush3.bf16.msra.mxu1 %v11059_v13  ;;  %v9444_v13 = vld [vmem:[%s15548_s15] ss:$0 sm:$0xff]  ;;  %s11144_s15 = smov 108  }
 0xc16   :  { %9724 = vmatprep.subr.bf16.mxu1 %v11060_v25 }
 0xc19   :  { %9725 = vmatpush3.bf16.msra.mxu1 %v11061_v43 }
 0xc1a   :  { %9732 = vmatprep.subr.bf16.mxu1 %v11062_v17 }
 0xc1c   :  { %7751 = vmatmul.mubr.bf16.vlgmr.msra.gmra.mrb[52].mxu1 %v6707_v61 }
 0xc1d   :  { %9733 = vmatpush3.bf16.msra.mxu1 %v11063_v54  ;;  %7791 = vmatprep.mubr.bf16.mxu1 %v6728_v46  ;;  %v11097_v54 = vld [vmem:[%s15545_s16 + $0x318] sm:$0xff]  }
 0xc1e   :  { %9734 = vmatprep.subr.bf16.mxu1 %v11064_v15 }
 0xc21   :  { %9735 = vmatpush3.bf16.msra.mxu1 %v11065_v51  ;;  %v11098_v51 = vld [vmem:[%s15545_s16 + $0x320] sm:$0xff]  }
 0xc22   :  { %9736 = vmatprep.subr.bf16.mxu1 %v11066_v55 }
 0xc25   :  { %9737 = vmatpush3.bf16.msra.mxu1 %v11067_v19  ;;  %v11099_v19 = vld [vmem:[%s15545_s16 + $0x328] sm:$0xff]  }
 0xc26   :  { %9738 = vmatprep.subr.bf16.mxu1 %v11068_v32 }
 0xc29   :  { %9739 = vmatpush3.bf16.msra.mxu1 %v11069_v5 }
 0xc2a   :  { %9740 = vmatprep.subr.bf16.mxu1 %v11070_v12 }
 0xc2d   :  { %9741 = vmatpush3.bf16.msra.mxu1 %v11071_v57 }
 0xc2e   :  { %9742 = vmatprep.subr.bf16.mxu1 %v11072_v33  ;;  %v11100_v33 = vld [vmem:[%s15545_s16 + $0x330] sm:$0xff]  }
 0xc31   :  { %9743 = vmatpush3.bf16.msra.mxu1 %v11073_v30 }
 0xc32   :  { %9744 = vmatprep.subr.bf16.mxu1 %v11074_v31 }
 0xc35   :  { %9745 = vmatpush3.bf16.msra.mxu1 %v11075_v29  ;;  %v11101_v29 = vld [vmem:[%s15545_s16 + $0x338] sm:$0xff]  }
 0xc36   :  { %9746 = vmatprep.subr.bf16.mxu1 %v11076_v2  ;;  %v11102_v2 = vld [vmem:[%s15545_s16 + $0x340] sm:$0xff]   ;;  %s15588_s16 = smov 12  }
 0xc39   :  { %9747 = vmatpush3.bf16.msra.mxu1 %v11077_v40  ;;  %v6731_v40 = vsel %vm15595_vm3, %v15023_v50, %v6727_v39  ;;  %vm8020_vm3 = vcmask 195584  }
 0xc3a   :  { %9754 = vmatprep.subr.bf16.mxu1 %v11078_v10 }
 0xc3c   :  { %7792 = vmatmul.mubr.bf16.vlgmr.msra.gmra.mrb[56].mxu1 %v6742_v3 }
 0xc3d   :  { %9755 = vmatpush3.bf16.msra.mxu1 %v11079_v58  ;;  %7832 = vmatprep.mubr.bf16.mxu1 %v6730_v37 }
 0xc3e   :  { %9756 = vmatprep.subr.bf16.mxu1 %v11080_v53 }
 0xc41   :  { %9757 = vmatpush3.bf16.msra.mxu1 %v11081_v38 }
 0xc42   :  { %9758 = vmatprep.subr.bf16.mxu1 %v11082_v1 }
 0xc43   :  { %v9612_v47 = vpop.f32.mrb[28].mxu1 }
 0xc44   :  { %v9613_v48 = vpop.f32.mrb[29].mxu1 }
 0xc45   :  { %v9614_v45 = vadd.f32 %v9613_v48, %v9612_v47  ;;  %9759 = vmatpush3.bf16.msra.mxu1 %v11083_v28  ;;  %v9615_v26 = vpop.f32.mrb[30].mxu1 }
 0xc46   :  { %v9616_v24 = vpop.f32.mrb[31].mxu1  ;;  %9760 = vmatprep.subr.bf16.mxu1 %v11084_v4 }
 0xc47   :  { %v9617_v16 = vadd.f32 %v9616_v24, %v9615_v26  ;;  %v6532_v43 = vadd.f32 %v9614_v45, %v9444_v13 }
 0xc49   :  { %9761 = vmatpush3.bf16.msra.mxu1 %v11085_v6  ;;  %v6535_v34 = vadd.f32 %v9617_v16, %v9444_v13 }
 0xc4a   :  { %9762 = vmatprep.subr.bf16.mxu1 %v11086_v11 }
 0xc4d   :  { %9763 = vmatpush3.bf16.msra.mxu1 %v11087_v7 }
 0xc4e   :  { %9764 = vmatprep.subr.bf16.mxu1 %v11088_v41 }
 0xc51   :  { %9765 = vmatpush3.bf16.msra.mxu1 %v11089_v20 }
 0xc52   :  { %9766 = vmatprep.subr.bf16.mxu1 %v11090_v27 }
 0xc55   :  { %9767 = vmatpush3.bf16.msra.mxu1 %v11091_v22 }
 0xc56   :  { %9768 = vmatprep.subr.bf16.mxu1 %v11092_v56 }
 0xc59   :  { %9769 = vmatpush3.bf16.msra.mxu1 %v11093_v63 }
 0xc5a   :  { %7841 = vmatprep.subr.bf16.mxu1 %v15625_v62 }
 0xc5c   :  { %7833 = vmatmul.mubr.bf16.vlgmr.msra.gmra.mrb[60].mxu1 %v6729_v42 }
 0xc5d   :  { %7842 = vmatpush1.bf16.msra.mxu1 %v11094_v8  ;;  %9587 = vmatprep.mubr.msk.bf16.mxu1 %vm7591_vm7, %v6727_v39 }
 0xc5e   :  { %7843 = vmatprep.subr.bf16.mxu1 %v15625_v62 }
 0xc61   :  { %7844 = vmatpush1.bf16.msra.mxu1 %v11095_v9 }
 0xc62   :  { %7845 = vmatprep.subr.bf16.mxu1 %v15625_v62 }
 0xc63   :  { %v9634_v25 = vpop.f32.mrb[32].mxu1 }
 0xc64   :  { %v9635_v0 = vpop.f32.mrb[33].mxu1 }
 0xc65   :  { %v9636_v17 = vadd.f32 %v9635_v0, %v9634_v25  ;;  %v9637_v36 = vpop.f32.mrb[34].mxu1  ;;  %7846 = vmatpush1.bf16.msra.mxu1 %v11096_v21 }
 0xc66   :  { %v9638_v15 = vpop.f32.mrb[35].mxu1  ;;  %7847 = vmatprep.subr.bf16.mxu1 %v15625_v62 }
 0xc67   :  { %v9639_v61 = vadd.f32 %v9638_v15, %v9637_v36  ;;  %v6573_v46 = vadd.f32 %v9636_v17, %v6532_v43 }
 0xc69   :  { %7848 = vmatpush1.bf16.msra.mxu1 %v11097_v54  ;;  %v6576_v55 = vadd.f32 %v9639_v61, %v6535_v34 }
 0xc6a   :  { %7849 = vmatprep.subr.bf16.mxu1 %v15625_v62 }
 0xc6d   :  { %7850 = vmatpush1.bf16.msra.mxu1 %v11098_v51 }
 0xc6e   :  { %7851 = vmatprep.subr.bf16.mxu1 %v15625_v62 }
 0xc6f   :  { %v6613_v32 = vpop.f32.mrb[36].mxu1 }
 0xc70   :  { %v15103_v5 = vadd.f32 %v6613_v32, %v6573_v46  ;;  %v9791_v12 = vpop.f32.mrb[37].mxu1 }
 0xc71   :  { %v6616_v57 = vpop.f32.mrb[38].mxu1  ;;  %7852 = vmatpush1.bf16.msra.mxu1 %v11099_v19 }
 0xc72   :  { %v15108_v30 = vadd.f32 %v6616_v57, %v6576_v55  ;;  %v9792_v31 = vpop.f32.mrb[39].mxu1  ;;  %7853 = vmatprep.subr.bf16.mxu1 %v15625_v62 }
 0xc75   :  { %7854 = vmatpush1.bf16.msra.mxu1 %v11100_v33 }
 0xc76   :  { %7855 = vmatprep.subr.bf16.mxu1 %v15625_v62 }
 0xc79   :  { %7856 = vmatpush1.bf16.msra.mxu1 %v11101_v29 }
 0xc7a   :  { %7857 = vmatprep.subr.bf16.mxu1 %v15625_v62  ;;  %v9481_v62 = vld [vmem:[%s15549_s17] ss:$0 sm:$0xff]  ;;  %s11136_s17 = smov 124  }
 0xc7d   :  { %7858 = vmatpush1.bf16.msra.mxu1 %v11102_v2 }
 0xc7e   :  { %9793 = vmatprep.subr.bf16.mxu1 %v11134_v23 }
 0xc80   :  { %7874 = vmatmul.mubr.bf16.vlgmr.msra.gmra.mrb[64].mxu1 %v6731_v40 }
 0xc81   :  { %9805 = vmatprep.mubr.msk.bf16.mxu1 %vm11135_vm5, %v11134_v23  ;;  %vm8016_vm5 = vcmask 162816  }
 0xc8f   :  { %v9660_v10 = vpop.f32.mrb[40].mxu1 }
 0xc90   :  { %v9661_v59 = vpop.f32.mrb[41].mxu1 }
 0xc91   :  { %v9662_v58 = vadd.f32 %v9661_v59, %v9660_v10  ;;  %v9663_v53 = vpop.f32.mrb[42].mxu1 }
 0xc92   :  { %v9664_v44 = vpop.f32.mrb[43].mxu1 }
 0xc93   :  { %v9665_v3 = vadd.f32 %v9664_v44, %v9663_v53  ;;  %v7630_v1 = vadd.f32 %v9662_v58, %v9481_v62 }
 0xc95   :  { %v7633_v47 = vadd.f32 %v9665_v3, %v9481_v62 }
 0xcaf   :  { %v9682_v37 = vpop.f32.mrb[44].mxu1 }
 0xcb0   :  { %v9683_v38 = vpop.f32.mrb[45].mxu1 }
 0xcb1   :  { %v9684_v28 = vadd.f32 %v9683_v38, %v9682_v37  ;;  %v9685_v4 = vpop.f32.mrb[46].mxu1 }
 0xcb2   :  { %v9686_v50 = vpop.f32.mrb[47].mxu1 }
 0xcb3   :  { %v7671_v48 = vadd.f32 %v9684_v28, %v7630_v1  ;;  %v9687_v45 = vadd.f32 %v9686_v50, %v9685_v4 }
 0xcb5   :  { %v7674_v26 = vadd.f32 %v9687_v45, %v7633_v47 }
 0xccf   :  { %v9704_v6 = vpop.f32.mrb[48].mxu1 }
 0xcd0   :  { %v9705_v24 = vpop.f32.mrb[49].mxu1 }
 0xcd1   :  { %v9706_v11 = vadd.f32 %v9705_v24, %v9704_v6  ;;  %v9707_v16 = vpop.f32.mrb[50].mxu1 }
 0xcd2   :  { %v9708_v7 = vpop.f32.mrb[51].mxu1 }
 0xcd3   :  { %v7712_v41 = vadd.f32 %v9706_v11, %v7671_v48  ;;  %v9709_v20 = vadd.f32 %v9708_v7, %v9707_v16 }
 0xcd5   :  { %v7715_v27 = vadd.f32 %v9709_v20, %v7674_v26 }
 0xcef   :  { %v9726_v22 = vpop.f32.mrb[52].mxu1 }
 0xcf0   :  { %v9727_v56 = vpop.f32.mrb[53].mxu1 }
 0xcf1   :  { %v9728_v63 = vadd.f32 %v9727_v56, %v9726_v22  ;;  %v9729_v8 = vpop.f32.mrb[54].mxu1 }
 0xcf2   :  { %v9730_v42 = vpop.f32.mrb[55].mxu1 }
 0xcf3   :  { %v7753_v39 = vadd.f32 %v9728_v63, %v7712_v41  ;;  %v9731_v9 = vadd.f32 %v9730_v42, %v9729_v8 }
 0xcf5   :  { %v7756_v21 = vadd.f32 %v9731_v9, %v7715_v27 }
 0xd0f   :  { %v9748_v13 = vpop.f32.mrb[56].mxu1 }
 0xd10   :  { %v9749_v25 = vpop.f32.mrb[57].mxu1 }
 0xd11   :  { %v9750_v0 = vadd.f32 %v9749_v25, %v9748_v13  ;;  %v9751_v43 = vpop.f32.mrb[58].mxu1 }
 0xd12   :  { %v9752_v17 = vpop.f32.mrb[59].mxu1 }
 0xd13   :  { %v7794_v36 = vadd.f32 %v9750_v0, %v7753_v39  ;;  %v9753_v54 = vadd.f32 %v9752_v17, %v9751_v43 }
 0xd15   :  { %v7797_v15 = vadd.f32 %v9753_v54, %v7756_v21 }
 0xd2f   :  { %v9770_v34 = vpop.f32.mrb[60].mxu1 }
 0xd30   :  { %v9771_v61 = vpop.f32.mrb[61].mxu1 }
 0xd31   :  { %v9772_v46 = vadd.f32 %v9771_v61, %v9770_v34  ;;  %v9773_v51 = vpop.f32.mrb[62].mxu1 }
 0xd32   :  { %v9774_v55 = vpop.f32.mrb[63].mxu1 }
 0xd33   :  { %v9775_v19 = vadd.f32 %v9774_v55, %v9773_v51  ;;  %v7835_v32 = vadd.f32 %v9772_v46, %v7794_v36 }
 0xd35   :  { %v7838_v12 = vadd.f32 %v9775_v19, %v7797_v15 }
 0xd53   :  { %v7875_v57 = vpop.f32.mrb[64].mxu1 }
 0xd54   :  { %v15127_v33 = vadd.f32 %v7875_v57, %v7835_v32  ;;  %v7877_v31 = vpop.f32.mrb[65].mxu1 }
 0xd55   :  { %v7878_v29 = vpop.f32.mrb[66].mxu1 }
 0xd56   :  { %v15129_v2 = vadd.f32 %v7878_v29, %v7838_v12  ;;  %v7880_v40 = vpop.f32.mrb[67].mxu1  ;;  %v7882_v10 = vsel %vm192_vm0, %v15127_v33, 0.0 }
 0xd58   :  { %v7883_v59 = vsel %vm192_vm0, %v15129_v2, 0.0 }
 0xd59   :  { %v7884_v58 = vadd.f32 %v7883_v59, %v7882_v10 }
 0xd5b   :  { %v7885_v53 = vrot.slane %v7884_v58, 4 }
 0xd5d   :  { %v7886_v44 = vadd.f32 %v7885_v53, %v7884_v58 }
 0xd5f   :  { %v7887_v3 = vrot.slane %v7886_v44, 2 }
 0xd61   :  { %v7888_v62 = vadd.f32 %v7887_v3, %v7886_v44 }
 0xd63   :  { %v7889_v37 = vrot.slane %v7888_v62, 1 }
 0xd65   :  { %v7890_v38 = vadd.f32 %v7889_v37, %v7888_v62 }
 0xd67   :  { %7896 = vrot.lane.b32.xlu0 %v7890_v38, %s11136_s17  ;;  %7892 = vrot.lane.b32.xlu1 %v7890_v38, %s11137_s27 }
 0xd6b   :  { %7904 = vrot.lane.b32.xlu0 %v7890_v38, %s11138_s29  ;;  %7900 = vrot.lane.b32.xlu1 %v7890_v38, %s11139_s30 }
 0xd6f   :  { %7912 = vrot.lane.b32.xlu0 %v7890_v38, %s11140_s25  ;;  %7908 = vrot.lane.b32.xlu1 %v7890_v38, %s11141_s11 }
 0xd73   :  { %7920 = vrot.lane.b32.xlu0 %v7890_v38, %s11142_s1  ;;  %7916 = vrot.lane.b32.xlu1 %v7890_v38, %s11143_s5 }
 0xd77   :  { %7928 = vrot.lane.b32.xlu0 %v7890_v38, %s11144_s15  ;;  %7924 = vrot.lane.b32.xlu1 %v7890_v38, %s11145_s13 }
 0xd7b   :  { %7936 = vrot.lane.b32.xlu0 %v7890_v38, %s11146_s12  ;;  %7932 = vrot.lane.b32.xlu1 %v7890_v38, %s11147_s8 }
 0xd7f   :  { %7944 = vrot.lane.b32.xlu0 %v7890_v38, %s11148_s6  ;;  %7940 = vrot.lane.b32.xlu1 %v7890_v38, %s11149_s4 }
 0xd83   :  { %7948 = vrot.lane.b32.xlu1 %v7890_v38, %s11150_s3 }
 0xdd9   :  { %v7897_v1 = vpop.permute.xlu0 %7896  ;;  %v7893_v28 = vpop.permute.xlu1 %7892 }
 0xdda   :  { %v7895_v4 = vadd.f32 %v7893_v28, %v7890_v38 }
 0xddc   :  { %v7899_v50 = vadd.f32 %v7897_v1, %v7895_v4 }
 0xddd   :  { %v7905_v47 = vpop.permute.xlu0 %7904  ;;  %v7901_v48 = vpop.permute.xlu1 %7900 }
 0xdde   :  { %v7903_v45 = vadd.f32 %v7901_v48, %v7899_v50 }
 0xde0   :  { %v7907_v26 = vadd.f32 %v7905_v47, %v7903_v45 }
 0xde1   :  { %v7913_v6 = vpop.permute.xlu0 %7912  ;;  %v7909_v24 = vpop.permute.xlu1 %7908 }
 0xde2   :  { %v7911_v11 = vadd.f32 %v7909_v24, %v7907_v26 }
 0xde4   :  { %v7915_v16 = vadd.f32 %v7913_v6, %v7911_v11 }
 0xde5   :  { %v7921_v7 = vpop.permute.xlu0 %7920  ;;  %v7917_v41 = vpop.permute.xlu1 %7916 }
 0xde6   :  { %v7919_v20 = vadd.f32 %v7917_v41, %v7915_v16 }
 0xde8   :  { %v7923_v27 = vadd.f32 %v7921_v7, %v7919_v20 }
 0xde9   :  { %v7929_v22 = vpop.permute.xlu0 %7928  ;;  %v7925_v56 = vpop.permute.xlu1 %7924 }
 0xdea   :  { %v7927_v63 = vadd.f32 %v7925_v56, %v7923_v27 }
 0xdec   :  { %v7931_v8 = vadd.f32 %v7929_v22, %v7927_v63 }
 0xded   :  { %v7937_v42 = vpop.permute.xlu0 %7936  ;;  %v7933_v39 = vpop.permute.xlu1 %7932 }
 0xdee   :  { %v7935_v9 = vadd.f32 %v7933_v39, %v7931_v8 }
 0xdf0   :  { %v7939_v21 = vadd.f32 %v7937_v42, %v7935_v9 }
 0xdf1   :  { %v7941_v13 = vpop.permute.xlu1 %7940  ;;  %v7945_v0 = vpop.permute.xlu0 %7944 }
 0xdf2   :  { %v7943_v25 = vadd.f32 %v7941_v13, %v7939_v21 }
 0xdf4   :  { %v7947_v43 = vadd.f32 %v7945_v0, %v7943_v25 }
 0xdf5   :  { %v7949_v17 = vpop.permute.xlu1 %7948 }
 0xdf6   :  { %v7951_v36 = vadd.f32 %v7949_v17, %v7947_v43 }
 0xdf8   :  { %v7952_v54 = vmul.f32 0.00390625, %v7951_v36 }
 0xdfa   :  { %7957 = vrot.lane.b32.xlu1 %v7952_v54, %s15582_s9  ;;  %7954 = vrot.lane.b32.xlu0 %v7952_v54, %s11152_s7  ;;  %s11160_s9 = smov 18  }
 0xdfe   :  { %7963 = vrot.lane.b32.xlu1 %v7952_v54, %s15584_s14  ;;  %7960 = vrot.lane.b32.xlu0 %v7952_v54, %s15586_s2  ;;  %s15599_s14 = smov 24   ;;  %s11162_s2 = smov 22  }
 0xe02   :  { %7969 = vrot.lane.b32.xlu1 %v7952_v54, %s15588_s16  ;;  %7966 = vrot.lane.b32.xlu0 %v7952_v54, %s15590_s0  ;;  %s11163_s16 = smov 28   ;;  %s11164_s0 = smov 26  }
 0xe06   :  { %7975 = vrot.lane.b32.xlu1 %v7952_v54, %s15592_s10  ;;  %7972 = vrot.lane.b32.xlu0 %v7952_v54, %s11158_s28  ;;  %s11165_s10 = smov 30  }
 0xe0a   :  { %7981 = vrot.lane.b32.xlu1 %v7952_v54, %s15601_s26  ;;  %7978 = vrot.lane.b32.xlu0 %v7952_v54, %s11160_s9 }
 0xe0e   :  { %7987 = vrot.lane.b32.xlu1 %v7952_v54, %s15599_s14  ;;  %7984 = vrot.lane.b32.xlu0 %v7952_v54, %s11162_s2 }
 0xe12   :  { %7993 = vrot.lane.b32.xlu1 %v7952_v54, %s11163_s16  ;;  %7990 = vrot.lane.b32.xlu0 %v7952_v54, %s11164_s0 }
 0xe16   :  { %7996 = vrot.lane.b32.xlu0 %v7952_v54, %s11165_s10 }
 0xe6c   :  { %v7958_v15 = vpop.permute.xlu1 %7957  ;;  %v7955_v34 = vpop.permute.xlu0 %7954 }
 0xe6d   :  { %v8000_v61 = vsel %vm7999_vm8, %v7952_v54, %v7955_v34 }
 0xe6e   :  { %v8002_v51 = vsel %vm8001_vm9, %v8000_v61, %v7958_v15 }
 0xe70   :  { %v7964_v46 = vpop.permute.xlu1 %7963  ;;  %v7961_v55 = vpop.permute.xlu0 %7960 }
 0xe71   :  { %v8004_v19 = vsel %vm8003_vm10, %v8002_v51, %v7961_v55 }
 0xe72   :  { %v8006_v12 = vsel %vm8005_vm11, %v8004_v19, %v7964_v46 }
 0xe74   :  { %v7970_v32 = vpop.permute.xlu1 %7969  ;;  %v7967_v57 = vpop.permute.xlu0 %7966 }
 0xe75   :  { %v8008_v31 = vsel %vm8007_vm12, %v8006_v12, %v7967_v57 }
 0xe76   :  { %v8010_v40 = vsel %vm8009_vm13, %v8008_v31, %v7970_v32 }
 0xe78   :  { %v7976_v29 = vpop.permute.xlu1 %7975  ;;  %v7973_v10 = vpop.permute.xlu0 %7972 }
 0xe79   :  { %v8012_v59 = vsel %vm8011_vm14, %v8010_v40, %v7973_v10 }
 0xe7a   :  { %v8013_v53 = vsel %vm7591_vm7, %v8012_v59, %v7976_v29 }
 0xe7c   :  { %v7982_v58 = vpop.permute.xlu1 %7981  ;;  %v7979_v44 = vpop.permute.xlu0 %7978 }
 0xe7d   :  { %v8015_v3 = vsel %vm8014_vm15, %v8013_v53, %v7979_v44 }
 0xe7e   :  { %v8017_v37 = vsel %vm8016_vm5, %v8015_v3, %v7982_v58 }
 0xe80   :  { %v7988_v62 = vpop.permute.xlu1 %7987  ;;  %v7985_v38 = vpop.permute.xlu0 %7984 }
 0xe81   :  { %v8019_v1 = vsel %vm8018_vm6, %v8017_v37, %v7985_v38 }
 0xe82   :  { %v8021_v28 = vsel %vm8020_vm3, %v8019_v1, %v7988_v62 }
 0xe84   :  { %v7991_v4 = vpop.permute.xlu0 %7990  ;;  %v7994_v50 = vpop.permute.xlu1 %7993 }
 0xe85   :  { %v8023_v47 = vsel %vm8022_vm1, %v8021_v28, %v7991_v4  ;;  %v8107_v28 = vld [vmem:[%s15551_s18] sm:$0x1]  ;;  %s15691_s18 = smov 64  }
 0xe86   :  { %v8025_v48 = vsel %vm8024_vm2, %v8023_v47, %v7994_v50 }
 0xe88   :  { %v7997_v45 = vpop.permute.xlu0 %7996 }
 0xe89   :  { %v8027_v26 = vsel %vm8026_vm4, %v8025_v48, %v7997_v45  ;;  %v11103_v48 = vld [vmem:[%s15552_s20] sm:$0xff]   ;;  %v11104_v45 = vld [vmem:[%s15552_s20 + $0x8] sm:$0xff]  }
 0xe8a   :  { %v8031_v6 = vrot.slane %v8027_v26, %v13648_v14  ;;  %9794 = vmatpush3.bf16.msra.mxu1 %v11103_v48  ;;  %v11105_v26 = vld [vmem:[%s15552_s20 + $0x10] sm:$0xff]  }
 0xe8b   :  { %9795 = vmatprep.subr.bf16.mxu1 %v11134_v23 }
 0xe8c   :  { %v15182_v24 = vsub.f32 %v15127_v33, %v8031_v6  ;;  %v15185_v11 = vsub.f32 %v15129_v2, %v8031_v6  ;;  %v15210_v2 = vld [vmem:[%s15550_s19] sm:$0x1]  ;;  %s15683_s19 = smov 10   ;;  %v11106_v6 = vld [vmem:[%s15552_s20 + $0x18] sm:$0xff]  }
 0xe8d   :  { %v15215_v39 = vrot.slane %v15210_v2, %v13648_v14 }
 0xe8e   :  { %v8034_v16 = vmul.f32 %v15182_v24, %v15182_v24  ;;  %v8035_v7 = vmul.f32 %v15185_v11, %v15185_v11  ;;  %9796 = vmatpush3.bf16.msra.mxu1 %v11104_v45 }
 0xe8f   :  { %9797 = vmatprep.subr.bf16.mxu1 %v11134_v23 }
 0xe90   :  { %v8036_v41 = vsel %vm192_vm0, %v8034_v16, 0.0  ;;  %v8037_v20 = vsel %vm192_vm0, %v8035_v7, 0.0  ;;  %v11107_v16 = vld [vmem:[%s15552_s20 + $0x20] sm:$0xff]  }
 0xe91   :  { %v8038_v27 = vadd.f32 %v8037_v20, %v8036_v41 }
 0xe92   :  { %9798 = vmatpush3.bf16.msra.mxu1 %v11105_v26 }
 0xe93   :  { %v8039_v22 = vrot.slane %v8038_v27, 4  ;;  %9799 = vmatprep.subr.bf16.mxu1 %v11134_v23 }
 0xe95   :  { %v8040_v56 = vadd.f32 %v8039_v22, %v8038_v27 }
 0xe96   :  { %9800 = vmatpush3.bf16.msra.mxu1 %v11106_v6 }
 0xe97   :  { %v8041_v63 = vrot.slane %v8040_v56, 2  ;;  %9801 = vmatprep.subr.bf16.mxu1 %v11134_v23 }
 0xe99   :  { %v8042_v8 = vadd.f32 %v8041_v63, %v8040_v56 }
 0xe9a   :  { %9802 = vmatpush3.bf16.msra.mxu1 %v11107_v16 }
 0xe9b   :  { %v8043_v33 = vrot.slane %v8042_v8, 1  ;;  %9803 = vmatprep.subr.bf16.mxu1 %v11134_v23 }
 0xe9d   :  { %v8044_v42 = vadd.f32 %v8043_v33, %v8042_v8 }
 0xe9f   :  { %8050 = vrot.lane.b32.xlu0 %v8044_v42, %s11136_s17  ;;  %8046 = vrot.lane.b32.xlu1 %v8044_v42, %s11137_s27  ;;  %s11174_s27 = smov 36  }
 0xea3   :  { %8058 = vrot.lane.b32.xlu0 %v8044_v42, %s11138_s29  ;;  %8054 = vrot.lane.b32.xlu1 %v8044_v42, %s11139_s30  ;;  %s11170_s30 = smov 72  }
 0xea7   :  { %8066 = vrot.lane.b32.xlu0 %v8044_v42, %s11140_s25  ;;  %8062 = vrot.lane.b32.xlu1 %v8044_v42, %s11141_s11  ;;  %s15680_s11 = smov 4  }
 0xeab   :  { %8074 = vrot.lane.b32.xlu0 %v8044_v42, %s11142_s1  ;;  %8070 = vrot.lane.b32.xlu1 %v8044_v42, %s11143_s5  ;;  %s15681_s5 = smov 6  }
 0xeaf   :  { %8082 = vrot.lane.b32.xlu0 %v8044_v42, %s11144_s15  ;;  %8078 = vrot.lane.b32.xlu1 %v8044_v42, %s11145_s13  ;;  %s15682_s13 = smov 8  }
 0xeb3   :  { %8090 = vrot.lane.b32.xlu0 %v8044_v42, %s11146_s12  ;;  %8086 = vrot.lane.b32.xlu1 %v8044_v42, %s11147_s8  ;;  %s15684_s8 = smov 12  }
 0xeb7   :  { %8098 = vrot.lane.b32.xlu0 %v8044_v42, %s11148_s6  ;;  %8094 = vrot.lane.b32.xlu1 %v8044_v42, %s11149_s4  ;;  %s15685_s4 = smov 16  }
 0xebb   :  { %8102 = vrot.lane.b32.xlu1 %v8044_v42, %s11150_s3  ;;  %s11173_s3 = smov 40  }
 0xebf   :  { %8182 = vrot.lane.b32.xlu1 %v15215_v39, %s11152_s7 }
 0xec3   :  { %8185 = vrot.lane.b32.xlu1 %v15215_v39, %s15680_s11 }
 0xec7   :  { %8188 = vrot.lane.b32.xlu1 %v15215_v39, %s15681_s5 }
 0xecb   :  { %8191 = vrot.lane.b32.xlu1 %v15215_v39, %s15682_s13 }
 0xecf   :  { %8194 = vrot.lane.b32.xlu1 %v15215_v39, %s15683_s19 }
 0xed3   :  { %8197 = vrot.lane.b32.xlu1 %v15215_v39, %s15684_s8 }
 0xed7   :  { %8200 = vrot.lane.b32.xlu1 %v15215_v39, %s11158_s28 }
 0xedb   :  { %8203 = vrot.lane.b32.xlu1 %v15215_v39, %s15685_s4 }
 0xedf   :  { %8206 = vrot.lane.b32.xlu1 %v15215_v39, %s11160_s9 }
 0xee3   :  { %8209 = vrot.lane.b32.xlu1 %v15215_v39, %s15601_s26 }
 0xf11   :  { %v8051_v9 = vpop.permute.xlu0 %8050  ;;  %v8047_v21 = vpop.permute.xlu1 %8046 }
 0xf12   :  { %v8049_v13 = vadd.f32 %v8047_v21, %v8044_v42 }
 0xf14   :  { %v8053_v25 = vadd.f32 %v8051_v9, %v8049_v13 }
 0xf15   :  { %v8059_v0 = vpop.permute.xlu0 %8058  ;;  %v8055_v43 = vpop.permute.xlu1 %8054 }
 0xf16   :  { %v8057_v17 = vadd.f32 %v8055_v43, %v8053_v25 }
 0xf18   :  { %v8061_v36 = vadd.f32 %v8059_v0, %v8057_v17 }
 0xf19   :  { %v8067_v54 = vpop.permute.xlu0 %8066  ;;  %v8063_v15 = vpop.permute.xlu1 %8062 }
 0xf1a   :  { %v8065_v34 = vadd.f32 %v8063_v15, %v8061_v36 }
 0xf1c   :  { %v8069_v61 = vadd.f32 %v8067_v54, %v8065_v34 }
 0xf1d   :  { %v8075_v46 = vpop.permute.xlu0 %8074  ;;  %v8071_v51 = vpop.permute.xlu1 %8070 }
 0xf1e   :  { %v8073_v55 = vadd.f32 %v8071_v51, %v8069_v61 }
 0xf20   :  { %v8077_v19 = vadd.f32 %v8075_v46, %v8073_v55 }
 0xf21   :  { %v8083_v32 = vpop.permute.xlu0 %8082  ;;  %v8079_v12 = vpop.permute.xlu1 %8078 }
 0xf22   :  { %v8081_v57 = vadd.f32 %v8079_v12, %v8077_v19 }
 0xf24   :  { %v8085_v31 = vadd.f32 %v8083_v32, %v8081_v57 }
 0xf25   :  { %v8091_v29 = vpop.permute.xlu0 %8090  ;;  %v8087_v40 = vpop.permute.xlu1 %8086 }
 0xf26   :  { %v8089_v10 = vadd.f32 %v8087_v40, %v8085_v31 }
 0xf28   :  { %v8093_v59 = vadd.f32 %v8091_v29, %v8089_v10 }
 0xf29   :  { %v8095_v58 = vpop.permute.xlu1 %8094  ;;  %v8099_v44 = vpop.permute.xlu0 %8098 }
 0xf2a   :  { %v8097_v53 = vadd.f32 %v8095_v58, %v8093_v59 }
 0xf2c   :  { %v8101_v3 = vadd.f32 %v8099_v44, %v8097_v53 }
 0xf2d   :  { %v8103_v62 = vpop.permute.xlu1 %8102 }
 0xf2e   :  { %v8105_v37 = vadd.f32 %v8103_v62, %v8101_v3 }
 0xf30   :  { %v8106_v38 = vmul.f32 0.00390625, %v8105_v37 }
 0xf31   :  { %v8183_v7 = vpop.permute.xlu1 %8182 }
 0xf32   :  { %v8108_v1 = vadd.f32 1e-05, %v8106_v38  ;;  %v8227_v13 = vsel %vm7999_vm8, %v15210_v2, %v8183_v7 }
 0xf34   :  { %11113 = vrsqrt.f32 %v8108_v1 }
 0xf35   :  { %v8186_v41 = vpop.permute.xlu1 %8185 }
 0xf36   :  { %v8228_v23 = vsel %vm8001_vm9, %v8227_v13, %v8186_v41 }
 0xf39   :  { %v8189_v20 = vpop.permute.xlu1 %8188 }
 0xf3a   :  { %v8229_v17 = vsel %vm8003_vm10, %v8228_v23, %v8189_v20 }
 0xf3d   :  { %v8192_v27 = vpop.permute.xlu1 %8191 }
 0xf3e   :  { %v11114_v4 = vpop.eup %11113  ;;  %v8230_v15 = vsel %vm8005_vm11, %v8229_v17, %v8192_v27 }
 0xf3f   :  { %v15240_v50 = vmul.f32 %v11114_v4, %v8107_v28 }
 0xf41   :  { %v8115_v47 = vrot.slane %v15240_v50, %v13648_v14  ;;  %v8195_v22 = vpop.permute.xlu1 %8194 }
 0xf42   :  { %v8231_v34 = vsel %vm8007_vm12, %v8230_v15, %v8195_v22 }
 0xf43   :  { %8119 = vrot.lane.b32.xlu1 %v8115_v47, %s15680_s11  ;;  %8116 = vrot.lane.b32.xlu0 %v8115_v47, %s11152_s7  ;;  %s11166_s7 = smov 88  }
 0xf45   :  { %v8198_v63 = vpop.permute.xlu1 %8197 }
 0xf46   :  { %v8232_v51 = vsel %vm8009_vm13, %v8231_v34, %v8198_v63  ;;  %v11108_v63 = vld [vmem:[%s15552_s20 + $0x28] sm:$0xff]   ;;  %s15690_s20 = smov 32  }
 0xf47   :  { %8122 = vrot.lane.b32.xlu0 %v8115_v47, %s15681_s5  ;;  %8212 = vrot.lane.b32.xlu1 %v15215_v39, %s11162_s2  ;;  %s11171_s5 = smov 76  }
 0xf48   :  { %9804 = vmatpush3.bf16.msra.mxu1 %v11108_v63 }
 0xf49   :  { %v8201_v42 = vpop.permute.xlu1 %8200 }
 0xf4a   :  { %v8233_v19 = vsel %vm8011_vm14, %v8232_v51, %v8201_v42 }
 0xf4b   :  { %8125 = vrot.lane.b32.xlu0 %v8115_v47, %s15682_s13  ;;  %8215 = vrot.lane.b32.xlu1 %v15215_v39, %s15599_s14 }
 0xf4d   :  { %v8204_v9 = vpop.permute.xlu1 %8203 }
 0xf4e   :  { %v8234_v31 = vsel %vm7591_vm7, %v8233_v19, %v8204_v9 }
 0xf4f   :  { %8128 = vrot.lane.b32.xlu0 %v8115_v47, %s15683_s19  ;;  %8218 = vrot.lane.b32.xlu1 %v15215_v39, %s11164_s0  ;;  %s11172_s19 = smov 68  }
 0xf51   :  { %v8207_v0 = vpop.permute.xlu1 %8206 }
 0xf52   :  { %v8235_v59 = vsel %vm8014_vm15, %v8234_v31, %v8207_v0 }
 0xf53   :  { %8131 = vrot.lane.b32.xlu0 %v8115_v47, %s15684_s8  ;;  %8224 = vrot.lane.b32.xlu1 %v15215_v39, %s11165_s10 }
 0xf55   :  { %v8210_v36 = vpop.permute.xlu1 %8209 }
 0xf56   :  { %v8236_v37 = vsel %vm8016_vm5, %v8235_v59, %v8210_v36 }
 0xf57   :  { %8134 = vrot.lane.b32.xlu0 %v8115_v47, %s11158_s28  ;;  %s11175_s28 = smov 44  }
 0xf5b   :  { %8137 = vrot.lane.b32.xlu0 %v8115_v47, %s15685_s4 }
 0xf5f   :  { %8140 = vrot.lane.b32.xlu0 %v8115_v47, %s11160_s9  ;;  %s11176_s9 = smov 56  }
 0xf63   :  { %8143 = vrot.lane.b32.xlu0 %v8115_v47, %s15601_s26 }
 0xf67   :  { %8146 = vrot.lane.b32.xlu0 %v8115_v47, %s11162_s2  ;;  %s11168_s2 = smov 80  }
 0xf6b   :  { %8149 = vrot.lane.b32.xlu0 %v8115_v47, %s15599_s14 }
 0xf6f   :  { %8152 = vrot.lane.b32.xlu0 %v8115_v47, %s11164_s0  ;;  %s11167_s0 = smov 92  }
 0xf73   :  { %8155 = vrot.lane.b32.xlu0 %v8115_v47, %s11163_s16 }
 0xf77   :  { %8158 = vrot.lane.b32.xlu0 %v8115_v47, %s11165_s10  ;;  %s11169_s10 = smov 84  }
 0xf7b   :  { %8221 = vrot.lane.b32.xlu0 %v15215_v39, %s11163_s16 }
 0xfb5   :  { %v8117_v56 = vpop.permute.xlu0 %8116  ;;  %v8120_v46 = vpop.permute.xlu1 %8119 }
 0xfb6   :  { %v8161_v2 = vsel %vm7999_vm8, %v15240_v50, %v8117_v56 }
 0xfb7   :  { %v8162_v12 = vsel %vm8001_vm9, %v8161_v2, %v8120_v46 }
 0xfb9   :  { %v8123_v8 = vpop.permute.xlu0 %8122  ;;  %v8213_v32 = vpop.permute.xlu1 %8212 }
 0xfba   :  { %v8163_v29 = vsel %vm8003_vm10, %v8162_v12, %v8123_v8  ;;  %v8237_v50 = vsel %vm8018_vm6, %v8236_v37, %v8213_v32  ;;  %vm15692_vm10 = vcmask 523264  }
 0xfbd   :  { %v8126_v33 = vpop.permute.xlu0 %8125  ;;  %v8216_v44 = vpop.permute.xlu1 %8215 }
 0xfbe   :  { %v8164_v40 = vsel %vm8005_vm11, %v8163_v29, %v8126_v33  ;;  %v8238_v16 = vsel %vm8020_vm3, %v8237_v50, %v8216_v44 }
 0xfc1   :  { %v8129_v39 = vpop.permute.xlu0 %8128  ;;  %v8219_v48 = vpop.permute.xlu1 %8218 }
 0xfc2   :  { %v8165_v10 = vsel %vm8007_vm12, %v8164_v40, %v8129_v39  ;;  %v8239_v27 = vsel %vm8022_vm1, %v8238_v16, %v8219_v48  ;;  %vm15693_vm12 = vcmask 785408  }
 0xfc5   :  { %v8132_v21 = vpop.permute.xlu0 %8131  ;;  %v8225_v20 = vpop.permute.xlu1 %8224 }
 0xfc6   :  { %v8166_v58 = vsel %vm8009_vm13, %v8165_v10, %v8132_v21 }
 0xfc9   :  { %v8135_v25 = vpop.permute.xlu0 %8134 }
 0xfca   :  { %v8167_v3 = vsel %vm8011_vm14, %v8166_v58, %v8135_v25  ;;  %vm15694_vm14 = vmmov %vm15692_vm10 }
 0xfcd   :  { %v8138_v43 = vpop.permute.xlu0 %8137 }
 0xfce   :  { %v8168_v62 = vsel %vm7591_vm7, %v8167_v3, %v8138_v43 }
 0xfd1   :  { %v8141_v54 = vpop.permute.xlu0 %8140 }
 0xfd2   :  { %v8169_v38 = vsel %vm8014_vm15, %v8168_v62, %v8141_v54  ;;  %vm15695_vm15 = vmmov %vm15692_vm10 }
 0xfd5   :  { %v8144_v61 = vpop.permute.xlu0 %8143 }
 0xfd6   :  { %v8170_v1 = vsel %vm8016_vm5, %v8169_v38, %v8144_v61 }
 0xfd9   :  { %v8147_v55 = vpop.permute.xlu0 %8146 }
 0xfda   :  { %v8171_v4 = vsel %vm8018_vm6, %v8170_v1, %v8147_v55  ;;  %vm15688_vm6 = vcmp.lt.s32.totalorder %v11610_v18, 1 }
 0xfdb   :  { %vm15689_vm8 = vmmov %vm15688_vm6 }
 0xfdd   :  { %v8150_v57 = vpop.permute.xlu0 %8149 }
 0xfde   :  { %v8172_v47 = vsel %vm8020_vm3, %v8171_v4, %v8150_v57 }
 0xfe1   :  { %v8153_v53 = vpop.permute.xlu0 %8152 }
 0xfe2   :  { %v8173_v45 = vsel %vm8022_vm1, %v8172_v47, %v8153_v53  ;;  %vm15686_vm1 = vcmp.lt.s32.totalorder %v11610_v18, 7 }
 0xfe5   :  { %v8156_v28 = vpop.permute.xlu0 %8155 }
 0xfe6   :  { %v8174_v26 = vsel %vm8024_vm2, %v8173_v45, %v8156_v28 }
 0xfe9   :  { %v8159_v6 = vpop.permute.xlu0 %8158 }
 0xfea   :  { %v8175_v7 = vsel %vm8026_vm4, %v8174_v26, %v8159_v6 }
 0xfeb   :  { %v8245_v41 = vrot.slane %v8175_v7, %v13648_v14 }
 0xfed   :  { %v8222_v22 = vpop.permute.xlu0 %8221  ;;  %v8246_v33 = vmul.f32 %v8245_v41, %v15182_v24  ;;  %v8247_v42 = vmul.f32 %v8245_v41, %v15185_v11 }
 0xfee   :  { %v8240_v56 = vsel %vm8024_vm2, %v8239_v27, %v8222_v22 }
 0xfef   :  { %v8241_v8 = vsel %vm8026_vm4, %v8240_v56, %v8225_v20  ;;  %vm15687_vm4 = vmmov %vm15686_vm1 }
 0xff0   :  { %v8251_v39 = vrot.slane %v8241_v8, %v13648_v14 }
 0xff2   :  { %v8252_v9 = vadd.f32 %v8251_v39, %v8246_v33  ;;  %v8253_v21 = vadd.f32 %v8251_v39, %v8247_v42 }
 0xff4   :  { %v8254_v13 = vmul.f32 0.01, %v8252_v9  ;;  %v8255_v25 = vmul.f32 0.01, %v8253_v21 }
 0xff6   :  { %v8256_v0 = vmax.f32 %v8252_v9, %v8254_v13  ;;  %v8257_v23 = vmax.f32 %v8253_v21, %v8255_v25 }
 0xff8   :  { %v8258_v43 = vrot.slane %v8256_v0, 7  ;;  %v8259_v17 = vrot.slane %v8257_v23, 7  ;;  %v8264_v36 = vrot.slane %v8256_v0, 1  ;;  %v8265_v54 = vrot.slane %v8257_v23, 1 }
 0xff9   :  { %v8271_v15 = vpack.c.bf16 %v8257_v23, %v8256_v0 }
 0xffa   :  { %v8266_v34 = vsel %vm15686_vm1, %v8264_v36, %v8265_v54  ;;  %v8267_v24 = vsel %vm15687_vm4, %v8265_v54, %v8264_v36  ;;  %v8260_v11 = vsel %vm15688_vm6, %v8258_v43, %v8259_v17  ;;  %v8261_v61 = vsel %vm15689_vm8, %v8259_v17, %v8258_v43 }
 0xffb   :  { %8274 = vrot.lane.b32.xlu0 %v8271_v15, %s15690_s20  ;;  %v8268_v46 = vmul.f32 %v8266_v34, %v11697_v49  ;;  %v8269_v51 = vmul.f32 %v8267_v24, %v11706_v52  ;;  %v8262_v55 = vmul.f32 %v8261_v61, %v11663_v35  ;;  %v8263_v2 = vmul.f32 %v8260_v11, %v11651_v60  ;;  %v9588_v49 = vld [vmem:[%s15553_s21] ss:$0 sm:$0xff]  ;;  %s15696_s21 = smov 96  }
 0xffc   :  { %vm8507_vm1 = vcmask 293888   ;;  %vm8509_vm4 = vcmask 326656   ;;  %vm8511_vm6 = vcmask 359424   ;;  %vm8514_vm8 = vcmask 424960  }
 0xffd   :  { %v8272_v19 = vpack.c.bf16 %v8269_v51, %v8268_v46  ;;  %v8270_v32 = vpack.c.bf16 %v8263_v2, %v8262_v55 }
 0xfff   :  { %8277 = vrot.lane.b32.xlu1 %v8272_v19, %s15691_s18  ;;  %s15697_s18 = smov 48  }
0x106d   :  { %v8275_v12 = vpop.permute.xlu0 %8274 }
0x106e   :  { %v8281_v57 = vsel %vm192_vm0, %v8270_v32, %v8275_v12 }
0x1071   :  { %v8278_v31 = vpop.permute.xlu1 %8277 }
0x1072   :  { %v8283_v18 = vsel %vm15692_vm10, %v8281_v57, %v8278_v31  ;;  %vm15698_vm10 = vcmask 392192  }
0x1073   :  { %9806 = vmatmul.mubr.msk.bf16.vlgmr.msra.gmra.mrb[68].mxu1 %vm15693_vm12, %v8283_v18  ;;  %vm8516_vm12 = vcmask 457728  }
0x1146   :  { %v8375_v52 = vpop.f32.mrb[68].mxu1 }
0x1147   :  { %v15348_v35 = vadd.f32 %v9588_v49, %v8375_v52  ;;  %v9807_v60 = vpop.f32.mrb[69].mxu1 }
0x1148   :  { %v8378_v29 = vpop.f32.mrb[70].mxu1 }
0x1149   :  { %v15350_v40 = vadd.f32 %v9588_v49, %v8378_v29  ;;  %v9808_v10 = vpop.f32.mrb[71].mxu1  ;;  %v8382_v59 = vsel %vm15694_vm14, %v15348_v35, 0.0  ;;  %vm8518_vm14 = vcmask 490496  }
0x114b   :  { %v8383_v58 = vsel %vm15695_vm15, %v15350_v40, 0.0 }
0x114c   :  { %v8384_v53 = vadd.f32 %v8383_v58, %v8382_v59 }
0x114e   :  { %v8385_v44 = vrot.slane %v8384_v53, 4 }
0x1150   :  { %v8386_v3 = vadd.f32 %v8385_v44, %v8384_v53 }
0x1152   :  { %v8387_v62 = vrot.slane %v8386_v3, 2 }
0x1154   :  { %v8388_v37 = vadd.f32 %v8387_v62, %v8386_v3 }
0x1156   :  { %v8389_v38 = vrot.slane %v8388_v37, 1 }
0x1158   :  { %v8390_v1 = vadd.f32 %v8389_v38, %v8388_v37 }
0x115a   :  { %8396 = vrot.lane.b32.xlu1 %v8390_v1, %s11138_s29  ;;  %8392 = vrot.lane.b32.xlu0 %v8390_v1, %s11136_s17 }
0x115e   :  { %8404 = vrot.lane.b32.xlu1 %v8390_v1, %s11142_s1  ;;  %8400 = vrot.lane.b32.xlu0 %v8390_v1, %s11140_s25 }
0x1162   :  { %8412 = vrot.lane.b32.xlu1 %v8390_v1, %s11146_s12  ;;  %8408 = vrot.lane.b32.xlu0 %v8390_v1, %s11144_s15 }
0x1166   :  { %8420 = vrot.lane.b32.xlu1 %v8390_v1, %s15696_s21  ;;  %8416 = vrot.lane.b32.xlu0 %v8390_v1, %s11148_s6 }
0x116a   :  { %8428 = vrot.lane.b32.xlu1 %v8390_v1, %s11166_s7  ;;  %8424 = vrot.lane.b32.xlu0 %v8390_v1, %s11167_s0 }
0x116e   :  { %8436 = vrot.lane.b32.xlu1 %v8390_v1, %s11168_s2  ;;  %8432 = vrot.lane.b32.xlu0 %v8390_v1, %s11169_s10 }
0x1172   :  { %8444 = vrot.lane.b32.xlu1 %v8390_v1, %s11170_s30  ;;  %8440 = vrot.lane.b32.xlu0 %v8390_v1, %s11171_s5 }
0x1176   :  { %8448 = vrot.lane.b32.xlu0 %v8390_v1, %s11172_s19 }
0x11cc   :  { %v8397_v28 = vpop.permute.xlu1 %8396  ;;  %v8393_v4 = vpop.permute.xlu0 %8392 }
0x11cd   :  { %v8395_v50 = vadd.f32 %v8393_v4, %v8390_v1 }
0x11cf   :  { %v8399_v47 = vadd.f32 %v8397_v28, %v8395_v50 }
0x11d0   :  { %v8405_v48 = vpop.permute.xlu1 %8404  ;;  %v8401_v45 = vpop.permute.xlu0 %8400 }
0x11d1   :  { %v8403_v26 = vadd.f32 %v8401_v45, %v8399_v47 }
0x11d3   :  { %v8407_v6 = vadd.f32 %v8405_v48, %v8403_v26 }
0x11d4   :  { %v8413_v16 = vpop.permute.xlu1 %8412  ;;  %v8409_v7 = vpop.permute.xlu0 %8408 }
0x11d5   :  { %v8411_v41 = vadd.f32 %v8409_v7, %v8407_v6 }
0x11d7   :  { %v8415_v20 = vadd.f32 %v8413_v16, %v8411_v41 }
0x11d8   :  { %v8421_v27 = vpop.permute.xlu1 %8420  ;;  %v8417_v22 = vpop.permute.xlu0 %8416 }
0x11d9   :  { %v8419_v56 = vadd.f32 %v8417_v22, %v8415_v20 }
0x11db   :  { %v8423_v63 = vadd.f32 %v8421_v27, %v8419_v56 }
0x11dc   :  { %v8429_v8 = vpop.permute.xlu1 %8428  ;;  %v8425_v33 = vpop.permute.xlu0 %8424 }
0x11dd   :  { %v8427_v42 = vadd.f32 %v8425_v33, %v8423_v63 }
0x11df   :  { %v8431_v39 = vadd.f32 %v8429_v8, %v8427_v42 }
0x11e0   :  { %v8437_v9 = vpop.permute.xlu1 %8436  ;;  %v8433_v21 = vpop.permute.xlu0 %8432 }
0x11e1   :  { %v8435_v13 = vadd.f32 %v8433_v21, %v8431_v39 }
0x11e3   :  { %v8439_v25 = vadd.f32 %v8437_v9, %v8435_v13 }
0x11e4   :  { %v8441_v0 = vpop.permute.xlu0 %8440  ;;  %v8445_v43 = vpop.permute.xlu1 %8444 }
0x11e5   :  { %v8443_v23 = vadd.f32 %v8441_v0, %v8439_v25 }
0x11e7   :  { %v8447_v17 = vadd.f32 %v8445_v43, %v8443_v23 }
0x11e8   :  { %v8449_v36 = vpop.permute.xlu0 %8448 }
0x11e9   :  { %v8451_v54 = vadd.f32 %v8449_v36, %v8447_v17 }
0x11eb   :  { %v8452_v15 = vmul.f32 0.00390625, %v8451_v54 }
0x11ed   :  { %8457 = vrot.lane.b32.xlu0 %v8452_v15, %s15682_s13  ;;  %8454 = vrot.lane.b32.xlu1 %v8452_v15, %s15680_s11 }
0x11f1   :  { %8463 = vrot.lane.b32.xlu0 %v8452_v15, %s15685_s4  ;;  %8460 = vrot.lane.b32.xlu1 %v8452_v15, %s15684_s8 }
0x11f5   :  { %8469 = vrot.lane.b32.xlu0 %v8452_v15, %s15599_s14  ;;  %8466 = vrot.lane.b32.xlu1 %v8452_v15, %s15601_s26  ;;  %s11177_s14 = smov 52   ;;  %s11178_s26 = smov 60  }
0x11f9   :  { %8475 = vrot.lane.b32.xlu0 %v8452_v15, %s15690_s20  ;;  %8472 = vrot.lane.b32.xlu1 %v8452_v15, %s11163_s16 }
0x11fd   :  { %8481 = vrot.lane.b32.xlu0 %v8452_v15, %s11173_s3  ;;  %8478 = vrot.lane.b32.xlu1 %v8452_v15, %s11174_s27 }
0x1201   :  { %8487 = vrot.lane.b32.xlu0 %v8452_v15, %s15697_s18  ;;  %8484 = vrot.lane.b32.xlu1 %v8452_v15, %s11175_s28 }
0x1205   :  { %8493 = vrot.lane.b32.xlu0 %v8452_v15, %s11176_s9  ;;  %8490 = vrot.lane.b32.xlu1 %v8452_v15, %s11177_s14 }
0x1209   :  { %8496 = vrot.lane.b32.xlu1 %v8452_v15, %s11178_s26 }
0x125f   :  { %v8458_v34 = vpop.permute.xlu0 %8457  ;;  %v8455_v24 = vpop.permute.xlu1 %8454 }
0x1260   :  { %v8499_v11 = vsel %vm8001_vm9, %v8452_v15, %v8455_v24 }
0x1261   :  { %v8500_v46 = vsel %vm8005_vm11, %v8499_v11, %v8458_v34 }
0x1263   :  { %v8464_v61 = vpop.permute.xlu0 %8463  ;;  %v8461_v51 = vpop.permute.xlu1 %8460 }
0x1264   :  { %v8501_v55 = vsel %vm8009_vm13, %v8500_v46, %v8461_v51 }
0x1265   :  { %v8502_v19 = vsel %vm7591_vm7, %v8501_v55, %v8464_v61 }
0x1267   :  { %v8470_v2 = vpop.permute.xlu0 %8469  ;;  %v8467_v32 = vpop.permute.xlu1 %8466 }
0x1268   :  { %v8503_v12 = vsel %vm8016_vm5, %v8502_v19, %v8467_v32 }
0x1269   :  { %v8504_v31 = vsel %vm8020_vm3, %v8503_v12, %v8470_v2 }
0x126b   :  { %v8476_v57 = vpop.permute.xlu0 %8475  ;;  %v8473_v18 = vpop.permute.xlu1 %8472 }
0x126c   :  { %v8505_v49 = vsel %vm8024_vm2, %v8504_v31, %v8473_v18 }
0x126d   :  { %v8506_v60 = vsel %vm192_vm0, %v8505_v49, %v8476_v57 }
0x126f   :  { %v8482_v52 = vpop.permute.xlu0 %8481  ;;  %v8479_v29 = vpop.permute.xlu1 %8478 }
0x1270   :  { %v8508_v10 = vsel %vm8507_vm1, %v8506_v60, %v8479_v29  ;;  %v8599_v29 = vld [vmem:[%s15555_s22] sm:$0x1] }
0x1271   :  { %v8510_v58 = vsel %vm8509_vm4, %v8508_v10, %v8482_v52 }
0x1273   :  { %v8488_v59 = vpop.permute.xlu0 %8487  ;;  %v8485_v53 = vpop.permute.xlu1 %8484 }
0x1274   :  { %v8512_v44 = vsel %vm8511_vm6, %v8510_v58, %v8485_v53 }
0x1275   :  { %v8513_v3 = vsel %vm15698_vm10, %v8512_v44, %v8488_v59  ;;  %vm15699_vm10 = vmmov %vm15695_vm15 }
0x1277   :  { %v8491_v62 = vpop.permute.xlu1 %8490  ;;  %v8494_v37 = vpop.permute.xlu0 %8493 }
0x1278   :  { %v8515_v38 = vsel %vm8514_vm8, %v8513_v3, %v8491_v62 }
0x1279   :  { %v8517_v1 = vsel %vm8516_vm12, %v8515_v38, %v8494_v37 }
0x127b   :  { %v8497_v28 = vpop.permute.xlu1 %8496 }
0x127c   :  { %v8519_v4 = vsel %vm8518_vm14, %v8517_v1, %v8497_v28 }
0x127d   :  { %v8523_v50 = vrot.slane %v8519_v4, %v13648_v14 }
0x127f   :  { %v15403_v47 = vsub.f32 %v15348_v35, %v8523_v50  ;;  %v15406_v48 = vsub.f32 %v15350_v40, %v8523_v50  ;;  %v15431_v40 = vld [vmem:[%s15554_s23] sm:$0x1]  ;;  %s15700_s23 = smov 20  }
0x1280   :  { %v15436_v63 = vrot.slane %v15431_v40, %v13648_v14 }
0x1281   :  { %v8526_v45 = vmul.f32 %v15403_v47, %v15403_v47  ;;  %v8527_v26 = vmul.f32 %v15406_v48, %v15406_v48 }
0x1283   :  { %v8528_v6 = vsel %vm15695_vm15, %v8526_v45, 0.0  ;;  %v8529_v16 = vsel %vm15699_vm10, %v8527_v26, 0.0 }
0x1284   :  { %v8530_v7 = vadd.f32 %v8529_v16, %v8528_v6 }
0x1286   :  { %v8531_v41 = vrot.slane %v8530_v7, 4 }
0x1288   :  { %v8532_v20 = vadd.f32 %v8531_v41, %v8530_v7 }
0x128a   :  { %v8533_v27 = vrot.slane %v8532_v20, 2 }
0x128c   :  { %v8534_v22 = vadd.f32 %v8533_v27, %v8532_v20 }
0x128e   :  { %v8535_v35 = vrot.slane %v8534_v22, 1 }
0x1290   :  { %v8536_v56 = vadd.f32 %v8535_v35, %v8534_v22 }
0x1292   :  { %8542 = vrot.lane.b32.xlu1 %v8536_v56, %s11138_s29  ;;  %8538 = vrot.lane.b32.xlu0 %v8536_v56, %s11136_s17 }
0x1296   :  { %8550 = vrot.lane.b32.xlu1 %v8536_v56, %s11142_s1  ;;  %8546 = vrot.lane.b32.xlu0 %v8536_v56, %s11140_s25  ;;  %s15701_s25 = smov 24  }
0x129a   :  { %8558 = vrot.lane.b32.xlu1 %v8536_v56, %s11146_s12  ;;  %8554 = vrot.lane.b32.xlu0 %v8536_v56, %s11144_s15 }
0x129e   :  { %8566 = vrot.lane.b32.xlu1 %v8536_v56, %s15696_s21  ;;  %8562 = vrot.lane.b32.xlu0 %v8536_v56, %s11148_s6 }
0x12a2   :  { %8574 = vrot.lane.b32.xlu1 %v8536_v56, %s11166_s7  ;;  %8570 = vrot.lane.b32.xlu0 %v8536_v56, %s11167_s0 }
0x12a6   :  { %8582 = vrot.lane.b32.xlu1 %v8536_v56, %s11168_s2  ;;  %8578 = vrot.lane.b32.xlu0 %v8536_v56, %s11169_s10 }
0x12aa   :  { %8590 = vrot.lane.b32.xlu1 %v8536_v56, %s11170_s30  ;;  %8586 = vrot.lane.b32.xlu0 %v8536_v56, %s11171_s5 }
0x12ae   :  { %8594 = vrot.lane.b32.xlu0 %v8536_v56, %s11172_s19 }
0x12b2   :  { %8674 = vrot.lane.b32.xlu0 %v15436_v63, %s15680_s11 }
0x12b6   :  { %8677 = vrot.lane.b32.xlu0 %v15436_v63, %s15682_s13 }
0x12ba   :  { %8680 = vrot.lane.b32.xlu0 %v15436_v63, %s15684_s8 }
0x12be   :  { %8683 = vrot.lane.b32.xlu0 %v15436_v63, %s15685_s4 }
0x12c2   :  { %8686 = vrot.lane.b32.xlu0 %v15436_v63, %s15700_s23 }
0x12c6   :  { %8689 = vrot.lane.b32.xlu0 %v15436_v63, %s15701_s25 }
0x12ca   :  { %8692 = vrot.lane.b32.xlu0 %v15436_v63, %s11163_s16 }
0x12ce   :  { %8695 = vrot.lane.b32.xlu0 %v15436_v63, %s15690_s20 }
0x12d2   :  { %8698 = vrot.lane.b32.xlu0 %v15436_v63, %s11174_s27 }
0x12d6   :  { %8701 = vrot.lane.b32.xlu0 %v15436_v63, %s11173_s3 }
0x1304   :  { %v8543_v8 = vpop.permute.xlu1 %8542  ;;  %v8539_v33 = vpop.permute.xlu0 %8538 }
0x1305   :  { %v8541_v42 = vadd.f32 %v8539_v33, %v8536_v56 }
0x1307   :  { %v8545_v39 = vadd.f32 %v8543_v8, %v8541_v42 }
0x1308   :  { %v8551_v9 = vpop.permute.xlu1 %8550  ;;  %v8547_v21 = vpop.permute.xlu0 %8546 }
0x1309   :  { %v8549_v13 = vadd.f32 %v8547_v21, %v8545_v39 }
0x130b   :  { %v8553_v25 = vadd.f32 %v8551_v9, %v8549_v13 }
0x130c   :  { %v8559_v0 = vpop.permute.xlu1 %8558  ;;  %v8555_v23 = vpop.permute.xlu0 %8554 }
0x130d   :  { %v8557_v43 = vadd.f32 %v8555_v23, %v8553_v25 }
0x130f   :  { %v8561_v17 = vadd.f32 %v8559_v0, %v8557_v43 }
0x1310   :  { %v8567_v36 = vpop.permute.xlu1 %8566  ;;  %v8563_v54 = vpop.permute.xlu0 %8562 }
0x1311   :  { %v8565_v15 = vadd.f32 %v8563_v54, %v8561_v17 }
0x1313   :  { %v8569_v34 = vadd.f32 %v8567_v36, %v8565_v15 }
0x1314   :  { %v8575_v24 = vpop.permute.xlu1 %8574  ;;  %v8571_v11 = vpop.permute.xlu0 %8570 }
0x1315   :  { %v8573_v61 = vadd.f32 %v8571_v11, %v8569_v34 }
0x1317   :  { %v8577_v46 = vadd.f32 %v8575_v24, %v8573_v61 }
0x1318   :  { %v8583_v51 = vpop.permute.xlu1 %8582  ;;  %v8579_v55 = vpop.permute.xlu0 %8578 }
0x1319   :  { %v8581_v2 = vadd.f32 %v8579_v55, %v8577_v46 }
0x131b   :  { %v8585_v19 = vadd.f32 %v8583_v51, %v8581_v2 }
0x131c   :  { %v8587_v32 = vpop.permute.xlu0 %8586  ;;  %v8591_v57 = vpop.permute.xlu1 %8590 }
0x131d   :  { %v8589_v12 = vadd.f32 %v8587_v32, %v8585_v19 }
0x131f   :  { %v8593_v31 = vadd.f32 %v8591_v57, %v8589_v12 }
0x1320   :  { %v8595_v18 = vpop.permute.xlu0 %8594 }
0x1321   :  { %v8597_v49 = vadd.f32 %v8595_v18, %v8593_v31 }
0x1323   :  { %v8598_v52 = vmul.f32 0.00390625, %v8597_v49 }
0x1324   :  { %v8675_v53 = vpop.permute.xlu0 %8674 }
0x1325   :  { %v8600_v60 = vadd.f32 1e-05, %v8598_v52  ;;  %v8719_v16 = vsel %vm8001_vm9, %v15431_v40, %v8675_v53 }
0x1327   :  { %11115 = vrsqrt.f32 %v8600_v60 }
0x1328   :  { %v8678_v44 = vpop.permute.xlu0 %8677 }
0x1329   :  { %v8720_v20 = vsel %vm8005_vm11, %v8719_v16, %v8678_v44 }
0x132c   :  { %v8681_v3 = vpop.permute.xlu0 %8680 }
0x132d   :  { %v8721_v22 = vsel %vm8009_vm13, %v8720_v20, %v8681_v3 }
0x1330   :  { %v8684_v62 = vpop.permute.xlu0 %8683 }
0x1331   :  { %v11116_v10 = vpop.eup %11115 }
0x1332   :  { %v8602_v59 = vmul.f32 %v11116_v10, %v8599_v29 }
0x1334   :  { %v8607_v58 = vrot.slane %v8602_v59, %v13648_v14  ;;  %v8687_v37 = vpop.permute.xlu0 %8686 }
0x1336   :  { %8611 = vrot.lane.b32.xlu0 %v8607_v58, %s15682_s13  ;;  %8608 = vrot.lane.b32.xlu1 %v8607_v58, %s15680_s11 }
0x1338   :  { %v8690_v1 = vpop.permute.xlu0 %8689 }
0x133a   :  { %8614 = vrot.lane.b32.xlu1 %v8607_v58, %s15684_s8  ;;  %8704 = vrot.lane.b32.xlu0 %v15436_v63, %s11175_s28 }
0x133c   :  { %v8693_v50 = vpop.permute.xlu0 %8692 }
0x133e   :  { %8617 = vrot.lane.b32.xlu1 %v8607_v58, %s15685_s4  ;;  %8707 = vrot.lane.b32.xlu0 %v15436_v63, %s15697_s18 }
0x1340   :  { %v8696_v26 = vpop.permute.xlu0 %8695 }
0x1342   :  { %8620 = vrot.lane.b32.xlu1 %v8607_v58, %s15700_s23  ;;  %8710 = vrot.lane.b32.xlu0 %v15436_v63, %s11177_s14 }
0x1344   :  { %v8699_v41 = vpop.permute.xlu0 %8698 }
0x1346   :  { %8623 = vrot.lane.b32.xlu1 %v8607_v58, %s15701_s25  ;;  %8716 = vrot.lane.b32.xlu0 %v15436_v63, %s11178_s26 }
0x1348   :  { %v8702_v35 = vpop.permute.xlu0 %8701 }
0x134a   :  { %8626 = vrot.lane.b32.xlu1 %v8607_v58, %s11163_s16 }
0x134e   :  { %8629 = vrot.lane.b32.xlu1 %v8607_v58, %s15690_s20 }
0x1352   :  { %8632 = vrot.lane.b32.xlu1 %v8607_v58, %s11174_s27 }
0x1356   :  { %8635 = vrot.lane.b32.xlu1 %v8607_v58, %s11173_s3 }
0x135a   :  { %8638 = vrot.lane.b32.xlu1 %v8607_v58, %s11175_s28 }
0x135e   :  { %8641 = vrot.lane.b32.xlu1 %v8607_v58, %s15697_s18 }
0x1362   :  { %8644 = vrot.lane.b32.xlu1 %v8607_v58, %s11177_s14 }
0x1366   :  { %8647 = vrot.lane.b32.xlu1 %v8607_v58, %s11176_s9 }
0x136a   :  { %8650 = vrot.lane.b32.xlu1 %v8607_v58, %s11178_s26 }
0x136e   :  { %8713 = vrot.lane.b32.xlu1 %v15436_v63, %s11176_s9  ;;  %v8722_v63 = vsel %vm7591_vm7, %v8721_v22, %v8684_v62 }
0x136f   :  { %v8723_v8 = vsel %vm8016_vm5, %v8722_v63, %v8687_v37 }
0x1370   :  { %v8724_v39 = vsel %vm8020_vm3, %v8723_v8, %v8690_v1 }
0x1371   :  { %v8725_v21 = vsel %vm8024_vm2, %v8724_v39, %v8693_v50 }
0x1372   :  { %v8726_v23 = vsel %vm192_vm0, %v8725_v21, %v8696_v26 }
0x1373   :  { %v8727_v54 = vsel %vm8507_vm1, %v8726_v23, %v8699_v41 }
0x1374   :  { %v8728_v46 = vsel %vm8509_vm4, %v8727_v54, %v8702_v35 }
0x13a8   :  { %v8609_v38 = vpop.permute.xlu1 %8608  ;;  %v8612_v42 = vpop.permute.xlu0 %8611 }
0x13a9   :  { %v8653_v40 = vsel %vm8001_vm9, %v8602_v59, %v8609_v38 }
0x13aa   :  { %v8654_v25 = vsel %vm8005_vm11, %v8653_v40, %v8612_v42 }
0x13ac   :  { %v8615_v28 = vpop.permute.xlu1 %8614  ;;  %v8705_v13 = vpop.permute.xlu0 %8704 }
0x13ad   :  { %v8655_v43 = vsel %vm8009_vm13, %v8654_v25, %v8615_v28  ;;  %v8729_v32 = vsel %vm8511_vm6, %v8728_v46, %v8705_v13 }
0x13b0   :  { %v8618_v4 = vpop.permute.xlu1 %8617  ;;  %v8708_v24 = vpop.permute.xlu0 %8707 }
0x13b1   :  { %v8656_v17 = vsel %vm7591_vm7, %v8655_v43, %v8618_v4  ;;  %vm15702_vm7 = vcmask 392192  }
0x13b4   :  { %v8621_v45 = vpop.permute.xlu1 %8620  ;;  %v8711_v57 = vpop.permute.xlu0 %8710 }
0x13b5   :  { %v8657_v36 = vsel %vm8016_vm5, %v8656_v17, %v8621_v45 }
0x13b8   :  { %v8624_v6 = vpop.permute.xlu1 %8623  ;;  %v8717_v10 = vpop.permute.xlu0 %8716 }
0x13b9   :  { %v8658_v15 = vsel %vm8020_vm3, %v8657_v36, %v8624_v6 }
0x13bc   :  { %v8627_v7 = vpop.permute.xlu1 %8626 }
0x13bd   :  { %v8659_v11 = vsel %vm8024_vm2, %v8658_v15, %v8627_v7  ;;  %vm15704_vm2 = vmmov %vm15699_vm10 }
0x13be   :  { %vm15705_vm3 = vmmov %vm15704_vm2 }
0x13c0   :  { %v8630_v27 = vpop.permute.xlu1 %8629 }
0x13c1   :  { %v8660_v61 = vsel %vm192_vm0, %v8659_v11, %v8630_v27  ;;  %vm15703_vm0 = vmmov %vm15702_vm7 }
0x13c2   :  { %v8730_v52 = vsel %vm15703_vm0, %v8729_v32, %v8708_v24 }
0x13c3   :  { %v8731_v59 = vsel %vm8514_vm8, %v8730_v52, %v8711_v57 }
0x13c4   :  { %v8633_v56 = vpop.permute.xlu1 %8632 }
0x13c5   :  { %v8661_v51 = vsel %vm8507_vm1, %v8660_v61, %v8633_v56 }
0x13c8   :  { %v8636_v33 = vpop.permute.xlu1 %8635 }
0x13c9   :  { %v8662_v55 = vsel %vm8509_vm4, %v8661_v51, %v8636_v33 }
0x13cc   :  { %v8639_v9 = vpop.permute.xlu1 %8638 }
0x13cd   :  { %v8663_v19 = vsel %vm8511_vm6, %v8662_v55, %v8639_v9 }
0x13d0   :  { %v8642_v0 = vpop.permute.xlu1 %8641 }
0x13d1   :  { %v8664_v12 = vsel %vm15702_vm7, %v8663_v19, %v8642_v0 }
0x13d4   :  { %v8645_v34 = vpop.permute.xlu1 %8644 }
0x13d5   :  { %v8665_v31 = vsel %vm8514_vm8, %v8664_v12, %v8645_v34 }
0x13d8   :  { %v8648_v2 = vpop.permute.xlu1 %8647 }
0x13d9   :  { %v8666_v18 = vsel %vm8516_vm12, %v8665_v31, %v8648_v2 }
0x13dc   :  { %v8651_v49 = vpop.permute.xlu1 %8650 }
0x13dd   :  { %v8667_v60 = vsel %vm8518_vm14, %v8666_v18, %v8651_v49 }
0x13de   :  { %v8737_v29 = vrot.slane %v8667_v60, %v13648_v14 }
0x13e0   :  { %v8714_v58 = vpop.permute.xlu1 %8713  ;;  %v8738_v3 = vmul.f32 %v8737_v29, %v15403_v47  ;;  %v8739_v62 = vmul.f32 %v8737_v29, %v15406_v48 }
0x13e1   :  { %v8732_v53 = vsel %vm8516_vm12, %v8731_v59, %v8714_v58 }
0x13e2   :  { %v8733_v44 = vsel %vm8518_vm14, %v8732_v53, %v8717_v10 }
0x13e3   :  { %v8743_v37 = vrot.slane %v8733_v44, %v13648_v14 }
0x13e5   :  { %v8744_v38 = vadd.f32 %v8743_v37, %v8738_v3  ;;  %v8745_v1 = vadd.f32 %v8743_v37, %v8739_v62 }
0x13e7   :  { %v8746_v28 = vadd.f32 %v8744_v38, %v15103_v5  ;;  %v8747_v4 = vadd.f32 %v8745_v1, %v15108_v30 }
0x13e9   :  { %8748 = vst.msk [vmem:[%s15556_s24] sm:$0xff] %vm15704_vm2, %v8746_v28 }
0x13ea   :  { %8749 = vst.msk [vmem:[%s15556_s24 + $0x8] sm:$0xff] %vm15705_vm3, %v8747_v4 }

</bundles_post_ra>
